<compile_context>
chip_gen: v6e
topology: v6e:2x2x1
jax: 0.10.0
libtpu: 0.0.40
codegen_flags: <defaults>
</compile_context>

<pallas_src>
import functools

import jax
import jax.numpy as jnp
from jax.experimental import pallas as pl
from jax.experimental.pallas import tpu as pltpu


# ------------------------------ Pallas kernel ------------------------------

def _basic_block_kernel(xp_ref, w1_ref, b1_ref, w2_ref, b2_ref, rsel_ref,
                        out_ref, out1_ref, *, Ho, Wo, stride, direct_residual):
    """Fused conv1+bn1+relu -> conv2+bn2 + shortcut + relu for B images.

    xp_ref   : (B, H+2, W+2, Cin)      bf16  zero-padded NHWC input block
    w1_ref   : (9, Cin, Cp)            bf16  conv1 weights, BN1 scale folded
    b1_ref   : (1, Cp)                 f32   BN1 bias (zero-padded)
    w2_ref   : (5, 2*Cp, Cp)           bf16  conv2 weights, taps pre-paired
                                              (pairs (0,1)(2,3)(4,5)(6,7); entry 4
                                               holds [tap8; zeros])
    b2_ref   : (1, Cp)                 f32   BN2 bias (zero-padded)
    rsel_ref : (Cin, Cp)               bf16  shortcut channel-selector (0/1)
    out_ref  : (B, Ho*Wo, Cp)          bf16  lane-dense output slab
    out1_ref : (B, Ho+2, Wpad, Cp)     bf16  VMEM scratch for out1 (+ zero halo)
    """
    B, _, _, Cin = xp_ref.shape
    Cp = out_ref.shape[2]
    Wpad = out1_ref.shape[2]
    M = Ho * Wo
    BM = B * M
    f32 = jnp.float32

    # ---- zero ONLY the 1-px halo of the out1 scratch.  The interior is fully
    #      overwritten below; the halo is re-zeroed every grid step so the
    #      kernel is correct under any grid-order / megacore core split.
    zrow = jnp.zeros((B, 1, Wpad, Cp), out1_ref.dtype)
    zcol = jnp.zeros((B, Ho + 2, 1, Cp), out1_ref.dtype)
    out1_ref[:, pl.ds(0, 1), :, :] = zrow
    out1_ref[:, pl.ds(Ho + 1, 1), :, :] = zrow
    out1_ref[:, :, pl.ds(0, 1), :] = zcol
    out1_ref[:, :, pl.ds(Wo + 1, 1), :] = zcol

    # ---- conv1 (+ folded bn1 scale): 9 taps, register/MXU-chained accumulate
    def x_tap(ky, kx):
        if stride == 1:
            t = xp_ref[:, pl.ds(ky, Ho), pl.ds(kx, Wo), :]
        else:
            t = xp_ref[:, pl.ds(ky, Ho, stride), pl.ds(kx, Wo, stride), :]
        return t.reshape(BM, Cin)

    acc = jnp.dot(x_tap(0, 0), w1_ref[0], preferred_element_type=f32)
    for k in range(1, 9):
        ky, kx = divmod(k, 3)
        acc = acc + jnp.dot(x_tap(ky, kx), w1_ref[k], preferred_element_type=f32)

    # ---- bn1 bias + relu; stash out1 interior (bf16) in the haloed scratch ----
    out1 = jnp.maximum(acc + b1_ref[...], 0.0).astype(out1_ref.dtype)
    out1_ref[:, pl.ds(1, Ho), pl.ds(1, Wo), :] = out1.reshape(B, Ho, Wo, Cp)

    # ---- conv2 (+ folded bn2 scale): taps paired along K (K = 2*Cp) ---------
    def o_tap(k):
        ky, kx = divmod(k, 3)
        return out1_ref[:, pl.ds(ky, Ho), pl.ds(kx, Wo), :].reshape(BM, Cp)

    acc2 = None
    for p in range(4):
        pair = jnp.concatenate([o_tap(2 * p), o_tap(2 * p + 1)], axis=-1)
        part = jnp.dot(pair, w2_ref[p], preferred_element_type=f32)
        acc2 = part if acc2 is None else acc2 + part
    acc2 = acc2 + jnp.dot(o_tap(8), w2_ref[4, :Cp, :], preferred_element_type=f32)

    # ---- shortcut + bn2 bias + relu, single lane-dense bf16 store -----------
    if stride == 1:
        res = xp_ref[:, pl.ds(1, Ho), pl.ds(1, Wo), :]
    else:
        res = xp_ref[:, pl.ds(1, Ho, stride), pl.ds(1, Wo, stride), :]
    res = res.reshape(BM, Cin)
    if direct_residual:
        # Identity shortcut with Cin == Cp: plain f32 VPU add, no MXU work.
        y = acc2 + b2_ref[...] + res.astype(f32)
    else:
        # Channel embed / option-'A' pad via a tiny 0/1 selector matmul.
        y = acc2 + b2_ref[...] + jnp.dot(res, rsel_ref[...],
                                         preferred_element_type=f32)
    out_ref[...] = jnp.maximum(y, 0.0).reshape(B, M, Cp).astype(out_ref.dtype)


# ------------------------------- JAX wrapper --------------------------------

def fold_bn(gamma, beta, mean, var, eps=1e-5):
    scale = gamma / jnp.sqrt(var + eps)
    bias = beta - mean * scale
    return scale, bias


def _round_up(x, m):
    return (x + m - 1) // m * m


def _prep_params(params, Cin, planes, Cp, shortcut_offset):
    """Fold BN scales into bf16 weights, pad to Cp lanes, pre-pair conv2 taps."""
    s1, b1 = fold_bn(**params["bn1"])
    s2, b2 = fold_bn(**params["bn2"])

    # torch layout (out, in, kh, kw) -> (kh, kw, in, out) -> (9, in, out)
    w1 = jnp.transpose(params["w1"], (2, 3, 1, 0)).reshape(9, Cin, planes) * s1
    w2 = jnp.transpose(params["w2"], (2, 3, 1, 0)).reshape(9, planes, planes) * s2

    w1p = jnp.zeros((9, Cin, Cp), jnp.float32).at[:, :, :planes].set(w1)
    w2p = jnp.zeros((9, Cp, Cp), jnp.float32).at[:, :planes, :planes].set(w2)
    b1p = jnp.zeros((1, Cp), jnp.float32).at[:, :planes].set(b1[None, :])
    b2p = jnp.zeros((1, Cp), jnp.float32).at[:, :planes].set(b2[None, :])

    # conv2 tap pairing along the contraction dim: K = 2*Cp per MXU push.
    w2_pairs = jnp.stack(
        [jnp.concatenate([w2p[2 * p], w2p[2 * p + 1]], axis=0) for p in range(4)]
        + [jnp.concatenate([w2p[8], jnp.zeros((Cp, Cp), jnp.float32)], axis=0)],
        axis=0)                                              # (5, 2*Cp, Cp)

    # Shortcut channel selector: identity embedding at channel offset
    # (0 for identity shortcut, planes//4 for option-'A' zero-padding).
    rsel = jnp.zeros((Cin, Cp), jnp.float32)
    rsel = rsel.at[jnp.arange(Cin), shortcut_offset + jnp.arange(Cin)].set(1.0)

    return (w1p.astype(jnp.bfloat16), b1p, w2_pairs.astype(jnp.bfloat16), b2p,
            rsel.astype(jnp.bfloat16))


def _pick_batch_block(N, per_image_bytes, budget=12 * 1024 * 1024):
    """Largest per-step image block that keeps the grid length even (2-TC
    balance) and the per-step VMEM footprint within budget."""
    best = 1
    for b in range(1, N + 1):
        if N % b:
            continue
        if N >= 2 and (N // b) % 2 != 0:
            continue
        if b * per_image_bytes > budget:
            continue
        best = b
    return best


def basic_block_forward(x_nchw, params, stride=1):
    """Matches BasicBlock.forward (eval-mode BN), option-'A' shortcut.

    Returns bf16 NCHW (the kernel emits a lane-dense bf16 slab)."""
    N, Cin, H, W = x_nchw.shape
    planes = params["w1"].shape[0]
    identity = (stride == 1 and Cin == planes)
    if not identity:
        if stride == 1:
            # PyTorch's option-'A' lambda would subsample ::2 while Ho == H and
            # the residual add would fail there too; refuse the degenerate combo.
            raise ValueError("stride==1 with in_planes != planes is not supported")
        if Cin + 2 * (planes // 4) != planes:
            raise ValueError("option-'A' shortcut needs in_planes + 2*(planes//4) == planes")

    Ho = (H + 2 - 3) // stride + 1
    Wo = (W + 2 - 3) // stride + 1
    M = Ho * Wo
    Cp = _round_up(max(planes, 1), 128)        # lane-dense output channels
    direct_residual = identity and (Cin == Cp)

    # NCHW -> NHWC, 1-pixel zero halo, bf16 for the MXU.
    x = jnp.transpose(x_nchw, (0, 2, 3, 1))
    xp = jnp.pad(x, ((0, 0), (1, 1), (1, 1), (0, 0))).astype(jnp.bfloat16)
    Hp, Wp = H + 2, W + 2
    Wpad = _round_up(Wo + 2, 8)                # sublane-aligned out1 scratch width

    off = 0 if identity else planes // 4
    w1p, b1p, w2p, b2p, rsel = _prep_params(params, Cin, planes, Cp, off)

    # Per-image per-step VMEM estimate (double-buffered in/out + scratch + temps).
    per_img = (2 * Hp * Wp * Cin * 2           # xp block (bf16, 2 buffers)
               + (Ho + 2) * Wpad * Cp * 2      # out1 scratch (bf16)
               + 2 * M * Cp * 2                # out slab (bf16, 2 buffers)
               + 3 * M * Cp * 4)               # f32 accumulators / pairing temps
    B = _pick_batch_block(N, per_img)

    kernel = functools.partial(_basic_block_kernel, Ho=Ho, Wo=Wo, stride=stride,
                               direct_residual=direct_residual)

    out = pl.pallas_call(
        kernel,
        out_shape=jax.ShapeDtypeStruct((N, M, Cp), jnp.bfloat16),
        grid=(N // B,),
        in_specs=[
            pl.BlockSpec((B, Hp, Wp, Cin), lambda n: (n, 0, 0, 0)),  # padded input
            pl.BlockSpec((9, Cin, Cp), lambda n: (0, 0, 0)),         # w1 (resident)
            pl.BlockSpec((1, Cp), lambda n: (0, 0)),                 # bn1 bias
            pl.BlockSpec((5, 2 * Cp, Cp), lambda n: (0, 0, 0)),      # w2 pairs (resident)
            pl.BlockSpec((1, Cp), lambda n: (0, 0)),                 # bn2 bias
            pl.BlockSpec((Cin, Cp), lambda n: (0, 0)),               # shortcut selector
        ],
        out_specs=pl.BlockSpec((B, M, Cp), lambda n: (n, 0, 0)),
        scratch_shapes=[
            pltpu.VMEM((B, Ho + 2, Wpad, Cp), jnp.bfloat16),   # out1 + zero halo
        ],
        compiler_params=pltpu.CompilerParams(
            dimension_semantics=("parallel",),                 # batch across TCs
            vmem_limit_bytes=32 * 1024 * 1024,                 # safe on v5e/v6e/v7x
        ),
    )(xp, w1p, b1p, w2p, b2p, rsel)

    out = out[:, :, :planes].reshape(N, Ho, Wo, planes)
    return jnp.transpose(out, (0, 3, 1, 2))                    # back to NCHW (bf16)


# --------------------------------- params -----------------------------------

def init_params(key, in_planes, planes):
    ks = jax.random.split(key, 6)

    def bn_params(kg, kb, c):
        return dict(
            gamma=jax.random.uniform(kg, (c,), jnp.float32, 0.5, 1.5),
            beta=0.1 * jax.random.normal(kb, (c,), jnp.float32),
            mean=jnp.zeros((c,), jnp.float32),
            var=jnp.ones((c,), jnp.float32),
        )

    w1 = jax.random.normal(ks[0], (planes, in_planes, 3, 3), jnp.float32) \
        * (2.0 / (in_planes * 9)) ** 0.5
    w2 = jax.random.normal(ks[1], (planes, planes, 3, 3), jnp.float32) \
        * (2.0 / (planes * 9)) ** 0.5
    return dict(w1=w1, w2=w2,
                bn1=bn_params(ks[2], ks[3], planes),
                bn2=bn_params(ks[4], ks[5], planes))


# ----------------------------- pure-JAX references --------------------------

def _conv(x, w, s):
    return jax.lax.conv_general_dilated(
        x, w, (s, s), ((1, 1), (1, 1)),
        dimension_numbers=("NCHW", "OIHW", "NCHW"))


def _shortcut_ref(x, planes, stride):
    N, Cin, H, W = x.shape
    if stride == 1 and Cin == planes:
        return x
    xs = x[:, :, ::2, ::2]
    pad = planes // 4
    return jnp.pad(xs, ((0, 0), (pad, pad), (0, 0), (0, 0)))


def reference_f32(x, params, stride=1):
    """Full-f32 module semantics (eval-mode BN)."""
    planes = params["w1"].shape[0]
    s1, b1 = fold_bn(**params["bn1"])
    s2, b2 = fold_bn(**params["bn2"])
    out = jax.nn.relu(_conv(x, params["w1"], stride)
                      * s1[None, :, None, None] + b1[None, :, None, None])
    out = _conv(out, params["w2"], 1) * s2[None, :, None, None] + b2[None, :, None, None]
    out = out + _shortcut_ref(x, planes, stride)
    return jax.nn.relu(out)


def reference_bf16(x, params, stride=1):
    """Mirrors kernel arithmetic: bf16 inputs/weights (BN scale folded), f32 accum."""
    planes = params["w1"].shape[0]
    s1, b1 = fold_bn(**params["bn1"])
    s2, b2 = fold_bn(**params["bn2"])
    q = lambda a: a.astype(jnp.bfloat16).astype(jnp.float32)
    xq = q(x)
    w1q = q(params["w1"] * s1[:, None, None, None])
    w2q = q(params["w2"] * s2[:, None, None, None])
    out1 = jax.nn.relu(_conv(xq, w1q, stride) + b1[None, :, None, None])
    out = _conv(q(out1), w2q, 1) + b2[None, :, None, None]
    out = out + _shortcut_ref(xq, planes, stride)
    return jax.nn.relu(out)


# ----------------------------------- main ------------------------------------

if __name__ == "__main__":
    key = jax.random.PRNGKey(0)
    k1, k2, k3, k4 = jax.random.split(key, 4)

    def check(x, params, stride, tol_q, tol_f):
        out = basic_block_forward(x, params, stride=stride)
        out = jax.block_until_ready(out).astype(jnp.float32)
        refq = reference_bf16(x, params, stride=stride)
        ref32 = reference_f32(x, params, stride=stride)
        assert out.shape == ref32.shape, (out.shape, ref32.shape)
        # Tight-ish check vs a bf16-matched reference (catches layout / tap-order /
        # weight-plumbing bugs -> O(1) errors); looser vs pure f32 module math
        # (absorbs bf16 quantization of activations/weights and the bf16 output).
        err_q = float(jnp.max(jnp.abs(out - refq)))
        err_f = float(jnp.max(jnp.abs(out - ref32)))
        assert err_q < tol_q, f"bf16-matched reference mismatch: {err_q}"
        assert err_f < tol_f, f"f32 reference mismatch: {err_f}"

    # 1) tiny-channel block (identity shortcut routed via the 0/1 selector matmul)
    x1 = jax.random.normal(k1, (2, 4, 16, 16), jnp.float32)
    p1 = init_params(k2, 4, 4)
    check(x1, p1, stride=1, tol_q=1e-1, tol_f=2e-1)

    # 2) lane-dense block: direct f32 residual add, batch-blocked grid (B=2)
    x2 = jax.random.normal(k3, (4, 128, 16, 16), jnp.float32)
    p2 = init_params(k4, 128, 128)
    check(x2, p2, stride=1, tol_q=1e-1, tol_f=2.5e-1)

    print("KERNEL_OK")
</pallas_src>

<mosaic_0001>
module attributes {stable_mosaic.version = 11 : i64} {
  func.func @_basic_block_kernel(%arg0: i32, %arg1: memref<1x18x18x4xbf16, #tpu.memory_space<vmem>>, %arg2: memref<9x4x128xbf16, #tpu.memory_space<vmem>>, %arg3: memref<1x128xf32, #tpu.memory_space<vmem>>, %arg4: memref<5x256x128xbf16, #tpu.memory_space<vmem>>, %arg5: memref<1x128xf32, #tpu.memory_space<vmem>>, %arg6: memref<4x128xbf16, #tpu.memory_space<vmem>>, %arg7: memref<1x256x128xbf16, #tpu.memory_space<vmem>>, %arg8: memref<1x18x24x128xbf16, #tpu.memory_space<vmem>>) attributes {dimension_semantics = [#tpu.dimension_semantics<parallel>], iteration_bounds = array<i64: 2>, scalar_prefetch = 0 : i64, scratch_operands = 1 : i64, tpu.core_type = #tpu.core_type<tc>, window_params = [{transform_indices = @transform_0, window_bounds = array<i64: 1, 18, 18, 4>}, {pipeline_mode = #tpu.pipeline_mode<synchronous>, transform_indices = @transform_1, window_bounds = array<i64: 9, 4, 128>}, {pipeline_mode = #tpu.pipeline_mode<synchronous>, transform_indices = @transform_2, window_bounds = array<i64: 1, 128>}, {pipeline_mode = #tpu.pipeline_mode<synchronous>, transform_indices = @transform_3, window_bounds = array<i64: 5, 256, 128>}, {pipeline_mode = #tpu.pipeline_mode<synchronous>, transform_indices = @transform_4, window_bounds = array<i64: 1, 128>}, {pipeline_mode = #tpu.pipeline_mode<synchronous>, transform_indices = @transform_5, window_bounds = array<i64: 4, 128>}, {transform_indices = @transform_6, window_bounds = array<i64: 1, 256, 128>}]} {
    %cst = arith.constant 0.000000e+00 : bf16
    %0 = vector.broadcast %cst : bf16 to vector<1x1x24x128xbf16>
    %cst_0 = arith.constant 0.000000e+00 : bf16
    %1 = vector.broadcast %cst_0 : bf16 to vector<1x18x1x128xbf16>
    %c0 = arith.constant 0 : index
    %c0_1 = arith.constant 0 : index
    %c0_2 = arith.constant 0 : index
    %c0_3 = arith.constant 0 : index
    %2 = vector.load %arg8[%c0, %c0_1, %c0_2, %c0_3] : memref<1x18x24x128xbf16, #tpu.memory_space<vmem>>, vector<1x1x24x128xbf16>
    tpu.vector_store %arg8[%c0, %c0_1, %c0_2, %c0_3], %0 {strides = array<i32>} : memref<1x18x24x128xbf16, #tpu.memory_space<vmem>>, vector<1x1x24x128xbf16>,
    %c0_4 = arith.constant 0 : index
    %c17 = arith.constant 17 : index
    %c0_5 = arith.constant 0 : index
    %c0_6 = arith.constant 0 : index
    %3 = vector.load %arg8[%c0_4, %c17, %c0_5, %c0_6] : memref<1x18x24x128xbf16, #tpu.memory_space<vmem>>, vector<1x1x24x128xbf16>
    tpu.vector_store %arg8[%c0_4, %c17, %c0_5, %c0_6], %0 {strides = array<i32>} : memref<1x18x24x128xbf16, #tpu.memory_space<vmem>>, vector<1x1x24x128xbf16>,
    %c0_7 = arith.constant 0 : index
    %c0_8 = arith.constant 0 : index
    %c0_9 = arith.constant 0 : index
    %c0_10 = arith.constant 0 : index
    %4 = vector.load %arg8[%c0_7, %c0_8, %c0_9, %c0_10] : memref<1x18x24x128xbf16, #tpu.memory_space<vmem>>, vector<1x18x1x128xbf16>
    tpu.vector_store %arg8[%c0_7, %c0_8, %c0_9, %c0_10], %1 {strides = array<i32>} : memref<1x18x24x128xbf16, #tpu.memory_space<vmem>>, vector<1x18x1x128xbf16>,
    %c0_11 = arith.constant 0 : index
    %c0_12 = arith.constant 0 : index
    %c17_13 = arith.constant 17 : index
    %c0_14 = arith.constant 0 : index
    %5 = vector.load %arg8[%c0_11, %c0_12, %c17_13, %c0_14] : memref<1x18x24x128xbf16, #tpu.memory_space<vmem>>, vector<1x18x1x128xbf16>
    tpu.vector_store %arg8[%c0_11, %c0_12, %c17_13, %c0_14], %1 {strides = array<i32>} : memref<1x18x24x128xbf16, #tpu.memory_space<vmem>>, vector<1x18x1x128xbf16>,
    %c0_15 = arith.constant 0 : index
    %c0_16 = arith.constant 0 : index
    %c0_17 = arith.constant 0 : index
    %c0_18 = arith.constant 0 : index
    %6 = vector.load %arg1[%c0_15, %c0_16, %c0_17, %c0_18] : memref<1x18x18x4xbf16, #tpu.memory_space<vmem>>, vector<1x16x16x4xbf16>
    %7 = vector.shape_cast %6 : vector<1x16x16x4xbf16> to vector<256x4xbf16>
    %c0_19 = arith.constant 0 : index
    %c0_20 = arith.constant 0 : index
    %c0_21 = arith.constant 0 : index
    %8 = vector.load %arg2[%c0_19, %c0_20, %c0_21] : memref<9x4x128xbf16, #tpu.memory_space<vmem>>, vector<1x4x128xbf16>
    %9 = vector.shape_cast %8 : vector<1x4x128xbf16> to vector<4x128xbf16>
    %cst_22 = arith.constant dense<0.000000e+00> : vector<256x128xf32>
    %10 = tpu.matmul %7, %9, %cst_22 {dimension_numbers = #tpu.dot_dimension_numbers<[1], [0], [0], [1], [0, 0, 1, 1], [], []>} : vector<256x4xbf16>, vector<4x128xbf16>, vector<256x128xf32> -> vector<256x128xf32>
    %c0_23 = arith.constant 0 : index
    %c0_24 = arith.constant 0 : index
    %c1 = arith.constant 1 : index
    %c0_25 = arith.constant 0 : index
    %11 = vector.load %arg1[%c0_23, %c0_24, %c1, %c0_25] : memref<1x18x18x4xbf16, #tpu.memory_space<vmem>>, vector<1x16x16x4xbf16>
    %12 = vector.shape_cast %11 : vector<1x16x16x4xbf16> to vector<256x4xbf16>
    %c1_26 = arith.constant 1 : index
    %c0_27 = arith.constant 0 : index
    %c0_28 = arith.constant 0 : index
    %13 = vector.load %arg2[%c1_26, %c0_27, %c0_28] : memref<9x4x128xbf16, #tpu.memory_space<vmem>>, vector<1x4x128xbf16>
    %14 = vector.shape_cast %13 : vector<1x4x128xbf16> to vector<4x128xbf16>
    %cst_29 = arith.constant dense<0.000000e+00> : vector<256x128xf32>
    %15 = tpu.matmul %12, %14, %cst_29 {dimension_numbers = #tpu.dot_dimension_numbers<[1], [0], [0], [1], [0, 0, 1, 1], [], []>} : vector<256x4xbf16>, vector<4x128xbf16>, vector<256x128xf32> -> vector<256x128xf32>
    %16 = arith.addf %10, %15 : vector<256x128xf32>
    %c0_30 = arith.constant 0 : index
    %c0_31 = arith.constant 0 : index
    %c2 = arith.constant 2 : index
    %c0_32 = arith.constant 0 : index
    %17 = vector.load %arg1[%c0_30, %c0_31, %c2, %c0_32] : memref<1x18x18x4xbf16, #tpu.memory_space<vmem>>, vector<1x16x16x4xbf16>
    %18 = vector.shape_cast %17 : vector<1x16x16x4xbf16> to vector<256x4xbf16>
    %c2_33 = arith.constant 2 : index
    %c0_34 = arith.constant 0 : index
    %c0_35 = arith.constant 0 : index
    %19 = vector.load %arg2[%c2_33, %c0_34, %c0_35] : memref<9x4x128xbf16, #tpu.memory_space<vmem>>, vector<1x4x128xbf16>
    %20 = vector.shape_cast %19 : vector<1x4x128xbf16> to vector<4x128xbf16>
    %cst_36 = arith.constant dense<0.000000e+00> : vector<256x128xf32>
    %21 = tpu.matmul %18, %20, %cst_36 {dimension_numbers = #tpu.dot_dimension_numbers<[1], [0], [0], [1], [0, 0, 1, 1], [], []>} : vector<256x4xbf16>, vector<4x128xbf16>, vector<256x128xf32> -> vector<256x128xf32>
    %22 = arith.addf %16, %21 : vector<256x128xf32>
    %c0_37 = arith.constant 0 : index
    %c1_38 = arith.constant 1 : index
    %c0_39 = arith.constant 0 : index
    %c0_40 = arith.constant 0 : index
    %23 = vector.load %arg1[%c0_37, %c1_38, %c0_39, %c0_40] : memref<1x18x18x4xbf16, #tpu.memory_space<vmem>>, vector<1x16x16x4xbf16>
    %24 = vector.shape_cast %23 : vector<1x16x16x4xbf16> to vector<256x4xbf16>
    %c3 = arith.constant 3 : index
    %c0_41 = arith.constant 0 : index
    %c0_42 = arith.constant 0 : index
    %25 = vector.load %arg2[%c3, %c0_41, %c0_42] : memref<9x4x128xbf16, #tpu.memory_space<vmem>>, vector<1x4x128xbf16>
    %26 = vector.shape_cast %25 : vector<1x4x128xbf16> to vector<4x128xbf16>
    %cst_43 = arith.constant dense<0.000000e+00> : vector<256x128xf32>
    %27 = tpu.matmul %24, %26, %cst_43 {dimension_numbers = #tpu.dot_dimension_numbers<[1], [0], [0], [1], [0, 0, 1, 1], [], []>} : vector<256x4xbf16>, vector<4x128xbf16>, vector<256x128xf32> -> vector<256x128xf32>
    %28 = arith.addf %22, %27 : vector<256x128xf32>
    %c0_44 = arith.constant 0 : index
    %c1_45 = arith.constant 1 : index
    %c1_46 = arith.constant 1 : index
    %c0_47 = arith.constant 0 : index
    %29 = vector.load %arg1[%c0_44, %c1_45, %c1_46, %c0_47] : memref<1x18x18x4xbf16, #tpu.memory_space<vmem>>, vector<1x16x16x4xbf16>
    %30 = vector.shape_cast %29 : vector<1x16x16x4xbf16> to vector<256x4xbf16>
    %c4 = arith.constant 4 : index
    %c0_48 = arith.constant 0 : index
    %c0_49 = arith.constant 0 : index
    %31 = vector.load %arg2[%c4, %c0_48, %c0_49] : memref<9x4x128xbf16, #tpu.memory_space<vmem>>, vector<1x4x128xbf16>
    %32 = vector.shape_cast %31 : vector<1x4x128xbf16> to vector<4x128xbf16>
    %cst_50 = arith.constant dense<0.000000e+00> : vector<256x128xf32>
    %33 = tpu.matmul %30, %32, %cst_50 {dimension_numbers = #tpu.dot_dimension_numbers<[1], [0], [0], [1], [0, 0, 1, 1], [], []>} : vector<256x4xbf16>, vector<4x128xbf16>, vector<256x128xf32> -> vector<256x128xf32>
    %34 = arith.addf %28, %33 : vector<256x128xf32>
    %c0_51 = arith.constant 0 : index
    %c1_52 = arith.constant 1 : index
    %c2_53 = arith.constant 2 : index
    %c0_54 = arith.constant 0 : index
    %35 = vector.load %arg1[%c0_51, %c1_52, %c2_53, %c0_54] : memref<1x18x18x4xbf16, #tpu.memory_space<vmem>>, vector<1x16x16x4xbf16>
    %36 = vector.shape_cast %35 : vector<1x16x16x4xbf16> to vector<256x4xbf16>
    %c5 = arith.constant 5 : index
    %c0_55 = arith.constant 0 : index
    %c0_56 = arith.constant 0 : index
    %37 = vector.load %arg2[%c5, %c0_55, %c0_56] : memref<9x4x128xbf16, #tpu.memory_space<vmem>>, vector<1x4x128xbf16>
    %38 = vector.shape_cast %37 : vector<1x4x128xbf16> to vector<4x128xbf16>
    %cst_57 = arith.constant dense<0.000000e+00> : vector<256x128xf32>
    %39 = tpu.matmul %36, %38, %cst_57 {dimension_numbers = #tpu.dot_dimension_numbers<[1], [0], [0], [1], [0, 0, 1, 1], [], []>} : vector<256x4xbf16>, vector<4x128xbf16>, vector<256x128xf32> -> vector<256x128xf32>
    %40 = arith.addf %34, %39 : vector<256x128xf32>
    %c0_58 = arith.constant 0 : index
    %c2_59 = arith.constant 2 : index
    %c0_60 = arith.constant 0 : index
    %c0_61 = arith.constant 0 : index
    %41 = vector.load %arg1[%c0_58, %c2_59, %c0_60, %c0_61] : memref<1x18x18x4xbf16, #tpu.memory_space<vmem>>, vector<1x16x16x4xbf16>
    %42 = vector.shape_cast %41 : vector<1x16x16x4xbf16> to vector<256x4xbf16>
    %c6 = arith.constant 6 : index
    %c0_62 = arith.constant 0 : index
    %c0_63 = arith.constant 0 : index
    %43 = vector.load %arg2[%c6, %c0_62, %c0_63] : memref<9x4x128xbf16, #tpu.memory_space<vmem>>, vector<1x4x128xbf16>
    %44 = vector.shape_cast %43 : vector<1x4x128xbf16> to vector<4x128xbf16>
    %cst_64 = arith.constant dense<0.000000e+00> : vector<256x128xf32>
    %45 = tpu.matmul %42, %44, %cst_64 {dimension_numbers = #tpu.dot_dimension_numbers<[1], [0], [0], [1], [0, 0, 1, 1], [], []>} : vector<256x4xbf16>, vector<4x128xbf16>, vector<256x128xf32> -> vector<256x128xf32>
    %46 = arith.addf %40, %45 : vector<256x128xf32>
    %c0_65 = arith.constant 0 : index
    %c2_66 = arith.constant 2 : index
    %c1_67 = arith.constant 1 : index
    %c0_68 = arith.constant 0 : index
    %47 = vector.load %arg1[%c0_65, %c2_66, %c1_67, %c0_68] : memref<1x18x18x4xbf16, #tpu.memory_space<vmem>>, vector<1x16x16x4xbf16>
    %48 = vector.shape_cast %47 : vector<1x16x16x4xbf16> to vector<256x4xbf16>
    %c7 = arith.constant 7 : index
    %c0_69 = arith.constant 0 : index
    %c0_70 = arith.constant 0 : index
    %49 = vector.load %arg2[%c7, %c0_69, %c0_70] : memref<9x4x128xbf16, #tpu.memory_space<vmem>>, vector<1x4x128xbf16>
    %50 = vector.shape_cast %49 : vector<1x4x128xbf16> to vector<4x128xbf16>
    %cst_71 = arith.constant dense<0.000000e+00> : vector<256x128xf32>
    %51 = tpu.matmul %48, %50, %cst_71 {dimension_numbers = #tpu.dot_dimension_numbers<[1], [0], [0], [1], [0, 0, 1, 1], [], []>} : vector<256x4xbf16>, vector<4x128xbf16>, vector<256x128xf32> -> vector<256x128xf32>
    %52 = arith.addf %46, %51 : vector<256x128xf32>
    %c0_72 = arith.constant 0 : index
    %c2_73 = arith.constant 2 : index
    %c2_74 = arith.constant 2 : index
    %c0_75 = arith.constant 0 : index
    %53 = vector.load %arg1[%c0_72, %c2_73, %c2_74, %c0_75] : memref<1x18x18x4xbf16, #tpu.memory_space<vmem>>, vector<1x16x16x4xbf16>
    %54 = vector.shape_cast %53 : vector<1x16x16x4xbf16> to vector<256x4xbf16>
    %c8 = arith.constant 8 : index
    %c0_76 = arith.constant 0 : index
    %c0_77 = arith.constant 0 : index
    %55 = vector.load %arg2[%c8, %c0_76, %c0_77] : memref<9x4x128xbf16, #tpu.memory_space<vmem>>, vector<1x4x128xbf16>
    %56 = vector.shape_cast %55 : vector<1x4x128xbf16> to vector<4x128xbf16>
    %cst_78 = arith.constant dense<0.000000e+00> : vector<256x128xf32>
    %57 = tpu.matmul %54, %56, %cst_78 {dimension_numbers = #tpu.dot_dimension_numbers<[1], [0], [0], [1], [0, 0, 1, 1], [], []>} : vector<256x4xbf16>, vector<4x128xbf16>, vector<256x128xf32> -> vector<256x128xf32>
    %58 = arith.addf %52, %57 : vector<256x128xf32>
    %c0_79 = arith.constant 0 : index
    %c0_80 = arith.constant 0 : index
    %59 = vector.load %arg3[%c0_79, %c0_80] : memref<1x128xf32, #tpu.memory_space<vmem>>, vector<1x128xf32>
    %60 = vector.broadcast %59 : vector<1x128xf32> to vector<256x128xf32>
    %61 = arith.addf %58, %60 : vector<256x128xf32>
    %cst_81 = arith.constant 0.000000e+00 : f32
    %62 = vector.broadcast %cst_81 : f32 to vector<256x128xf32>
    %63 = arith.maximumf %61, %62 : vector<256x128xf32>
    %64 = arith.truncf %63 : vector<256x128xf32> to vector<256x128xbf16>
    %65 = vector.shape_cast %64 : vector<256x128xbf16> to vector<1x16x16x128xbf16>
    %c0_82 = arith.constant 0 : index
    %c1_83 = arith.constant 1 : index
    %c1_84 = arith.constant 1 : index
    %c0_85 = arith.constant 0 : index
    %66 = vector.load %arg8[%c0_82, %c1_83, %c1_84, %c0_85] : memref<1x18x24x128xbf16, #tpu.memory_space<vmem>>, vector<1x16x16x128xbf16>
    tpu.vector_store %arg8[%c0_82, %c1_83, %c1_84, %c0_85], %65 {strides = array<i32>} : memref<1x18x24x128xbf16, #tpu.memory_space<vmem>>, vector<1x16x16x128xbf16>,
    %c0_86 = arith.constant 0 : index
    %c0_87 = arith.constant 0 : index
    %c0_88 = arith.constant 0 : index
    %c0_89 = arith.constant 0 : index
    %67 = vector.load %arg8[%c0_86, %c0_87, %c0_88, %c0_89] : memref<1x18x24x128xbf16, #tpu.memory_space<vmem>>, vector<1x16x16x128xbf16>
    %68 = vector.shape_cast %67 : vector<1x16x16x128xbf16> to vector<256x128xbf16>
    %c0_90 = arith.constant 0 : index
    %c0_91 = arith.constant 0 : index
    %c1_92 = arith.constant 1 : index
    %c0_93 = arith.constant 0 : index
    %69 = vector.load %arg8[%c0_90, %c0_91, %c1_92, %c0_93] : memref<1x18x24x128xbf16, #tpu.memory_space<vmem>>, vector<1x16x16x128xbf16>
    %70 = vector.shape_cast %69 : vector<1x16x16x128xbf16> to vector<256x128xbf16>
    %71 = tpu.concatenate %68, %70 in 1 : vector<256x128xbf16>, vector<256x128xbf16> -> vector<256x256xbf16>
    %c0_94 = arith.constant 0 : index
    %c0_95 = arith.constant 0 : index
    %c0_96 = arith.constant 0 : index
    %72 = vector.load %arg4[%c0_94, %c0_95, %c0_96] : memref<5x256x128xbf16, #tpu.memory_space<vmem>>, vector<1x256x128xbf16>
    %73 = vector.shape_cast %72 : vector<1x256x128xbf16> to vector<256x128xbf16>
    %cst_97 = arith.constant dense<0.000000e+00> : vector<256x128xf32>
    %74 = tpu.matmul %71, %73, %cst_97 {dimension_numbers = #tpu.dot_dimension_numbers<[1], [0], [0], [1], [0, 0, 1, 1], [], []>} : vector<256x256xbf16>, vector<256x128xbf16>, vector<256x128xf32> -> vector<256x128xf32>
    %c0_98 = arith.constant 0 : index
    %c0_99 = arith.constant 0 : index
    %c2_100 = arith.constant 2 : index
    %c0_101 = arith.constant 0 : index
    %75 = vector.load %arg8[%c0_98, %c0_99, %c2_100, %c0_101] : memref<1x18x24x128xbf16, #tpu.memory_space<vmem>>, vector<1x16x16x128xbf16>
    %76 = vector.shape_cast %75 : vector<1x16x16x128xbf16> to vector<256x128xbf16>
    %c0_102 = arith.constant 0 : index
    %c1_103 = arith.constant 1 : index
    %c0_104 = arith.constant 0 : index
    %c0_105 = arith.constant 0 : index
    %77 = vector.load %arg8[%c0_102, %c1_103, %c0_104, %c0_105] : memref<1x18x24x128xbf16, #tpu.memory_space<vmem>>, vector<1x16x16x128xbf16>
    %78 = vector.shape_cast %77 : vector<1x16x16x128xbf16> to vector<256x128xbf16>
    %79 = tpu.concatenate %76, %78 in 1 : vector<256x128xbf16>, vector<256x128xbf16> -> vector<256x256xbf16>
    %c1_106 = arith.constant 1 : index
    %c0_107 = arith.constant 0 : index
    %c0_108 = arith.constant 0 : index
    %80 = vector.load %arg4[%c1_106, %c0_107, %c0_108] : memref<5x256x128xbf16, #tpu.memory_space<vmem>>, vector<1x256x128xbf16>
    %81 = vector.shape_cast %80 : vector<1x256x128xbf16> to vector<256x128xbf16>
    %cst_109 = arith.constant dense<0.000000e+00> : vector<256x128xf32>
    %82 = tpu.matmul %79, %81, %cst_109 {dimension_numbers = #tpu.dot_dimension_numbers<[1], [0], [0], [1], [0, 0, 1, 1], [], []>} : vector<256x256xbf16>, vector<256x128xbf16>, vector<256x128xf32> -> vector<256x128xf32>
    %83 = arith.addf %74, %82 : vector<256x128xf32>
    %c0_110 = arith.constant 0 : index
    %c1_111 = arith.constant 1 : index
    %c1_112 = arith.constant 1 : index
    %c0_113 = arith.constant 0 : index
    %84 = vector.load %arg8[%c0_110, %c1_111, %c1_112, %c0_113] : memref<1x18x24x128xbf16, #tpu.memory_space<vmem>>, vector<1x16x16x128xbf16>
    %85 = vector.shape_cast %84 : vector<1x16x16x128xbf16> to vector<256x128xbf16>
    %c0_114 = arith.constant 0 : index
    %c1_115 = arith.constant 1 : index
    %c2_116 = arith.constant 2 : index
    %c0_117 = arith.constant 0 : index
    %86 = vector.load %arg8[%c0_114, %c1_115, %c2_116, %c0_117] : memref<1x18x24x128xbf16, #tpu.memory_space<vmem>>, vector<1x16x16x128xbf16>
    %87 = vector.shape_cast %86 : vector<1x16x16x128xbf16> to vector<256x128xbf16>
    %88 = tpu.concatenate %85, %87 in 1 : vector<256x128xbf16>, vector<256x128xbf16> -> vector<256x256xbf16>
    %c2_118 = arith.constant 2 : index
    %c0_119 = arith.constant 0 : index
    %c0_120 = arith.constant 0 : index
    %89 = vector.load %arg4[%c2_118, %c0_119, %c0_120] : memref<5x256x128xbf16, #tpu.memory_space<vmem>>, vector<1x256x128xbf16>
    %90 = vector.shape_cast %89 : vector<1x256x128xbf16> to vector<256x128xbf16>
    %cst_121 = arith.constant dense<0.000000e+00> : vector<256x128xf32>
    %91 = tpu.matmul %88, %90, %cst_121 {dimension_numbers = #tpu.dot_dimension_numbers<[1], [0], [0], [1], [0, 0, 1, 1], [], []>} : vector<256x256xbf16>, vector<256x128xbf16>, vector<256x128xf32> -> vector<256x128xf32>
    %92 = arith.addf %83, %91 : vector<256x128xf32>
    %c0_122 = arith.constant 0 : index
    %c2_123 = arith.constant 2 : index
    %c0_124 = arith.constant 0 : index
    %c0_125 = arith.constant 0 : index
    %93 = vector.load %arg8[%c0_122, %c2_123, %c0_124, %c0_125] : memref<1x18x24x128xbf16, #tpu.memory_space<vmem>>, vector<1x16x16x128xbf16>
    %94 = vector.shape_cast %93 : vector<1x16x16x128xbf16> to vector<256x128xbf16>
    %c0_126 = arith.constant 0 : index
    %c2_127 = arith.constant 2 : index
    %c1_128 = arith.constant 1 : index
    %c0_129 = arith.constant 0 : index
    %95 = vector.load %arg8[%c0_126, %c2_127, %c1_128, %c0_129] : memref<1x18x24x128xbf16, #tpu.memory_space<vmem>>, vector<1x16x16x128xbf16>
    %96 = vector.shape_cast %95 : vector<1x16x16x128xbf16> to vector<256x128xbf16>
    %97 = tpu.concatenate %94, %96 in 1 : vector<256x128xbf16>, vector<256x128xbf16> -> vector<256x256xbf16>
    %c3_130 = arith.constant 3 : index
    %c0_131 = arith.constant 0 : index
    %c0_132 = arith.constant 0 : index
    %98 = vector.load %arg4[%c3_130, %c0_131, %c0_132] : memref<5x256x128xbf16, #tpu.memory_space<vmem>>, vector<1x256x128xbf16>
    %99 = vector.shape_cast %98 : vector<1x256x128xbf16> to vector<256x128xbf16>
    %cst_133 = arith.constant dense<0.000000e+00> : vector<256x128xf32>
    %100 = tpu.matmul %97, %99, %cst_133 {dimension_numbers = #tpu.dot_dimension_numbers<[1], [0], [0], [1], [0, 0, 1, 1], [], []>} : vector<256x256xbf16>, vector<256x128xbf16>, vector<256x128xf32> -> vector<256x128xf32>
    %101 = arith.addf %92, %100 : vector<256x128xf32>
    %c0_134 = arith.constant 0 : index
    %c2_135 = arith.constant 2 : index
    %c2_136 = arith.constant 2 : index
    %c0_137 = arith.constant 0 : index
    %102 = vector.load %arg8[%c0_134, %c2_135, %c2_136, %c0_137] : memref<1x18x24x128xbf16, #tpu.memory_space<vmem>>, vector<1x16x16x128xbf16>
    %103 = vector.shape_cast %102 : vector<1x16x16x128xbf16> to vector<256x128xbf16>
    %c4_138 = arith.constant 4 : index
    %c0_139 = arith.constant 0 : index
    %c0_140 = arith.constant 0 : index
    %104 = vector.load %arg4[%c4_138, %c0_139, %c0_140] : memref<5x256x128xbf16, #tpu.memory_space<vmem>>, vector<1x128x128xbf16>
    %105 = vector.shape_cast %104 : vector<1x128x128xbf16> to vector<128x128xbf16>
    %cst_141 = arith.constant dense<0.000000e+00> : vector<256x128xf32>
    %106 = tpu.matmul %103, %105, %cst_141 {dimension_numbers = #tpu.dot_dimension_numbers<[1], [0], [0], [1], [0, 0, 1, 1], [], []>} : vector<256x128xbf16>, vector<128x128xbf16>, vector<256x128xf32> -> vector<256x128xf32>
    %107 = arith.addf %101, %106 : vector<256x128xf32>
    %c0_142 = arith.constant 0 : index
    %c1_143 = arith.constant 1 : index
    %c1_144 = arith.constant 1 : index
    %c0_145 = arith.constant 0 : index
    %108 = vector.load %arg1[%c0_142, %c1_143, %c1_144, %c0_145] : memref<1x18x18x4xbf16, #tpu.memory_space<vmem>>, vector<1x16x16x4xbf16>
    %109 = vector.shape_cast %108 : vector<1x16x16x4xbf16> to vector<256x4xbf16>
    %c0_146 = arith.constant 0 : index
    %c0_147 = arith.constant 0 : index
    %110 = vector.load %arg5[%c0_146, %c0_147] : memref<1x128xf32, #tpu.memory_space<vmem>>, vector<1x128xf32>
    %111 = vector.broadcast %110 : vector<1x128xf32> to vector<256x128xf32>
    %112 = arith.addf %107, %111 : vector<256x128xf32>
    %c0_148 = arith.constant 0 : index
    %c0_149 = arith.constant 0 : index
    %113 = vector.load %arg6[%c0_148, %c0_149] : memref<4x128xbf16, #tpu.memory_space<vmem>>, vector<4x128xbf16>
    %cst_150 = arith.constant dense<0.000000e+00> : vector<256x128xf32>
    %114 = tpu.matmul %109, %113, %cst_150 {dimension_numbers = #tpu.dot_dimension_numbers<[1], [0], [0], [1], [0, 0, 1, 1], [], []>} : vector<256x4xbf16>, vector<4x128xbf16>, vector<256x128xf32> -> vector<256x128xf32>
    %115 = arith.addf %112, %114 : vector<256x128xf32>
    %cst_151 = arith.constant 0.000000e+00 : f32
    %116 = vector.broadcast %cst_151 : f32 to vector<256x128xf32>
    %117 = arith.maximumf %115, %116 : vector<256x128xf32>
    %118 = vector.shape_cast %117 : vector<256x128xf32> to vector<1x256x128xf32>
    %119 = arith.truncf %118 : vector<1x256x128xf32> to vector<1x256x128xbf16>
    %c0_152 = arith.constant 0 : index
    %c0_153 = arith.constant 0 : index
    %c0_154 = arith.constant 0 : index
    %120 = vector.load %arg7[%c0_152, %c0_153, %c0_154] : memref<1x256x128xbf16, #tpu.memory_space<vmem>>, vector<1x256x128xbf16>
    tpu.vector_store %arg7[%c0_152, %c0_153, %c0_154], %119 {strides = array<i32>} : memref<1x256x128xbf16, #tpu.memory_space<vmem>>, vector<1x256x128xbf16>,
    return
  }
  func.func @transform_0(%arg0: i32) -> (i32, i32, i32, i32) {
    %c0_i32 = arith.constant 0 : i32
    %c0_i32_0 = arith.constant 0 : i32
    %c0_i32_1 = arith.constant 0 : i32
    %c0_i32_2 = arith.constant 0 : i32
    return %arg0, %c0_i32, %c0_i32_0, %c0_i32_1 : i32, i32, i32, i32
  }
  func.func @transform_1(%arg0: i32) -> (i32, i32, i32) {
    %c0_i32 = arith.constant 0 : i32
    %c0_i32_0 = arith.constant 0 : i32
    %c0_i32_1 = arith.constant 0 : i32
    %c0_i32_2 = arith.constant 0 : i32
    return %c0_i32, %c0_i32_0, %c0_i32_1 : i32, i32, i32
  }
  func.func @transform_2(%arg0: i32) -> (i32, i32) {
    %c0_i32 = arith.constant 0 : i32
    %c0_i32_0 = arith.constant 0 : i32
    %c0_i32_1 = arith.constant 0 : i32
    return %c0_i32, %c0_i32_0 : i32, i32
  }
  func.func @transform_3(%arg0: i32) -> (i32, i32, i32) {
    %c0_i32 = arith.constant 0 : i32
    %c0_i32_0 = arith.constant 0 : i32
    %c0_i32_1 = arith.constant 0 : i32
    %c0_i32_2 = arith.constant 0 : i32
    return %c0_i32, %c0_i32_0, %c0_i32_1 : i32, i32, i32
  }
  func.func @transform_4(%arg0: i32) -> (i32, i32) {
    %c0_i32 = arith.constant 0 : i32
    %c0_i32_0 = arith.constant 0 : i32
    %c0_i32_1 = arith.constant 0 : i32
    return %c0_i32, %c0_i32_0 : i32, i32
  }
  func.func @transform_5(%arg0: i32) -> (i32, i32) {
    %c0_i32 = arith.constant 0 : i32
    %c0_i32_0 = arith.constant 0 : i32
    %c0_i32_1 = arith.constant 0 : i32
    return %c0_i32, %c0_i32_0 : i32, i32
  }
  func.func @transform_6(%arg0: i32) -> (i32, i32, i32) {
    %c0_i32 = arith.constant 0 : i32
    %c0_i32_0 = arith.constant 0 : i32
    %c0_i32_1 = arith.constant 0 : i32
    return %arg0, %c0_i32, %c0_i32_0 : i32, i32, i32
  }
}

</mosaic_0001>

<bundles_post_ra>
// kernel: tpu_custom_call.1
= control target key start
LH: loop header
LB: loop body
LE: loop exit
PB: predicated region body
PF: predicated region fallthrough
CT: control target
= control target key end

     0   :  { %11 = vsyncpa [#allocation4], 0  ;;  %s18127_s0 = inlined_call_operand.vmem [shape: bf16[2,18,18,4], index: 0, kind: input, shape index: {}]   ;;  %s18128_s1 = inlined_call_operand.vmem [shape: bf16[9,4,128], index: 1, kind: input, shape index: {}]   ;;  %s18129_s2 = inlined_call_operand.vmem [shape: f32[1,128], index: 2, kind: input, shape index: {}]   ;;  %s18130_s3 = inlined_call_operand.hbm [shape: bf16[5,256,128], index: 3, kind: input, shape index: {}]   ;;  %s18131_s4 = inlined_call_operand.vmem [shape: f32[1,128], index: 4, kind: input, shape index: {}]   ;;  %s18132_s5 = inlined_call_operand.vmem [shape: bf16[4,128], index: 5, kind: input, shape index: {}]   ;;  %s18133_s6 = inlined_call_operand.hbm [shape: bf16[2,256,128], index: 6, kind: output, shape index: {}]  }
   0x1   :  { %12 = vsyncpa [#allocation5], 0 }
   0x2   :  { %14 = vsyncpa [#allocation5 + $0x1], 0  ;;  %s13123_s21 = smov 0   ;;  %s13125_s22 = smov 0  }
   0x3   :  { %s13127_s23 = smov 0   ;;  %s13129_s24 = smov 0  }
   0x4 LB: > { %s13144_s25 = sadd.s32 4294967295, %s13079_s24   ;;  %s10571_s26 = sadd.s32 4294967294, %s13079_s24   ;;  %s13079_s24 = sphi %s13129_s24, %s18545_s24   ;;  %s13075_s23 = sphi %s13127_s23, %s18544_s23   ;;  %s13071_s22 = sphi %s13125_s22, %s18543_s22   ;;  %s13067_s21 = sphi %s13123_s21, %s18542_s21  }
   0x5   : > { %s13148_s27 = sadd.s32 1, %s13079_s24   ;;  %s158_s28 = sadd.s32 1, %s13075_s23 }
   0x6   : > { %s155_s29 = ssub.s32 %s13079_s24, %s13148_s27  ;;  %p168_p0 = scmp.ne.s32.totalorder %s13075_s23, %s13071_s22 }
   0x7   : > { %p156_p1 = scmp.eq.s32.totalorder %s155_s29, 0  ;;  %p169_p2 = scmp.eq.s32.totalorder %s13144_s25, 1 }
   0x8   : > { %p174_p3 = scmp.ne.s32.totalorder %s13071_s22, %s13067_s21  ;;  %p175_p4 = scmp.eq.s32.totalorder %s10571_s26, 1 }
   0x9   : > { %s13159_s30 = scalar_select %p156_p1, %s13075_s23, %s158_s28  }
   0xa   : > { %p13161_p5 = por %p169_p2, %p168_p0  ;;  %p13165_p6 = por %p175_p4, %p174_p3 }
   0xb   : > { %p10572_p7 = scmp.ge.s32.totalorder %s13079_s24, 1  ;;  %p182_p8 = scmp.lt.s32.totalorder %s13079_s24, 3 }
   0xc   : > { %s18169_s8 = scalar_select %p13165_p6, 1, 0 }
   0xd   : > { %p12748_p9 = scmp.eq.s32.totalorder %s13144_s25, 0  ;;  %p13172_p10 = pnand %p10572_p7, %p182_p8 }
   0xe   : > { %s13081_s10 = smov [#allocation3]  }
   0xf   : > { %s200_s11 = sshll.u32 %s13081_s10, 4  ;;  %p12740_p11 = pneg %p13172_p10  ;;  %s201_s11 = int_to_ptr.vmem [resolvable:$true] %s200_s11 }
  0x10   : > { %s13000_s12 = scalar_lea.vmem %s201_s11, 10240  ;;  %p13008_p3 = scmp.lt.s32.totalorder %s201_s11, %s201_s11 }
  0x11   : > { %p12741_p12 = pnand %p12748_p9, %p12740_p11  ;;  %p13001_p0 = scmp.ne.s32.totalorder %s201_s11, %s13000_s12 }
  0x12   : > { %p13009_p4 = scmp.lt.s32.totalorder %s13000_s12, %s13000_s12 }
  0x13   : > { %p12991_p13 = pneg %p12741_p12 }
  0x14   : > { %p13010_p6 = por %p13009_p4, %p13008_p3 }
  0x15   : > { %p13003_p1 = pnand %p13001_p0, %p12991_p13 }
  0x17   : > { %p13004_p2 = pneg %p13003_p1 }
  0x19   : > { %p13011_p7 = pnand %p13010_p6, %p13004_p2 }
  0x1b   : > { %13014 = shalt.err (!%p13011_p7)
}
  0x1c   : > { %s13082_s13 = smov 64   ;;  %s13083_s14 = smov 4  }
  0x1d   : > { %12743 = dma.hbm_to_vmem [thread:$0]  (!%p12741_p12), %s18130_s3, 10240, %s201_s11, [#allocation4], %s13082_s13, %s13082_s13, %s13083_s14  }
  0x1e   : > { %230 = sbr.rel (%p13172_p10) target bundleno = 1215 (0x4bf), region = 44 }
  0x23   : > { %13058 = dma.done.wait (%p12748_p9), [#allocation4], 10240  }
  0x24   : > { %13060 = vsyncadd (%p12748_p9), [#allocation4], 4294957056  ;;  %p260_p8 = scmp.lt.s32.totalorder %s13144_s25, 1  ;;  %vm921_vm0 = vcmask 1041408   ;;  %vm435_vm1 = vsmask.f32 3328 }
  0x25   : > { %vm436_vm2 = vsmask.f32 7440  ;;  %v10579_v0 = vld [vmem:[%s18128_s1 + $0x2] sm:$0x3]  ;;  %vm872_vm3 = vcmask 31744   ;;  %v18171_v26 = vmov 0 }
  0x26   : > { %s261_s17 = scalar_select %p260_p8, %s13144_s25, 1  ;;  %12723 = vmatprep.subr.msk.bf16.mxu1 %vm921_vm0, %v10579_v0  ;;  %12722 = vmatprep.subr.msk.bf16.mxu0 %vm921_vm0, %v10579_v0  ;;  %v923_v3 = vsel %vm921_vm0, %v10579_v0, 0  ;;  %v418_v25 = vld [vmem:[%s18128_s1] sm:$0x3]  ;;  %vm13232_vm4 = vmor %vm435_vm1, %vm436_vm2  ;;  %v10660_v56 = vld [vmem:[%s18128_s1 + $0x4] sm:$0x3] }
  0x27   : > { %12721 = vmatpush3.bf16.msra.mxu1 %v923_v3  ;;  %12333 = vmatpush3.bf16.msra.mxu0 %v923_v3  ;;  %v18172_v26 = vsel %vm13232_vm4, 4294967295, %v18171_v26  ;;  %vm1426_vm5 = vcmask 1042432   ;;  %vm1427_vm6 = vcmask 1046532   ;;  %vm273_vm8 = vcmask 1040384   ;;  %s257_s20 = sand.u32 1, %s13071_s22   ;;  %s11594_s9 = sshll.u32 %s13144_s25, 11 }
  0x28   : > { %s12733_s18 = smul.u32 216, %s261_s17  ;;  %18173 = vst [vmem:[#allocation9_spill] sm:$0xff] %v18172_v26  ;;  %12724 = vmatprep.subr.msk.bf16.mxu1 %vm921_vm0, %v418_v25  ;;  %12725 = vmatprep.subr.msk.bf16.mxu0 %vm921_vm0, %v10660_v56  ;;  %vm13524_vm7 = vmor %vm1426_vm5, %vm1427_vm6  ;;  %vm274_vm9 = vsmask.f32 256  ;;  %vm330_vm11 = vsmask.f32 7938  ;;  %s18079_s13 = scalar_lea.hbm %s18133_s6, %s11594_s9 }
  0x29   : > { %vm15444_vm10 = vmand %vm273_vm8, %vm274_vm9  ;;  %vm5435_vm13 = vcmask 1043456   ;;  %vm5112_vm14 = vsmask.f32 4368  ;;  %s10577_s28 = sshll.u32 %s257_s20, 7  ;;  %s18087_s14 = scalar_lea.sflag [#allocation5], %s257_s20 }
  0x2a   : > { %s13194_s26 = scalar_lea.vmem %s18127_s0, %s12733_s18  ;;  %vm15465_vm12 = vmand %vm273_vm8, %vm330_vm11  ;;  %s18007_s29 = scalar_lea.vmem [#allocation6], %s10577_s28 }
  0x2b   : > { %v13200_v1 = vld [vmem:[%s13194_s26] sm:$0xf]  ;;  %v13203_v2 = vld [vmem:[%s13194_s26 + $0x4] sm:$0xf]  ;;  %v13209_v4 = vld [vmem:[%s13194_s26 + $0x8] sm:$0x1] }
  0x2c   : > { %v439_v5 = vshrl.u32 %v13200_v1, 16  ;;  %v442_v6 = vshll.u32 %v13200_v1, 16  ;;  %v448_v7 = vshll.u32 %v13203_v2, 16  ;;  %v452_v8 = vshrl.u32 %v13203_v2, 16  ;;  %v402_v10 = vld [vmem:[%s13194_s26 + $0x60] sm:$0xf]  ;;  %vm15850_vm15 = vmand %vm5435_vm13, %vm330_vm11 }
  0x2d   : > { %v458_v9 = vshll.u32 %v13209_v4, 16  ;;  %v13218_v14 = vld [vmem:[%s13194_s26 + $0x64] sm:$0xf]  ;;  %v631_v15 = vshrl.u32 %v402_v10, 16  ;;  %v13222_v18 = vld [vmem:[%s13194_s26 + $0x68] sm:$0x1]  ;;  %vm15865_vm1 = vmor %vm274_vm9, %vm5112_vm14 }
  0x2e   : > { %v441_v11 = vrot.slane %v439_v5, 4  ;;  %v444_v12 = vrot.slane %v442_v6, 5  ;;  %v450_v13 = vrot.slane %v448_v7, 5  ;;  %v454_v16 = vrot.slane %v452_v8, 4  ;;  %v13238_v31 = vld [vmem:[%s13194_s26 + $0xc] sm:$0xf] }
  0x2f   : > { %v634_v19 = vshll.u32 %v402_v10, 16  ;;  %v640_v20 = vshll.u32 %v13218_v14, 16  ;;  %v633_v22 = vrot.slane %v631_v15, 4  ;;  %v644_v23 = vshrl.u32 %v13218_v14, 16  ;;  %v13241_v35 = vld [vmem:[%s13194_s26 + $0x10] sm:$0xf] }
  0x30   : > { %v445_v21 = vor.u32 %v444_v12, %v441_v11  ;;  %v650_v24 = vshll.u32 %v13222_v18, 16  ;;  %v455_v27 = vor.u32 %v454_v16, %v450_v13  ;;  %v460_v28 = vrot.slane %v458_v9, 5  ;;  %v13245_v39 = vld [vmem:[%s13194_s26 + $0x14] sm:$0x1]  ;;  %v404_v46 = vld [vmem:[%s13194_s26 + $0x6c] sm:$0xf] }
  0x31   : > { %v636_v29 = vrot.slane %v634_v19, 5  ;;  %v642_v30 = vrot.slane %v640_v20, 5  ;;  %v646_v33 = vrot.slane %v644_v23, 4  ;;  %v463_v36 = vshrl.u32 %v13238_v31, 16  ;;  %v13256_v51 = vld [vmem:[%s13194_s26 + $0x70] sm:$0xf] }
  0x32   : > { %v446_v32 = vrot.slane %v445_v21, 4  ;;  %v652_v34 = vrot.slane %v650_v24, 5  ;;  %v456_v37 = vrot.slane %v455_v27, 4  ;;  %v466_v40 = vshll.u32 %v13238_v31, 16  ;;  %v13267_v61 = vld [vmem:[%s13194_s26 + $0x74] sm:$0x1] }
  0x33   : > { %v637_v38 = vor.u32 %v636_v29, %v633_v22  ;;  %v472_v41 = vshll.u32 %v13241_v35, 16  ;;  %v647_v43 = vor.u32 %v646_v33, %v642_v30  ;;  %v465_v44 = vrot.slane %v463_v36, 4  ;;  %v13275_v9 = vld [vmem:[%s13194_s26 + $0x18] sm:$0xf]  ;;  %v13280_v15 = vld [vmem:[%s13194_s26 + $0x1c] sm:$0xf] }
  0x34   : > { %v451_v42 = vsel %vm13232_vm4, %v446_v32, %v450_v13  ;;  %v476_v45 = vshrl.u32 %v13241_v35, 16  ;;  %v461_v47 = vsel %vm13232_vm4, %v456_v37, %v460_v28  ;;  %v468_v49 = vrot.slane %v466_v40, 5  ;;  %v13287_v22 = vld [vmem:[%s13194_s26 + $0x20] sm:$0x1]  ;;  %v13293_v29 = vld [vmem:[%s13194_s26 + $0x78] sm:$0xf] }
  0x35   : > { %v638_v48 = vrot.slane %v637_v38, 4  ;;  %v474_v50 = vrot.slane %v472_v41, 5  ;;  %v10580_v52 = vcombine.low %v451_v42, %v461_v47  ;;  %v648_v53 = vrot.slane %v647_v43, 4  ;;  %18174 = vst [vmem:[#allocation10_spill] sm:$0xff] %v13293_v29  ;;  %v13302_v43 = vld [vmem:[%s13194_s26 + $0x7c] sm:$0xf] }
  0x36   : > { %v478_v54 = vrot.slane %v476_v45, 4  ;;  %v482_v55 = vshll.u32 %v13245_v39, 16  ;;  %v469_v58 = vor.u32 %v468_v49, %v465_v44  ;;  %v655_v3 = vshrl.u32 %v404_v46, 16  ;;  %v13306_v49 = vld [vmem:[%s13194_s26 + $0x80] sm:$0x1]  ;;  %s10497_s10 = sshll.u32 %s18007_s29, 4  ;;  %s18081_s10 = int_to_ptr.vmem [resolvable:$true] %s10497_s10 }
  0x37   : > { %v643_v57 = vsel %vm13232_vm4, %v638_v48, %v642_v30  ;;  %12334 = vmatprep.mubr.msk.bf16.mxu0 %vm872_vm3, %v10580_v52  ;;  %v653_v62 = vsel %vm13232_vm4, %v648_v53, %v652_v34  ;;  %v658_v7 = vshll.u32 %v404_v46, 16  ;;  %v664_v8 = vshll.u32 %v13256_v51, 16  ;;  %18175 = vst [vmem:[#allocation11_spill] sm:$0xff] %v13306_v49  ;;  %v13470_v59 = vld [vmem:[%s13194_s26 + $0xb0] sm:$0x1]  ;;  %s13015_s25 = scalar_lea.vmem %s18081_s10, 2048 }
  0x38   : > { %v479_v63 = vor.u32 %v478_v54, %v474_v50  ;;  %v484_v0 = vrot.slane %v482_v55, 5  ;;  %v10588_v5 = vcombine.low %v643_v57, %v653_v62  ;;  %v470_v6 = vrot.slane %v469_v58, 4  ;;  %v13312_v55 = vld [vmem:[%s13194_s26 + $0x24] sm:$0xf]  ;;  %18180 = vst [vmem:[#allocation16_spill] sm:$0xff] %v13470_v59  ;;  %p13016_p6 = scmp.ne.s32.totalorder %s18081_s10, %s13015_s25  ;;  %s13085_s15 = smov [#allocation6]  }
  0x39   : > { %v657_v11 = vrot.slane %v655_v3, 4  ;;  %v668_v12 = vshrl.u32 %v13256_v51, 16  ;;  %v674_v13 = vshll.u32 %v13267_v61, 16  ;;  %v660_v19 = vrot.slane %v658_v7, 5  ;;  %s13019_s16 = sshll.u32 %s13085_s15, 4  ;;  %s13020_s16 = int_to_ptr.vmem [resolvable:$false] %s13019_s16 }
  0x3a   : > { %v480_v10 = vrot.slane %v479_v63, 4  ;;  %12350 = vmatprep.mubr.msk.bf16.mxu1 %vm872_vm3, %v10588_v5  ;;  %v475_v16 = vsel %vm13232_vm4, %v470_v6, %v474_v50  ;;  %v666_v20 = vrot.slane %v664_v8, 5  ;;  %v1215_v21 = vsel %vm921_vm0, %v418_v25, 0  ;;  %v13320_v6 = vld [vmem:[%s13194_s26 + $0x28] sm:$0xf]  ;;  %p13017_p9 = pnand %p13016_p6, %p13161_p5  ;;  %s13021_s17 = scalar_lea.vmem %s13020_s16, 4096 }
  0x3b   : > { %v670_v24 = vrot.slane %v668_v12, 4  ;;  %v676_v27 = vrot.slane %v674_v13, 5  ;;  %v1640_v28 = vsel %vm921_vm0, %v10660_v56, 0  ;;  %v661_v32 = vor.u32 %v660_v19, %v657_v11  ;;  %v13327_v19 = vld [vmem:[%s13194_s26 + $0x2c] sm:$0x1]  ;;  %p13022_p11 = scmp.lt.s32.totalorder %s18081_s10, %s13020_s16  ;;  %p13023_p12 = scmp.lt.s32.totalorder %s13021_s17, %s13015_s25 }
  0x3c   : > { %v485_v23 = vsel %vm13232_vm4, %v480_v10, %v484_v0  ;;  %v487_v33 = vshrl.u32 %v13275_v9, 16  ;;  %v490_v34 = vshll.u32 %v13275_v9, 16  ;;  %v496_v36 = vshll.u32 %v13280_v15, 16  ;;  %p13018_p10 = pneg %p13017_p9 }
  0x3d   : > { %v10581_v30 = vcombine.low %v475_v16, %v485_v23  ;;  %v671_v25 = vor.u32 %v670_v24, %v666_v20  ;;  %v500_v37 = vshrl.u32 %v13280_v15, 16  ;;  %v506_v38 = vshll.u32 %v13287_v22, 16  ;;  %v13331_v23 = vld [vmem:[%s13194_s26 + $0x84] sm:$0xf]  ;;  %p13024_p13 = por %p13023_p12, %p13022_p11 }
  0x3e   : > { %v662_v40 = vrot.slane %v661_v32, 4  ;;  %v489_v41 = vrot.slane %v487_v33, 4  ;;  %v492_v42 = vrot.slane %v490_v34, 5  ;;  %v679_v44 = vshrl.u32 %v13293_v29, 16 }
  0x3f   : > { %12335 = vmatmul.mubr.msk.bf16.vlgmr.msra.gmra.mxu0 %vm872_vm3, %v10581_v30  ;;  %v672_v45 = vrot.slane %v671_v25, 4  ;;  %v498_v46 = vrot.slane %v496_v36, 5  ;;  %v502_v47 = vrot.slane %v500_v37, 4  ;;  %v508_v48 = vrot.slane %v506_v38, 5  ;;  %v13338_v36 = vld [vmem:[%s13194_s26 + $0x88] sm:$0xf]  ;;  %p13025_p0 = pnand %p13024_p13, %p13018_p10 }
  0x40   : > { %12401 = vmatpush3.bf16.msra.mxu0 %v1640_v28  ;;  %v667_v50 = vsel %vm13232_vm4, %v662_v40, %v666_v20  ;;  %v493_v52 = vor.u32 %v492_v42, %v489_v41  ;;  %v681_v53 = vrot.slane %v679_v44, 4  ;;  %v682_v54 = vshll.u32 %v13293_v29, 16 }
  0x41   : > { %v677_v56 = vsel %vm13232_vm4, %v672_v45, %v676_v27  ;;  %v503_v57 = vor.u32 %v502_v47, %v498_v46  ;;  %v688_v58 = vshll.u32 %v13302_v43, 16  ;;  %v692_v62 = vshrl.u32 %v13302_v43, 16  ;;  %v13346_v45 = vld [vmem:[%s13194_s26 + $0x8c] sm:$0x1]  ;;  %v13350_v47 = vld [vmem:[%s13194_s26 + $0x30] sm:$0xf] }
  0x42   : > { %v10589_v63 = vcombine.low %v667_v50, %v677_v56  ;;  %v494_v0 = vrot.slane %v493_v52, 4  ;;  %v684_v3 = vrot.slane %v682_v54, 5  ;;  %v698_v5 = vshll.u32 %v13306_v49, 16 }
  0x43   : > { %v504_v7 = vrot.slane %v503_v57, 4  ;;  %v690_v8 = vrot.slane %v688_v58, 5  ;;  %v694_v10 = vrot.slane %v692_v62, 4  ;;  %v511_v11 = vshrl.u32 %v13312_v55, 16  ;;  %v13356_v62 = vld [vmem:[%s13194_s26 + $0x34] sm:$0xf] }
  0x44   : > { %12351 = vmatmul.mubr.msk.bf16.vlgmr.msra.gmra.mxu1 %vm872_vm3, %v10589_v63  ;;  %v499_v12 = vsel %vm13232_vm4, %v494_v0, %v498_v46  ;;  %v685_v13 = vor.u32 %v684_v3, %v681_v53  ;;  %v700_v16 = vrot.slane %v698_v5, 5  ;;  %v514_v20 = vshll.u32 %v13312_v55, 16 }
  0x45   : > { %12367 = vmatpush3.bf16.msra.mxu1 %v1215_v21  ;;  %v509_v24 = vsel %vm13232_vm4, %v504_v7, %v508_v48  ;;  %v695_v27 = vor.u32 %v694_v10, %v690_v8  ;;  %v513_v28 = vrot.slane %v511_v11, 4  ;;  %v520_v30 = vshll.u32 %v13320_v6, 16  ;;  %v13365_v11 = vld [vmem:[%s13194_s26 + $0x38] sm:$0x1] }
  0x46   : > { %v10582_v32 = vcombine.low %v499_v12, %v509_v24  ;;  %v686_v33 = vrot.slane %v685_v13, 4  ;;  %v516_v34 = vrot.slane %v514_v20, 5  ;;  %v524_v25 = vshrl.u32 %v13320_v6, 16 }
  0x47   : > { %v696_v37 = vrot.slane %v695_v27, 4  ;;  %v522_v38 = vrot.slane %v520_v30, 5  ;;  %v530_v21 = vshll.u32 %v13327_v19, 16  ;;  %v703_v40 = vshrl.u32 %v13331_v23, 16  ;;  %v13370_v27 = vld [vmem:[%s13194_s26 + $0x90] sm:$0xf] }
  0x48   : > { %12338 = vmatprep.mubr.msk.bf16.mxu0 %vm872_vm3, %v10582_v32  ;;  %v691_v41 = vsel %vm13232_vm4, %v686_v33, %v690_v8  ;;  %v517_v42 = vor.u32 %v516_v34, %v513_v28  ;;  %v526_v44 = vrot.slane %v524_v25, 4  ;;  %v706_v46 = vshll.u32 %v13331_v23, 16  ;;  %v13376_v34 = vld [vmem:[%s13194_s26 + $0x94] sm:$0xf] }
  0x49   : > { %v701_v48 = vsel %vm13232_vm4, %v696_v37, %v700_v16  ;;  %v532_v50 = vrot.slane %v530_v21, 5  ;;  %v705_v52 = vrot.slane %v703_v40, 4  ;;  %v712_v53 = vshll.u32 %v13338_v36, 16 }
  0x4a   : > { %v10590_v54 = vcombine.low %v691_v41, %v701_v48  ;;  %v518_v56 = vrot.slane %v517_v42, 4  ;;  %v527_v57 = vor.u32 %v526_v44, %v522_v38  ;;  %v708_v58 = vrot.slane %v706_v46, 5  ;;  %v13382_v44 = vld [vmem:[%s13194_s26 + $0x98] sm:$0x1]  ;;  %v13388_v48 = vld [vmem:[%s18128_s1 + $0x6] sm:$0x3] }
  0x4b   : > { %v714_v63 = vrot.slane %v712_v53, 5  ;;  %v716_v0 = vshrl.u32 %v13338_v36, 16  ;;  %v722_v3 = vshll.u32 %v13346_v45, 16  ;;  %v535_v5 = vshrl.u32 %v13350_v47, 16  ;;  %12726 = vmatprep.subr.msk.bf16.mxu1 %vm921_vm0, %v13388_v48 }
  0x4c   : > { %12354 = vmatprep.mubr.msk.bf16.mxu1 %vm872_vm3, %v10590_v54  ;;  %v523_v7 = vsel %vm13232_vm4, %v518_v56, %v522_v38  ;;  %v528_v8 = vrot.slane %v527_v57, 4  ;;  %v709_v10 = vor.u32 %v708_v58, %v705_v52  ;;  %v538_v12 = vshll.u32 %v13350_v47, 16  ;;  %v13398_v56 = vld [vmem:[%s18128_s1 + $0x8] sm:$0x3] }
  0x4d   : > { %v718_v13 = vrot.slane %v716_v0, 4  ;;  %v724_v16 = vrot.slane %v722_v3, 5  ;;  %v537_v20 = vrot.slane %v535_v5, 4  ;;  %v544_v24 = vshll.u32 %v13356_v62, 16  ;;  %v13402_v3 = vld [vmem:[%s13194_s26 + $0x3c] sm:$0xf]  ;;  %12727 = vmatprep.subr.msk.bf16.mxu0 %vm921_vm0, %v13398_v56 }
  0x4e   : > { %v533_v28 = vsel %vm13232_vm4, %v528_v8, %v532_v50  ;;  %v710_v30 = vrot.slane %v709_v10, 4  ;;  %v540_v32 = vrot.slane %v538_v12, 5  ;;  %v548_v33 = vshrl.u32 %v13356_v62, 16  ;;  %v13410_v12 = vld [vmem:[%s13194_s26 + $0x40] sm:$0xf] }
  0x4f   : > { %v10583_v25 = vcombine.low %v523_v7, %v533_v28  ;;  %v719_v37 = vor.u32 %v718_v13, %v714_v63  ;;  %v546_v38 = vrot.slane %v544_v24, 5  ;;  %v554_v21 = vshll.u32 %v13365_v11, 16 }
  0x50   : > { %v715_v40 = vsel %vm13232_vm4, %v710_v30, %v714_v63  ;;  %v541_v41 = vor.u32 %v540_v32, %v537_v20  ;;  %v550_v42 = vrot.slane %v548_v33, 4  ;;  %v727_v46 = vshrl.u32 %v13370_v27, 16  ;;  %v13415_v33 = vld [vmem:[%s13194_s26 + $0x44] sm:$0x1] }
  0x51   : > { %12339 = vmatmul.mubr.msk.bf16.gmra.mxu0 %vm872_vm3, %v10583_v25  ;;  %v720_v50 = vrot.slane %v719_v37, 4  ;;  %v556_v52 = vrot.slane %v554_v21, 5  ;;  %v730_v53 = vshll.u32 %v13370_v27, 16  ;;  %v736_v54 = vshll.u32 %v13376_v34, 16 }
  0x52   : > { %v542_v57 = vrot.slane %v541_v41, 4  ;;  %v551_v58 = vor.u32 %v550_v42, %v546_v38  ;;  %v729_v63 = vrot.slane %v727_v46, 4  ;;  %v740_v0 = vshrl.u32 %v13376_v34, 16  ;;  %v13425_v41 = vld [vmem:[%s13194_s26 + $0x9c] sm:$0xf] }
  0x53   : > { %v725_v5 = vsel %vm13232_vm4, %v720_v50, %v724_v16  ;;  %v732_v7 = vrot.slane %v730_v53, 5  ;;  %v738_v8 = vrot.slane %v736_v54, 5  ;;  %v746_v10 = vshll.u32 %v13382_v44, 16  ;;  %18176 = vst [vmem:[#allocation12_spill] sm:$0xff] %v13425_v41  ;;  %v13428_v54 = vld [vmem:[%s13194_s26 + $0xa0] sm:$0xf] }
  0x54   : > { %v10591_v13 = vcombine.low %v715_v40, %v725_v5  ;;  %v547_v20 = vsel %vm13232_vm4, %v542_v57, %v546_v38  ;;  %v552_v24 = vrot.slane %v551_v58, 4  ;;  %v742_v28 = vrot.slane %v740_v0, 4 }
  0x55   : > { %v733_v30 = vor.u32 %v732_v7, %v729_v63  ;;  %v748_v32 = vrot.slane %v746_v10, 5  ;;  %v559_v16 = vshrl.u32 %v13402_v3, 16  ;;  %v562_v25 = vshll.u32 %v13402_v3, 16  ;;  %v13435_v7 = vld [vmem:[%s13194_s26 + $0xa4] sm:$0x1] }
  0x56   : > { %12355 = vmatmul.mubr.msk.bf16.gmra.mxu1 %vm872_vm3, %v10591_v13  ;;  %v557_v37 = vsel %vm13232_vm4, %v552_v24, %v556_v52  ;;  %v743_v21 = vor.u32 %v742_v28, %v738_v8  ;;  %v568_v38 = vshll.u32 %v13410_v12, 16  ;;  %v572_v40 = vshrl.u32 %v13410_v12, 16  ;;  %18177 = vst [vmem:[#allocation13_spill] sm:$0xff] %v13435_v7 }
  0x57   : > { %v10584_v42 = vcombine.low %v547_v20, %v557_v37  ;;  %v734_v46 = vrot.slane %v733_v30, 4  ;;  %v561_v50 = vrot.slane %v559_v16, 4  ;;  %v564_v53 = vrot.slane %v562_v25, 5  ;;  %v13443_v16 = vld [vmem:[%s13194_s26 + $0x48] sm:$0xf] }
  0x58   : > { %v744_v57 = vrot.slane %v743_v21, 4  ;;  %v570_v58 = vrot.slane %v568_v38, 5  ;;  %v574_v63 = vrot.slane %v572_v40, 4  ;;  %v578_v52 = vshll.u32 %v13415_v33, 16  ;;  %v13446_v38 = vld [vmem:[%s13194_s26 + $0x4c] sm:$0xf] }
  0x59   : > { %12342 = vmatprep.mubr.msk.bf16.mxu0 %vm872_vm3, %v10584_v42  ;;  %v739_v0 = vsel %vm13232_vm4, %v734_v46, %v738_v8  ;;  %v565_v5 = vor.u32 %v564_v53, %v561_v50  ;;  %v751_v10 = vshrl.u32 %v13425_v41, 16  ;;  %v754_v13 = vshll.u32 %v13425_v41, 16  ;;  %v13510_v41 = vld [vmem:[%s13194_s26 + $0xbc] sm:$0x1] }
  0x5a   : > { %v749_v20 = vsel %vm13232_vm4, %v744_v57, %v748_v32  ;;  %v575_v24 = vor.u32 %v574_v63, %v570_v58  ;;  %v580_v28 = vrot.slane %v578_v52, 5  ;;  %v760_v30 = vshll.u32 %v13428_v54, 16  ;;  %v13454_v57 = vld [vmem:[%s13194_s26 + $0x50] sm:$0x1]  ;;  %18181 = vst [vmem:[#allocation17_spill] sm:$0xff] %v13510_v41 }
  0x5b   : > { %v10592_v25 = vcombine.low %v739_v0, %v749_v20  ;;  %v566_v37 = vrot.slane %v565_v5, 4  ;;  %v753_v8 = vrot.slane %v751_v10, 4  ;;  %v756_v21 = vrot.slane %v754_v13, 5  ;;  %v13462_v20 = vld [vmem:[%s13194_s26 + $0xa8] sm:$0xf] }
  0x5c   : > { %v576_v40 = vrot.slane %v575_v24, 4  ;;  %v762_v42 = vrot.slane %v760_v30, 5  ;;  %v764_v46 = vshrl.u32 %v13428_v54, 16  ;;  %v770_v32 = vshll.u32 %v13435_v7, 16  ;;  %18178 = vst [vmem:[#allocation14_spill] sm:$0xff] %v13462_v20 }
  0x5d   : > { %12358 = vmatprep.mubr.msk.bf16.mxu1 %vm872_vm3, %v10592_v25  ;;  %v571_v50 = vsel %vm13232_vm4, %v566_v37, %v570_v58  ;;  %v757_v53 = vor.u32 %v756_v21, %v753_v8  ;;  %v583_v63 = vshrl.u32 %v13443_v16, 16  ;;  %v586_v52 = vshll.u32 %v13443_v16, 16  ;;  %v13465_v37 = vld [vmem:[%s13194_s26 + $0xac] sm:$0xf] }
  0x5e   : > { %v581_v0 = vsel %vm13232_vm4, %v576_v40, %v580_v28  ;;  %v766_v5 = vrot.slane %v764_v46, 4  ;;  %v772_v10 = vrot.slane %v770_v32, 5  ;;  %v592_v13 = vshll.u32 %v13446_v38, 16  ;;  %18179 = vst [vmem:[#allocation15_spill] sm:$0xff] %v13465_v37 }
  0x5f   : > { %v10585_v24 = vcombine.low %v571_v50, %v581_v0  ;;  %v758_v30 = vrot.slane %v757_v53, 4  ;;  %v585_v58 = vrot.slane %v583_v63, 4  ;;  %v588_v25 = vrot.slane %v586_v52, 5 }
  0x60   : > { %v767_v8 = vor.u32 %v766_v5, %v762_v42  ;;  %v594_v21 = vrot.slane %v592_v13, 5  ;;  %v596_v60 = vshrl.u32 %v13446_v38, 16  ;;  %v602_v17 = vshll.u32 %v13454_v57, 16 }
  0x61   : > { %12343 = vmatmul.mubr.msk.bf16.gmra.mxu0 %vm872_vm3, %v10585_v24  ;;  %v763_v28 = vsel %vm13232_vm4, %v758_v30, %v762_v42  ;;  %v589_v40 = vor.u32 %v588_v25, %v585_v58  ;;  %v775_v46 = vshrl.u32 %v13462_v20, 16  ;;  %v778_v32 = vshll.u32 %v13462_v20, 16  ;;  %v13480_v42 = vld [vmem:[%s13194_s26 + $0x54] sm:$0xf] }
  0x62   : > { %v768_v50 = vrot.slane %v767_v8, 4  ;;  %v598_v53 = vrot.slane %v596_v60, 4  ;;  %v604_v63 = vrot.slane %v602_v17, 5  ;;  %v784_v52 = vshll.u32 %v13465_v37, 16  ;;  %v13486_v17 = vld [vmem:[%s13194_s26 + $0x58] sm:$0xf] }
  0x63   : > { %v590_v0 = vrot.slane %v589_v40, 4  ;;  %v777_v5 = vrot.slane %v775_v46, 4  ;;  %v780_v13 = vrot.slane %v778_v32, 5  ;;  %v788_v24 = vshrl.u32 %v13465_v37, 16  ;;  %v13489_v60 = vld [vmem:[%s13194_s26 + $0x5c] sm:$0x1] }
  0x64   : > { %v773_v30 = vsel %vm13232_vm4, %v768_v50, %v772_v10  ;;  %v599_v58 = vor.u32 %v598_v53, %v594_v21  ;;  %v786_v25 = vrot.slane %v784_v52, 5  ;;  %v794_v8 = vshll.u32 %v13470_v59, 16 }
  0x65   : > { %v10593_v29 = vcombine.low %v763_v28, %v773_v30  ;;  %v595_v40 = vsel %vm13232_vm4, %v590_v0, %v594_v21  ;;  %v781_v46 = vor.u32 %v780_v13, %v777_v5  ;;  %v790_v32 = vrot.slane %v788_v24, 4  ;;  %v13499_v30 = vld [vmem:[%s13194_s26 + $0xb4] sm:$0xf]  ;;  %v13505_v24 = vld [vmem:[%s13194_s26 + $0xb8] sm:$0xf] }
  0x66   : > { %v600_v49 = vrot.slane %v599_v58, 4  ;;  %v796_v20 = vrot.slane %v794_v8, 5  ;;  %v607_v10 = vshrl.u32 %v13480_v42, 16  ;;  %v610_v50 = vshll.u32 %v13480_v42, 16 }
  0x67   : > { %12359 = vmatmul.mubr.msk.bf16.gmra.mxu1 %vm872_vm3, %v10593_v29  ;;  %v782_v53 = vrot.slane %v781_v46, 4  ;;  %v791_v52 = vor.u32 %v790_v32, %v786_v25  ;;  %v616_v59 = vshll.u32 %v13486_v17, 16  ;;  %v620_v28 = vshrl.u32 %v13486_v17, 16 }
  0x68   : > { %v605_v21 = vsel %vm13232_vm4, %v600_v49, %v604_v63  ;;  %v609_v0 = vrot.slane %v607_v10, 4  ;;  %v612_v5 = vrot.slane %v610_v50, 5  ;;  %v626_v13 = vshll.u32 %v13489_v60, 16 }
  0x69   : > { %v10586_v29 = vcombine.low %v595_v40, %v605_v21  ;;  %v787_v58 = vsel %vm13232_vm4, %v782_v53, %v786_v25  ;;  %v792_v8 = vrot.slane %v791_v52, 4  ;;  %v618_v46 = vrot.slane %v616_v59, 5  ;;  %v1378_v59 = vld [vmem:[%s13194_s26] sm:$0xe]  ;;  %v1379_v21 = vld [vmem:[%s13194_s26 + $0xc] sm:$0xe] }
  0x6a   : > { %v613_v32 = vor.u32 %v612_v5, %v609_v0  ;;  %v622_v37 = vrot.slane %v620_v28, 4  ;;  %v628_v7 = vrot.slane %v626_v13, 5  ;;  %v799_v49 = vshrl.u32 %v13499_v30, 16 }
  0x6b   : > { %12346 = vmatprep.mubr.msk.bf16.mxu0 %vm872_vm3, %v10586_v29  ;;  %v797_v63 = vsel %vm13232_vm4, %v792_v8, %v796_v20  ;;  %v802_v40 = vshll.u32 %v13499_v30, 16  ;;  %v808_v10 = vshll.u32 %v13505_v24, 16  ;;  %v812_v25 = vshrl.u32 %v13505_v24, 16 }
  0x6c   : > { %v10594_v50 = vcombine.low %v787_v58, %v797_v63  ;;  %v614_v53 = vrot.slane %v613_v32, 4  ;;  %v623_v52 = vor.u32 %v622_v37, %v618_v46  ;;  %v801_v28 = vrot.slane %v799_v49, 4 }
  0x6d   : > { %v804_v0 = vrot.slane %v802_v40, 5  ;;  %v810_v5 = vrot.slane %v808_v10, 5  ;;  %v814_v13 = vrot.slane %v812_v25, 4  ;;  %v818_v29 = vshll.u32 %v13510_v41, 16 }
  0x6e   : > { %v18182_v20 = vmov 0  ;;  %12362 = vmatprep.mubr.msk.bf16.mxu1 %vm872_vm3, %v10594_v50  ;;  %v619_v58 = vsel %vm13232_vm4, %v614_v53, %v618_v46  ;;  %v624_v37 = vrot.slane %v623_v52, 4  ;;  %v10644_v8 = vrot.slane %v1378_v59, 9 }
  0x6f   : > { %v18183_v20 = vsel %vm13524_vm7, 4294967295, %v18182_v20  ;;  %v1431_v32 = vrot.slane %v13203_v2, 5  ;;  %v805_v49 = vor.u32 %v804_v0, %v801_v28  ;;  %v815_v63 = vor.u32 %v814_v13, %v810_v5  ;;  %v1380_v13 = vld [vmem:[%s13194_s26 + $0x18] sm:$0xe] }
  0x70   : > { %18184 = vst [vmem:[#allocation18_spill] sm:$0xff] %v18183_v20  ;;  %v820_v40 = vrot.slane %v818_v29, 5  ;;  %v629_v25 = vsel %vm13232_vm4, %v624_v37, %v628_v7  ;;  %v10645_v46 = vrot.slane %v1379_v21, 9  ;;  %v18185_v28 = vrot.slane %v13241_v35, 5 }
  0x71   : > { %v1432_v50 = vsel %vm13524_vm7, %v10644_v8, %v1431_v32  ;;  %v1433_v41 = vrot.slane %v1431_v32, 4  ;;  %v10587_v53 = vcombine.low %v619_v58, %v629_v25  ;;  %v806_v52 = vrot.slane %v805_v49, 4 }
  0x72   : > { %v816_v59 = vrot.slane %v815_v63, 4  ;;  %v1440_v0 = vrot.slane %v18185_v28, 4  ;;  %v10612_v29 = vcombine.low %v13200_v1, %v13203_v2  ;;  %v18186_v10 = vrot.slane %v13209_v4, 5  ;;  %v1381_v4 = vld [vmem:[%s13194_s26 + $0x24] sm:$0xe] }
  0x73   : > { %v18187_v37 = vmov %v18185_v28  ;;  %12347 = vmatmul.mubr.msk.bf16.gmra.mxu0 %vm872_vm3, %v10587_v53  ;;  %v811_v58 = vsel %vm13232_vm4, %v806_v52, %v810_v5  ;;  %v18188_v1 = vrot.slane %v13245_v39, 5  ;;  %v10614_v49 = vcombine.low %v13275_v9, %v13280_v15 }
  0x74   : > { %v1435_v7 = vsel %vm13524_vm7, %v1433_v41, %v18186_v10  ;;  %v1439_v21 = vsel %vm13524_vm7, %v10645_v46, %v18187_v37  ;;  %v821_v8 = vsel %vm13232_vm4, %v816_v59, %v820_v40  ;;  %v10646_v63 = vrot.slane %v1380_v13, 9  ;;  %v1382_v10 = vld [vmem:[%s13194_s26 + $0x30] sm:$0xe] }
  0x75   : > { %v10661_v32 = vcombine.low %v1432_v50, %v1435_v7  ;;  %v1442_v2 = vsel %vm13524_vm7, %v1440_v0, %v18188_v1  ;;  %v10595_v41 = vcombine.low %v811_v58, %v821_v8  ;;  %v1445_v5 = vrot.slane %v13280_v15, 5  ;;  %v1383_v0 = vld [vmem:[%s13194_s26 + $0x3c] sm:$0xe] }
  0x76   : > { %v1448_v40 = vrot.slane %v13287_v22, 5  ;;  %v10662_v39 = vcombine.low %v1439_v21, %v1442_v2  ;;  %v10647_v25 = vrot.slane %v1381_v4, 9  ;;  %v1452_v50 = vrot.slane %v13320_v6, 5  ;;  %v1384_v21 = vld [vmem:[%s13194_s26 + $0x48] sm:$0xe] }
  0x77   : > { %12402 = vmatprep.mubr.msk.bf16.mxu0 %vm872_vm3, %v10661_v32  ;;  %12363 = vmatmul.mubr.msk.bf16.gmra.mxu1 %vm872_vm3, %v10595_v41  ;;  %v1446_v9 = vsel %vm13524_vm7, %v10646_v63, %v1445_v5  ;;  %v1447_v46 = vrot.slane %v1445_v5, 4  ;;  %v10648_v53 = vrot.slane %v1382_v10, 9  ;;  %v1459_v52 = vrot.slane %v13356_v62, 5  ;;  %v1385_v32 = vld [vmem:[%s13194_s26 + $0x54] sm:$0xe] }
  0x78   : > { %12368 = vmatprep.mubr.msk.bf16.mxu1 %vm872_vm3, %v10612_v29  ;;  %v2725_v15 = vsel %vm921_vm0, %v13398_v56, 0  ;;  %v1454_v22 = vrot.slane %v1452_v50, 4  ;;  %v1455_v59 = vrot.slane %v13327_v19, 5  ;;  %v1462_v28 = vrot.slane %v13365_v11, 5  ;;  %v13585_v56 = vld [vmem:[%s18128_s1 + $0xc] sm:$0x3] }
  0x79   : > { %v1449_v13 = vsel %vm13524_vm7, %v1447_v46, %v1448_v40  ;;  %v1461_v29 = vrot.slane %v1459_v52, 4  ;;  %v1466_v7 = vrot.slane %v13410_v12, 5  ;;  %v1999_v19 = vsel %vm921_vm0, %v13388_v48, 0  ;;  %v1386_v48 = vld [vmem:[%s13194_s26 + $0x60] sm:$0xe] }
  0x7a   : > { %v10663_v37 = vcombine.low %v1446_v9, %v1449_v13  ;;  %v1453_v11 = vsel %vm13524_vm7, %v10647_v25, %v1452_v50  ;;  %v1460_v58 = vsel %vm13524_vm7, %v10648_v53, %v1459_v52  ;;  %v10649_v8 = vrot.slane %v1383_v0, 9 }
  0x7b   : > { %12403 = vmatmul.mubr.msk.bf16.vlgmr.msra.gmra.mxu0 %vm872_vm3, %v10662_v39  ;;  %v1456_v1 = vsel %vm13524_vm7, %v1454_v22, %v1455_v59  ;;  %v1468_v2 = vrot.slane %v1466_v7, 4  ;;  %v1469_v4 = vrot.slane %v13415_v33, 5  ;;  %v1473_v41 = vrot.slane %v13446_v38, 5  ;;  %v13608_v39 = vld [vmem:[%s18128_s1 + $0xa] sm:$0x3] }
  0x7c   : > { %12469 = vmatpush3.bf16.msra.mxu0 %v2725_v15  ;;  %12406 = vmatprep.mubr.msk.bf16.mxu0 %vm872_vm3, %v10663_v37  ;;  %v1463_v63 = vsel %vm13524_vm7, %v1461_v29, %v1462_v28  ;;  %v10650_v10 = vrot.slane %v1384_v21, 9  ;;  %v1476_v5 = vrot.slane %v13454_v57, 5  ;;  %v1480_v40 = vrot.slane %v13486_v17, 5 }
  0x7d   : > { %12729 = vmatprep.subr.msk.bf16.mxu0 %vm921_vm0, %v13585_v56  ;;  %v18189_v33 = vcombine.low %v13238_v31, %v13241_v35  ;;  %v1475_v25 = vrot.slane %v1473_v41, 4  ;;  %v10651_v50 = vrot.slane %v1385_v32, 9  ;;  %v1483_v57 = vrot.slane %v13489_v60, 5  ;;  %v13627_v60 = vld [vmem:[%s13194_s26 + $0x6c] sm:$0xe] }
  0x7e   : > { %v1490_v9 = vrot.slane %v13222_v18, 5  ;;  %v10615_v46 = vcombine.low %v13312_v55, %v13320_v6  ;;  %v10664_v53 = vcombine.low %v1453_v11, %v1456_v1  ;;  %v1482_v52 = vrot.slane %v1480_v40, 4  ;;  %v1389_v18 = vld [vmem:[%s13194_s26 + $0x84] sm:$0xe]  ;;  %v1391_v32 = vld [vmem:[%s13194_s26 + $0x9c] sm:$0xe] }
  0x7f   : > { %12369 = vmatmul.mubr.msk.bf16.vlgmr.msra.gmra.mxu1 %vm872_vm3, %v18189_v33  ;;  %v10665_v15 = vcombine.low %v1460_v58, %v1463_v63  ;;  %v1467_v31 = vsel %vm13524_vm7, %v10649_v8, %v1466_v7  ;;  %v1470_v35 = vsel %vm13524_vm7, %v1468_v2, %v1469_v4  ;;  %v1487_v22 = vrot.slane %v13218_v14, 5  ;;  %v1392_v1 = vld [vmem:[%s13194_s26 + $0xa8] sm:$0xe] }
  0x80   : > { %12435 = vmatpush3.bf16.msra.mxu1 %v1999_v19  ;;  %12372 = vmatprep.mubr.msk.bf16.mxu1 %vm872_vm3, %v10614_v49  ;;  %v1474_v55 = vsel %vm13524_vm7, %v10650_v10, %v1473_v41  ;;  %v1477_v6 = vsel %vm13524_vm7, %v1475_v25, %v1476_v5  ;;  %v10652_v49 = vrot.slane %v1386_v48, 9  ;;  %v1494_v59 = vrot.slane %v13256_v51, 5  ;;  %v18190_v25 = vld [vmem:[#allocation12_spill] sm:$0xff] }
  0x81   : > { %12728 = vmatprep.subr.msk.bf16.mxu1 %vm921_vm0, %v13608_v39  ;;  %v10616_v14 = vcombine.low %v13350_v47, %v13356_v62  ;;  %v10617_v28 = vcombine.low %v13402_v3, %v13410_v12  ;;  %v13643_v0 = vsel %vm13524_vm7, %v10651_v50, %v1480_v40  ;;  %v13647_v13 = vsel %vm13524_vm7, %v1482_v52, %v1483_v57  ;;  %v13656_v3 = vld [vmem:[%s13194_s26 + $0x78] sm:$0xe]  ;;  %v1390_v12 = vld [vmem:[%s13194_s26 + $0x90] sm:$0xe] }
  0x82   : > { %v10666_v29 = vcombine.low %v1467_v31, %v1470_v35  ;;  %v10618_v7 = vcombine.low %v13443_v16, %v13446_v38  ;;  %v10619_v47 = vcombine.low %v13480_v42, %v13486_v17  ;;  %v10653_v62 = vrot.slane %v13627_v60, 9  ;;  %v18191_v52 = vld [vmem:[#allocation13_spill] sm:$0xff]  ;;  %v18192_v31 = vld [vmem:[#allocation15_spill] sm:$0xff]  ;;  %v18193_v35 = vld [vmem:[#allocation14_spill] sm:$0xff] }
  0x83   : > { %12407 = vmatmul.mubr.msk.bf16.gmra.mxu0 %vm872_vm3, %v10664_v53  ;;  %v10667_v37 = vcombine.low %v1474_v55, %v1477_v6  ;;  %v1489_v21 = vrot.slane %v1487_v22, 4  ;;  %v10623_v19 = vcombine.low %v13331_v23, %v13338_v36  ;;  %v10655_v11 = vrot.slane %v1389_v18, 9 }
  0x84   : > { %12410 = vmatprep.mubr.msk.bf16.mxu0 %vm872_vm3, %v10665_v15  ;;  %v10668_v58 = vcombine.low %v13643_v0, %v13647_v13  ;;  %v13666_v16 = vsel %vm13524_vm7, %v10652_v49, %v1487_v22  ;;  %v1496_v38 = vrot.slane %v1494_v59, 4  ;;  %v1497_v8 = vrot.slane %v13267_v61, 5  ;;  %v18197_v0 = vld [vmem:[#allocation10_spill] sm:$0xff] }
  0x85   : > { %v10654_v2 = vrot.slane %v13656_v3, 9  ;;  %v1508_v4 = vrot.slane %v13338_v36, 5  ;;  %v1511_v41 = vrot.slane %v13346_v45, 5  ;;  %v1501_v63 = vrot.slane %v13302_v43, 5 }
  0x86   : > { %v10656_v10 = vrot.slane %v1390_v12, 9  ;;  %v1515_v61 = vrot.slane %v13376_v34, 5  ;;  %v1518_v5 = vrot.slane %v13382_v44, 5  ;;  %v13685_v40 = vsel %vm13524_vm7, %v1489_v21, %v1490_v9  ;;  %v18194_v12 = vld [vmem:[#allocation16_spill] sm:$0xff] }
  0x87   : > { %12373 = vmatmul.mubr.msk.bf16.gmra.mxu1 %vm872_vm3, %v10615_v46  ;;  %v13689_v33 = vsel %vm13524_vm7, %v10655_v11, %v1508_v4  ;;  %v1510_v45 = vrot.slane %v1508_v4, 4  ;;  %v10657_v53 = vrot.slane %v1391_v32, 9  ;;  %v1522_v44 = vrot.slane %v13428_v54, 5  ;;  %v13725_v32 = vld [vmem:[%s13194_s26 + $0x10] sm:$0xf]  ;;  %v18195_v4 = vld [vmem:[#allocation11_spill] sm:$0xff] }
  0x88   : > { %12376 = vmatprep.mubr.msk.bf16.mxu1 %vm872_vm3, %v10616_v14  ;;  %v13695_v57 = vsel %vm13524_vm7, %v10656_v10, %v1515_v61  ;;  %v1517_v46 = vrot.slane %v1515_v61, 4  ;;  %v1525_v15 = vrot.slane %v18191_v52, 5  ;;  %v10658_v60 = vrot.slane %v1392_v1, 9  ;;  %v10758_v14 = vld [vmem:[%s13194_s26 + $0xc] sm:$0xf] }
  0x89   : > { %v13700_v9 = vsel %vm13524_vm7, %v1510_v45, %v1511_v41  ;;  %v13714_v6 = vsel %vm13524_vm7, %v10657_v53, %v1522_v44  ;;  %v1524_v49 = vrot.slane %v1522_v44, 4  ;;  %v1532_v21 = vrot.slane %v18194_v12, 5  ;;  %v10764_v11 = vld [vmem:[%s13194_s26 + $0x24] sm:$0xf] }
  0x8a   : > { %v10672_v18 = vcombine.low %v13689_v33, %v13700_v9  ;;  %v13710_v55 = vsel %vm13524_vm7, %v1517_v46, %v1518_v5  ;;  %v1503_v1 = vrot.slane %v1501_v63, 4  ;;  %v1504_v41 = vrot.slane %v18195_v4, 5  ;;  %v1393_v46 = vld [vmem:[%s13194_s26 + $0xb4] sm:$0xe]  ;;  %v12958_v4 = vld [vmem:[%s13194_s26 + $0x64] sm:$0xf] }
  0x8b   : > { %12411 = vmatmul.mubr.msk.bf16.gmra.mxu0 %vm872_vm3, %v10666_v29  ;;  %v10673_v3 = vcombine.low %v13695_v57, %v13710_v55  ;;  %v1529_v29 = vrot.slane %v18192_v31, 5  ;;  %v13730_v10 = vsel %vm13524_vm7, %v1524_v49, %v1525_v15  ;;  %v2243_v53 = vshrl.u32 %v10758_v14, 16 }
  0x8c   : > { %12414 = vmatprep.mubr.msk.bf16.mxu0 %vm872_vm3, %v10667_v37  ;;  %v1536_v37 = vrot.slane %v13505_v24, 5  ;;  %v10669_v44 = vcombine.low %v13666_v16, %v13685_v40  ;;  %v13752_v52 = vsel %vm13524_vm7, %v1496_v38, %v1497_v8  ;;  %v2246_v15 = vshll.u32 %v10758_v14, 16  ;;  %v13774_v14 = vld [vmem:[%s13194_s26 + $0x14] sm:$0x1]  ;;  %v13801_v8 = vld [vmem:[%s13194_s26 + $0x28] sm:$0xf] }
  0x8d   : > { %v13738_v5 = vsel %vm13524_vm7, %v10658_v60, %v1529_v29  ;;  %v1531_v45 = vrot.slane %v1529_v29, 4  ;;  %v10761_v60 = vld [vmem:[%s13194_s26 + $0x18] sm:$0xf]  ;;  %v2252_v51 = vshll.u32 %v13725_v32, 16  ;;  %v1505_v38 = vsel %vm13524_vm7, %v1503_v1, %v1504_v41  ;;  %v12957_v1 = vld [vmem:[%s13194_s26 + $0x60] sm:$0xf] }
  0x8e   : > { %v1538_v49 = vrot.slane %v1536_v37, 4  ;;  %v2245_v29 = vrot.slane %v2243_v53, 4  ;;  %v2248_v12 = vrot.slane %v2246_v15, 5  ;;  %v10620_v41 = vcombine.low %v12957_v1, %v12958_v4  ;;  %v12959_v53 = vld [vmem:[%s13194_s26 + $0x6c] sm:$0xf] }
  0x8f   : > { %12377 = vmatmul.mubr.msk.bf16.gmra.mxu1 %vm872_vm3, %v10617_v28  ;;  %v13748_v28 = vsel %vm13524_vm7, %v10653_v62, %v1494_v59  ;;  %v13761_v16 = vsel %vm13524_vm7, %v1531_v45, %v1532_v21  ;;  %v2256_v59 = vshrl.u32 %v13725_v32, 16  ;;  %v13766_v62 = vld [vmem:[%s13194_s26 + $0x1c] sm:$0xf]  ;;  %v2267_v21 = vshrl.u32 %v10761_v60, 16  ;;  %v12960_v15 = vld [vmem:[%s13194_s26 + $0x70] sm:$0xf] }
  0x90   : > { %12380 = vmatprep.mubr.msk.bf16.mxu1 %vm872_vm3, %v10618_v7  ;;  %v13757_v7 = vsel %vm13524_vm7, %v10654_v2, %v1501_v63  ;;  %v10659_v2 = vrot.slane %v1393_v46, 9  ;;  %v18196_v63 = vld [vmem:[#allocation17_spill] sm:$0xff]  ;;  %v2270_v45 = vshll.u32 %v10761_v60, 16  ;;  %v2276_v46 = vshll.u32 %v13766_v62, 16 }
  0x91   : > { %v1539_v40 = vrot.slane %v18196_v63, 5  ;;  %v2280_v63 = vshrl.u32 %v13766_v62, 16  ;;  %v10621_v22 = vcombine.low %v12959_v53, %v12960_v15  ;;  %v10622_v13 = vcombine.low %v18197_v0, %v13302_v43  ;;  %v13817_v53 = vld [vmem:[%s13194_s26 + $0x2c] sm:$0x1] }
  0x92   : > { %v2258_v1 = vrot.slane %v2256_v59, 4  ;;  %v10670_v60 = vcombine.low %v13748_v28, %v13752_v52  ;;  %v10671_v4 = vcombine.low %v13757_v7, %v1505_v38  ;;  %v13797_v50 = vsel %vm13524_vm7, %v10659_v2, %v1536_v37  ;;  %v10763_v52 = vld [vmem:[%s13194_s26 + $0x20] sm:$0x1]  ;;  %v10767_v37 = vld [vmem:[%s13194_s26 + $0x30] sm:$0xf] }
  0x93   : > { %12415 = vmatmul.mubr.msk.bf16.gmra.mxu0 %vm872_vm3, %v10668_v58  ;;  %v13790_v58 = vrot.slane %v2252_v51, 5  ;;  %v13809_v43 = vsel %vm13524_vm7, %v1538_v49, %v1539_v40  ;;  %v2249_v28 = vor.u32 %v2248_v12, %v2245_v29  ;;  %v2269_v7 = vrot.slane %v2267_v21, 4  ;;  %v13846_v29 = vld [vmem:[%s13194_s26 + $0x38] sm:$0x1] }
  0x94   : > { %12418 = vmatprep.mubr.msk.bf16.mxu0 %vm872_vm3, %v10669_v44  ;;  %v2262_v44 = vshll.u32 %v13774_v14, 16  ;;  %v2291_v51 = vshrl.u32 %v10764_v11, 16  ;;  %v2272_v59 = vrot.slane %v2270_v45, 5  ;;  %v13814_v38 = vrot.slane %v2276_v46, 5  ;;  %v13827_v45 = vld [vmem:[%s13194_s26 + $0x34] sm:$0xf] }
  0x95   : > { %v2282_v2 = vrot.slane %v2280_v63, 4  ;;  %v2294_v42 = vshll.u32 %v10764_v11, 16  ;;  %v2259_v17 = vor.u32 %v2258_v1, %v13790_v58  ;;  %v2300_v40 = vshll.u32 %v13801_v8, 16 }
  0x96   : > { %v2304_v49 = vshrl.u32 %v13801_v8, 16  ;;  %v13824_v12 = vrot.slane %v2262_v44, 5  ;;  %v2286_v21 = vshll.u32 %v10763_v52, 16  ;;  %v13831_v11 = vsel %vm921_vm0, %v13608_v39, 0 }
  0x97   : > { %12381 = vmatmul.mubr.msk.bf16.gmra.mxu1 %vm872_vm3, %v10619_v47  ;;  %v2293_v47 = vrot.slane %v2291_v51, 4  ;;  %v13833_v46 = vrot.slane %v2300_v40, 5  ;;  %v2315_v15 = vshrl.u32 %v10767_v37, 16  ;;  %v13836_v0 = vrot.slane %v2249_v28, 4  ;;  %v10770_v51 = vld [vmem:[%s13194_s26 + $0x3c] sm:$0xf] }
  0x98   : > { %12384 = vmatprep.mubr.msk.bf16.mxu1 %vm872_vm3, %v10620_v41  ;;  %v2296_v41 = vrot.slane %v2294_v42, 5  ;;  %v2306_v63 = vrot.slane %v2304_v49, 4  ;;  %v2273_v1 = vor.u32 %v2272_v59, %v2269_v7  ;;  %v2283_v44 = vor.u32 %v2282_v2, %v13814_v38  ;;  %v10773_v59 = vld [vmem:[%s13194_s26 + $0x48] sm:$0xf] }
  0x99   : > { %v2318_v52 = vshll.u32 %v10767_v37, 16  ;;  %v13841_v42 = vrot.slane %v2259_v17, 4  ;;  %v2310_v49 = vshll.u32 %v13817_v53, 16  ;;  %v2317_v28 = vrot.slane %v2315_v15, 4 }
  0x9a   : > { %v2297_v39 = vor.u32 %v2296_v41, %v2293_v47  ;;  %v2307_v40 = vor.u32 %v2306_v63, %v13833_v46  ;;  %v2324_v7 = vshll.u32 %v13827_v45, 16  ;;  %v2328_v37 = vshrl.u32 %v13827_v45, 16 }
  0x9b   : > { %12419 = vmatmul.mubr.msk.bf16.gmra.mxu0 %vm872_vm3, %v10670_v60  ;;  %v13849_v60 = vld [vmem:[%s13194_s26 + $0x40] sm:$0xf]  ;;  %v2320_v61 = vrot.slane %v2318_v52, 5  ;;  %v13857_v2 = vsel %vm921_vm0, %v13585_v56, 0  ;;  %v2339_v17 = vshrl.u32 %v10770_v51, 16  ;;  %v2342_v47 = vshll.u32 %v10770_v51, 16 }
  0x9c   : > { %12422 = vmatprep.mubr.msk.bf16.mxu0 %vm872_vm3, %v10671_v4  ;;  %v2288_v4 = vrot.slane %v2286_v21, 5  ;;  %v2274_v41 = vrot.slane %v2273_v1, 4  ;;  %v2284_v63 = vrot.slane %v2283_v44, 4  ;;  %v13860_v15 = vrot.slane %v2324_v7, 5  ;;  %v13873_v7 = vld [vmem:[%s13194_s26 + $0x4c] sm:$0xf] }
  0x9d   : > { %v2330_v52 = vrot.slane %v2328_v37, 4  ;;  %v2298_v21 = vrot.slane %v2297_v39, 4  ;;  %v2308_v48 = vrot.slane %v2307_v40, 4  ;;  %v2312_v56 = vrot.slane %v2310_v49, 5  ;;  %v13887_v40 = vld [vmem:[%s13194_s26 + $0x44] sm:$0x1] }
  0x9e   : > { %v2265_v51 = vsel %vm13232_vm4, %v13841_v42, %v13824_v12  ;;  %v2334_v1 = vshll.u32 %v13846_v29, 16  ;;  %v2348_v44 = vshll.u32 %v13849_v60, 16  ;;  %v2341_v37 = vrot.slane %v2339_v17, 4  ;;  %v13905_v17 = vld [vmem:[%s13194_s26 + $0x50] sm:$0x1] }
  0x9f   : > { %12385 = vmatmul.mubr.msk.bf16.gmra.mxu1 %vm872_vm3, %v10621_v22  ;;  %v2255_v22 = vsel %vm13232_vm4, %v13836_v0, %v13790_v58  ;;  %v2344_v58 = vrot.slane %v2342_v47, 5  ;;  %v2352_v0 = vshrl.u32 %v13849_v60, 16  ;;  %v2363_v39 = vshrl.u32 %v10773_v59, 16 }
  0xa0   : > { %12388 = vmatprep.mubr.msk.bf16.mxu1 %vm872_vm3, %v10622_v13  ;;  %v2321_v13 = vor.u32 %v2320_v61, %v2317_v28  ;;  %v2279_v61 = vsel %vm13232_vm4, %v2274_v41, %v13814_v38  ;;  %v2289_v12 = vsel %vm13232_vm4, %v2284_v63, %v2288_v4  ;;  %v2331_v42 = vor.u32 %v2330_v52, %v13860_v15  ;;  %v10776_v28 = vld [vmem:[%s13194_s26 + $0x54] sm:$0xf]  ;;  %v13902_v4 = vld [vmem:[%s13194_s26 + $0x58] sm:$0xf] }
  0xa1   : > { %v2366_v49 = vshll.u32 %v10773_v59, 16  ;;  %v2303_v33 = vsel %vm13232_vm4, %v2298_v21, %v13833_v46  ;;  %v2313_v9 = vsel %vm13232_vm4, %v2308_v48, %v2312_v56  ;;  %v2354_v38 = vrot.slane %v2352_v0, 4  ;;  %v13937_v0 = vld [vmem:[%s13194_s26 + $0x64] sm:$0xf] }
  0xa2   : > { %v2365_v59 = vrot.slane %v2363_v39, 4  ;;  %v2372_v57 = vshll.u32 %v13873_v7, 16  ;;  %v2376_v55 = vshrl.u32 %v13873_v7, 16  ;;  %v13913_v48 = vrot.slane %v2321_v13, 4 }
  0xa3   : > { %12423 = vmatmul.mubr.msk.bf16.gmra.mxu0 %vm872_vm3, %v10672_v18  ;;  %v13898_v18 = vrot.slane %v2348_v44, 5  ;;  %v2368_v47 = vrot.slane %v2366_v49, 5  ;;  %v2345_v46 = vor.u32 %v2344_v58, %v2341_v37  ;;  %v2358_v41 = vshll.u32 %v13887_v40, 16  ;;  %v10779_v58 = vld [vmem:[%s13194_s26 + $0x60] sm:$0xf] }
  0xa4   : > { %12426 = vmatprep.mubr.msk.bf16.mxu0 %vm872_vm3, %v10673_v3  ;;  %v13915_v3 = vrot.slane %v2334_v1, 5  ;;  %v18198_v63 = vcombine.low %v13370_v27, %v13376_v34  ;;  %v13922_v52 = vrot.slane %v2331_v42, 4  ;;  %v13924_v21 = vrot.slane %v2372_v57, 5 }
  0xa5   : > { %v2378_v23 = vrot.slane %v2376_v55, 4  ;;  %v2387_v36 = vshrl.u32 %v10776_v28, 16  ;;  %v13928_v56 = vcombine.low %v2279_v61, %v2289_v12  ;;  %v2390_v13 = vshll.u32 %v10776_v28, 16  ;;  %v13949_v12 = vld [vmem:[%s13194_s26 + $0x5c] sm:$0x1] }
  0xa6   : > { %v2396_v1 = vshll.u32 %v13902_v4, 16  ;;  %v13931_v44 = vcombine.low %v2303_v33, %v2313_v9  ;;  %v2355_v27 = vor.u32 %v2354_v38, %v13898_v18  ;;  %v2369_v34 = vor.u32 %v2368_v47, %v2365_v59  ;;  %v10782_v28 = vld [vmem:[%s13194_s26 + $0x6c] sm:$0xf] }
  0xa7   : > { %12389 = vmatmul.mubr.msk.bf16.gmra.mxu1 %vm872_vm3, %v10623_v19  ;;  %v13926_v19 = vcombine.low %v2255_v22, %v2265_v51  ;;  %v2400_v37 = vshrl.u32 %v13902_v4, 16  ;;  %v2327_v22 = vsel %vm13232_vm4, %v13913_v48, %v13860_v15  ;;  %v13943_v51 = vrot.slane %v2345_v46, 4  ;;  %v13971_v46 = vld [vmem:[%s13194_s26 + $0x70] sm:$0xf] }
  0xa8   : > { %12392 = vmatprep.mubr.msk.bf16.mxu1 %vm872_vm3, %v18198_v63  ;;  %v13945_v39 = vrot.slane %v2358_v41, 5  ;;  %v2382_v61 = vshll.u32 %v13905_v17, 16  ;;  %v18199_v42 = vcombine.low %v13714_v6, %v13730_v10  ;;  %v2337_v49 = vsel %vm13232_vm4, %v13922_v52, %v13915_v3  ;;  %v13968_v10 = vld [vmem:[%s13194_s26 + $0x68] sm:$0x1] }
  0xa9   : > { %v2379_v33 = vor.u32 %v2378_v23, %v13924_v21  ;;  %v2389_v9 = vrot.slane %v2387_v36, 4  ;;  %v2392_v38 = vrot.slane %v2390_v13, 5  ;;  %v18200_v59 = vcombine.low %v13738_v5, %v13761_v16 }
  0xaa   : > { %v13965_v47 = vrot.slane %v2396_v1, 5  ;;  %v2402_v6 = vrot.slane %v2400_v37, 4  ;;  %v2411_v57 = vshrl.u32 %v10779_v58, 16  ;;  %v2414_v55 = vshll.u32 %v10779_v58, 16 }
  0xab   : > { %12427 = vmatmul.mubr.msk.bf16.gmra.mxu0 %vm872_vm3, %v18199_v42  ;;  %v2356_v41 = vrot.slane %v2355_v27, 4  ;;  %v2370_v63 = vrot.slane %v2369_v34, 4  ;;  %v2420_v23 = vshll.u32 %v13937_v0, 16  ;;  %v2424_v36 = vshrl.u32 %v13937_v0, 16 }
  0xac   : > { %12430 = vmatprep.mubr.msk.bf16.mxu0 %vm872_vm3, %v18200_v59  ;;  %v18201_v5 = vcombine.low %v18190_v25, %v13428_v54  ;;  %v2351_v16 = vsel %vm13232_vm4, %v13943_v51, %v13898_v18  ;;  %v2384_v13 = vrot.slane %v2382_v61, 5  ;;  %v2413_v1 = vrot.slane %v2411_v57, 4  ;;  %v13992_v51 = vld [vmem:[%s13194_s26 + $0x74] sm:$0x1] }
  0xad   : > { %v2416_v27 = vrot.slane %v2414_v55, 5  ;;  %v18202_v34 = vcombine.low %v18193_v35, %v18192_v31  ;;  %v2380_v37 = vrot.slane %v2379_v33, 4  ;;  %v2406_v58 = vshll.u32 %v13949_v12, 16 }
  0xae   : > { %v13988_v54 = vrot.slane %v2420_v23, 5  ;;  %v2426_v25 = vrot.slane %v2424_v36, 4  ;;  %v2393_v42 = vor.u32 %v2392_v38, %v2389_v9  ;;  %v2403_v18 = vor.u32 %v2402_v6, %v13965_v47  ;;  %v10785_v38 = vld [vmem:[%s13194_s26 + $0x78] sm:$0xf] }
  0xaf   : > { %12393 = vmatmul.mubr.msk.bf16.gmra.mxu1 %vm872_vm3, %v18201_v5  ;;  %v2435_v61 = vshrl.u32 %v10782_v28, 16  ;;  %v2438_v59 = vshll.u32 %v10782_v28, 16  ;;  %v2361_v31 = vsel %vm13232_vm4, %v2356_v41, %v13945_v39  ;;  %v2375_v35 = vsel %vm13232_vm4, %v2370_v63, %v13924_v21  ;;  %v14005_v28 = vld [vmem:[%s13194_s26 + $0x7c] sm:$0xf]  ;;  %v12805_v41 = vld [vmem:[%s13194_s26 + $0xc] sm:$0xff]  }
  0xb0   : > { %12396 = vmatprep.mubr.msk.bf16.mxu1 %vm872_vm3, %v18202_v34  ;;  %v2430_v33 = vshll.u32 %v13968_v10, 16  ;;  %v2444_v9 = vshll.u32 %v13971_v46, 16  ;;  %v2417_v57 = vor.u32 %v2416_v27, %v2413_v1  ;;  %v2427_v6 = vor.u32 %v2426_v25, %v13988_v54  ;;  %v10788_v1 = vld [vmem:[%s13194_s26 + $0x84] sm:$0xf] }
  0xb1   : > { %v2437_v55 = vrot.slane %v2435_v61, 4  ;;  %v2440_v23 = vrot.slane %v2438_v59, 5  ;;  %v18203_v39 = vcombine.low %v13797_v50, %v13809_v43  ;;  %v2385_v21 = vsel %vm13232_vm4, %v2380_v37, %v2384_v13 }
  0xb2   : > { %v2408_v63 = vrot.slane %v2406_v58, 5  ;;  %v14014_v36 = vrot.slane %v2444_v9, 5  ;;  %v2448_v5 = vshrl.u32 %v13971_v46, 16  ;;  %v2394_v27 = vrot.slane %v2393_v42, 4 }
  0xb3   : > { %12431 = vmatmul.mubr.msk.bf16.gmra.mxu0 %vm872_vm3, %v18203_v39  ;;  %v2404_v34 = vrot.slane %v2403_v18, 4  ;;  %v2459_v25 = vshrl.u32 %v10785_v38, 16  ;;  %v2462_v61 = vshll.u32 %v10785_v38, 16  ;;  %v2432_v50 = vrot.slane %v2430_v33, 5 }
  0xb4   : > { %12470 = vmatprep.mubr.msk.bf16.mxu0 %vm872_vm3, %v13926_v19  ;;  %v2441_v43 = vor.u32 %v2440_v23, %v2437_v55  ;;  %v2450_v59 = vrot.slane %v2448_v5, 4  ;;  %v2454_v39 = vshll.u32 %v13992_v51, 16  ;;  %v18204_v13 = vcombine.low %v13499_v30, %v13505_v24  ;;  %v12807_v23 = vld [vmem:[%s13194_s26 + $0x24] sm:$0xff]   ;;  %v14067_v5 = vld [vmem:[%s18128_s1 + $0x10] sm:$0x3] }
  0xb5   : > { %v2418_v37 = vrot.slane %v2417_v57, 4  ;;  %v2428_v58 = vrot.slane %v2427_v6, 4  ;;  %v2461_v9 = vrot.slane %v2459_v25, 4  ;;  %v2464_v19 = vrot.slane %v2462_v61, 5  ;;  %v14044_v57 = vld [vmem:[%s13194_s26 + $0x88] sm:$0xf] }
  0xb6   : > { %v14036_v30 = vcombine.low %v2327_v22, %v2337_v49  ;;  %v2451_v24 = vor.u32 %v2450_v59, %v14014_v36  ;;  %v2468_v42 = vshll.u32 %v14005_v28, 16  ;;  %v2472_v18 = vshrl.u32 %v14005_v28, 16  ;;  %18205 = vst [vmem:[#allocation12_spill] sm:$0xff] %v14044_v57  ;;  %v12806_v6 = vld [vmem:[%s13194_s26 + $0x18] sm:$0xff]   ;;  %v14050_v49 = vld [vmem:[%s13194_s26 + $0x80] sm:$0x1] }
  0xb7   : > { %12397 = vmatmul.mubr.msk.bf16.gmra.mxu1 %vm872_vm3, %v18204_v13  ;;  %v14041_v33 = vcombine.low %v2351_v16, %v2361_v31  ;;  %v2465_v38 = vor.u32 %v2464_v19, %v2461_v9  ;;  %v2483_v3 = vshrl.u32 %v10788_v1, 16  ;;  %v2486_v52 = vshll.u32 %v10788_v1, 16  ;;  %18206 = vst [vmem:[#allocation13_spill] sm:$0xff] %v14050_v49  ;;  %18207 = vst [vmem:[#allocation15_spill] sm:$0xff] %v14067_v5  ;;  %v10794_v9 = vld [vmem:[%s13194_s26 + $0x9c] sm:$0xf] }
  0xb8   : > { %12436 = vmatprep.mubr.msk.bf16.mxu1 %vm872_vm3, %v12805_v41  ;;  %v14047_v55 = vcombine.low %v2375_v35, %v2385_v21  ;;  %v2442_v15 = vrot.slane %v2441_v43, 4  ;;  %v2452_v48 = vrot.slane %v2451_v24, 4  ;;  %v2456_v22 = vrot.slane %v2454_v39, 5  ;;  %v10791_v21 = vld [vmem:[%s13194_s26 + $0x90] sm:$0xf] }
  0xb9   : > { %v2399_v16 = vsel %vm13232_vm4, %v2394_v27, %v13965_v47  ;;  %v2409_v31 = vsel %vm13232_vm4, %v2404_v34, %v2408_v63  ;;  %v2423_v35 = vsel %vm13232_vm4, %v2418_v37, %v13988_v54  ;;  %v2433_v41 = vsel %vm13232_vm4, %v2428_v58, %v2432_v50  ;;  %v14076_v54 = vld [vmem:[%s13194_s26 + $0x94] sm:$0xf] }
  0xba   : > { %v14071_v47 = vrot.slane %v2468_v42, 5  ;;  %v2474_v1 = vrot.slane %v2472_v18, 4  ;;  %v2492_v63 = vshll.u32 %v14044_v57, 16  ;;  %v2496_v27 = vshrl.u32 %v14044_v57, 16  ;;  %18208 = vst [vmem:[#allocation14_spill] sm:$0xff] %v14076_v54 }
  0xbb   : > { %12471 = vmatmul.mubr.msk.bf16.vlgmr.msra.gmra.mxu0 %vm872_vm3, %v13928_v56  ;;  %v14081_v34 = vrot.slane %v2465_v38, 4  ;;  %v2478_v25 = vshll.u32 %v14050_v49, 16  ;;  %v14085_v56 = vld [vmem:[%s13194_s26 + $0x8c] sm:$0x1]  ;;  %v2485_v61 = vrot.slane %v2483_v3, 4  ;;  %v2488_v50 = vrot.slane %v2486_v52, 5 }
  0xbc   : > { %12537 = vmatpush3.bf16.msra.mxu0 %v13857_v2  ;;  %12474 = vmatprep.mubr.msk.bf16.mxu0 %vm872_vm3, %v13931_v44  ;;  %18209 = vst [vmem:[#allocation16_spill] sm:$0xff] %v14085_v56  ;;  %v2447_v43 = vsel %vm13232_vm4, %v2442_v15, %v14014_v36  ;;  %v2457_v59 = vsel %vm13232_vm4, %v2452_v48, %v2456_v22  ;;  %v2507_v2 = vshrl.u32 %v10791_v21, 16  ;;  %v2510_v39 = vshll.u32 %v10791_v21, 16  ;;  %v14095_v44 = vld [vmem:[%s18128_s1 + $0xe] sm:$0x3]  ;;  %v12808_v3 = vld [vmem:[%s13194_s26 + $0x30] sm:$0xff]  }
  0xbd   : > { %18210 = vst [vmem:[#allocation11_spill] sm:$0xff] %v14095_v44  ;;  %12731 = vmatprep.subr.msk.bf16.mxu0 %vm921_vm0, %v14067_v5  ;;  %v14100_v13 = vcombine.low %v2399_v16, %v2409_v31  ;;  %v14102_v36 = vcombine.low %v2423_v35, %v2433_v41  ;;  %v2516_v37 = vshll.u32 %v14076_v54, 16  ;;  %v2520_v58 = vshrl.u32 %v14076_v54, 16  ;;  %v14114_v38 = vld [vmem:[%s13194_s26 + $0xa0] sm:$0xf] }
  0xbe   : > { %v2475_v19 = vor.u32 %v2474_v1, %v14071_v47  ;;  %v14110_v24 = vrot.slane %v2492_v63, 5  ;;  %v2498_v42 = vrot.slane %v2496_v27, 4  ;;  %v2502_v18 = vshll.u32 %v14085_v56, 16  ;;  %18211 = vst [vmem:[#allocation17_spill] sm:$0xff] %v14114_v38  ;;  %v14126_v48 = vld [vmem:[%s13194_s26 + $0x98] sm:$0x1] }
  0xbf   : > { %12437 = vmatmul.mubr.msk.bf16.vlgmr.msra.gmra.mxu1 %vm872_vm3, %v12806_v6  ;;  %v14117_v52 = vcombine.low %v2447_v43, %v2457_v59  ;;  %v14123_v6 = vrot.slane %v2478_v25, 5  ;;  %v2489_v15 = vor.u32 %v2488_v50, %v2485_v61  ;;  %18212 = vst [vmem:[#allocation10_spill] sm:$0xff] %v14126_v48  ;;  %v2509_v22 = vrot.slane %v2507_v2, 4  ;;  %v14133_v31 = vld [vmem:[%s13194_s26 + $0xa4] sm:$0x1]  ;;  %v12809_v25 = vld [vmem:[%s13194_s26 + $0x3c] sm:$0xff]  }
  0xc0   : > { %12503 = vmatpush3.bf16.msra.mxu1 %v13831_v11  ;;  %12440 = vmatprep.mubr.msk.bf16.mxu1 %vm872_vm3, %v12807_v23  ;;  %v2512_v23 = vrot.slane %v2510_v39, 5  ;;  %v14130_v16 = vrot.slane %v2516_v37, 5  ;;  %18213 = vst [vmem:[#allocation19_spill] sm:$0xff] %v14133_v31  ;;  %v2531_v35 = vshrl.u32 %v10794_v9, 16  ;;  %v2522_v41 = vrot.slane %v2520_v58, 4 }
  0xc1   : > { %12730 = vmatprep.subr.msk.bf16.mxu1 %vm921_vm0, %v14095_v44  ;;  %v2534_v21 = vshll.u32 %v10794_v9, 16  ;;  %v2540_v1 = vshll.u32 %v14114_v38, 16  ;;  %v2544_v63 = vshrl.u32 %v14114_v38, 16  ;;  %v10797_v27 = vld [vmem:[%s13194_s26 + $0xa8] sm:$0xf]  ;;  %v14141_v61 = vrot.slane %v2475_v19, 4 }
  0xc2   : > { %v2499_v50 = vor.u32 %v2498_v42, %v14110_v24  ;;  %v14144_v43 = vrot.slane %v2502_v18, 5  ;;  %v2533_v59 = vrot.slane %v2531_v35, 4  ;;  %v14147_v2 = vld [vmem:[%s13194_s26 + $0xac] sm:$0xf]  ;;  %v2526_v39 = vshll.u32 %v14126_v48, 16 }
  0xc3   : > { %12475 = vmatmul.mubr.msk.bf16.gmra.mxu0 %vm872_vm3, %v14036_v30  ;;  %18214 = vst [vmem:[#allocation20_spill] sm:$0xff] %v14147_v2  ;;  %v2536_v37 = vrot.slane %v2534_v21, 5  ;;  %v14152_v58 = vrot.slane %v2540_v1, 5  ;;  %v2546_v30 = vrot.slane %v2544_v63, 4  ;;  %v14154_v9 = vrot.slane %v2489_v15, 4 }
  0xc4   : > { %12478 = vmatprep.mubr.msk.bf16.mxu0 %vm872_vm3, %v14041_v33  ;;  %v2513_v19 = vor.u32 %v2512_v23, %v2509_v22  ;;  %v14157_v42 = vld [vmem:[%s13194_s26 + $0xb0] sm:$0x1]  ;;  %v2555_v18 = vshrl.u32 %v10797_v27, 16  ;;  %v2558_v35 = vshll.u32 %v10797_v27, 16  ;;  %v2523_v11 = vor.u32 %v2522_v41, %v14130_v16  ;;  %v10800_v1 = vld [vmem:[%s13194_s26 + $0xb4] sm:$0xf] }
  0xc5   : > { %18215 = vst [vmem:[#allocation21_spill] sm:$0xff] %v14157_v42  ;;  %v2537_v33 = vor.u32 %v2536_v37, %v2533_v59  ;;  %v2550_v44 = vshll.u32 %v14133_v31, 16  ;;  %v2564_v21 = vshll.u32 %v14147_v2, 16  ;;  %v14165_v63 = vld [vmem:[%s13194_s26 + $0xb8] sm:$0xf]  ;;  %v2547_v15 = vor.u32 %v2546_v30, %v14152_v58 }
  0xc6   : > { %v2557_v22 = vrot.slane %v2555_v18, 4  ;;  %v2560_v23 = vrot.slane %v2558_v35, 5  ;;  %v14174_v27 = vrot.slane %v2499_v50, 4  ;;  %v14176_v59 = vrot.slane %v2526_v39, 5  ;;  %v14183_v35 = vld [vmem:[%s13194_s26 + $0xbc] sm:$0x1] }
  0xc7   : > { %12441 = vmatmul.mubr.msk.bf16.gmra.mxu1 %vm872_vm3, %v12808_v3  ;;  %v2568_v3 = vshrl.u32 %v14147_v2, 16  ;;  %v14178_v37 = vrot.slane %v2564_v21, 5  ;;  %v2574_v18 = vshll.u32 %v14157_v42, 16  ;;  %v2579_v2 = vshrl.u32 %v10800_v1, 16  ;;  %v10803_v50 = vld [vmem:[%s13194_s26 + $0xc0] sm:$0xf] }
  0xc8   : > { %12444 = vmatprep.mubr.msk.bf16.mxu1 %vm872_vm3, %v12809_v25  ;;  %v12810_v25 = vld [vmem:[%s13194_s26 + $0x48] sm:$0xff]   ;;  %v2561_v5 = vor.u32 %v2560_v23, %v2557_v22  ;;  %v2514_v31 = vrot.slane %v2513_v19, 4  ;;  %v2524_v38 = vrot.slane %v2523_v11, 4  ;;  %v2582_v48 = vshll.u32 %v10800_v1, 16  ;;  %v12811_v39 = vld [vmem:[%s13194_s26 + $0x54] sm:$0xff]  }
  0xc9   : > { %v2570_v30 = vrot.slane %v2568_v3, 4  ;;  %v2588_v41 = vshll.u32 %v14165_v63, 16  ;;  %v2538_v21 = vrot.slane %v2537_v33, 4  ;;  %v2548_v54 = vrot.slane %v2547_v15, 4  ;;  %v14192_v3 = vld [vmem:[%s13194_s26 + $0xc4] sm:$0xf] }
  0xca   : > { %v2552_v22 = vrot.slane %v2550_v44, 5  ;;  %v2581_v11 = vrot.slane %v2579_v2, 4  ;;  %v2584_v19 = vrot.slane %v2582_v48, 5  ;;  %v2592_v42 = vshrl.u32 %v14165_v63, 16 }
  0xcb   : > { %12479 = vmatmul.mubr.msk.bf16.gmra.mxu0 %vm872_vm3, %v14047_v55  ;;  %v2571_v23 = vor.u32 %v2570_v30, %v14178_v37  ;;  %v2590_v1 = vrot.slane %v2588_v41, 5  ;;  %v2562_v56 = vrot.slane %v2561_v5, 4  ;;  %v2576_v57 = vrot.slane %v2574_v18, 5  ;;  %v14200_v30 = vld [vmem:[%s13194_s26 + $0xc8] sm:$0x1] }
  0xcc   : > { %12482 = vmatprep.mubr.msk.bf16.mxu0 %vm872_vm3, %v14100_v13  ;;  %v2598_v55 = vshll.u32 %v14183_v35, 16  ;;  %v2603_v33 = vshrl.u32 %v10803_v50, 16  ;;  %v2585_v44 = vor.u32 %v2584_v19, %v2581_v11  ;;  %v2594_v15 = vrot.slane %v2592_v42, 4 }
  0xcd   : > { %v2606_v49 = vshll.u32 %v10803_v50, 16  ;;  %v2612_v13 = vshll.u32 %v14192_v3, 16  ;;  %v2572_v48 = vrot.slane %v2571_v23, 4  ;;  %v2616_v5 = vshrl.u32 %v14192_v3, 16 }
  0xce   : > { %v2600_v2 = vrot.slane %v2598_v55, 5  ;;  %v2605_v41 = vrot.slane %v2603_v33, 4  ;;  %v2586_v42 = vrot.slane %v2585_v44, 4  ;;  %v2595_v18 = vor.u32 %v2594_v15, %v2590_v1  ;;  %v12812_v55 = vld [vmem:[%s13194_s26 + $0x60] sm:$0xff]  }
  0xcf   : > { %12445 = vmatmul.mubr.msk.bf16.gmra.mxu1 %vm872_vm3, %v12810_v25  ;;  %v2495_v25 = vsel %vm13232_vm4, %v14154_v9, %v14110_v24  ;;  %v2608_v11 = vrot.slane %v2606_v49, 5  ;;  %v2505_v50 = vsel %vm13232_vm4, %v14174_v27, %v14144_v43  ;;  %v14216_v23 = vrot.slane %v2612_v13, 5  ;;  %v12813_v43 = vld [vmem:[%s13194_s26 + $0x6c] sm:$0xff]   ;;  %v10843_v13 = vld [vmem:[%s13194_s26 + $0x3c] sm:$0xe] }
  0xd0   : > { %12448 = vmatprep.mubr.msk.bf16.mxu1 %vm872_vm3, %v12811_v39  ;;  %v2519_v39 = vsel %vm13232_vm4, %v2514_v31, %v14130_v16  ;;  %v2618_v19 = vrot.slane %v2616_v5, 4  ;;  %v2529_v24 = vsel %vm13232_vm4, %v2524_v38, %v14176_v59  ;;  %v2596_v9 = vrot.slane %v2595_v18, 4  ;;  %v14233_v27 = vld [vmem:[%s13194_s26 + $0xc] sm:$0xe] }
  0xd1   : > { %v2609_v49 = vor.u32 %v2608_v11, %v2605_v41  ;;  %v2622_v33 = vshll.u32 %v14200_v30, 16  ;;  %v2543_v16 = vsel %vm13232_vm4, %v2538_v21, %v14152_v58  ;;  %v2553_v31 = vsel %vm13232_vm4, %v2548_v54, %v2552_v22  ;;  %v10841_v22 = vld [vmem:[%s13194_s26 + $0x24] sm:$0xe] }
  0xd2   : > { %v2619_v38 = vor.u32 %v2618_v19, %v14216_v23  ;;  %v2986_v59 = vrot.slane %v13725_v32, 5  ;;  %v2577_v58 = vsel %vm13232_vm4, %v2572_v48, %v2576_v57  ;;  %v2591_v21 = vsel %vm13232_vm4, %v2586_v42, %v2590_v1  ;;  %v10842_v1 = vld [vmem:[%s13194_s26 + $0x30] sm:$0xe] }
  0xd3   : > { %12483 = vmatmul.mubr.msk.bf16.gmra.mxu0 %vm872_vm3, %v14102_v36  ;;  %v2567_v36 = vsel %vm13232_vm4, %v2562_v56, %v14178_v37  ;;  %v2601_v54 = vsel %vm13232_vm4, %v2596_v9, %v2600_v2  ;;  %v18216_v44 = vsel %vm13232_vm4, %v14141_v61, %v14123_v6  ;;  %v18217_v56 = vsel %vm13232_vm4, %v14081_v34, %v14071_v47  ;;  %v12814_v9 = vld [vmem:[%s13194_s26 + $0x78] sm:$0xff]  }
  0xd4   : > { %12486 = vmatprep.mubr.msk.bf16.mxu0 %vm872_vm3, %v14117_v52  ;;  %v10816_v52 = vcombine.low %v18217_v56, %v18216_v44  ;;  %v10817_v37 = vcombine.low %v2495_v25, %v2505_v50  ;;  %v14258_v57 = vcombine.low %v2519_v39, %v2529_v24  ;;  %v14260_v15 = vrot.slane %v2609_v49, 4  ;;  %v10844_v24 = vld [vmem:[%s13194_s26 + $0x48] sm:$0xe] }
  0xd5   : > { %v14265_v48 = vcombine.low %v2543_v16, %v2553_v31  ;;  %v14267_v2 = vrot.slane %v2619_v38, 4  ;;  %v14269_v6 = vrot.slane %v2622_v33, 5  ;;  %v10855_v47 = vrot.slane %v14233_v27, 9  ;;  %v10845_v38 = vld [vmem:[%s13194_s26 + $0x54] sm:$0xe]  ;;  %v12820_v27 = vld [vmem:[%s13194_s26 + $0xc0] sm:$0xff]  }
  0xd6   : > { %v14273_v34 = vcombine.low %v2567_v36, %v2577_v58  ;;  %v14275_v61 = vcombine.low %v2591_v21, %v2601_v54  ;;  %v14279_v41 = vrot.slane %v2986_v59, 4  ;;  %v2989_v5 = vrot.slane %v13774_v14, 5 }
  0xd7   : > { %12449 = vmatmul.mubr.msk.bf16.gmra.mxu1 %vm872_vm3, %v12812_v55  ;;  %v2993_v25 = vrot.slane %v13766_v62, 5  ;;  %v10857_v42 = vrot.slane %v10841_v22, 9  ;;  %v3000_v18 = vrot.slane %v13801_v8, 5  ;;  %v3003_v11 = vrot.slane %v13817_v53, 5  ;;  %v10846_v22 = vld [vmem:[%s13194_s26 + $0x60] sm:$0xe] }
  0xd8   : > { %12452 = vmatprep.mubr.msk.bf16.mxu1 %vm872_vm3, %v12813_v43  ;;  %v2615_v50 = vsel %vm13232_vm4, %v14260_v15, %v14216_v23  ;;  %v10858_v39 = vrot.slane %v10842_v1, 9  ;;  %v3007_v19 = vrot.slane %v13827_v45, 5  ;;  %v3010_v55 = vrot.slane %v13846_v29, 5  ;;  %v12815_v43 = vld [vmem:[%s13194_s26 + $0x84] sm:$0xff]   ;;  %v12821_v15 = vld [vmem:[%s13194_s26 + $0x18] sm:$0xff]  }
  0xd9   : > { %v2625_v8 = vsel %vm13232_vm4, %v14267_v2, %v14269_v6  ;;  %v14299_v53 = vsel %vm13524_vm7, %v10857_v42, %v3000_v18  ;;  %v3002_v49 = vrot.slane %v3000_v18, 4  ;;  %v10859_v33 = vrot.slane %v10843_v13, 9  ;;  %v10848_v13 = vld [vmem:[%s13194_s26 + $0x78] sm:$0xe] }
  0xda   : > { %v14305_v29 = vsel %vm13524_vm7, %v10858_v39, %v3007_v19  ;;  %v3009_v45 = vrot.slane %v3007_v19, 4  ;;  %v3014_v16 = vrot.slane %v13849_v60, 5  ;;  %v3017_v31 = vrot.slane %v13887_v40, 5  ;;  %v10854_v19 = vld [vmem:[%s13194_s26 + $0xc0] sm:$0xe] }
  0xdb   : > { %12487 = vmatmul.mubr.msk.bf16.gmra.mxu0 %vm872_vm3, %v10816_v52  ;;  %v14313_v36 = vsel %vm13524_vm7, %v3002_v49, %v3003_v11  ;;  %v10860_v58 = vrot.slane %v10844_v24, 9  ;;  %v3021_v21 = vrot.slane %v13873_v7, 5  ;;  %v3024_v54 = vrot.slane %v13905_v17, 5  ;;  %v10847_v52 = vld [vmem:[%s13194_s26 + $0x6c] sm:$0xe] }
  0xdc   : > { %12490 = vmatprep.mubr.msk.bf16.mxu0 %vm872_vm3, %v10817_v37  ;;  %v10874_v44 = vcombine.low %v14299_v53, %v14313_v36  ;;  %v14322_v60 = vsel %vm13524_vm7, %v3009_v45, %v3010_v55  ;;  %v14326_v40 = vsel %vm13524_vm7, %v10859_v33, %v3014_v16  ;;  %v3016_v56 = vrot.slane %v3014_v16, 4  ;;  %v14566_v53 = vld [vmem:[%s13194_s26 + $0x2c] sm:$0x1]  ;;  %v14569_v36 = vld [vmem:[%s13194_s26 + $0x34] sm:$0xf] }
  0xdd   : > { %v10875_v7 = vcombine.low %v14305_v29, %v14322_v60  ;;  %v14334_v17 = vsel %vm13524_vm7, %v10860_v58, %v3021_v21  ;;  %v3023_v37 = vrot.slane %v3021_v21, 4  ;;  %v10861_v1 = vrot.slane %v10845_v38, 9  ;;  %v12817_v38 = vld [vmem:[%s13194_s26 + $0x9c] sm:$0xff]  }
  0xde   : > { %v14340_v42 = vsel %vm13524_vm7, %v3016_v56, %v3017_v31  ;;  %v3028_v18 = vrot.slane %v13902_v4, 5  ;;  %v3031_v11 = vrot.slane %v13949_v12, 5  ;;  %v10862_v39 = vrot.slane %v10846_v22, 9  ;;  %v10849_v31 = vld [vmem:[%s13194_s26 + $0x84] sm:$0xe]  ;;  %v18218_v22 = vld [vmem:[#allocation13_spill] sm:$0xff] }
  0xdf   : > { %12453 = vmatmul.mubr.msk.bf16.gmra.mxu1 %vm872_vm3, %v12814_v9  ;;  %v14348_v55 = vsel %vm13524_vm7, %v3023_v37, %v3024_v54  ;;  %v3035_v24 = vrot.slane %v13937_v0, 5  ;;  %v3038_v9 = vrot.slane %v13968_v10, 5  ;;  %v10863_v33 = vrot.slane %v10847_v52, 9  ;;  %v10850_v52 = vld [vmem:[%s13194_s26 + $0x90] sm:$0xe] }
  0xe0   : > { %12456 = vmatprep.mubr.msk.bf16.mxu1 %vm872_vm3, %v12815_v43  ;;  %v14356_v4 = vsel %vm13524_vm7, %v10861_v1, %v3028_v18  ;;  %v3030_v12 = vrot.slane %v3028_v18, 4  ;;  %v12816_v43 = vld [vmem:[%s13194_s26 + $0x90] sm:$0xff]   ;;  %v3042_v0 = vrot.slane %v13971_v46, 5  ;;  %v3045_v10 = vrot.slane %v13992_v51, 5  ;;  %v10851_v18 = vld [vmem:[%s13194_s26 + $0x9c] sm:$0xe] }
  0xe1   : > { %v14361_v45 = vsel %vm13524_vm7, %v10862_v39, %v3035_v24  ;;  %v3037_v16 = vrot.slane %v3035_v24, 4  ;;  %v10864_v21 = vrot.slane %v10848_v13, 9  ;;  %v3049_v54 = vrot.slane %v14005_v28, 5  ;;  %v18219_v39 = vld [vmem:[#allocation12_spill] sm:$0xff]  ;;  %v12818_v28 = vld [vmem:[%s13194_s26 + $0xa8] sm:$0xff]  }
  0xe2   : > { %v14371_v58 = vsel %vm13524_vm7, %v3030_v12, %v3031_v11  ;;  %v3052_v56 = vrot.slane %v18218_v22, 5  ;;  %v3044_v37 = vrot.slane %v3042_v0, 4  ;;  %v10865_v13 = vrot.slane %v10849_v31, 9  ;;  %v18221_v31 = vld [vmem:[#allocation14_spill] sm:$0xff] }
  0xe3   : > { %12491 = vmatmul.mubr.msk.bf16.gmra.mxu0 %vm872_vm3, %v14258_v57  ;;  %v14382_v51 = vsel %vm13524_vm7, %v3037_v16, %v3038_v9  ;;  %v14386_v57 = vsel %vm13524_vm7, %v10863_v33, %v3042_v0  ;;  %v14392_v1 = vsel %vm13524_vm7, %v10864_v21, %v3049_v54  ;;  %v3056_v24 = vrot.slane %v18219_v39, 5  ;;  %v18220_v9 = vld [vmem:[#allocation16_spill] sm:$0xff]  ;;  %v10852_v16 = vld [vmem:[%s13194_s26 + $0xa8] sm:$0xe]  ;;  %v18222_v21 = vld [vmem:[#allocation10_spill] sm:$0xff] }
  0xe4   : > { %12494 = vmatprep.mubr.msk.bf16.mxu0 %vm872_vm3, %v14265_v48  ;;  %v3051_v48 = vrot.slane %v3049_v54, 4  ;;  %v14398_v11 = vsel %vm13524_vm7, %v3044_v37, %v3045_v10  ;;  %v3059_v12 = vrot.slane %v18220_v9, 5  ;;  %v10866_v33 = vrot.slane %v10850_v52, 9 }
  0xe5   : > { %v3063_v10 = vrot.slane %v18221_v31, 5  ;;  %v3066_v54 = vrot.slane %v18222_v21, 5  ;;  %v14416_v52 = vsel %vm13524_vm7, %v10865_v13, %v3056_v24  ;;  %v10867_v37 = vrot.slane %v10851_v18, 9  ;;  %v18224_v31 = vld [vmem:[#allocation19_spill] sm:$0xff]  ;;  %v10853_v21 = vld [vmem:[%s13194_s26 + $0xb4] sm:$0xe] }
  0xe6   : > { %v3073_v0 = vrot.slane %v18224_v31, 5  ;;  %v10868_v46 = vrot.slane %v10852_v16, 9  ;;  %v18225_v13 = vld [vmem:[#allocation20_spill] sm:$0xff]  ;;  %v2987_v2 = vsel %vm13524_vm7, %v10855_v47, %v2986_v59  ;;  %v2990_v23 = vsel %vm13524_vm7, %v14279_v41, %v2989_v5 }
  0xe7   : > { %12457 = vmatmul.mubr.msk.bf16.gmra.mxu1 %vm872_vm3, %v12816_v43  ;;  %v14408_v43 = vsel %vm13524_vm7, %v3051_v48, %v3052_v56  ;;  %v14420_v39 = vsel %vm13524_vm7, %v10866_v33, %v3063_v10  ;;  %v3065_v56 = vrot.slane %v3063_v10, 4  ;;  %v18223_v48 = vld [vmem:[#allocation17_spill] sm:$0xff]  ;;  %v3077_v49 = vrot.slane %v18225_v13, 5 }
  0xe8   : > { %12460 = vmatprep.mubr.msk.bf16.mxu1 %vm872_vm3, %v12817_v38  ;;  %v3058_v38 = vrot.slane %v3056_v24, 4  ;;  %v3070_v9 = vrot.slane %v18223_v48, 5  ;;  %v18226_v24 = vld [vmem:[#allocation21_spill] sm:$0xff]  ;;  %v10869_v13 = vrot.slane %v10853_v21, 9  ;;  %v3094_v21 = vrot.slane %v14200_v30, 5 }
  0xe9   : > { %v3080_v18 = vrot.slane %v18226_v24, 5  ;;  %v12819_v33 = vld [vmem:[%s13194_s26 + $0xb4] sm:$0xff]   ;;  %v14440_v48 = vsel %vm13524_vm7, %v3065_v56, %v3066_v54  ;;  %v3079_v31 = vrot.slane %v3077_v49, 4  ;;  %v3087_v56 = vrot.slane %v14183_v35, 5 }
  0xea   : > { %v14428_v22 = vsel %vm13524_vm7, %v3058_v38, %v3059_v12  ;;  %v14444_v12 = vsel %vm13524_vm7, %v10867_v37, %v3070_v9  ;;  %v3072_v16 = vrot.slane %v3070_v9, 4  ;;  %v14452_v38 = vsel %vm13524_vm7, %v10868_v46, %v3077_v49 }
  0xeb   : > { %12495 = vmatmul.mubr.msk.bf16.gmra.mxu0 %vm872_vm3, %v14273_v34  ;;  %v3084_v37 = vrot.slane %v14165_v63, 5  ;;  %v10870_v9 = vrot.slane %v10854_v19, 9  ;;  %v14466_v49 = vsel %vm13524_vm7, %v3079_v31, %v3080_v18  ;;  %v10822_v63 = vcombine.low %v2615_v50, %v2625_v8  ;;  %v12961_v8 = vld [vmem:[%s13194_s26 + $0x20] sm:$0x1]  ;;  %v18227_v31 = vld [vmem:[#allocation15_spill] sm:$0xff] }
  0xec   : > { %12498 = vmatprep.mubr.msk.bf16.mxu0 %vm872_vm3, %v14275_v61  ;;  %v14456_v54 = vsel %vm13524_vm7, %v3072_v16, %v3073_v0  ;;  %v10840_v61 = vld [vmem:[%s13194_s26 + $0x18] sm:$0xe]  ;;  %v3091_v0 = vrot.slane %v14192_v3, 5  ;;  %v10872_v41 = vcombine.low %v2987_v2, %v2990_v23  ;;  %v2995_v5 = vrot.slane %v2993_v25, 4  ;;  %v14547_v2 = vld [vmem:[%s13194_s26 + $0x20] sm:$0x1] }
  0xed   : > { %v14485_v3 = vsel %vm13524_vm7, %v10869_v13, %v3084_v37  ;;  %v3086_v30 = vrot.slane %v3084_v37, 4  ;;  %v10856_v59 = vrot.slane %v10840_v61, 9  ;;  %v2996_v19 = vrot.slane %v12961_v8, 5  ;;  %v10969_v16 = vld [vmem:[%s13194_s26 + $0x18] sm:$0xf]  ;;  %v12823_v37 = vld [vmem:[%s13194_s26 + $0x30] sm:$0xff]  }
  0xee   : > { %v14501_v6 = vsel %vm13524_vm7, %v10870_v9, %v3091_v0  ;;  %v3093_v50 = vrot.slane %v3091_v0, 4  ;;  %v4750_v13 = vsel %vm921_vm0, %v18227_v31, 0  ;;  %v14535_v9 = vld [vmem:[%s13194_s26 + $0x1c] sm:$0xf]  ;;  %v3798_v62 = vshrl.u32 %v10969_v16, 16  ;;  %v18228_v0 = vld [vmem:[#allocation11_spill] sm:$0xff] }
  0xef   : > { %12461 = vmatmul.mubr.msk.bf16.gmra.mxu1 %vm872_vm3, %v12818_v28  ;;  %v14505_v32 = vsel %vm13524_vm7, %v3086_v30, %v3087_v56  ;;  %v2994_v24 = vsel %vm13524_vm7, %v10856_v59, %v2993_v25  ;;  %v2997_v18 = vsel %vm13524_vm7, %v2995_v5, %v2996_v19  ;;  %v3801_v61 = vshll.u32 %v10969_v16, 16  ;;  %v10972_v25 = vld [vmem:[%s13194_s26 + $0x24] sm:$0xf]  ;;  %v12824_v30 = vld [vmem:[%s13194_s26 + $0x3c] sm:$0xff]   ;;  %v11050_v16 = vld [vmem:[%s13194_s26 + $0x18] sm:$0xe] }
  0xf0   : > { %12464 = vmatprep.mubr.msk.bf16.mxu1 %vm872_vm3, %v12819_v33  ;;  %v14512_v47 = vsel %vm13524_vm7, %v3093_v50, %v3094_v21  ;;  %v12822_v33 = vld [vmem:[%s13194_s26 + $0x24] sm:$0xff]   ;;  %v10873_v56 = vcombine.low %v2994_v24, %v2997_v18  ;;  %v4280_v21 = vsel %vm921_vm0, %v18228_v0, 0  ;;  %v3807_v23 = vshll.u32 %v14535_v9, 16  ;;  %v10975_v24 = vld [vmem:[%s13194_s26 + $0x30] sm:$0xf] }
  0xf1   : > { %v12825_v50 = vld [vmem:[%s13194_s26 + $0x48] sm:$0xff]   ;;  %v3803_v59 = vrot.slane %v3801_v61, 5  ;;  %v3825_v5 = vshll.u32 %v10972_v25, 16  ;;  %v3846_v61 = vshrl.u32 %v10975_v24, 16 }
  0xf2   : > { %v14560_v18 = vrot.slane %v3807_v23, 5 }
  0xf3   : > { %12499 = vmatmul.mubr.msk.bf16.gmra.mxu0 %vm872_vm3, %v10822_v63  ;;  %v14543_v63 = vld [vmem:[%s13194_s26 + $0x28] sm:$0xf] }
  0xf4   : > { %12538 = vmatprep.mubr.msk.bf16.mxu0 %vm872_vm3, %v12821_v15  ;;  %v3811_v15 = vshrl.u32 %v14535_v9, 16  ;;  %v3831_v8 = vshll.u32 %v14543_v63, 16  ;;  %v3835_v19 = vshrl.u32 %v14543_v63, 16 }
  0xf6   : > { %v14575_v0 = vrot.slane %v3831_v8, 5  ;;  %v18229_v8 = vcombine.low %v14326_v40, %v14340_v42  ;;  %v14604_v40 = vld [vmem:[%s13194_s26 + $0x38] sm:$0x1]  ;;  %v14607_v42 = vld [vmem:[%s13194_s26 + $0x40] sm:$0xf] }
  0xf7   : > { %12465 = vmatmul.mubr.msk.bf16.gmra.mxu1 %vm872_vm3, %v12820_v27  ;;  %v3800_v27 = vrot.slane %v3798_v62, 4  ;;  %v3827_v62 = vrot.slane %v3825_v5, 5  ;;  %v3859_v5 = vshrl.u32 %v14569_v36, 16 }
  0xf8   : > { %12504 = vmatprep.mubr.msk.bf16.mxu1 %vm872_vm3, %v10872_v41  ;;  %v3822_v41 = vshrl.u32 %v10972_v25, 16  ;;  %v3849_v25 = vshll.u32 %v10975_v24, 16  ;;  %v3848_v24 = vrot.slane %v3846_v61, 4 }
  0xf9   : > { %v3804_v31 = vor.u32 %v3803_v59, %v3800_v27  ;;  %v3861_v61 = vrot.slane %v3859_v5, 4 }
  0xfb   : > { %12539 = vmatmul.mubr.msk.bf16.vlgmr.msra.gmra.mxu0 %vm872_vm3, %v12822_v33  ;;  %v3813_v33 = vrot.slane %v3811_v15, 4  ;;  %v11066_v15 = vrot.slane %v11050_v16, 9  ;;  %v14584_v27 = vrot.slane %v3804_v31, 4  ;;  %v10978_v16 = vld [vmem:[%s13194_s26 + $0x3c] sm:$0xf] }
  0xfc   : > { %12605 = vmatpush3.bf16.msra.mxu0 %v4750_v13  ;;  %12542 = vmatprep.mubr.msk.bf16.mxu0 %vm872_vm3, %v12823_v37  ;;  %v3817_v13 = vshll.u32 %v14547_v2, 16  ;;  %v4541_v37 = vrot.slane %v14535_v9, 5  ;;  %v12826_v9 = vld [vmem:[%s13194_s26 + $0x54] sm:$0xff]   ;;  %v3870_v46 = vshrl.u32 %v10978_v16, 16 }
  0xfd   : > { %v3814_v23 = vor.u32 %v3813_v33, %v14560_v18  ;;  %v3851_v33 = vrot.slane %v3849_v25, 5  ;;  %v10981_v25 = vld [vmem:[%s13194_s26 + $0x48] sm:$0xf] }
  0xfe   : > { %v4543_v59 = vrot.slane %v4541_v37, 4  ;;  %v3819_v14 = vrot.slane %v3817_v13, 5  ;;  %v3810_v13 = vsel %vm13232_vm4, %v14584_v27, %v14560_v18  ;;  %v3873_v18 = vshll.u32 %v10978_v16, 16  ;;  %v14662_v16 = vld [vmem:[%s13194_s26 + $0x4c] sm:$0xf] }
  0xff   : > { %12505 = vmatmul.mubr.msk.bf16.vlgmr.msra.gmra.mxu1 %vm872_vm3, %v10873_v56  ;;  %v3824_v56 = vrot.slane %v3822_v41, 4  ;;  %v3855_v41 = vshll.u32 %v14569_v36, 16  ;;  %v3815_v28 = vrot.slane %v3814_v23, 4  ;;  %v3852_v35 = vor.u32 %v3851_v33, %v3848_v24 }
 0x100   : > { %12571 = vmatpush3.bf16.msra.mxu1 %v4280_v21  ;;  %12508 = vmatprep.mubr.msk.bf16.mxu1 %vm872_vm3, %v10874_v44  ;;  %v14572_v44 = vpop.f32.mrf.mxu0  ;;  %v3837_v21 = vrot.slane %v3835_v19, 4  ;;  %v3841_v19 = vshll.u32 %v14566_v53, 16  ;;  %v3883_v27 = vshrl.u32 %v14607_v42, 16  ;;  %v3875_v10 = vrot.slane %v3873_v18, 5 }
 0x101   : > { %v3820_v34 = vsel %vm13232_vm4, %v3815_v28, %v3819_v14  ;;  %v3865_v14 = vshll.u32 %v14604_v40, 16  ;;  %v18233_v28 = vcombine.low %v14356_v4, %v14371_v58  ;;  %v3897_v4 = vshll.u32 %v10981_v25, 16  ;;  %v12829_v58 = vld [vmem:[%s13194_s26 + $0x78] sm:$0xff]  }
 0x102   : > { %v14598_v60 = vpop.f32.mrf.mxu0  ;;  %v3838_v31 = vor.u32 %v3837_v21, %v14575_v0  ;;  %v3843_v5 = vrot.slane %v3841_v19, 5 }
 0x103   : > { %12543 = vmatmul.mubr.msk.bf16.gmra.mxu0 %vm872_vm3, %v12824_v30  ;;  %v4544_v30 = vrot.slane %v14547_v2, 5  ;;  %v12827_v2 = vld [vmem:[%s13194_s26 + $0x60] sm:$0xff]  }
 0x104   : > { %12546 = vmatprep.mubr.msk.bf16.mxu0 %vm872_vm3, %v12825_v50  ;;  %v14587_v50 = vld [vmem:[%s13194_s26 + $0x24] sm:$0xe]  ;;  %v14596_v29 = vpop.f32.mrf.mxu1  ;;  %v14620_v23 = vpop.f32.mrf.mxu0 }
 0x105   : > { %18230 = vst [vmem:[#allocation13_spill] sm:$0xff] %v14596_v29  ;;  %v14676_v29 = vcombine.low %v3810_v13, %v3820_v34  ;;  %v3899_v13 = vrot.slane %v3897_v4, 5 }
 0x106   : > { %v14618_v21 = vpop.f32.mrf.mxu1  ;;  %v14653_v33 = vpop.f32.mrf.mxu0 }
 0x107   : > { %12509 = vmatmul.mubr.msk.bf16.gmra.mxu1 %vm872_vm3, %v10875_v7  ;;  %v3828_v7 = vor.u32 %v3827_v62, %v3824_v56  ;;  %v4548_v56 = vrot.slane %v14543_v63, 5  ;;  %v14614_v62 = vrot.slane %v3855_v41, 5  ;;  %18231 = vst [vmem:[#allocation12_spill] sm:$0xff] %v14618_v21  ;;  %v14632_v41 = vld [vmem:[%s13194_s26 + $0x44] sm:$0x1]  ;;  %18235 = vst [vmem:[#allocation14_spill] sm:$0xff] %v14653_v33 }
 0x108   : > { %12512 = vmatprep.mubr.msk.bf16.mxu1 %vm872_vm3, %v18229_v8  ;;  %v14611_v8 = vsel %vm13524_vm7, %v11066_v15, %v4541_v37  ;;  %v14628_v37 = vsel %vm13524_vm7, %v4543_v59, %v4544_v30  ;;  %v11067_v15 = vrot.slane %v14587_v50, 9  ;;  %v3879_v30 = vshll.u32 %v14607_v42, 16  ;;  %v12828_v50 = vld [vmem:[%s13194_s26 + $0x6c] sm:$0xff]   ;;  %v14651_v24 = vpop.f32.mrf.mxu1  ;;  %v14811_v33 = vld [vmem:[%s13194_s26 + $0x54] sm:$0xe] }
 0x109   : > { %v3829_v63 = vrot.slane %v3828_v7, 4  ;;  %v18232_v59 = vcombine.low %v14334_v17, %v14348_v55  ;;  %v4551_v7 = vrot.slane %v14566_v53, 5  ;;  %v3862_v19 = vor.u32 %v3861_v61, %v14614_v62  ;;  %18234 = vst [vmem:[#allocation16_spill] sm:$0xff] %v14651_v24  ;;  %v11052_v53 = vld [vmem:[%s13194_s26 + $0x30] sm:$0xe] }
 0x10a   : > { %v3889_v17 = vshll.u32 %v14632_v41, 16  ;;  %v14670_v24 = vrot.slane %v3879_v30, 5  ;;  %v14674_v21 = vld [vmem:[%s13194_s26 + $0x50] sm:$0x1]  ;;  %v14687_v18 = vpop.f32.mrf.mxu1 }
 0x10b   : > { %12547 = vmatmul.mubr.msk.bf16.gmra.mxu0 %vm872_vm3, %v12826_v9  ;;  %v3839_v9 = vrot.slane %v3838_v31, 4  ;;  %v3834_v55 = vsel %vm13232_vm4, %v3829_v63, %v14575_v0  ;;  %v3894_v31 = vshrl.u32 %v10981_v25, 16  ;;  %v3885_v0 = vrot.slane %v3883_v27, 4  ;;  %18236 = vst [vmem:[#allocation10_spill] sm:$0xff] %v14687_v18 }
 0x10c   : > { %12550 = vmatprep.mubr.msk.bf16.mxu0 %vm872_vm3, %v12827_v2  ;;  %v4550_v2 = vrot.slane %v4548_v56, 4  ;;  %v4555_v63 = vrot.slane %v14569_v36, 5  ;;  %v14680_v25 = vsel %vm13524_vm7, %v11067_v15, %v4548_v56  ;;  %v14698_v15 = vrot.slane %v3889_v17, 5  ;;  %v10987_v17 = vld [vmem:[%s13194_s26 + $0x60] sm:$0xf] }
 0x10d   : > { %v3844_v61 = vsel %vm13232_vm4, %v3839_v9, %v3843_v5  ;;  %v3863_v9 = vrot.slane %v3862_v19, 4  ;;  %v14684_v5 = vld [vmem:[%s13194_s26 + $0x58] sm:$0xf]  ;;  %v3896_v56 = vrot.slane %v3894_v31, 4  ;;  %v11068_v27 = vrot.slane %v11052_v53, 9 }
 0x10e   : > { %v14691_v30 = vcombine.low %v3834_v55, %v3844_v61  ;;  %v14695_v34 = vsel %vm13524_vm7, %v4550_v2, %v4551_v7  ;;  %v3907_v19 = vshrl.u32 %v14662_v16, 16  ;;  %v3886_v61 = vor.u32 %v3885_v0, %v14670_v24  ;;  %v11053_v7 = vld [vmem:[%s13194_s26 + $0x3c] sm:$0xe]  ;;  %v14728_v0 = vld [vmem:[%s13194_s26 + $0x5c] sm:$0x1] }
 0x10f   : > { %12513 = vmatmul.mubr.msk.bf16.gmra.mxu1 %vm872_vm3, %v18232_v59  ;;  %v14667_v59 = vrot.slane %v3852_v35, 4  ;;  %v3867_v35 = vrot.slane %v3865_v14, 5  ;;  %v12830_v14 = vld [vmem:[%s13194_s26 + $0x84] sm:$0xff]   ;;  %v4557_v18 = vrot.slane %v4555_v63, 4  ;;  %v4558_v2 = vrot.slane %v14604_v40, 5 }
 0x110   : > { %12516 = vmatprep.mubr.msk.bf16.mxu1 %vm872_vm3, %v18233_v28  ;;  %v3872_v28 = vrot.slane %v3870_v46, 4  ;;  %v10984_v46 = vld [vmem:[%s13194_s26 + $0x54] sm:$0xf]  ;;  %v18238_v31 = vcombine.low %v14361_v45, %v14382_v51  ;;  %v3913_v4 = vshll.u32 %v14674_v21, 16  ;;  %v18239_v40 = vcombine.low %v14386_v57, %v14398_v11 }
 0x111   : > { %v14689_v36 = vpop.f32.mrf.mxu0  ;;  %v3858_v53 = vsel %vm13232_vm4, %v14667_v59, %v14614_v62  ;;  %v12831_v45 = vld [vmem:[%s13194_s26 + $0x90] sm:$0xff]   ;;  %v3918_v62 = vshrl.u32 %v10984_v46, 16  ;;  %v3921_v59 = vshll.u32 %v10984_v46, 16  ;;  %v14735_v57 = vsel %vm13524_vm7, %v11068_v27, %v4555_v63  ;;  %v14745_v46 = vld [vmem:[%s13194_s26 + $0x64] sm:$0xf] }
 0x112   : > { %18237 = vst [vmem:[#allocation17_spill] sm:$0xff] %v14689_v36  ;;  %v3876_v55 = vor.u32 %v3875_v10, %v3872_v28  ;;  %v4562_v10 = vrot.slane %v14607_v42, 5  ;;  %v3900_v28 = vor.u32 %v3899_v13, %v3896_v56  ;;  %v3927_v42 = vshll.u32 %v14684_v5, 16  ;;  %v14742_v36 = vld [vmem:[%s13194_s26 + $0x48] sm:$0xe] }
 0x113   : > { %12551 = vmatmul.mubr.msk.bf16.gmra.mxu0 %vm872_vm3, %v12828_v50  ;;  %v3903_v50 = vshll.u32 %v14662_v16, 16  ;;  %v11069_v56 = vrot.slane %v11053_v7, 9  ;;  %v3931_v13 = vshrl.u32 %v14684_v5, 16  ;;  %v14752_v27 = vrot.slane %v3913_v4, 5  ;;  %v14769_v4 = vld [vmem:[%s13194_s26 + $0x68] sm:$0x1] }
 0x114   : > { %12554 = vmatprep.mubr.msk.bf16.mxu0 %vm872_vm3, %v12829_v58  ;;  %v14725_v58 = vpop.f32.mrf.mxu0  ;;  %v4564_v63 = vrot.slane %v4562_v10, 4  ;;  %v3923_v7 = vrot.slane %v3921_v59, 5  ;;  %v10990_v59 = vld [vmem:[%s13194_s26 + $0x6c] sm:$0xf] }
 0x115   : > { %18241 = vst [vmem:[#allocation20_spill] sm:$0xff] %v14725_v58  ;;  %v14737_v11 = vrot.slane %v3903_v50, 5  ;;  %v3887_v58 = vrot.slane %v3886_v61, 4  ;;  %v3920_v61 = vrot.slane %v3918_v62, 4 }
 0x116   : > { %v14723_v51 = vpop.f32.mrf.mxu1 }
 0x117   : > { %12517 = vmatmul.mubr.msk.bf16.gmra.mxu1 %vm872_vm3, %v18238_v31  ;;  %18240 = vst [vmem:[#allocation19_spill] sm:$0xff] %v14723_v51  ;;  %v3868_v31 = vsel %vm13232_vm4, %v3863_v9, %v3867_v35  ;;  %v3877_v51 = vrot.slane %v3876_v55, 4  ;;  %v14749_v9 = vsel %vm13524_vm7, %v4557_v18, %v4558_v2  ;;  %v4565_v35 = vrot.slane %v14632_v41, 5 }
 0x118   : > { %12520 = vmatprep.mubr.msk.bf16.mxu1 %vm872_vm3, %v18239_v40  ;;  %v3909_v40 = vrot.slane %v3907_v19, 4  ;;  %v14755_v50 = vpop.f32.mrf.mxu1  ;;  %v14757_v19 = vpop.f32.mrf.mxu0  ;;  %v14759_v55 = vrot.slane %v3900_v28, 4  ;;  %v14761_v18 = vrot.slane %v3927_v42, 5  ;;  %v14764_v2 = vcombine.low %v3858_v53, %v3868_v31  ;;  %v12833_v31 = vld [vmem:[%s13194_s26 + $0xa8] sm:$0xff]  }
 0x119   : > { %18242 = vst [vmem:[#allocation21_spill] sm:$0xff] %v14755_v50  ;;  %18243 = vst [vmem:[#allocation15_spill] sm:$0xff] %v14757_v19  ;;  %v3942_v50 = vshrl.u32 %v10987_v17, 16  ;;  %v12832_v19 = vld [vmem:[%s13194_s26 + $0x9c] sm:$0xff]   ;;  %v3882_v28 = vsel %vm13232_vm4, %v3877_v51, %v14670_v24  ;;  %v3892_v62 = vsel %vm13232_vm4, %v3887_v58, %v14698_v15  ;;  %v3945_v53 = vshll.u32 %v10987_v17, 16 }
 0x11a   : > { %v3910_v41 = vor.u32 %v3909_v40, %v14737_v11  ;;  %v18244_v42 = vcombine.low %v14392_v1, %v14408_v43  ;;  %v14788_v24 = vsel %vm13524_vm7, %v11069_v56, %v4562_v10  ;;  %v11070_v51 = vrot.slane %v14742_v36, 9  ;;  %v14793_v17 = vld [vmem:[%s13194_s26 + $0x70] sm:$0xf]  ;;  %v14799_v43 = vpop.f32.mrf.mxu1  ;;  %v14801_v58 = vpop.f32.mrf.mxu0 }
 0x11b   : > { %12555 = vmatmul.mubr.msk.bf16.gmra.mxu0 %vm872_vm3, %v12830_v14  ;;  %v3937_v14 = vshll.u32 %v14728_v0, 16  ;;  %v3951_v15 = vshll.u32 %v14745_v46, 16  ;;  %v18245_v1 = vcombine.low %v14416_v52, %v14428_v22  ;;  %18246 = vst [vmem:[#allocation11_spill] sm:$0xff] %v14799_v43  ;;  %18247 = vst [vmem:[#allocation22_spill] sm:$0xff] %v14801_v58  ;;  %v3924_v10 = vor.u32 %v3923_v7, %v3920_v61  ;;  %v14840_v22 = vld [vmem:[%s13194_s26 + $0x7c] sm:$0xf] }
 0x11c   : > { %12558 = vmatprep.mubr.msk.bf16.mxu0 %vm872_vm3, %v12831_v45  ;;  %v3933_v45 = vrot.slane %v3931_v13, 4  ;;  %v14805_v13 = vsel %vm13524_vm7, %v4564_v63, %v4565_v35  ;;  %v4569_v36 = vrot.slane %v14662_v16, 5  ;;  %v3955_v56 = vshrl.u32 %v14745_v46, 16  ;;  %v14827_v7 = vpop.f32.mrf.mxu1 }
 0x11d   : > { %18248 = vst [vmem:[#allocation23_spill] sm:$0xff] %v14805_v13  ;;  %v4572_v40 = vrot.slane %v14674_v21, 5  ;;  %v3944_v52 = vrot.slane %v3942_v50, 4  ;;  %v3947_v63 = vrot.slane %v3945_v53, 5  ;;  %v3961_v35 = vshll.u32 %v14769_v4, 16  ;;  %18250 = vst [vmem:[#allocation25_spill] sm:$0xff] %v14827_v7 }
 0x11e   : > { %v3934_v43 = vor.u32 %v3933_v45, %v14761_v18  ;;  %v3906_v21 = vsel %vm13232_vm4, %v14759_v55, %v14737_v11  ;;  %v14824_v61 = vrot.slane %v3951_v15, 5  ;;  %v3966_v50 = vshrl.u32 %v10990_v59, 16  ;;  %v10993_v11 = vld [vmem:[%s13194_s26 + $0x78] sm:$0xf] }
 0x11f   : > { %12521 = vmatmul.mubr.msk.bf16.gmra.mxu1 %vm872_vm3, %v18244_v42  ;;  %v3911_v42 = vrot.slane %v3910_v41, 4  ;;  %v3975_v45 = vshll.u32 %v14793_v17, 16  ;;  %v3979_v53 = vshrl.u32 %v14793_v17, 16  ;;  %v3925_v55 = vrot.slane %v3924_v10, 4  ;;  %v12834_v10 = vld [vmem:[%s13194_s26 + $0xb4] sm:$0xff]  }
 0x120   : > { %12524 = vmatprep.mubr.msk.bf16.mxu1 %vm872_vm3, %v18245_v1  ;;  %v14814_v1 = vcombine.low %v3882_v28, %v3892_v62  ;;  %v3957_v28 = vrot.slane %v3955_v56, 4  ;;  %v3969_v62 = vshll.u32 %v10990_v59, 16  ;;  %v3939_v15 = vrot.slane %v3937_v14, 5  ;;  %v14851_v14 = vld [vmem:[%s13194_s26 + $0x60] sm:$0xe] }
 0x121   : > { %v14829_v41 = vpop.f32.mrf.mxu0  ;;  %v4571_v16 = vrot.slane %v4569_v36, 4  ;;  %v3916_v59 = vsel %vm13232_vm4, %v3911_v42, %v14752_v27  ;;  %v3935_v56 = vrot.slane %v3934_v43, 4  ;;  %v11071_v7 = vrot.slane %v14811_v33, 9 }
 0x122   : > { %18249 = vst [vmem:[#allocation24_spill] sm:$0xff] %v14814_v1  ;;  %18251 = vst [vmem:[#allocation26_spill] sm:$0xff] %v14829_v41  ;;  %v4579_v41 = vrot.slane %v14728_v0, 5  ;;  %v3948_v1 = vor.u32 %v3947_v63, %v3944_v52  ;;  %v14860_v27 = vrot.slane %v3961_v35, 5  ;;  %v3968_v43 = vrot.slane %v3966_v50, 4 }
 0x123   : > { %12559 = vmatmul.mubr.msk.bf16.gmra.mxu0 %vm872_vm3, %v12832_v19  ;;  %v14837_v19 = vsel %vm13524_vm7, %v11070_v51, %v4569_v36  ;;  %v18252_v51 = vcombine.low %v14420_v39, %v14440_v48  ;;  %v18253_v36 = vrot.slane %v14684_v5, 5  ;;  %v18254_v33 = vcombine.low %v14444_v12, %v14456_v54  ;;  %v14868_v42 = vpop.f32.mrf.mxu0  ;;  %v12835_v39 = vld [vmem:[%s13194_s26 + $0xc0] sm:$0xff]  }
 0x124   : > { %12562 = vmatprep.mubr.msk.bf16.mxu0 %vm872_vm3, %v12833_v31  ;;  %v14848_v31 = vld [vmem:[%s13194_s26 + $0x74] sm:$0x1]  ;;  %v3958_v48 = vor.u32 %v3957_v28, %v14824_v61  ;;  %v14872_v13 = vrot.slane %v3975_v45, 5  ;;  %v3981_v52 = vrot.slane %v3979_v53, 4  ;;  %v14874_v63 = vcombine.low %v3906_v21, %v3916_v59 }
 0x125   : > { %v4578_v58 = vrot.slane %v18253_v36, 4  ;;  %v14878_v12 = vsel %vm13524_vm7, %v4571_v16, %v4572_v40  ;;  %v3990_v54 = vshrl.u32 %v10993_v11, 16  ;;  %v3993_v35 = vshll.u32 %v10993_v11, 16 }
 0x126   : > { %v3930_v50 = vsel %vm13232_vm4, %v3925_v55, %v14761_v18  ;;  %v3940_v28 = vsel %vm13232_vm4, %v3935_v56, %v3939_v15  ;;  %v4003_v45 = vshrl.u32 %v14840_v22, 16  ;;  %v14889_v53 = vrot.slane %v3948_v1, 4  ;;  %v11057_v18 = vld [vmem:[%s13194_s26 + $0x6c] sm:$0xe]  ;;  %v10996_v55 = vld [vmem:[%s13194_s26 + $0x84] sm:$0xf]  ;;  %v14897_v15 = vpop.f32.mrf.mxu0 }
 0x127   : > { %12525 = vmatmul.mubr.msk.bf16.gmra.mxu1 %vm872_vm3, %v18252_v51  ;;  %v14866_v0 = vpop.f32.mrf.mxu1  ;;  %v3971_v51 = vrot.slane %v3969_v62, 5  ;;  %v3999_v62 = vshll.u32 %v14840_v22, 16  ;;  %v3985_v40 = vshll.u32 %v14848_v31, 16  ;;  %v11072_v16 = vrot.slane %v14851_v14, 9  ;;  %v14905_v14 = vld [vmem:[%s13194_s26 + $0x80] sm:$0x1] }
 0x128   : > { %12528 = vmatprep.mubr.msk.bf16.mxu1 %vm872_vm3, %v18254_v33  ;;  %18255 = vst [vmem:[#allocation27_spill] sm:$0xff] %v14866_v0  ;;  %v4583_v11 = vrot.slane %v14745_v46, 5  ;;  %v14901_v56 = vrot.slane %v3958_v48, 4  ;;  %v4590_v36 = vrot.slane %v14793_v17, 5  ;;  %v18257_v46 = vrot.slane %v14684_v5, 5 }
 0x129   : > { %v14887_v21 = vpop.f32.mrf.mxu1  ;;  %v3972_v1 = vor.u32 %v3971_v51, %v3968_v43  ;;  %v3982_v33 = vor.u32 %v3981_v52, %v14872_v13  ;;  %v3995_v59 = vrot.slane %v3993_v35, 5  ;;  %v14916_v48 = vld [vmem:[%s13194_s26 + $0x88] sm:$0xf]  ;;  %v14918_v43 = vcombine.low %v3930_v50, %v3940_v28  ;;  %v14927_v5 = vld [vmem:[%s13194_s26 + $0x8c] sm:$0x1]  ;;  %v14941_v28 = vpop.f32.mrf.mxu0 }
 0x12a   : > { %18256 = vst [vmem:[#allocation28_spill] sm:$0xff] %v14887_v21  ;;  %v3992_v21 = vrot.slane %v3990_v54, 4  ;;  %v14922_v17 = vsel %vm13524_vm7, %v4578_v58, %v4579_v41  ;;  %v14924_v51 = vrot.slane %v3999_v62, 5  ;;  %v12836_v54 = vld [vmem:[%s13194_s26 + $0xcc] sm:$0xff]   ;;  %v3954_v35 = vsel %vm13232_vm4, %v14889_v53, %v14824_v61 }
 0x12b   : > { %12563 = vmatmul.mubr.msk.bf16.gmra.mxu0 %vm872_vm3, %v12834_v10  ;;  %v14912_v10 = vsel %vm13524_vm7, %v11071_v7, %v18257_v46  ;;  %v18258_v7 = vcombine.low %v14452_v38, %v14466_v49  ;;  %v14933_v52 = vpop.f32.mrf.mxu1  ;;  %v3987_v58 = vrot.slane %v3985_v40, 5  ;;  %v4585_v41 = vrot.slane %v4583_v11, 4 }
 0x12c   : > { %12566 = vmatprep.mubr.msk.bf16.mxu0 %vm872_vm3, %v12835_v39  ;;  %v4005_v39 = vrot.slane %v4003_v45, 4  ;;  %18259 = vst [vmem:[#allocation29_spill] sm:$0xff] %v14933_v52  ;;  %v4586_v50 = vrot.slane %v14769_v4, 5  ;;  %v18260_v38 = vcombine.low %v14485_v3, %v14505_v32  ;;  %v3973_v49 = vrot.slane %v3972_v1, 4  ;;  %v14953_v32 = vld [vmem:[%s13194_s26 + $0x78] sm:$0xe] }
 0x12d   : > { %v11073_v62 = vrot.slane %v11057_v18, 9  ;;  %v4014_v45 = vshrl.u32 %v10996_v55, 16  ;;  %v4017_v46 = vshll.u32 %v10996_v55, 16  ;;  %v4592_v52 = vrot.slane %v4590_v36, 4  ;;  %v14955_v18 = vpop.f32.mrf.mxu1  ;;  %v10999_v1 = vld [vmem:[%s13194_s26 + $0x90] sm:$0xf] }
 0x12e   : > { %v4593_v61 = vrot.slane %v14848_v31, 5  ;;  %v4009_v53 = vshll.u32 %v14905_v14, 16  ;;  %v3996_v40 = vor.u32 %v3995_v59, %v3992_v21  ;;  %v4006_v4 = vor.u32 %v4005_v39, %v14924_v51  ;;  %18261 = vst [vmem:[#allocation30_spill] sm:$0xff] %v14955_v18 }
 0x12f   : > { %12529 = vmatmul.mubr.msk.bf16.gmra.mxu1 %vm872_vm3, %v18258_v7  ;;  %v3983_v7 = vrot.slane %v3982_v33, 4  ;;  %v4023_v0 = vshll.u32 %v14916_v48, 16  ;;  %v4027_v3 = vshrl.u32 %v14916_v48, 16  ;;  %v3964_v55 = vsel %vm13232_vm4, %v14901_v56, %v14860_v27  ;;  %v14982_v56 = vld [vmem:[%s13194_s26 + $0x94] sm:$0xf] }
 0x130   : > { %12532 = vmatprep.mubr.msk.bf16.mxu1 %vm872_vm3, %v18260_v38  ;;  %v14963_v31 = vsel %vm13524_vm7, %v11072_v16, %v4583_v11  ;;  %v14967_v21 = vsel %vm13524_vm7, %v4585_v41, %v4586_v50  ;;  %v4033_v59 = vshll.u32 %v14927_v5, 16  ;;  %v3978_v39 = vsel %vm13232_vm4, %v3973_v49, %v14872_v13 }
 0x131   : > { %v14979_v27 = vsel %vm13524_vm7, %v11073_v62, %v4590_v36  ;;  %v4016_v16 = vrot.slane %v4014_v45, 4  ;;  %v4019_v11 = vrot.slane %v4017_v46, 5  ;;  %v18262_v41 = vcombine.low %v14611_v8, %v14628_v37 }
 0x132   : > { %v14992_v13 = vsel %vm13524_vm7, %v4592_v52, %v4593_v61  ;;  %v4011_v36 = vrot.slane %v4009_v53, 5  ;;  %v11074_v50 = vrot.slane %v14953_v32, 9  ;;  %v3997_v49 = vrot.slane %v3996_v40, 4  ;;  %v11002_v40 = vld [vmem:[%s13194_s26 + $0x9c] sm:$0xf] }
 0x133   : > { %v14971_v33 = vpop.f32.mrf.mxu0  ;;  %12567 = vmatmul.mubr.msk.bf16.gmra.mxu0 %vm872_vm3, %v12836_v54  ;;  %v3988_v54 = vsel %vm13232_vm4, %v3983_v7, %v3987_v58  ;;  %v4007_v62 = vrot.slane %v4006_v4, 4  ;;  %v14997_v45 = vrot.slane %v4023_v0, 5  ;;  %v4029_v8 = vrot.slane %v4027_v3, 4  ;;  %v11059_v7 = vld [vmem:[%s13194_s26 + $0x84] sm:$0xe] }
 0x134   : > { %12606 = vmatprep.mubr.msk.bf16.mxu0 %vm872_vm3, %v18262_v41  ;;  %v18264_v58 = vcombine.low %v14501_v6, %v14512_v47  ;;  %v15005_v52 = vrot.slane %v4033_v59, 5  ;;  %v4597_v46 = vrot.slane %v14840_v22, 5  ;;  %v4038_v61 = vshrl.u32 %v10999_v1, 16  ;;  %v15021_v22 = vld [vmem:[%s13194_s26 + $0x98] sm:$0x1] }
 0x135   : > { %v14995_v38 = vpop.f32.mrf.mxu0  ;;  %v4041_v53 = vshll.u32 %v10999_v1, 16  ;;  %v15016_v6 = vcombine.low %v3954_v35, %v3964_v55  ;;  %v4020_v3 = vor.u32 %v4019_v11, %v4016_v16  ;;  %v15025_v59 = vcombine.low %v3978_v39, %v3988_v54  ;;  %v15041_v54 = vld [vmem:[%s13194_s26 + $0xa0] sm:$0xf] }
 0x136   : > { %v4051_v41 = vshrl.u32 %v14982_v56, 16  ;;  %v4002_v55 = vsel %vm13232_vm4, %v3997_v49, %v14924_v51  ;;  %v4012_v16 = vsel %vm13232_vm4, %v4007_v62, %v4011_v36  ;;  %v4030_v39 = vor.u32 %v4029_v8, %v14997_v45  ;;  %v15053_v62 = vld [vmem:[%s13194_s26 + $0xa4] sm:$0x1] }
 0x137   : > { %v14999_v37 = vpop.f32.mrf.mxu1  ;;  %12533 = vmatmul.mubr.msk.bf16.gmra.mxu1 %vm872_vm3, %v18264_v58  ;;  %v15010_v4 = vpop.f32.mrf.mxu0  ;;  %v4600_v11 = vrot.slane %v14905_v14, 5  ;;  %v4599_v1 = vrot.slane %v4597_v46, 4  ;;  %v4604_v47 = vrot.slane %v14916_v48, 5  ;;  %v4040_v0 = vrot.slane %v4038_v61, 4 }
 0x138   : > { %18263 = vst [vmem:[#allocation31_spill] sm:$0xff] %v14999_v37  ;;  %12572 = vmatprep.mubr.msk.bf16.mxu1 %vm872_vm3, %v14676_v29  ;;  %v4047_v29 = vshll.u32 %v14982_v56, 16  ;;  %v4043_v18 = vrot.slane %v4041_v53, 5  ;;  %v18267_v51 = vcombine.low %v14680_v25, %v14695_v34  ;;  %v15050_v36 = vrot.slane %v4020_v3, 4 }
 0x139   : > { %v15023_v32 = vpop.f32.mrf.mxu1  ;;  %v15031_v35 = vpop.f32.mrf.mxu0  ;;  %v11075_v49 = vrot.slane %v11059_v7, 9  ;;  %v4062_v14 = vshrl.u32 %v11002_v40, 16  ;;  %v4065_v8 = vshll.u32 %v11002_v40, 16  ;;  %v18269_v48 = vcombine.low %v14735_v57, %v14749_v9 }
 0x13a   : > { %18265 = vst [vmem:[#allocation32_spill] sm:$0xff] %v15023_v32  ;;  %v15061_v61 = vrot.slane %v4047_v29, 5  ;;  %v4053_v25 = vrot.slane %v4051_v41, 4  ;;  %v4057_v34 = vshll.u32 %v15021_v22, 16  ;;  %v4071_v53 = vshll.u32 %v15041_v54, 16 }
 0x13b   : > { %v15043_v58 = vpop.f32.mrf.mxu1  ;;  %v12404_v32 = vpop.f32.mrf.mxu0  ;;  %12607 = vmatmul.mubr.msk.bf16.vlgmr.msra.gmra.mxu0 %vm872_vm3, %v18267_v51  ;;  %v15065_v3 = vcombine.low %v4002_v55, %v4012_v16  ;;  %v4031_v51 = vrot.slane %v4030_v39, 4  ;;  %v15069_v40 = vsel %vm13524_vm7, %v11074_v50, %v4597_v46  ;;  %v4607_v57 = vrot.slane %v14927_v5, 5  ;;  %v15080_v16 = vld [vmem:[%s13194_s26 + $0x90] sm:$0xe] }
 0x13c   : > { %18266 = vst [vmem:[#allocation33_spill] sm:$0xff] %v15043_v58  ;;  %12610 = vmatprep.mubr.msk.bf16.mxu0 %vm872_vm3, %v18269_v48  ;;  %v15076_v29 = vsel %vm13524_vm7, %v4599_v1, %v4600_v11  ;;  %v4606_v41 = vrot.slane %v4604_v47, 4  ;;  %v4044_v48 = vor.u32 %v4043_v18, %v4040_v0  ;;  %v4075_v55 = vshrl.u32 %v15041_v54, 16  ;;  %v11005_v1 = vld [vmem:[%s13194_s26 + $0xa8] sm:$0xf] }
 0x13d   : > { %v15055_v37 = vpop.f32.mrf.mxu1  ;;  %v1676_v7 = vpop.f32.mrf.mxu0  ;;  %v4064_v5 = vrot.slane %v4062_v14, 4  ;;  %v4067_v46 = vrot.slane %v4065_v8, 5  ;;  %v4054_v18 = vor.u32 %v4053_v25, %v15061_v61  ;;  %v15091_v0 = vrot.slane %v4057_v34, 5  ;;  %v15107_v14 = vld [vmem:[%s13194_s26 + $0xac] sm:$0xf] }
 0x13e   : > { %18268 = vst [vmem:[#allocation34_spill] sm:$0xff] %v15055_v37  ;;  %v15093_v37 = vrot.slane %v4071_v53, 5  ;;  %v4045_v25 = vrot.slane %v4044_v48, 4  ;;  %v4077_v34 = vrot.slane %v4075_v55, 4  ;;  %v4089_v48 = vshll.u32 %v11005_v1, 16 }
 0x13f   : > { %v12370_v9 = vpop.f32.mrf.mxu1  ;;  %12573 = vmatmul.mubr.msk.bf16.vlgmr.msra.gmra.mxu1 %vm872_vm3, %v14691_v30  ;;  %v12405_v50 = vpop.f32.mrf.mxu0  ;;  %v15087_v30 = vsel %vm13524_vm7, %v11075_v49, %v4604_v47  ;;  %v4026_v47 = vsel %vm13232_vm4, %v15050_v36, %v14997_v45  ;;  %v4036_v49 = vsel %vm13232_vm4, %v4031_v51, %v15005_v52  ;;  %v4068_v51 = vor.u32 %v4067_v46, %v4064_v5 }
 0x140   : > { %v1260_v39 = vadd.f32 %v12370_v9, %v14572_v44  ;;  %12576 = vmatprep.mubr.msk.bf16.mxu1 %vm872_vm3, %v14764_v2  ;;  %v4081_v44 = vshll.u32 %v15053_v62, 16  ;;  %v15135_v46 = vcombine.low %v4026_v47, %v4036_v49  ;;  %v4614_v49 = vrot.slane %v15021_v22, 5 }
 0x141   : > { %v1251_v11 = vpop.f32.mrf.mxu1  ;;  %v1679_v58 = vpop.f32.mrf.mxu0 }
 0x142   : > { %v15096_v9 = vadd.f32 %v12404_v32, %v1260_v39  ;;  %v1252_v2 = vadd.f32 %v1251_v11, %v14598_v60  ;;  %v15113_v60 = vsel %vm13524_vm7, %v4606_v41, %v4607_v57  ;;  %v18271_v39 = vld [vmem:[#allocation23_spill] sm:$0xff]  ;;  %v11076_v11 = vrot.slane %v15080_v16, 9  ;;  %v15124_v32 = vld [vmem:[%s13194_s26 + $0x9c] sm:$0xe] }
 0x143   : > { %v12371_v8 = vpop.f32.mrf.mxu1  ;;  %v12408_v36 = vpop.f32.mrf.mxu0  ;;  %v18272_v52 = vcombine.low %v14788_v24, %v18271_v39  ;;  %v18273_v57 = vcombine.low %v14837_v19, %v14878_v12  ;;  %v15130_v41 = vrot.slane %v4081_v44, 5  ;;  %v18275_v24 = vld [vmem:[#allocation14_spill] sm:$0xff]  ;;  %v18276_v39 = vld [vmem:[#allocation24_spill] sm:$0xff]  ;;  %v4078_v19 = vor.u32 %v4077_v34, %v15093_v37  ;;  %v18278_v44 = vld [vmem:[#allocation17_spill] sm:$0xff] }
 0x144   : > { %18270 = vst [vmem:[#allocation35_spill] sm:$0xff] %v15096_v9  ;;  %v15115_v53 = vadd.f32 %v1676_v7, %v1252_v2  ;;  %v1263_v45 = vadd.f32 %v12371_v8, %v14620_v23  ;;  %v4055_v7 = vrot.slane %v4054_v18, 4  ;;  %v4086_v23 = vshrl.u32 %v11005_v1, 16 }
 0x145   : > { %12611 = vmatmul.mubr.msk.bf16.gmra.mxu0 %vm872_vm3, %v18272_v52  ;;  %v1254_v9 = vpop.f32.mrf.mxu1  ;;  %v1692_v5 = vpop.f32.mrf.mxu0  ;;  %v4611_v12 = vrot.slane %v14982_v56, 5  ;;  %v4095_v1 = vshll.u32 %v15107_v14, 16  ;;  %v4050_v56 = vsel %vm13232_vm4, %v4045_v25, %v15061_v61  ;;  %v4069_v52 = vrot.slane %v4068_v51, 4 }
 0x146   : > { %12614 = vmatprep.mubr.msk.bf16.mxu0 %vm872_vm3, %v18273_v57  ;;  %v15132_v55 = vadd.f32 %v12405_v50, %v1263_v45  ;;  %v1255_v2 = vadd.f32 %v1254_v9, %v18275_v24  ;;  %v4099_v50 = vshrl.u32 %v15107_v14, 16  ;;  %v4618_v45 = vrot.slane %v15041_v54, 5 }
 0x147   : > { %v12374_v8 = vpop.f32.mrf.mxu1  ;;  %12577 = vmatmul.mubr.msk.bf16.gmra.mxu1 %vm872_vm3, %v18276_v39  ;;  %v12409_v47 = vpop.f32.mrf.mxu0  ;;  %v11077_v57 = vrot.slane %v15124_v32, 9  ;;  %v4091_v54 = vrot.slane %v4089_v48, 5  ;;  %v11008_v39 = vld [vmem:[%s13194_s26 + $0xb4] sm:$0xf]  ;;  %v4079_v16 = vrot.slane %v4078_v19, 4  ;;  %v15163_v61 = vrot.slane %v4095_v1, 5 }
 0x148   : > { %18274 = vst [vmem:[#allocation23_spill] sm:$0xff] %v15132_v55  ;;  %v15145_v18 = vadd.f32 %v1679_v58, %v1255_v2  ;;  %v1276_v9 = vadd.f32 %v12374_v8, %v18278_v44  ;;  %12580 = vmatprep.mubr.msk.bf16.mxu1 %vm872_vm3, %v14874_v63  ;;  %v4060_v58 = vsel %vm13232_vm4, %v4055_v7, %v15091_v0  ;;  %v18279_v2 = vld [vmem:[#allocation20_spill] sm:$0xff]  ;;  %v4088_v8 = vrot.slane %v4086_v23, 4  ;;  %v18280_v0 = vld [vmem:[#allocation15_spill] sm:$0xff] }
 0x149   : > { %v1267_v34 = vpop.f32.mrf.mxu1  ;;  %v1695_v22 = vpop.f32.mrf.mxu0  ;;  %v4101_v25 = vrot.slane %v4099_v50, 4  ;;  %v4620_v7 = vrot.slane %v4618_v45, 4  ;;  %v4621_v23 = vrot.slane %v15053_v62, 5  ;;  %v15174_v48 = vld [vmem:[%s13194_s26 + $0xb0] sm:$0x1]  ;;  %v18282_v1 = vcombine.low %v14963_v31, %v14967_v21 }
 0x14a   : > { %18277 = vst [vmem:[#allocation14_spill] sm:$0xff] %v15145_v18  ;;  %v15159_v24 = vadd.f32 %v12408_v36, %v1276_v9  ;;  %v1268_v63 = vadd.f32 %v1267_v34, %v18279_v2  ;;  %v4613_v18 = vrot.slane %v4611_v12, 4  ;;  %v18281_v36 = vcombine.low %v14912_v10, %v14922_v17  ;;  %v18283_v34 = vld [vmem:[#allocation22_spill] sm:$0xff]  ;;  %v15193_v21 = vld [vmem:[%s13194_s26 + $0xb8] sm:$0xf] }
 0x14b   : > { %v12375_v44 = vpop.f32.mrf.mxu1  ;;  %v12412_v32 = vpop.f32.mrf.mxu0  ;;  %v15184_v50 = vsel %vm13524_vm7, %v11076_v11, %v4611_v12  ;;  %v4110_v10 = vshrl.u32 %v11008_v39, 16  ;;  %v4113_v17 = vshll.u32 %v11008_v39, 16  ;;  %v4092_v31 = vor.u32 %v4091_v54, %v4088_v8 }
 0x14c   : > { %v15165_v55 = vadd.f32 %v1692_v5, %v1268_v63  ;;  %v1279_v51 = vadd.f32 %v12375_v44, %v18280_v0  ;;  %v15180_v5 = vcombine.low %v4050_v56, %v4060_v58  ;;  %v4074_v63 = vsel %vm13232_vm4, %v4069_v52, %v15093_v37  ;;  %v18284_v52 = vld [vmem:[#allocation26_spill] sm:$0xff] }
 0x14d   : > { %12615 = vmatmul.mubr.msk.bf16.gmra.mxu0 %vm872_vm3, %v18281_v36  ;;  %v1270_v19 = vpop.f32.mrf.mxu1  ;;  %v1708_v2 = vpop.f32.mrf.mxu0  ;;  %v15199_v11 = vsel %vm13524_vm7, %v4613_v18, %v4614_v49  ;;  %v15203_v12 = vsel %vm13524_vm7, %v11077_v57, %v4618_v45  ;;  %v4105_v37 = vshll.u32 %v15174_v48, 16  ;;  %v15217_v18 = vsel %vm13524_vm7, %v4620_v7, %v4621_v23  ;;  %v15220_v45 = vld [vmem:[%s13194_s26 + $0xbc] sm:$0x1] }
 0x14e   : > { %12618 = vmatprep.mubr.msk.bf16.mxu0 %vm872_vm3, %v18282_v1  ;;  %v15186_v9 = vadd.f32 %v12409_v47, %v1279_v51  ;;  %v1271_v62 = vadd.f32 %v1270_v19, %v18283_v34  ;;  %v4102_v47 = vor.u32 %v4101_v25, %v15163_v61  ;;  %v4112_v57 = vrot.slane %v4110_v10, 4 }
 0x14f   : > { %v12378_v56 = vpop.f32.mrf.mxu1  ;;  %12581 = vmatmul.mubr.msk.bf16.gmra.mxu1 %vm872_vm3, %v14918_v43  ;;  %v12413_v54 = vpop.f32.mrf.mxu0  ;;  %v4084_v43 = vsel %vm13232_vm4, %v4079_v16, %v15130_v41  ;;  %v4119_v39 = vshll.u32 %v15193_v21, 16  ;;  %v4123_v44 = vshrl.u32 %v15193_v21, 16  ;;  %v4093_v41 = vrot.slane %v4092_v31, 4  ;;  %v11062_v16 = vld [vmem:[%s13194_s26 + $0xa8] sm:$0xe] }
 0x150   : > { %v15207_v58 = vadd.f32 %v1695_v22, %v1271_v62  ;;  %v1292_v8 = vadd.f32 %v12378_v56, %v18284_v52  ;;  %12584 = vmatprep.mubr.msk.bf16.mxu1 %vm872_vm3, %v15016_v6  ;;  %v4115_v22 = vrot.slane %v4113_v17, 5  ;;  %v4625_v51 = vrot.slane %v15107_v14, 5  ;;  %v11011_v62 = vld [vmem:[%s13194_s26 + $0xc0] sm:$0xf] }
 0x151   : > { %v1283_v49 = vpop.f32.mrf.mxu1  ;;  %v1711_v0 = vpop.f32.mrf.mxu0  ;;  %v15229_v7 = vcombine.low %v4074_v63, %v4084_v43  ;;  %v11093_v23 = vcombine.low %v15184_v50, %v15199_v11  ;;  %v4103_v19 = vrot.slane %v4102_v47, 4  ;;  %v4107_v1 = vrot.slane %v4105_v37, 5 }
 0x152   : > { %v15224_v25 = vadd.f32 %v12412_v32, %v1292_v8  ;;  %v1284_v6 = vadd.f32 %v1283_v49, %v14868_v42  ;;  %v18285_v17 = vcombine.low %v14979_v27, %v14992_v13  ;;  %v11094_v14 = vcombine.low %v15203_v12, %v15217_v18  ;;  %v15251_v27 = vld [vmem:[%s13194_s26 + $0xc4] sm:$0xf] }
 0x153   : > { %v12379_v36 = vpop.f32.mrf.mxu1  ;;  %v12416_v42 = vpop.f32.mrf.mxu0  ;;  %v4129_v34 = vshll.u32 %v15220_v45, 16  ;;  %v18286_v63 = vcombine.low %v15069_v40, %v15076_v29  ;;  %v4125_v31 = vrot.slane %v4123_v44, 4  ;;  %v11078_v56 = vrot.slane %v11062_v16, 9 }
 0x154   : > { %v15233_v10 = vadd.f32 %v1708_v2, %v1284_v6  ;;  %v1295_v32 = vadd.f32 %v12379_v36, %v14897_v15  ;;  %v4116_v2 = vor.u32 %v4115_v22, %v4112_v57  ;;  %v15248_v15 = vrot.slane %v4119_v39, 5 }
 0x155   : > { %12619 = vmatmul.mubr.msk.bf16.gmra.mxu0 %vm872_vm3, %v18285_v17  ;;  %v1286_v50 = vpop.f32.mrf.mxu1  ;;  %v1724_v47 = vpop.f32.mrf.mxu0  ;;  %v4098_v37 = vsel %vm13232_vm4, %v4093_v41, %v15163_v61  ;;  %v4627_v40 = vrot.slane %v4625_v51, 4  ;;  %v4108_v52 = vsel %vm13232_vm4, %v4103_v19, %v4107_v1  ;;  %v4628_v8 = vrot.slane %v15174_v48, 5  ;;  %v11063_v61 = vld [vmem:[%s13194_s26 + $0xb4] sm:$0xe]  ;;  %v15288_v19 = vld [vmem:[%s13194_s26 + $0xc8] sm:$0x1] }
 0x156   : > { %12622 = vmatprep.mubr.msk.bf16.mxu0 %vm872_vm3, %v18286_v63  ;;  %v15253_v13 = vadd.f32 %v12413_v54, %v1295_v32  ;;  %v1287_v11 = vadd.f32 %v1286_v50, %v14941_v28  ;;  %v4134_v43 = vshrl.u32 %v11011_v62, 16  ;;  %v4137_v54 = vshll.u32 %v11011_v62, 16 }
 0x157   : > { %v12382_v29 = vpop.f32.mrf.mxu1  ;;  %12585 = vmatmul.mubr.msk.bf16.gmra.mxu1 %vm872_vm3, %v15025_v59  ;;  %v12417_v57 = vpop.f32.mrf.mxu0  ;;  %v4143_v22 = vshll.u32 %v15251_v27, 16  ;;  %v4147_v59 = vshrl.u32 %v15251_v27, 16  ;;  %v15272_v44 = vrot.slane %v4116_v2, 4  ;;  %v4126_v48 = vor.u32 %v4125_v31, %v15248_v15  ;;  %v11014_v2 = vld [vmem:[%s13194_s26 + $0xcc] sm:$0xf] }
 0x158   : > { %v15264_v49 = vadd.f32 %v1711_v0, %v1287_v11  ;;  %v1308_v28 = vadd.f32 %v12382_v29, %v14971_v33  ;;  %12588 = vmatprep.mubr.msk.bf16.mxu1 %vm872_vm3, %v15065_v3  ;;  %v15275_v6 = vrot.slane %v4129_v34, 5  ;;  %v4632_v0 = vrot.slane %v15193_v21, 5  ;;  %v15305_v31 = vld [vmem:[%s13194_s26 + $0xd0] sm:$0xf] }
 0x159   : > { %v1299_v39 = vpop.f32.mrf.mxu1  ;;  %v1727_v3 = vpop.f32.mrf.mxu0  ;;  %v15281_v16 = vcombine.low %v4098_v37, %v4108_v52  ;;  %v15285_v36 = vsel %vm13524_vm7, %v11078_v56, %v4625_v51  ;;  %v15292_v32 = vsel %vm13524_vm7, %v4627_v40, %v4628_v8  ;;  %v11079_v21 = vrot.slane %v11063_v61, 9  ;;  %v11064_v52 = vld [vmem:[%s13194_s26 + $0xc0] sm:$0xe]  ;;  %v18290_v61 = vld [vmem:[#allocation13_spill] sm:$0xff] }
 0x15a   : > { %18287 = vst [vmem:[#allocation24_spill] sm:$0xff] %v15264_v49  ;;  %v15278_v33 = vadd.f32 %v12416_v42, %v1308_v28  ;;  %v1300_v41 = vadd.f32 %v1299_v39, %v14995_v38  ;;  %v4136_v42 = vrot.slane %v4134_v43, 4  ;;  %v4139_v17 = vrot.slane %v4137_v54, 5 }
 0x15b   : > { %v12383_v1 = vpop.f32.mrf.mxu1  ;;  %v12420_v62 = vpop.f32.mrf.mxu0  ;;  %v18288_v50 = vcombine.low %v15087_v30, %v15113_v60  ;;  %v15301_v51 = vrot.slane %v4143_v22, 5  ;;  %v4149_v63 = vrot.slane %v4147_v59, 4  ;;  %v15308_v11 = vrot.slane %v4126_v48, 4 }
 0x15c   : > { %v15294_v38 = vadd.f32 %v1724_v47, %v1300_v41  ;;  %v1311_v34 = vadd.f32 %v12383_v1, %v15010_v4  ;;  %v4634_v47 = vrot.slane %v4632_v0, 4  ;;  %v4635_v4 = vrot.slane %v15220_v45, 5 }
 0x15d   : > { %12623 = vmatmul.mubr.msk.bf16.gmra.mxu0 %vm872_vm3, %v18288_v50  ;;  %v1302_v56 = vpop.f32.mrf.mxu1  ;;  %v4153_v37 = vshll.u32 %v15288_v19, 16  ;;  %v1740_v40 = vpop.f32.mrf.mxu0  ;;  %v11095_v29 = vcombine.low %v15285_v36, %v15292_v32  ;;  %v4639_v8 = vrot.slane %v15251_v27, 5  ;;  %v4158_v54 = vshrl.u32 %v11014_v2, 16 }
 0x15e   : > { %12626 = vmatprep.mubr.msk.bf16.mxu0 %vm872_vm3, %v11093_v23  ;;  %v15312_v30 = vadd.f32 %v12417_v57, %v1311_v34  ;;  %v1303_v60 = vadd.f32 %v1302_v56, %v15031_v35  ;;  %v4140_v23 = vor.u32 %v4139_v17, %v4136_v42  ;;  %v4161_v45 = vshll.u32 %v11014_v2, 16  ;;  %v18292_v56 = vld [vmem:[#allocation16_spill] sm:$0xff] }
 0x15f   : > { %v12386_v43 = vpop.f32.mrf.mxu1  ;;  %12589 = vmatmul.mubr.msk.bf16.gmra.mxu1 %vm872_vm3, %v15135_v46  ;;  %v4167_v28 = vshll.u32 %v15305_v31, 16  ;;  %v12421_v22 = vpop.f32.mrf.mxu0  ;;  %v4150_v59 = vor.u32 %v4149_v63, %v15301_v51  ;;  %v4171_v27 = vshrl.u32 %v15305_v31, 16  ;;  %v15331_v46 = vsel %vm13524_vm7, %v11079_v21, %v4632_v0 }
 0x160   : > { %v15322_v57 = vadd.f32 %v1727_v3, %v1303_v60  ;;  %v1324_v35 = vadd.f32 %v12386_v43, %v18290_v61  ;;  %12592 = vmatprep.mubr.msk.bf16.mxu1 %vm872_vm3, %v15180_v5  ;;  %v15335_v48 = vsel %vm13524_vm7, %v4634_v47, %v4635_v4  ;;  %v15337_v41 = vrot.slane %v4153_v37, 5  ;;  %v18291_v5 = vld [vmem:[#allocation12_spill] sm:$0xff] }
 0x161   : > { %v1315_v39 = vpop.f32.mrf.mxu1  ;;  %v11080_v3 = vrot.slane %v11064_v52, 9  ;;  %v15342_v32 = vpop.f32.mrf.mxu0  ;;  %v4641_v42 = vrot.slane %v4639_v8, 4  ;;  %v4642_v17 = vrot.slane %v15288_v19, 5  ;;  %v4141_v0 = vrot.slane %v4140_v23, 4  ;;  %v11016_v37 = vld [vmem:[%s13194_s26 + $0xd4] sm:$0x1] }
 0x162   : > { %18289 = vst [vmem:[#allocation17_spill] sm:$0xff] %v15322_v57  ;;  %v15339_v36 = vadd.f32 %v12420_v62, %v1324_v35  ;;  %v1316_v1 = vadd.f32 %v1315_v39, %v18291_v5  ;;  %v4160_v21 = vrot.slane %v4158_v54, 4  ;;  %v4163_v50 = vrot.slane %v4161_v45, 5  ;;  %v12837_v60 = vld [vmem:[#allocation3 + $0xf8] sm:$0xff]   ;;  %v18294_v5 = vld [vmem:[#allocation21_spill] sm:$0xff] }
 0x163   : > { %v12387_v34 = vpop.f32.mrf.mxu1  ;;  %v15345_v63 = vrot.slane %v4167_v28, 5  ;;  %v12424_v4 = vpop.f32.mrf.mxu0  ;;  %v4151_v62 = vrot.slane %v4150_v59, 4  ;;  %v4173_v19 = vrot.slane %v4171_v27, 4  ;;  %v12838_v52 = vld [vmem:[#allocation3 + $0xb8] sm:$0xff]   ;;  %v4646_v23 = vrot.slane %v15305_v31, 5  ;;  %11843 = vmatprep.subr.bf16.mxu1 %v12837_v60 }
 0x164   : > { %v15347_v2 = vadd.f32 %v1740_v40, %v1316_v1  ;;  %v1327_v47 = vadd.f32 %v12387_v34, %v18292_v56  ;;  %v4122_v40 = vsel %vm13232_vm4, %v15272_v44, %v15248_v15  ;;  %v4640_v54 = vsel %vm13524_vm7, %v11080_v3, %v4639_v8  ;;  %v11065_v28 = vld [vmem:[%s13194_s26 + $0xcc] sm:$0xe]  ;;  %11844 = vmatpush3.bf16.msra.mxu1 %v12838_v52  ;;  %v12840_v59 = vld [vmem:[#allocation3 + $0x38] sm:$0xff]  }
 0x165   : > { %12627 = vmatmul.mubr.msk.bf16.gmra.mxu0 %vm872_vm3, %v11094_v14  ;;  %v15355_v43 = vpop.f32.mrf.mxu1  ;;  %v1756_v18 = vpop.f32.mrf.mxu0  ;;  %v4132_v14 = vsel %vm13232_vm4, %v15308_v11, %v15275_v6  ;;  %v4643_v45 = vsel %vm13524_vm7, %v4641_v42, %v4642_v17  ;;  %v11096_v44 = vcombine.low %v15331_v46, %v15335_v48  ;;  %v4146_v31 = vsel %vm13232_vm4, %v4141_v0, %v15301_v51 }
 0x166   : > { %12630 = vmatprep.mubr.msk.bf16.mxu0 %vm872_vm3, %v11095_v29  ;;  %v15363_v12 = vadd.f32 %v12421_v22, %v1327_v47  ;;  %v4164_v6 = vor.u32 %v4163_v50, %v4160_v21  ;;  %v4177_v11 = vshll.u32 %v11016_v37, 16  ;;  %v18293_v29 = vld [vmem:[#allocation19_spill] sm:$0xff]  ;;  %v4156_v35 = vsel %vm13232_vm4, %v4151_v62, %v15337_v41  ;;  %v12839_v22 = vld [vmem:[#allocation3 + $0x78] sm:$0xff]  }
 0x167   : > { %v12390_v15 = vpop.f32.mrf.mxu1  ;;  %12593 = vmatmul.mubr.msk.bf16.gmra.mxu1 %vm872_vm3, %v15229_v7  ;;  %v12425_v61 = vpop.f32.mrf.mxu0  ;;  %v4174_v7 = vor.u32 %v4173_v19, %v15345_v63  ;;  %v11097_v39 = vcombine.low %v4640_v54, %v4643_v45  ;;  %v11081_v51 = vrot.slane %v11065_v28, 9  ;;  %v4648_v46 = vrot.slane %v4646_v23, 4  ;;  %11955 = vmatprep.subr.bf16.mxu0 %v12839_v22  ;;  %v18295_v21 = vld [vmem:[#allocation11_spill] sm:$0xff] }
 0x168   : > { %v1340_v8 = vadd.f32 %v12390_v15, %v18293_v29  ;;  %12596 = vmatprep.mubr.msk.bf16.mxu1 %vm872_vm3, %v15281_v16  ;;  %v4649_v48 = vrot.slane %v11016_v37, 5  ;;  %v11031_v17 = vcombine.low %v4122_v40, %v4132_v14  ;;  %v4165_v41 = vrot.slane %v4164_v6, 4  ;;  %11956 = vmatpush3.bf16.msra.mxu0 %v12840_v59  ;;  %v12841_v62 = vld [vmem:[#allocation3 + $0xf0] sm:$0xff]   ;;  %v18298_v59 = vld [vmem:[#allocation29_spill] sm:$0xff] }
 0x169   : > { %v1331_v27 = vpop.f32.mrf.mxu1  ;;  %v15391_v42 = vpop.f32.mrf.mxu0  ;;  %v4179_v34 = vrot.slane %v4177_v11, 5  ;;  %v11032_v47 = vcombine.low %v4146_v31, %v4156_v35  ;;  %v12842_v37 = vld [vmem:[#allocation3 + $0xb0] sm:$0xff]   ;;  %v4647_v60 = vsel %vm13524_vm7, %v11081_v51, %v4646_v23  ;;  %11845 = vmatprep.subr.bf16.mxu1 %v12841_v62  ;;  %v12845_v51 = vld [vmem:[#allocation3 + $0xe8] sm:$0xff]  }
 0x16a   : > { %v15388_v3 = vadd.f32 %v12424_v4, %v1340_v8  ;;  %v1332_v1 = vadd.f32 %v1331_v27, %v18294_v5  ;;  %v4175_v4 = vrot.slane %v4174_v7, 4  ;;  %v4650_v52 = vsel %vm13524_vm7, %v4648_v46, %v4649_v48  ;;  %v18296_v45 = vld [vmem:[#allocation27_spill] sm:$0xff]  ;;  %11846 = vmatpush3.bf16.msra.mxu1 %v12842_v37  ;;  %v18297_v8 = vld [vmem:[#allocation28_spill] sm:$0xff]  ;;  %v12846_v46 = vld [vmem:[#allocation3 + $0xa8] sm:$0xff]  }
 0x16b   : > { %v12391_v16 = vpop.f32.mrf.mxu1  ;;  %v12428_v56 = vpop.f32.mrf.mxu0  ;;  %v4170_v54 = vsel %vm13232_vm4, %v4165_v41, %v15345_v63  ;;  %v12843_v31 = vld [vmem:[#allocation3 + $0x70] sm:$0xff]   ;;  %11847 = vmatprep.subr.bf16.mxu1 %v12845_v51 }
 0x16c   : > { %v15393_v0 = vadd.f32 %v1756_v18, %v1332_v1  ;;  %v1343_v50 = vadd.f32 %v12391_v16, %v18295_v21  ;;  %v4180_v23 = vsel %vm13232_vm4, %v4175_v4, %v4179_v34  ;;  %v12844_v6 = vld [vmem:[#allocation3 + $0x30] sm:$0xff]   ;;  %11957 = vmatprep.subr.bf16.mxu0 %v12843_v31  ;;  %v12847_v21 = vld [vmem:[#allocation3 + $0x68] sm:$0xff]   ;;  %v18300_v4 = vld [vmem:[#allocation32_spill] sm:$0xff] }
 0x16d   : > { %12631 = vmatmul.mubr.msk.bf16.gmra.mxu0 %vm872_vm3, %v11096_v44  ;;  %v15397_v19 = vpop.f32.mrf.mxu1  ;;  %v1772_v18 = vpop.f32.mrf.mxu0  ;;  %v11098_v44 = vcombine.low %v4647_v60, %v4650_v52  ;;  %v11033_v7 = vcombine.low %v4170_v54, %v4180_v23 }
 0x16e   : > { %12634 = vmatprep.mubr.msk.bf16.mxu0 %vm872_vm3, %v11097_v39  ;;  %v15404_v40 = vadd.f32 %v12425_v61, %v1343_v50  ;;  %11958 = vmatpush3.bf16.msra.mxu0 %v12844_v6  ;;  %v12848_v50 = vld [vmem:[#allocation3 + $0x28] sm:$0xff]   ;;  %v18302_v6 = vld [vmem:[#allocation35_spill] sm:$0xff] }
 0x16f   : > { %v12394_v14 = vpop.f32.mrf.mxu1  ;;  %12597 = vmatmul.mubr.msk.bf16.gmra.mxu1 %vm872_vm3, %v11031_v17  ;;  %v12429_v15 = vpop.f32.mrf.mxu0  ;;  %v18299_v17 = vld [vmem:[#allocation31_spill] sm:$0xff]  ;;  %11959 = vmatprep.subr.bf16.mxu0 %v12847_v21 }
 0x170   : > { %v1356_v28 = vadd.f32 %v12394_v14, %v18296_v45  ;;  %12600 = vmatprep.mubr.msk.bf16.mxu1 %vm872_vm3, %v11032_v47  ;;  %11848 = vmatpush3.bf16.msra.mxu1 %v12846_v46  ;;  %v12849_v45 = vld [vmem:[#allocation3 + $0xe0] sm:$0xff]  }
 0x171   : > { %v1347_v11 = vpop.f32.mrf.mxu1  ;;  %v15417_v35 = vpop.f32.mrf.mxu0  ;;  %11849 = vmatprep.subr.bf16.mxu1 %v12849_v45 }
 0x172   : > { %v15414_v29 = vadd.f32 %v12428_v56, %v1356_v28  ;;  %v1348_v61 = vadd.f32 %v1347_v11, %v18297_v8  ;;  %11960 = vmatpush3.bf16.msra.mxu0 %v12848_v50  ;;  %v12850_v28 = vld [vmem:[#allocation3 + $0xa0] sm:$0xff]  }
 0x173   : > { %v12395_v63 = vpop.f32.mrf.mxu1  ;;  %v12432_v39 = vpop.f32.mrf.mxu0 }
 0x174   : > { %v15419_v22 = vadd.f32 %v1772_v18, %v1348_v61  ;;  %v1359_v27 = vadd.f32 %v12395_v63, %v18298_v59  ;;  %v18301_v18 = vld [vmem:[#allocation33_spill] sm:$0xff]  ;;  %11850 = vmatpush3.bf16.msra.mxu1 %v12850_v28 }
 0x175   : > { %12635 = vmatmul.mubr.msk.bf16.gmra.mxu0 %vm872_vm3, %v11098_v44  ;;  %v15423_v48 = vpop.f32.mrf.mxu1  ;;  %v1788_v1 = vpop.f32.mrf.mxu0  ;;  %v12851_v61 = vld [vmem:[#allocation3 + $0x60] sm:$0xff]  }
 0x176   : > { %v15425_v5 = vadd.f32 %v12429_v15, %v1359_v27  ;;  %v12852_v63 = vld [vmem:[#allocation3 + $0x20] sm:$0xff]   ;;  %11961 = vmatprep.subr.bf16.mxu0 %v12851_v61 }
 0x177   : > { %v12398_v16 = vpop.f32.mrf.mxu1  ;;  %12601 = vmatmul.mubr.msk.bf16.gmra.mxu1 %vm872_vm3, %v11033_v7  ;;  %v12433_v34 = vpop.f32.mrf.mxu0  ;;  %v282_v27 = vld [vmem:[#allocation2 + $0x18] sm:$0x1]  ;;  %11962 = vmatpush3.bf16.msra.mxu0 %v12852_v63 }
 0x178   : > { %v1372_v41 = vadd.f32 %v12398_v16, %v18299_v17 }
 0x179   : > { %v1363_v56 = vpop.f32.mrf.mxu1  ;;  %v15432_v37 = vpop.f32.mrf.mxu0 }
 0x17a   : > { %v15429_v47 = vadd.f32 %v12432_v39, %v1372_v41  ;;  %v1364_v62 = vadd.f32 %v1363_v56, %v18300_v4  ;;  %v18306_v41 = vld [vmem:[#allocation23_spill] sm:$0xff] }
 0x17b   : > { %v12399_v60 = vpop.f32.mrf.mxu1  ;;  %v12472_v54 = vpop.f32.mrf.mxu0 }
 0x17c   : > { %v15434_v52 = vadd.f32 %v1788_v1, %v1364_v62  ;;  %v1375_v14 = vadd.f32 %v12399_v60, %v18301_v18  ;;  %v283_v1 = vsel %vm15444_vm10, 0, %v282_v27  ;;  %v335_v27 = vld [vmem:[#allocation2 + $0x14] sm:$0x1] }
 0x17d   : > { %v15437_v15 = vpop.f32.mrf.mxu1  ;;  %v2761_v44 = vpop.f32.mrf.mxu0  ;;  %284 = vst [vmem:[#allocation2 + $0x18] sm:$0x1] %v283_v1  ;;  %v336_v1 = vsel %vm15465_vm12, 0, %v335_v27 }
 0x17e   : > { %v15439_v23 = vadd.f32 %v12433_v34, %v1375_v14  ;;  %v279_v14 = vld [vmem:[#allocation2 + $0xc] sm:$0x1]  ;;  %337 = vst [vmem:[#allocation2 + $0x14] sm:$0x1] %v336_v1 }
 0x17f   : > { %v12438_v31 = vpop.f32.mrf.mxu1  ;;  %v12473_v8 = vpop.f32.mrf.mxu0  ;;  %v280_v45 = vsel %vm15444_vm10, 0, %v279_v14 }
 0x180   : > { %v2164_v11 = vadd.f32 %v12438_v31, %v18302_v6  ;;  %281 = vst [vmem:[#allocation2 + $0xc] sm:$0x1] %v280_v45  ;;  %v285_v45 = vld [vmem:[#allocation2 + $0x24] sm:$0x1] }
 0x181   : > { %v2035_v7 = vpop.f32.mrf.mxu1  ;;  %v15451_v46 = vpop.f32.mrf.mxu0 }
 0x182   : > { %v15448_v39 = vadd.f32 %v12472_v54, %v2164_v11  ;;  %v2162_v51 = vadd.f32 %v2035_v7, %v15115_v53 }
 0x183   : > { %v12439_v16 = vpop.f32.mrf.mxu1  ;;  %v12476_v21 = vpop.f32.mrf.mxu0 }
 0x184   : > { %v15455_v17 = vadd.f32 %v2761_v44, %v2162_v51  ;;  %v2165_v34 = vadd.f32 %v12439_v16, %v18306_v41  ;;  %v12855_v16 = vld [vmem:[#allocation3 + $0x58] sm:$0xff]   ;;  %v13084_v41 = vmov 0  }
 0x185   : > { %v15458_v50 = vpop.f32.mrf.mxu1  ;;  %v2777_v53 = vpop.f32.mrf.mxu0  ;;  %266 = vst [vmem:[#allocation2] sm:$0xf] %v13084_v41  ;;  %267 = vst [vmem:[#allocation2 + $0x4] sm:$0xf] %v13084_v41  ;;  %11963 = vmatprep.subr.bf16.mxu0 %v12855_v16  ;;  %v12857_v16 = vld [vmem:[#allocation3 + $0xd0] sm:$0xff]  }
 0x186   : > { %18305 = vst [vmem:[#allocation20_spill] sm:$0xff] %v15455_v17  ;;  %v15460_v56 = vadd.f32 %v12473_v8, %v2165_v34  ;;  %268 = vst [vmem:[#allocation2 + $0x8] sm:$0xf] %v13084_v41  ;;  %v12853_v34 = vld [vmem:[#allocation3 + $0xd8] sm:$0xff]  }
 0x187   : > { %v12442_v4 = vpop.f32.mrf.mxu1  ;;  %v12477_v60 = vpop.f32.mrf.mxu0  ;;  %270 = vst [vmem:[#allocation2 + $0xcc] sm:$0xf] %v13084_v41  ;;  %271 = vst [vmem:[#allocation2 + $0xd0] sm:$0xf] %v13084_v41  ;;  %11851 = vmatprep.subr.bf16.mxu1 %v12853_v34 }
 0x188   : > { %18307 = vst [vmem:[#allocation15_spill] sm:$0xff] %v15460_v56  ;;  %v2168_v62 = vadd.f32 %v12442_v4, %v15159_v24  ;;  %v338_v24 = vld [vmem:[#allocation2 + $0x20] sm:$0x1]  ;;  %272 = vst [vmem:[#allocation2 + $0xd4] sm:$0xf] %v13084_v41 }
 0x189   : > { %v2051_v54 = vpop.f32.mrf.mxu1  ;;  %v15474_v31 = vpop.f32.mrf.mxu0  ;;  %v339_v11 = vsel %vm15465_vm12, 0, %v338_v24 }
 0x18a   : > { %v15471_v28 = vadd.f32 %v12476_v21, %v2168_v62  ;;  %v2166_v44 = vadd.f32 %v2051_v54, %v15165_v55  ;;  %18311 = vst [vmem:[#allocation26_spill] sm:$0xff] %v15474_v31  ;;  %340 = vst [vmem:[#allocation2 + $0x20] sm:$0x1] %v339_v11  ;;  %v12856_v21 = vld [vmem:[#allocation3 + $0x18] sm:$0xff]   ;;  %v347_v31 = vld [vmem:[#allocation2 + $0x44] sm:$0x1] }
 0x18b   : > { %v12443_v6 = vpop.f32.mrf.mxu1  ;;  %v12480_v63 = vpop.f32.mrf.mxu0  ;;  %v12854_v62 = vld [vmem:[#allocation3 + $0x98] sm:$0xff]   ;;  %11964 = vmatpush3.bf16.msra.mxu0 %v12856_v21  ;;  %v344_v21 = vld [vmem:[#allocation2 + $0x38] sm:$0x1] }
 0x18c   : > { %18310 = vst [vmem:[#allocation22_spill] sm:$0xff] %v15471_v28  ;;  %v15478_v8 = vadd.f32 %v2777_v53, %v2166_v44  ;;  %v2169_v61 = vadd.f32 %v12443_v6, %v15186_v9  ;;  %11852 = vmatpush3.bf16.msra.mxu1 %v12854_v62 }
 0x18d   : > { %v15481_v7 = vpop.f32.mrf.mxu1  ;;  %v2793_v55 = vpop.f32.mrf.mxu0  ;;  %11853 = vmatprep.subr.bf16.mxu1 %v12857_v16 }
 0x18e   : > { %18312 = vst [vmem:[#allocation13_spill] sm:$0xff] %v15478_v8  ;;  %v15483_v51 = vadd.f32 %v12477_v60, %v2169_v61  ;;  %v288_v60 = vld [vmem:[#allocation2 + $0x30] sm:$0x1] }
 0x18f   : > { %v12446_v9 = vpop.f32.mrf.mxu1  ;;  %v12481_v4 = vpop.f32.mrf.mxu0  ;;  %v289_v54 = vsel %vm15444_vm10, 0, %v288_v60 }
 0x190   : > { %v2172_v53 = vadd.f32 %v12446_v9, %v15224_v25  ;;  %290 = vst [vmem:[#allocation2 + $0x30] sm:$0x1] %v289_v54  ;;  %v286_v25 = vsel %vm15444_vm10, 0, %v285_v45  ;;  %v276_v9 = vld [vmem:[#allocation2] sm:$0x1]  ;;  %v12860_v54 = vld [vmem:[#allocation3 + $0x10] sm:$0xff]  }
 0x191   : > { %v2067_v14 = vpop.f32.mrf.mxu1  ;;  %v15493_v6 = vpop.f32.mrf.mxu0  ;;  %287 = vst [vmem:[#allocation2 + $0x24] sm:$0x1] %v286_v25  ;;  %v332_v45 = vld [vmem:[#allocation2 + $0x8] sm:$0x1] }
 0x192   : > { %v15490_v44 = vadd.f32 %v12480_v63, %v2172_v53  ;;  %v2170_v24 = vadd.f32 %v2067_v14, %v15233_v10  ;;  %18313 = vst [vmem:[#allocation12_spill] sm:$0xff] %v15493_v6  ;;  %v12858_v63 = vld [vmem:[#allocation3 + $0x90] sm:$0xff]   ;;  %v277_v53 = vsel %vm15444_vm10, 0, %v276_v9  ;;  %v333_v16 = vsel %vm15465_vm12, 0, %v332_v45 }
 0x193   : > { %v12447_v11 = vpop.f32.mrf.mxu1  ;;  %v12484_v1 = vpop.f32.mrf.mxu0  ;;  %11854 = vmatpush3.bf16.msra.mxu1 %v12858_v63  ;;  %278 = vst [vmem:[#allocation2] sm:$0x1] %v277_v53  ;;  %334 = vst [vmem:[#allocation2 + $0x8] sm:$0x1] %v333_v16  ;;  %v294_v53 = vld [vmem:[#allocation2 + $0x48] sm:$0x1] }
 0x194   : > { %v15497_v61 = vadd.f32 %v2793_v55, %v2170_v24  ;;  %v2173_v27 = vadd.f32 %v12447_v11, %v15253_v13  ;;  %v345_v55 = vsel %vm15465_vm12, 0, %v344_v21  ;;  %v12859_v13 = vld [vmem:[#allocation3 + $0x50] sm:$0xff]  }
 0x195   : > { %v15500_v41 = vpop.f32.mrf.mxu1  ;;  %v2809_v34 = vpop.f32.mrf.mxu0  ;;  %346 = vst [vmem:[#allocation2 + $0x38] sm:$0x1] %v345_v55  ;;  %11965 = vmatprep.subr.bf16.mxu0 %v12859_v13  ;;  %v12863_v55 = vld [vmem:[#allocation3 + $0x48] sm:$0xff]  }
 0x196   : > { %18314 = vst [vmem:[#allocation16_spill] sm:$0xff] %v15500_v41  ;;  %v15502_v10 = vadd.f32 %v12481_v4, %v2173_v27  ;;  %11966 = vmatpush3.bf16.msra.mxu0 %v12860_v54  ;;  %v341_v27 = vld [vmem:[#allocation2 + $0x2c] sm:$0x1]  ;;  %v12861_v54 = vld [vmem:[#allocation3 + $0xc8] sm:$0xff]  }
 0x197   : > { %v12450_v62 = vpop.f32.mrf.mxu1  ;;  %v12485_v14 = vpop.f32.mrf.mxu0  ;;  %11967 = vmatprep.subr.bf16.mxu0 %v12863_v55  ;;  %11855 = vmatprep.subr.bf16.mxu1 %v12861_v54 }
 0x198   : > { %v2176_v60 = vadd.f32 %v12450_v62, %v15278_v33  ;;  %v342_v33 = vsel %vm15465_vm12, 0, %v341_v27  ;;  %v295_v62 = vsel %vm15444_vm10, 0, %v294_v53  ;;  %v15529_v27 = vld [vmem:[#allocation2 + $0x4] sm:$0xf] }
 0x199   : > { %v2083_v4 = vpop.f32.mrf.mxu1  ;;  %v15512_v11 = vpop.f32.mrf.mxu0  ;;  %343 = vst [vmem:[#allocation2 + $0x2c] sm:$0x1] %v342_v33  ;;  %296 = vst [vmem:[#allocation2 + $0x48] sm:$0x1] %v295_v62  ;;  %v350_v62 = vld [vmem:[#allocation2 + $0x50] sm:$0x1] }
 0x19a   : > { %v15509_v24 = vadd.f32 %v12484_v1, %v2176_v60  ;;  %v2174_v25 = vadd.f32 %v2083_v4, %v15294_v38  ;;  %18315 = vst [vmem:[#allocation19_spill] sm:$0xff] %v15512_v11  ;;  %v12864_v4 = vld [vmem:[#allocation3 + $0x8] sm:$0xff]   ;;  %v5607_v55 = vshll.u32 %v15529_v27, 16  ;;  %v351_v54 = vsel %vm15465_vm12, 0, %v350_v62  ;;  %v12866_v62 = vld [vmem:[#allocation3 + $0x80] sm:$0xff]  }
 0x19b   : > { %v12451_v63 = vpop.f32.mrf.mxu1  ;;  %v12488_v1 = vpop.f32.mrf.mxu0  ;;  %v15527_v45 = vld [vmem:[#allocation2] sm:$0xf]  ;;  %11968 = vmatpush3.bf16.msra.mxu0 %v12864_v4  ;;  %352 = vst [vmem:[#allocation2 + $0x50] sm:$0x1] %v351_v54 }
 0x19c   : > { %v15518_v9 = vadd.f32 %v2809_v34, %v2174_v25  ;;  %v2177_v21 = vadd.f32 %v12451_v63, %v15312_v30  ;;  %v12862_v25 = vld [vmem:[#allocation3 + $0x88] sm:$0xff]   ;;  %v291_v30 = vld [vmem:[#allocation2 + $0x3c] sm:$0x1]  ;;  %v5598_v16 = vshrl.u32 %v15527_v45, 16  ;;  %v5609_v6 = vrot.slane %v5607_v55, 5 }
 0x19d   : > { %v15521_v38 = vpop.f32.mrf.mxu1  ;;  %v2825_v60 = vpop.f32.mrf.mxu0  ;;  %11856 = vmatpush3.bf16.msra.mxu1 %v12862_v25  ;;  %v5611_v25 = vshrl.u32 %v15529_v27, 16 }
 0x19e   : > { %18316 = vst [vmem:[#allocation21_spill] sm:$0xff] %v15521_v38  ;;  %v15525_v13 = vadd.f32 %v12485_v14, %v2177_v21  ;;  %v292_v14 = vsel %vm15444_vm10, 0, %v291_v30  ;;  %v5601_v21 = vshll.u32 %v15527_v45, 16  ;;  %v5600_v8 = vrot.slane %v5598_v16, 4 }
 0x19f   : > { %v12454_v34 = vpop.f32.mrf.mxu1  ;;  %v12489_v33 = vpop.f32.mrf.mxu0  ;;  %293 = vst [vmem:[#allocation2 + $0x3c] sm:$0x1] %v292_v14  ;;  %v5613_v54 = vrot.slane %v5611_v25, 4 }
 0x1a0   : > { %v2180_v63 = vadd.f32 %v12454_v34, %v15339_v36  ;;  %v5581_v34 = vld [vmem:[#allocation2 + $0x8] sm:$0x1]  ;;  %v5603_v4 = vrot.slane %v5601_v21, 5  ;;  %v348_v21 = vsel %vm15465_vm12, 0, %v347_v31 }
 0x1a1   : > { %v2099_v53 = vpop.f32.mrf.mxu1  ;;  %v15540_v36 = vpop.f32.mrf.mxu0  ;;  %v5617_v14 = vshll.u32 %v5581_v34, 16  ;;  %349 = vst [vmem:[#allocation2 + $0x44] sm:$0x1] %v348_v21  ;;  %v6173_v21 = vld [vmem:[#allocation2] sm:$0xe]  ;;  %v6226_v57 = vrot.slane %v5581_v34, 5 }
 0x1a2   : > { %v15537_v28 = vadd.f32 %v12488_v1, %v2180_v63  ;;  %v2178_v11 = vadd.f32 %v2099_v53, %v15347_v2  ;;  %18317 = vst [vmem:[#allocation11_spill] sm:$0xff] %v15540_v36  ;;  %v12865_v2 = vld [vmem:[#allocation3 + $0xc0] sm:$0xff]   ;;  %v5604_v36 = vor.u32 %v5603_v4, %v5600_v8  ;;  %v5614_v4 = vor.u32 %v5613_v54, %v5609_v6 }
 0x1a3   : > { %v12455_v30 = vpop.f32.mrf.mxu1  ;;  %v12492_v63 = vpop.f32.mrf.mxu0  ;;  %v12867_v53 = vld [vmem:[#allocation3 + $0x40] sm:$0xff]   ;;  %11857 = vmatprep.subr.bf16.mxu1 %v12865_v2  ;;  %v5619_v31 = vrot.slane %v5617_v14, 5  ;;  %v11180_v41 = vrot.slane %v6173_v21, 9 }
 0x1a4   : > { %v15545_v16 = vadd.f32 %v2825_v60, %v2178_v11  ;;  %v2181_v1 = vadd.f32 %v12455_v30, %v15363_v12  ;;  %v300_v11 = vld [vmem:[#allocation2 + $0x60] sm:$0x1]  ;;  %11969 = vmatprep.subr.bf16.mxu0 %v12867_v53  ;;  %v12868_v12 = vld [vmem:[#allocation3] sm:$0xff]   ;;  %v5605_v60 = vrot.slane %v5604_v36, 4  ;;  %v6223_v30 = vrot.slane %v15529_v27, 5  ;;  %11858 = vmatpush3.bf16.msra.mxu1 %v12866_v62 }
 0x1a5   : > { %v15548_v56 = vpop.f32.mrf.mxu1  ;;  %v2841_v17 = vpop.f32.mrf.mxu0  ;;  %v301_v8 = vsel %vm15444_vm10, 0, %v300_v11  ;;  %11970 = vmatpush3.bf16.msra.mxu0 %v12868_v12  ;;  %v297_v53 = vld [vmem:[#allocation2 + $0x54] sm:$0x1] }
 0x1a6   : > { %18318 = vst [vmem:[#allocation27_spill] sm:$0xff] %v15548_v56  ;;  %v15552_v55 = vadd.f32 %v12489_v33, %v2181_v1  ;;  %302 = vst [vmem:[#allocation2 + $0x60] sm:$0x1] %v301_v8  ;;  %v6225_v1 = vrot.slane %v6223_v30, 4  ;;  %v5610_v36 = vsel %vm13232_vm4, %v5605_v60, %v5609_v6  ;;  %v5615_v56 = vrot.slane %v5614_v4, 4 }
 0x1a7   : > { %v12458_v38 = vpop.f32.mrf.mxu1  ;;  %v12493_v33 = vpop.f32.mrf.mxu0  ;;  %v11148_v6 = vcombine.low %v15527_v45, %v15529_v27  ;;  %v356_v45 = vld [vmem:[#allocation2 + $0x68] sm:$0x1] }
 0x1a8   : > { %v2184_v25 = vadd.f32 %v12458_v38, %v15388_v3  ;;  %v298_v3 = vsel %vm15444_vm10, 0, %v297_v53  ;;  %v5620_v54 = vsel %vm13232_vm4, %v5615_v56, %v5619_v31  ;;  %v15573_v34 = vsel %vm13524_vm7, %v6225_v1, %v6226_v57 }
 0x1a9   : > { %v2115_v2 = vpop.f32.mrf.mxu1  ;;  %v15563_v14 = vpop.f32.mrf.mxu0  ;;  %299 = vst [vmem:[#allocation2 + $0x54] sm:$0x1] %v298_v3  ;;  %18319 = vst [vmem:[#allocation28_spill] sm:$0xff] %v15573_v34  ;;  %v11164_v60 = vcombine.low %v5610_v36, %v5620_v54  ;;  %v357_v4 = vsel %vm15465_vm12, 0, %v356_v45  ;;  %v303_v54 = vld [vmem:[#allocation2 + $0x6c] sm:$0x1] }
 0x1aa   : > { %v15560_v49 = vadd.f32 %v12492_v63, %v2184_v25  ;;  %v2182_v62 = vadd.f32 %v2115_v2, %v15393_v0  ;;  %v15577_v0 = vsel %vm13524_vm7, %v11180_v41, %v6223_v30  ;;  %358 = vst [vmem:[#allocation2 + $0x68] sm:$0x1] %v357_v4  ;;  %v353_v30 = vld [vmem:[#allocation2 + $0x5c] sm:$0x1]  ;;  %v306_v2 = vld [vmem:[#allocation2 + $0x78] sm:$0x1] }
 0x1ab   : > { %v12459_v38 = vpop.f32.mrf.mxu1  ;;  %18320 = vst [vmem:[#allocation29_spill] sm:$0xff] %v15577_v0  ;;  %v12496_v12 = vpop.f32.mrf.mxu0  ;;  %6943 = vmatprep.mubr.bf16.mxu0 %v11164_v60  ;;  %v354_v25 = vsel %vm15465_vm12, 0, %v353_v30  ;;  %v307_v36 = vsel %vm15444_vm10, 0, %v306_v2  ;;  %v362_v60 = vld [vmem:[#allocation2 + $0x80] sm:$0x1] }
 0x1ac   : > { %v15579_v63 = vadd.f32 %v2841_v17, %v2182_v62  ;;  %v2185_v11 = vadd.f32 %v12459_v38, %v15404_v40  ;;  %6944 = vmatmul.mubr.bf16.vlgmr.msra.gmra.mxu0 %v11148_v6  ;;  %355 = vst [vmem:[#allocation2 + $0x5c] sm:$0x1] %v354_v25  ;;  %308 = vst [vmem:[#allocation2 + $0x78] sm:$0x1] %v307_v36 }
 0x1ad   : > { %v15584_v8 = vpop.f32.mrf.mxu1  ;;  %v2857_v57 = vpop.f32.mrf.mxu0 }
 0x1ae   : > { %v15586_v27 = vadd.f32 %v12493_v33, %v2185_v11  ;;  %v304_v11 = vsel %vm15444_vm10, 0, %v303_v54  ;;  %v312_v54 = vld [vmem:[#allocation2 + $0x90] sm:$0x1] }
 0x1af   : > { %v12462_v41 = vpop.f32.mrf.mxu1  ;;  %v12497_v17 = vpop.f32.mrf.mxu0  ;;  %305 = vst [vmem:[#allocation2 + $0x6c] sm:$0x1] %v304_v11 }
 0x1b0   : > { %v2188_v40 = vadd.f32 %v12462_v41, %v15414_v29 }
 0x1b1   : > { %v2131_v31 = vpop.f32.mrf.mxu1  ;;  %v15596_v21 = vpop.f32.mrf.mxu0 }
 0x1b2   : > { %v15593_v1 = vadd.f32 %v12496_v12, %v2188_v40  ;;  %v2186_v33 = vadd.f32 %v2131_v31, %v15419_v22 }
 0x1b3   : > { %v12463_v53 = vpop.f32.mrf.mxu1  ;;  %v12500_v3 = vpop.f32.mrf.mxu0 }
 0x1b4   : > { %v15600_v62 = vadd.f32 %v2857_v57, %v2186_v33  ;;  %v2189_v29 = vadd.f32 %v12463_v53, %v15425_v5  ;;  %v363_v5 = vsel %vm15465_vm12, 0, %v362_v60 }
 0x1b5   : > { %v15603_v38 = vpop.f32.mrf.mxu1  ;;  %v2873_v22 = vpop.f32.mrf.mxu0  ;;  %364 = vst [vmem:[#allocation2 + $0x80] sm:$0x1] %v363_v5  ;;  %v12875_v5 = vld [vmem:[#allocation3 + $0x1b8] sm:$0xff]  }
 0x1b6   : > { %v15605_v6 = vadd.f32 %v12497_v17, %v2189_v29 }
 0x1b7   : > { %v12466_v12 = vpop.f32.mrf.mxu1  ;;  %v12501_v57 = vpop.f32.mrf.mxu0 }
 0x1b8   : > { %v2192_v45 = vadd.f32 %v12466_v12, %v15429_v47  ;;  %v359_v47 = vld [vmem:[#allocation2 + $0x74] sm:$0x1] }
 0x1b9   : > { %v2147_v4 = vpop.f32.mrf.mxu1  ;;  %v15615_v17 = vpop.f32.mrf.mxu0  ;;  %v360_v53 = vsel %vm15465_vm12, 0, %v359_v47 }
 0x1ba   : > { %v15612_v41 = vadd.f32 %v12500_v3, %v2192_v45  ;;  %v2190_v40 = vadd.f32 %v2147_v4, %v15434_v52  ;;  %v12871_v52 = vld [vmem:[#allocation3 + $0x178] sm:$0xff]   ;;  %361 = vst [vmem:[#allocation2 + $0x74] sm:$0x1] %v360_v53 }
 0x1bb   : > { %v12467_v30 = vpop.f32.mrf.mxu1  ;;  %v15620_v33 = vpop.f32.mrf.mxu0  ;;  %12067 = vmatprep.subr.bf16.mxu1 %v12871_v52 }
 0x1bc   : > { %v15617_v31 = vadd.f32 %v2873_v22, %v2190_v40  ;;  %v2193_v25 = vadd.f32 %v12467_v30, %v15439_v23  ;;  %v313_v23 = vsel %vm15444_vm10, 0, %v312_v54 }
 0x1bd   : > { %v15622_v2 = vpop.f32.mrf.mxu1  ;;  %v15628_v29 = vpop.f32.mrf.mxu0  ;;  %314 = vst [vmem:[#allocation2 + $0x90] sm:$0x1] %v313_v23 }
 0x1be   : > { %v15626_v36 = vadd.f32 %v12501_v57, %v2193_v25  ;;  %v12874_v57 = vld [vmem:[#allocation3 + $0x1f8] sm:$0xff]  }
 0x1bf   : > { %v15630_v3 = vpop.f32.mrf.mxu1  ;;  %v15632_v22 = vpop.f32.mrf.mxu0  ;;  %12179 = vmatprep.subr.bf16.mxu0 %v12874_v57 }
 0x1c0   : > { %12180 = vmatpush3.bf16.msra.mxu0 %v12875_v5 }
 0x1c1   : > { %v15636_v11 = vpop.f32.mrf.mxu1  ;;  %v15638_v12 = vpop.f32.mrf.mxu0 }
 0x1c2   : > { %18321 = vst [vmem:[#allocation31_spill] sm:$0xff] %v15638_v12  ;;  %v368_v12 = vld [vmem:[#allocation2 + $0x98] sm:$0x1] }
 0x1c3   : > { %v15640_v60 = vpop.f32.mrf.mxu1  ;;  %v15642_v45 = vpop.f32.mrf.mxu0 }
 0x1c4   : > { %18322 = vst [vmem:[#allocation32_spill] sm:$0xff] %v15642_v45 }
 0x1c5   : > { %v15644_v4 = vpop.f32.mrf.mxu1  ;;  %v15646_v40 = vpop.f32.mrf.mxu0 }
 0x1c6   : > { %18323 = vst [vmem:[#allocation33_spill] sm:$0xff] %v15646_v40  ;;  %v309_v40 = vld [vmem:[#allocation2 + $0x84] sm:$0x1] }
 0x1c7   : > { %v15648_v30 = vpop.f32.mrf.mxu1  ;;  %v12545_v25 = vpop.f32.mrf.mxu0  ;;  %v310_v45 = vsel %vm15444_vm10, 0, %v309_v40 }
 0x1c8   : > { %311 = vst [vmem:[#allocation2 + $0x84] sm:$0x1] %v310_v45 }
 0x1c9   : > { %v15650_v47 = vpop.f32.mrf.mxu1  ;;  %v15652_v53 = vpop.f32.mrf.mxu0 }
 0x1ca   : > { %18324 = vst [vmem:[#allocation35_spill] sm:$0xff] %v15650_v47  ;;  %18325 = vst [vmem:[#allocation23_spill] sm:$0xff] %v15652_v53 }
 0x1cb   : > { %v12511_v52 = vpop.f32.mrf.mxu1  ;;  %v12548_v23 = vpop.f32.mrf.mxu0 }
 0x1cc   : > { %v3365_v54 = vadd.f32 %v12511_v52, %v15483_v51 }
 0x1cd   : > { %v15655_v56 = vpop.f32.mrf.mxu1  ;;  %v3622_v20 = vpop.f32.mrf.mxu0 }
 0x1ce   : > { %18326 = vst [vmem:[#allocation36_spill] sm:$0xff] %v15655_v56  ;;  %v15657_v26 = vadd.f32 %v12545_v25, %v3365_v54 }
 0x1cf   : > { %v12514_v34 = vpop.f32.mrf.mxu1  ;;  %v12549_v0 = vpop.f32.mrf.mxu0 }
 0x1d0   : > { %18327 = vst [vmem:[#allocation37_spill] sm:$0xff] %v15657_v26  ;;  %v3368_v57 = vadd.f32 %v12514_v34, %v15490_v44 }
 0x1d1   : > { %v3263_v5 = vpop.f32.mrf.mxu1  ;;  %v15665_v51 = vpop.f32.mrf.mxu0 }
 0x1d2   : > { %v15662_v47 = vadd.f32 %v12548_v23, %v3368_v57  ;;  %v3366_v53 = vadd.f32 %v3263_v5, %v15497_v61  ;;  %v369_v23 = vsel %vm15465_vm12, 0, %v368_v12  ;;  %v318_v12 = vld [vmem:[#allocation2 + $0xa8] sm:$0x1] }
 0x1d3   : > { %v12515_v52 = vpop.f32.mrf.mxu1  ;;  %v12552_v26 = vpop.f32.mrf.mxu0  ;;  %370 = vst [vmem:[#allocation2 + $0x98] sm:$0x1] %v369_v23 }
 0x1d4   : > { %v15667_v25 = vadd.f32 %v3622_v20, %v3366_v53  ;;  %v3369_v54 = vadd.f32 %v12515_v52, %v15502_v10 }
 0x1d5   : > { %v15670_v44 = vpop.f32.mrf.mxu1  ;;  %v3638_v56 = vpop.f32.mrf.mxu0 }
 0x1d6   : > { %18328 = vst [vmem:[#allocation38_spill] sm:$0xff] %v15667_v25  ;;  %v15672_v34 = vadd.f32 %v12549_v0, %v3369_v54 }
 0x1d7   : > { %v12518_v40 = vpop.f32.mrf.mxu1  ;;  %v12553_v57 = vpop.f32.mrf.mxu0 }
 0x1d8   : > { %18329 = vst [vmem:[#allocation39_spill] sm:$0xff] %v15672_v34  ;;  %v3372_v61 = vadd.f32 %v12518_v40, %v15509_v24  ;;  %v365_v34 = vld [vmem:[#allocation2 + $0x8c] sm:$0x1] }
 0x1d9   : > { %v3279_v45 = vpop.f32.mrf.mxu1  ;;  %v15680_v53 = vpop.f32.mrf.mxu0  ;;  %v366_v24 = vsel %vm15465_vm12, 0, %v365_v34 }
 0x1da   : > { %v15677_v20 = vadd.f32 %v12552_v26, %v3372_v61  ;;  %v3370_v10 = vadd.f32 %v3279_v45, %v15518_v9  ;;  %367 = vst [vmem:[#allocation2 + $0x8c] sm:$0x1] %v366_v24  ;;  %v319_v9 = vsel %vm15444_vm10, 0, %v318_v12  ;;  %v315_v61 = vld [vmem:[#allocation2 + $0x9c] sm:$0x1] }
 0x1db   : > { %v12519_v5 = vpop.f32.mrf.mxu1  ;;  %v12556_v54 = vpop.f32.mrf.mxu0  ;;  %320 = vst [vmem:[#allocation2 + $0xa8] sm:$0x1] %v319_v9 }
 0x1dc   : > { %v15682_v0 = vadd.f32 %v3638_v56, %v3370_v10  ;;  %v3373_v52 = vadd.f32 %v12519_v5, %v15525_v13  ;;  %v316_v10 = vsel %vm15444_vm10, 0, %v315_v61 }
 0x1dd   : > { %v15685_v25 = vpop.f32.mrf.mxu1  ;;  %v3654_v26 = vpop.f32.mrf.mxu0  ;;  %317 = vst [vmem:[#allocation2 + $0x9c] sm:$0x1] %v316_v10 }
 0x1de   : > { %18330 = vst [vmem:[#allocation40_spill] sm:$0xff] %v15682_v0  ;;  %v15689_v40 = vadd.f32 %v12553_v57, %v3373_v52 }
 0x1df   : > { %v12522_v23 = vpop.f32.mrf.mxu1  ;;  %v12557_v13 = vpop.f32.mrf.mxu0 }
 0x1e0   : > { %18331 = vst [vmem:[#allocation41_spill] sm:$0xff] %v15689_v40  ;;  %v3376_v56 = vadd.f32 %v12522_v23, %v15537_v28 }
 0x1e1   : > { %v3295_v45 = vpop.f32.mrf.mxu1  ;;  %v15699_v57 = vpop.f32.mrf.mxu0 }
 0x1e2   : > { %v15696_v5 = vadd.f32 %v12556_v54, %v3376_v56  ;;  %v3374_v34 = vadd.f32 %v3295_v45, %v15545_v16  ;;  %v374_v16 = vld [vmem:[#allocation2 + $0xb0] sm:$0x1] }
 0x1e3   : > { %v12523_v52 = vpop.f32.mrf.mxu1  ;;  %v12560_v9 = vpop.f32.mrf.mxu0 }
 0x1e4   : > { %v15701_v24 = vadd.f32 %v3654_v26, %v3374_v34  ;;  %v3377_v12 = vadd.f32 %v12523_v52, %v15552_v55  ;;  %v375_v55 = vsel %vm15465_vm12, 0, %v374_v16 }
 0x1e5   : > { %v15704_v28 = vpop.f32.mrf.mxu1  ;;  %v3670_v40 = vpop.f32.mrf.mxu0  ;;  %376 = vst [vmem:[#allocation2 + $0xb0] sm:$0x1] %v375_v55 }
 0x1e6   : > { %18332 = vst [vmem:[#allocation42_spill] sm:$0xff] %v15701_v24  ;;  %v15706_v23 = vadd.f32 %v12557_v13, %v3377_v12 }
 0x1e7   : > { %v12526_v0 = vpop.f32.mrf.mxu1  ;;  %v12561_v56 = vpop.f32.mrf.mxu0 }
 0x1e8   : > { %18333 = vst [vmem:[#allocation43_spill] sm:$0xff] %v15706_v23  ;;  %v3380_v54 = vadd.f32 %v12526_v0, %v15560_v49 }
 0x1e9   : > { %v3311_v61 = vpop.f32.mrf.mxu1  ;;  %v15712_v26 = vpop.f32.mrf.mxu0 }
 0x1ea   : > { %v15709_v45 = vadd.f32 %v12560_v9, %v3380_v54  ;;  %v3378_v10 = vadd.f32 %v3311_v61, %v15579_v63  ;;  %v12883_v63 = vld [vmem:[#allocation3 + $0x1b0] sm:$0xff]   ;;  %v371_v61 = vld [vmem:[#allocation2 + $0xa4] sm:$0x1] }
 0x1eb   : > { %v12527_v34 = vpop.f32.mrf.mxu1  ;;  %v12564_v12 = vpop.f32.mrf.mxu0  ;;  %v372_v16 = vsel %vm15465_vm12, 0, %v371_v61 }
 0x1ec   : > { %18334 = vst [vmem:[#allocation44_spill] sm:$0xff] %v15709_v45  ;;  %v15716_v13 = vadd.f32 %v3670_v40, %v3378_v10  ;;  %v3381_v52 = vadd.f32 %v12527_v34, %v15586_v27  ;;  %v12882_v45 = vld [vmem:[#allocation3 + $0x1f0] sm:$0xff]   ;;  %v324_v40 = vld [vmem:[#allocation2 + $0xc0] sm:$0x1]  ;;  %373 = vst [vmem:[#allocation2 + $0xa4] sm:$0x1] %v372_v16 }
 0x1ed   : > { %v15719_v49 = vpop.f32.mrf.mxu1  ;;  %v3686_v9 = vpop.f32.mrf.mxu0  ;;  %12181 = vmatprep.subr.bf16.mxu0 %v12882_v45  ;;  %v325_v27 = vsel %vm15444_vm10, 0, %v324_v40  ;;  %v18336_v40 = vld [vmem:[#allocation10_spill] sm:$0xff] }
 0x1ee   : > { %v15721_v0 = vadd.f32 %v12561_v56, %v3381_v52  ;;  %v321_v56 = vld [vmem:[#allocation2 + $0xb4] sm:$0x1]  ;;  %12182 = vmatpush3.bf16.msra.mxu0 %v12883_v63  ;;  %326 = vst [vmem:[#allocation2 + $0xc0] sm:$0x1] %v325_v27  ;;  %v18339_v27 = vld [vmem:[#allocation34_spill] sm:$0xff] }
 0x1ef   : > { %v12530_v54 = vpop.f32.mrf.mxu1  ;;  %v12565_v24 = vpop.f32.mrf.mxu0 }
 0x1f0   : > { %v3384_v23 = vadd.f32 %v12530_v54, %v15593_v1  ;;  %v322_v1 = vsel %vm15444_vm10, 0, %v321_v56 }
 0x1f1   : > { %v3327_v10 = vpop.f32.mrf.mxu1  ;;  %v15731_v52 = vpop.f32.mrf.mxu0  ;;  %323 = vst [vmem:[#allocation2 + $0xb4] sm:$0x1] %v322_v1  ;;  %v18340_v1 = vld [vmem:[#allocation14_spill] sm:$0xff] }
 0x1f2   : > { %v15728_v55 = vadd.f32 %v12564_v12, %v3384_v23  ;;  %v3382_v34 = vadd.f32 %v3327_v10, %v15600_v62  ;;  %v1319_v23 = vadd.f32 %v15355_v43, %v18336_v40  ;;  %v18337_v12 = vld [vmem:[#allocation25_spill] sm:$0xff]  ;;  %v18338_v10 = vld [vmem:[#allocation30_spill] sm:$0xff] }
 0x1f3   : > { %v12531_v54 = vpop.f32.mrf.mxu1  ;;  %v12568_v16 = vpop.f32.mrf.mxu0  ;;  %v1335_v62 = vadd.f32 %v15397_v19, %v18337_v12  ;;  %v1351_v63 = vadd.f32 %v15423_v48, %v18338_v10 }
 0x1f4   : > { %18335 = vst [vmem:[#allocation45_spill] sm:$0xff] %v15728_v55  ;;  %v15735_v61 = vadd.f32 %v3686_v9, %v3382_v34  ;;  %v3385_v45 = vadd.f32 %v12531_v54, %v15605_v6  ;;  %v1367_v55 = vadd.f32 %v15437_v15, %v18339_v27  ;;  %v2163_v9 = vadd.f32 %v15458_v50, %v18340_v1 }
 0x1f5   : > { %v15746_v56 = vpop.f32.mrf.mxu1  ;;  %v3702_v6 = vpop.f32.mrf.mxu0  ;;  %v1820_v19 = vadd.f32 %v15342_v32, %v1319_v23  ;;  %v1824_v12 = vadd.f32 %v15391_v42, %v1335_v62  ;;  %v1828_v48 = vadd.f32 %v15417_v35, %v1351_v63  ;;  %v3360_v50 = vadd.f32 %v15630_v3, %v15448_v39  ;;  %v18341_v42 = vld [vmem:[#allocation24_spill] sm:$0xff]  ;;  %v18343_v62 = vld [vmem:[#allocation17_spill] sm:$0xff]  ;;  %v18345_v63 = vld [vmem:[#allocation27_spill] sm:$0xff] }
 0x1f6   : > { %v15750_v34 = vadd.f32 %v12565_v24, %v3385_v45  ;;  %v1832_v15 = vadd.f32 %v15432_v37, %v1367_v55  ;;  %v2889_v27 = vadd.f32 %v15451_v46, %v2163_v9  ;;  %v2167_v32 = vadd.f32 %v15481_v7, %v15207_v58  ;;  %v18342_v23 = vld [vmem:[#allocation16_spill] sm:$0xff]  ;;  %v18344_v37 = vld [vmem:[#allocation21_spill] sm:$0xff]  ;;  %v380_v9 = vld [vmem:[#allocation2 + $0xc8] sm:$0x1] }
 0x1f7   : > { %v12534_v54 = vpop.f32.mrf.mxu1  ;;  %v12569_v40 = vpop.f32.mrf.mxu0  ;;  %v2171_v35 = vadd.f32 %v18342_v23, %v18341_v42  ;;  %v2175_v55 = vadd.f32 %v18344_v37, %v18343_v62  ;;  %v2179_v46 = vadd.f32 %v18345_v63, %v1820_v19  ;;  %v18346_v39 = vld [vmem:[#allocation20_spill] sm:$0xff]  ;;  %v381_v58 = vsel %vm15465_vm12, 0, %v380_v9  ;;  %v18347_v19 = vld [vmem:[#allocation15_spill] sm:$0xff]  ;;  %v18348_v62 = vld [vmem:[#allocation26_spill] sm:$0xff] }
 0x1f8   : > { %v3388_v43 = vadd.f32 %v12534_v54, %v15612_v41  ;;  %v3358_v3 = vadd.f32 %v15636_v11, %v18346_v39  ;;  %v2183_v7 = vadd.f32 %v15584_v8, %v1824_v12  ;;  %v3361_v42 = vadd.f32 %v15640_v60, %v18347_v19  ;;  %382 = vst [vmem:[#allocation2 + $0xc8] sm:$0x1] %v381_v58  ;;  %v18349_v63 = vld [vmem:[#allocation12_spill] sm:$0xff]  ;;  %v18350_v12 = vld [vmem:[#allocation19_spill] sm:$0xff] }
 0x1f9   : > { %v3343_v10 = vpop.f32.mrf.mxu1  ;;  %v15763_v41 = vpop.f32.mrf.mxu0  ;;  %v3719_v11 = vadd.f32 %v15620_v33, %v3360_v50  ;;  %v2893_v37 = vadd.f32 %v18348_v62, %v2167_v32  ;;  %v2897_v8 = vadd.f32 %v18349_v63, %v2171_v35  ;;  %v15802_v35 = vld [vmem:[%s18129_s2] ss:$0 sm:$0xff] }
 0x1fa   : > { %v15760_v24 = vadd.f32 %v12568_v16, %v3388_v43  ;;  %v3386_v45 = vadd.f32 %v3343_v10, %v15617_v31  ;;  %v2187_v43 = vadd.f32 %v15603_v38, %v1828_v48  ;;  %v2191_v10 = vadd.f32 %v15622_v2, %v1832_v15  ;;  %v18351_v2 = vld [vmem:[#allocation11_spill] sm:$0xff] }
 0x1fb   : > { %v12535_v1 = vpop.f32.mrf.mxu1  ;;  %v12608_v54 = vpop.f32.mrf.mxu0  ;;  %v2901_v38 = vadd.f32 %v18350_v12, %v2175_v55  ;;  %v2905_v15 = vadd.f32 %v18351_v2, %v2179_v46  ;;  %v3717_v60 = vadd.f32 %v15628_v29, %v3358_v3  ;;  %v3720_v32 = vadd.f32 %v15632_v22, %v3361_v42  ;;  %v377_v29 = vld [vmem:[#allocation2 + $0xbc] sm:$0x1]  ;;  %v18353_v46 = vld [vmem:[#allocation31_spill] sm:$0xff]  ;;  %v18356_v22 = vld [vmem:[#allocation36_spill] sm:$0xff] }
 0x1fc   : > { %v15774_v16 = vadd.f32 %v3702_v6, %v3386_v45  ;;  %v3389_v31 = vadd.f32 %v12535_v1, %v15626_v36  ;;  %v3359_v6 = vadd.f32 %v15644_v4, %v2889_v27  ;;  %v18352_v1 = vld [vmem:[#allocation22_spill] sm:$0xff]  ;;  %v2909_v4 = vadd.f32 %v15563_v14, %v2183_v7 }
 0x1fd   : > { %v3346_v23 = vpop.f32.mrf.mxu1  ;;  %v4786_v45 = vpop.f32.mrf.mxu0  ;;  %v3364_v9 = vadd.f32 %v15648_v30, %v18352_v1  ;;  %v2917_v27 = vadd.f32 %v15615_v17, %v2191_v10  ;;  %v378_v14 = vsel %vm15465_vm12, 0, %v377_v29  ;;  %v18355_v17 = vld [vmem:[#allocation35_spill] sm:$0xff]  ;;  %v3363_v7 = vadd.f32 %v18356_v22, %v2893_v37  ;;  %v12890_v42 = vld [vmem:[#allocation3 + $0x1e8] sm:$0xff]  }
 0x1fe   : > { %v15786_v36 = vadd.f32 %v12569_v40, %v3389_v31  ;;  %v2913_v40 = vadd.f32 %v15596_v21, %v2187_v43  ;;  %v3718_v39 = vadd.f32 %v18353_v46, %v3359_v6  ;;  %v18354_v21 = vld [vmem:[#allocation13_spill] sm:$0xff]  ;;  %v3367_v43 = vadd.f32 %v15670_v44, %v2897_v8  ;;  %379 = vst [vmem:[#allocation2 + $0xbc] sm:$0x1] %v378_v14 }
 0x1ff   : > { %v12574_v48 = vpop.f32.mrf.mxu1  ;;  %v12609_v50 = vpop.f32.mrf.mxu0  ;;  %v3362_v58 = vadd.f32 %v18355_v17, %v18354_v21  ;;  %v3371_v10 = vadd.f32 %v15685_v25, %v2901_v38  ;;  %v3375_v2 = vadd.f32 %v15704_v28, %v2905_v15  ;;  %v3387_v44 = vadd.f32 %v3346_v23, %v2917_v27  ;;  %12183 = vmatprep.subr.bf16.mxu0 %v12890_v42  ;;  %v5444_v42 = vld [vmem:[#allocation2 + $0x18] sm:$0xf] }
 0x200   : > { %v4445_v33 = vadd.f32 %v12574_v48, %v3719_v11  ;;  %v18357_v11 = vld [vmem:[#allocation32_spill] sm:$0xff]  ;;  %v12891_v48 = vld [vmem:[#allocation3 + $0x1a8] sm:$0xff]   ;;  %v3383_v37 = vadd.f32 %v15746_v56, %v2913_v40  ;;  %v15823_v28 = vadd.f32 %v15665_v51, %v3367_v43 }
 0x201   : > { %v4316_v55 = vpop.f32.mrf.mxu1  ;;  %v4789_v31 = vpop.f32.mrf.mxu0  ;;  %12184 = vmatpush3.bf16.msra.mxu0 %v12891_v48  ;;  %v15832_v27 = vadd.f32 %v15699_v57, %v3375_v2 }
 0x202   : > { %v4915_v30 = vadd.f32 %v12608_v54, %v4445_v33  ;;  %v4443_v3 = vadd.f32 %v4316_v55, %v3717_v60  ;;  %v3723_v54 = vadd.f32 %v18357_v11, %v3364_v9  ;;  %v3379_v60 = vadd.f32 %v15719_v49, %v2909_v4  ;;  %v18359_v55 = vld [vmem:[#allocation23_spill] sm:$0xff] }
 0x203   : > { %v12575_v19 = vpop.f32.mrf.mxu1  ;;  %v15820_v29 = vadd.f32 %v18359_v55, %v3363_v7  ;;  %v15826_v49 = vadd.f32 %v15680_v53, %v3371_v10  ;;  %v15838_v51 = vadd.f32 %v15731_v52, %v3383_v37 }
 0x204   : > { %v4954_v6 = vadd.f32 %v15802_v35, %v4915_v30  ;;  %v4913_v62 = vadd.f32 %v4786_v45, %v4443_v3  ;;  %v4446_v63 = vadd.f32 %v12575_v19, %v3720_v32  ;;  %v18358_v45 = vld [vmem:[#allocation33_spill] sm:$0xff]  ;;  %v15835_v46 = vadd.f32 %v15712_v26, %v3379_v60 }
 0x205   : > { %v12612_v12 = vpop.f32.mrf.mxu0  ;;  %v4319_v8 = vpop.f32.mrf.mxu1  ;;  %v3721_v32 = vadd.f32 %v18358_v45, %v3362_v58  ;;  %v15841_v30 = vadd.f32 %v15763_v41, %v3387_v44 }
 0x206   : > { %v4986_v25 = vmax.f32 %v4954_v6, 0.0  ;;  %v4952_v38 = vadd.f32 %v15802_v35, %v4913_v62  ;;  %v4916_v1 = vadd.f32 %v12609_v50, %v4446_v63  ;;  %v4444_v9 = vadd.f32 %v4319_v8, %v3718_v39  ;;  %v18362_v6 = vld [vmem:[#allocation37_spill] sm:$0xff]  ;;  %v5437_v8 = vld [vmem:[#allocation2 + $0xc] sm:$0xf] }
 0x207   : > { %v4802_v33 = vpop.f32.mrf.mxu0  ;;  %v12578_v56 = vpop.f32.mrf.mxu1 }
 0x208   : > { %v11532_v23 = vpack.c.bf16 %v4986_v25, %v4986_v25  ;;  %v4984_v15 = vmax.f32 %v4952_v38, 0.0  ;;  %v4955_v50 = vadd.f32 %v15802_v35, %v4916_v1  ;;  %v4914_v4 = vadd.f32 %v4789_v31, %v4444_v9 }
 0x209   : > { %v15829_v40 = vpop.f32.mrf.mxu0  ;;  %v4449_v39 = vadd.f32 %v12578_v56, %v3723_v54  ;;  %v4332_v53 = vpop.f32.mrf.mxu1 }
 0x20a   : > { %v5132_v3 = vshrl.u32 %v11532_v23, 16  ;;  %v11530_v14 = vpack.c.bf16 %v4984_v15, %v4984_v15  ;;  %v4987_v21 = vmax.f32 %v4955_v50, 0.0  ;;  %v5135_v17 = vshll.u32 %v11532_v23, 16  ;;  %v5448_v50 = vld [vmem:[#allocation2 + $0x20] sm:$0x1] }
 0x20b   : > { %v15843_v31 = vpop.f32.mrf.mxu0  ;;  %v4953_v57 = vadd.f32 %v15802_v35, %v4914_v4  ;;  %v4447_v58 = vadd.f32 %v4332_v53, %v3721_v32  ;;  %v4919_v22 = vadd.f32 %v12612_v12, %v4449_v39  ;;  %v12579_v26 = vpop.f32.mrf.mxu1 }
 0x20c   : > { %v5134_v7 = vrot.slane %v5132_v3, 7  ;;  %v5115_v43 = vshrl.u32 %v11530_v14, 16  ;;  %v5118_v52 = vshll.u32 %v11530_v14, 16  ;;  %v11533_v10 = vpack.c.bf16 %v4987_v21, %v4987_v21 }
 0x20d   : > { %v15846_v19 = vpop.f32.mrf.mxu0  ;;  %v4985_v11 = vmax.f32 %v4953_v57, 0.0  ;;  %v4958_v54 = vadd.f32 %v15802_v35, %v4919_v22  ;;  %v4450_v62 = vadd.f32 %v12579_v26, %v18362_v6  ;;  %v4917_v63 = vadd.f32 %v4802_v33, %v4447_v58  ;;  %v4335_v12 = vpop.f32.mrf.mxu1  ;;  %v12898_v26 = vld [vmem:[#allocation3 + $0x1e0] sm:$0xff]  }
 0x20e   : > { %v5137_v48 = vor.u32 %v5135_v17, %v5134_v7  ;;  %v5138_v2 = vrot.slane %v5134_v7, 4  ;;  %v5117_v60 = vrot.slane %v5115_v43, 7  ;;  %v5140_v37 = vshrl.u32 %v11533_v10, 16  ;;  %v12899_v7 = vld [vmem:[#allocation3 + $0x1a0] sm:$0xff]   ;;  %12185 = vmatprep.subr.bf16.mxu0 %v12898_v26 }
 0x20f   : > { %v15856_v44 = vpop.f32.mrf.mxu0  ;;  %v5143_v25 = vshll.u32 %v11533_v10, 16  ;;  %v11531_v38 = vpack.c.bf16 %v4985_v11, %v4985_v11  ;;  %v4990_v1 = vmax.f32 %v4958_v54, 0.0  ;;  %v4956_v9 = vadd.f32 %v15802_v35, %v4917_v63  ;;  %v12582_v45 = vpop.f32.mrf.mxu1  ;;  %v5441_v63 = vld [vmem:[#allocation2 + $0x14] sm:$0x1]  ;;  %12186 = vmatpush3.bf16.msra.mxu0 %v12899_v7 }
 0x210   : > { %v5445_v32 = vsel %vm15850_vm15, %v5137_v48, %v5444_v42  ;;  %v5120_v55 = vor.u32 %v5118_v52, %v5117_v60  ;;  %v5121_v56 = vrot.slane %v5117_v60, 4  ;;  %v5142_v33 = vrot.slane %v5140_v37, 7 }
 0x211   : > { %v15861_v23 = vpop.f32.mrf.mxu0  ;;  %5446 = vst [vmem:[#allocation2 + $0x18] sm:$0xf] %v5445_v32  ;;  %v5123_v4 = vshrl.u32 %v11531_v38, 16  ;;  %v5126_v39 = vshll.u32 %v11531_v38, 16  ;;  %v11536_v53 = vpack.c.bf16 %v4990_v1, %v4990_v1  ;;  %v4988_v3 = vmax.f32 %v4956_v9, 0.0  ;;  %v4348_v14 = vpop.f32.mrf.mxu1  ;;  %v18365_v32 = vld [vmem:[#allocation38_spill] sm:$0xff] }
 0x212   : > { %v5438_v21 = vsel %vm15850_vm15, %v5120_v55, %v5437_v8  ;;  %v5145_v17 = vor.u32 %v5143_v25, %v5142_v33  ;;  %v5147_v57 = vrot.slane %v5142_v33, 4  ;;  %v4448_v58 = vadd.f32 %v4335_v12, %v15820_v29  ;;  %v5458_v38 = vld [vmem:[#allocation2 + $0x30] sm:$0xf] }
 0x213   : > { %v15872_v22 = vpop.f32.mrf.mxu0  ;;  %5439 = vst [vmem:[#allocation2 + $0xc] sm:$0xf] %v5438_v21  ;;  %v5125_v43 = vrot.slane %v5123_v4, 7  ;;  %v5166_v52 = vshrl.u32 %v11536_v53, 16  ;;  %v5169_v10 = vshll.u32 %v11536_v53, 16  ;;  %v11534_v42 = vpack.c.bf16 %v4988_v3, %v4988_v3  ;;  %v12583_v11 = vpop.f32.mrf.mxu1 }
 0x214   : > { %v5146_v54 = vsel %vm15865_vm1, %v5138_v2, %v5145_v17  ;;  %v5449_v6 = vsel %vm15444_vm10, %v5147_v57, %v5448_v50  ;;  %v4920_v48 = vadd.f32 %v15829_v40, %v4450_v62  ;;  %v4453_v29 = vadd.f32 %v12582_v45, %v15662_v47  ;;  %v5451_v3 = vld [vmem:[#allocation2 + $0x24] sm:$0xf] }
 0x215   : > { %5447 = vst [vmem:[#allocation2 + $0x1c] sm:$0xf] %v5146_v54  ;;  %5450 = vst [vmem:[#allocation2 + $0x20] sm:$0x1] %v5449_v6  ;;  %v5128_v12 = vor.u32 %v5126_v39, %v5125_v43  ;;  %v5130_v60 = vrot.slane %v5125_v43, 4  ;;  %v15880_v37 = vrot.slane %v5166_v52, 7  ;;  %v4351_v25 = vpop.f32.mrf.mxu1  ;;  %v4918_v9 = vadd.f32 %v15843_v31, %v4448_v58  ;;  %v12620_v62 = vpop.f32.mrf.mxu0 }
 0x216   : > { %v5149_v8 = vshrl.u32 %v11534_v42, 16  ;;  %v5152_v2 = vshll.u32 %v11534_v42, 16  ;;  %v4959_v1 = vadd.f32 %v15802_v35, %v4920_v48  ;;  %v4451_v40 = vadd.f32 %v4348_v14, %v18365_v32  ;;  %v18366_v14 = vld [vmem:[#allocation39_spill] sm:$0xff] }
 0x217   : > { %v5129_v47 = vsel %vm15865_vm1, %v5121_v56, %v5128_v12  ;;  %v5442_v45 = vsel %vm15444_vm10, %v5130_v60, %v5441_v63  ;;  %v5171_v55 = vor.u32 %v5169_v10, %v15880_v37  ;;  %v5172_v33 = vrot.slane %v15880_v37, 4  ;;  %v12586_v50 = vpop.f32.mrf.mxu1  ;;  %v15902_v10 = vpop.f32.mrf.mxu0 }
 0x218   : > { %5440 = vst [vmem:[#allocation2 + $0x10] sm:$0xf] %v5129_v47  ;;  %5443 = vst [vmem:[#allocation2 + $0x14] sm:$0x1] %v5442_v45  ;;  %v15891_v4 = vrot.slane %v5149_v8, 7  ;;  %v4991_v39 = vmax.f32 %v4959_v1, 0.0  ;;  %v4957_v31 = vadd.f32 %v15802_v35, %v4918_v9  ;;  %v4923_v53 = vadd.f32 %v15846_v19, %v4453_v29 }
 0x219   : > { %v5459_v56 = vsel %vm15850_vm15, %v5171_v55, %v5458_v38  ;;  %v4454_v21 = vadd.f32 %v12583_v11, %v18366_v14  ;;  %v4921_v17 = vadd.f32 %v15856_v44, %v4451_v40  ;;  %v4452_v57 = vadd.f32 %v4351_v25, %v15823_v28  ;;  %v4364_v58 = vpop.f32.mrf.mxu1  ;;  %v18367_v1 = vld [vmem:[#allocation40_spill] sm:$0xff]  ;;  %v15917_v32 = vpop.f32.mrf.mxu0  ;;  %v5455_v47 = vld [vmem:[#allocation2 + $0x2c] sm:$0x1] }
 0x21a   : > { %5460 = vst [vmem:[#allocation2 + $0x30] sm:$0xf] %v5459_v56  ;;  %v5154_v26 = vor.u32 %v5152_v2, %v15891_v4  ;;  %v5155_v7 = vrot.slane %v15891_v4, 4  ;;  %v11537_v43 = vpack.c.bf16 %v4991_v39, %v4991_v39  ;;  %v4989_v52 = vmax.f32 %v4957_v31, 0.0  ;;  %v12872_v40 = vld [vmem:[#allocation3 + $0x138] sm:$0xff]  }
 0x21b   : > { %v4962_v19 = vadd.f32 %v15802_v35, %v4923_v53  ;;  %v4960_v42 = vadd.f32 %v15802_v35, %v4921_v17  ;;  %v4924_v11 = vadd.f32 %v15861_v23, %v4454_v21  ;;  %v4457_v44 = vadd.f32 %v12586_v50, %v15677_v20  ;;  %v12587_v54 = vpop.f32.mrf.mxu1  ;;  %v5462_v23 = vld [vmem:[#allocation2 + $0x38] sm:$0x1]  ;;  %v12906_v17 = vld [vmem:[#allocation3 + $0x1d8] sm:$0xff]  }
 0x21c   : > { %v5452_v28 = vsel %vm15850_vm15, %v5154_v26, %v5451_v3  ;;  %v5174_v6 = vshrl.u32 %v11537_v43, 16  ;;  %v5177_v63 = vshll.u32 %v11537_v43, 16  ;;  %v11535_v48 = vpack.c.bf16 %v4989_v52, %v4989_v52  ;;  %v12873_v21 = vld [vmem:[#allocation2 + $0x18] sm:$0xff]   ;;  %12187 = vmatprep.subr.bf16.mxu0 %v12906_v17  ;;  %v12887_v17 = vld [vmem:[#allocation3 + $0x128] sm:$0xff]  }
 0x21d   : > { %5453 = vst [vmem:[#allocation2 + $0x24] sm:$0xf] %v5452_v28  ;;  %v4994_v29 = vmax.f32 %v4962_v19, 0.0  ;;  %v4992_v12 = vmax.f32 %v4960_v42, 0.0  ;;  %v4963_v60 = vadd.f32 %v15802_v35, %v4924_v11  ;;  %v4922_v8 = vadd.f32 %v15872_v22, %v4452_v57  ;;  %v15912_v25 = vpop.f32.mrf.mxu1  ;;  %v12878_v22 = vld [vmem:[#allocation3 + $0x170] sm:$0xff]   ;;  %v12907_v57 = vld [vmem:[#allocation3 + $0x198] sm:$0xff]  }
 0x21e   : > { %v5176_v38 = vrot.slane %v5174_v6, 7  ;;  %v5157_v2 = vshrl.u32 %v11535_v48, 16  ;;  %v5160_v20 = vshll.u32 %v11535_v48, 16  ;;  %v15915_v9 = vadd.f32 %v4364_v58, %v18367_v1  ;;  %v18371_v1 = vld [vmem:[#allocation41_spill] sm:$0xff]  ;;  %12188 = vmatpush3.bf16.msra.mxu0 %v12907_v57 }
 0x21f   : > { %v11540_v45 = vpack.c.bf16 %v4994_v29, %v4994_v29  ;;  %v11538_v55 = vpack.c.bf16 %v4992_v12, %v4992_v12  ;;  %v4995_v50 = vmax.f32 %v4963_v60, 0.0  ;;  %v4961_v39 = vadd.f32 %v15802_v35, %v4922_v8  ;;  %v12870_v31 = vld [vmem:[#allocation2 + $0xc] sm:$0xff]   ;;  %v12590_v19 = vpop.f32.mrf.mxu1  ;;  %v5472_v12 = vld [vmem:[#allocation2 + $0x48] sm:$0xf] }
 0x220   : > { %v5179_v53 = vor.u32 %v5177_v63, %v5176_v38  ;;  %v5181_v56 = vrot.slane %v5176_v38, 4  ;;  %v5159_v3 = vrot.slane %v5157_v2, 7  ;;  %v4927_v14 = vadd.f32 %v12620_v62, %v4457_v44  ;;  %6686 = vmatprep.mubr.bf16.mxu1 %v12870_v31  ;;  %v4837_v62 = vpop.f32.mrf.mxu0  ;;  %v18368_v44 = vld [vmem:[#allocation29_spill] sm:$0xff]  ;;  %v18369_v63 = vld [vmem:[#allocation28_spill] sm:$0xff] }
 0x221   : > { %v5200_v58 = vshrl.u32 %v11540_v45, 16  ;;  %v5203_v26 = vshll.u32 %v11540_v45, 16  ;;  %v5183_v43 = vshrl.u32 %v11538_v55, 16  ;;  %v5186_v52 = vshll.u32 %v11538_v55, 16  ;;  %v5465_v2 = vld [vmem:[#allocation2 + $0x3c] sm:$0xf]  ;;  %v4380_v31 = vpop.f32.mrf.mxu1 }
 0x222   : > { %v5180_v42 = vsel %vm15865_vm1, %v5172_v33, %v5179_v53  ;;  %v5463_v11 = vsel %vm15444_vm10, %v5181_v56, %v5462_v23  ;;  %v5162_v28 = vor.u32 %v5160_v20, %v5159_v3  ;;  %v5164_v6 = vrot.slane %v5159_v3, 4  ;;  %v12879_v33 = vld [vmem:[#allocation3 + $0x130] sm:$0xff]   ;;  %v12886_v55 = vld [vmem:[#allocation3 + $0x168] sm:$0xff]   ;;  %v12624_v3 = vpop.f32.mrf.mxu0 }
 0x223   : > { %v18370_v48 = vcombine.low %v18368_v44, %v18369_v63  ;;  %5461 = vst [vmem:[#allocation2 + $0x34] sm:$0xf] %v5180_v42  ;;  %5464 = vst [vmem:[#allocation2 + $0x38] sm:$0x1] %v5463_v11  ;;  %v5202_v29 = vrot.slane %v5200_v58, 7  ;;  %v15929_v60 = vrot.slane %v5183_v43, 7  ;;  %v11541_v37 = vpack.c.bf16 %v4995_v50, %v4995_v50 }
 0x224   : > { %v4993_v8 = vmax.f32 %v4961_v39, 0.0  ;;  %v5163_v38 = vsel %vm15865_vm1, %v5155_v7, %v5162_v28  ;;  %v5456_v23 = vsel %vm15444_vm10, %v5164_v6, %v5455_v47  ;;  %v4966_v20 = vadd.f32 %v15802_v35, %v4927_v14  ;;  %v5476_v42 = vld [vmem:[#allocation2 + $0x50] sm:$0x1]  ;;  %v12591_v6 = vpop.f32.mrf.mxu1 }
 0x225   : > { %6687 = vmatmul.mubr.bf16.vlgmr.msra.gmra.mxu1 %v18370_v48  ;;  %v4458_v45 = vadd.f32 %v12587_v54, %v18371_v1  ;;  %5454 = vst [vmem:[#allocation2 + $0x28] sm:$0xf] %v5163_v38  ;;  %5457 = vst [vmem:[#allocation2 + $0x2c] sm:$0x1] %v5456_v23  ;;  %v5206_v50 = vrot.slane %v5202_v29, 4  ;;  %v5188_v39 = vor.u32 %v5186_v52, %v15929_v60  ;;  %v5189_v4 = vrot.slane %v15929_v60, 4  ;;  %v4850_v48 = vpop.f32.mrf.mxu0 }
 0x226   : > { %12068 = vmatpush3.bf16.msra.mxu1 %v12872_v40  ;;  %6694 = vmatprep.mubr.bf16.mxu1 %v12873_v21  ;;  %v5205_v40 = vor.u32 %v5203_v26, %v5202_v29  ;;  %v5208_v7 = vshrl.u32 %v11541_v37, 16  ;;  %v5211_v53 = vshll.u32 %v11541_v37, 16  ;;  %v11539_v47 = vpack.c.bf16 %v4993_v8, %v4993_v8  ;;  %v12894_v52 = vld [vmem:[#allocation3 + $0x160] sm:$0xff]   ;;  %v5469_v29 = vld [vmem:[#allocation2 + $0x44] sm:$0x1]  ;;  %v12902_v38 = vld [vmem:[#allocation3 + $0x158] sm:$0xff]  }
 0x227   : > { %12069 = vmatprep.subr.bf16.mxu1 %v12878_v22  ;;  %v4998_v56 = vmax.f32 %v4966_v20, 0.0  ;;  %v5466_v22 = vsel %vm15850_vm15, %v5188_v39, %v5465_v2  ;;  %v4925_v14 = vadd.f32 %v15902_v10, %v15915_v9  ;;  %v4456_v21 = vadd.f32 %v15912_v25, %v15826_v49  ;;  %v18372_v39 = vld [vmem:[#allocation42_spill] sm:$0xff] }
 0x228   : > { %v5473_v54 = vsel %vm15850_vm15, %v5205_v40, %v5472_v12  ;;  %5467 = vst [vmem:[#allocation2 + $0x3c] sm:$0xf] %v5466_v22  ;;  %v5210_v57 = vrot.slane %v5208_v7, 7  ;;  %v5191_v58 = vshrl.u32 %v11539_v47, 16  ;;  %v5194_v26 = vshll.u32 %v11539_v47, 16  ;;  %v12625_v47 = vpop.f32.mrf.mxu0 }
 0x229   : > { %5474 = vst [vmem:[#allocation2 + $0x48] sm:$0xf] %v5473_v54  ;;  %v11544_v43 = vpack.c.bf16 %v4998_v56, %v4998_v56  ;;  %v4964_v11 = vadd.f32 %v15802_v35, %v4925_v14  ;;  %v4928_v28 = vadd.f32 %v15917_v32, %v4458_v45  ;;  %v4461_v10 = vadd.f32 %v12590_v19, %v15696_v5  ;;  %v4383_v45 = vpop.f32.mrf.mxu1 }
 0x22a   : > { %12070 = vmatpush3.bf16.msra.mxu1 %v12879_v33  ;;  %v4926_v9 = vadd.f32 %v4837_v62, %v4456_v21  ;;  %v5213_v49 = vor.u32 %v5211_v53, %v5210_v57  ;;  %v5215_v25 = vrot.slane %v5210_v57, 4  ;;  %v5193_v44 = vrot.slane %v5191_v58, 7  ;;  %v12895_v33 = vld [vmem:[#allocation3 + $0x120] sm:$0xff]   ;;  %v12903_v21 = vld [vmem:[#allocation3 + $0x118] sm:$0xff]   ;;  %v18373_v58 = vld [vmem:[#allocation43_spill] sm:$0xff] }
 0x22b   : > { %12071 = vmatprep.subr.bf16.mxu1 %v12886_v55  ;;  %v5234_v63 = vshrl.u32 %v11544_v43, 16  ;;  %v5237_v12 = vshll.u32 %v11544_v43, 16  ;;  %v4996_v60 = vmax.f32 %v4964_v11, 0.0  ;;  %v4967_v37 = vadd.f32 %v15802_v35, %v4928_v28  ;;  %v12594_v28 = vpop.f32.mrf.mxu1 }
 0x22c   : > { %v4965_v8 = vadd.f32 %v15802_v35, %v4926_v9  ;;  %v5214_v32 = vsel %vm15865_vm1, %v5206_v50, %v5213_v49  ;;  %v5477_v5 = vsel %vm15444_vm10, %v5215_v25, %v5476_v42  ;;  %v5196_v19 = vor.u32 %v5194_v26, %v5193_v44  ;;  %v5486_v50 = vld [vmem:[#allocation2 + $0x60] sm:$0xf] }
 0x22d   : > { %v5198_v62 = vrot.slane %v5193_v44, 4  ;;  %5475 = vst [vmem:[#allocation2 + $0x4c] sm:$0xf] %v5214_v32  ;;  %5478 = vst [vmem:[#allocation2 + $0x50] sm:$0x1] %v5477_v5  ;;  %v15958_v23 = vrot.slane %v5234_v63, 7  ;;  %v11542_v2 = vpack.c.bf16 %v4996_v60, %v4996_v60  ;;  %v4459_v7 = vadd.f32 %v4380_v31, %v18372_v39  ;;  %v4853_v63 = vpop.f32.mrf.mxu0 }
 0x22e   : > { %12072 = vmatpush3.bf16.msra.mxu1 %v12887_v17  ;;  %v4999_v20 = vmax.f32 %v4967_v37, 0.0  ;;  %v4997_v1 = vmax.f32 %v4965_v8, 0.0  ;;  %v5197_v55 = vsel %vm15865_vm1, %v5189_v4, %v5196_v19  ;;  %v4931_v53 = vadd.f32 %v12624_v3, %v4461_v10  ;;  %v12910_v31 = vld [vmem:[#allocation3 + $0x150] sm:$0xff]   ;;  %v18374_v32 = vld [vmem:[#allocation44_spill] sm:$0xff] }
 0x22f   : > { %12073 = vmatprep.subr.bf16.mxu1 %v12894_v52  ;;  %v5470_v40 = vsel %vm15444_vm10, %v5198_v62, %v5469_v29  ;;  %5468 = vst [vmem:[#allocation2 + $0x40] sm:$0xf] %v5197_v55  ;;  %v5239_v56 = vor.u32 %v5237_v12, %v15958_v23  ;;  %v5240_v54 = vrot.slane %v15958_v23, 4  ;;  %v5217_v22 = vshrl.u32 %v11542_v2, 16  ;;  %v5479_v52 = vld [vmem:[#allocation2 + $0x54] sm:$0xf] }
 0x230   : > { %5471 = vst [vmem:[#allocation2 + $0x44] sm:$0x1] %v5470_v40  ;;  %v5220_v14 = vshll.u32 %v11542_v2, 16  ;;  %v11545_v17 = vpack.c.bf16 %v4999_v20, %v4999_v20  ;;  %v11543_v4 = vpack.c.bf16 %v4997_v1, %v4997_v1  ;;  %v4970_v57 = vadd.f32 %v15802_v35, %v4931_v53  ;;  %v12914_v10 = vld [vmem:[#allocation3 + $0x1d0] sm:$0xff]  }
 0x231   : > { %v4462_v26 = vadd.f32 %v12591_v6, %v18373_v58  ;;  %v5487_v3 = vsel %vm15850_vm15, %v5239_v56, %v5486_v50  ;;  %v5219_v43 = vrot.slane %v5217_v22, 7  ;;  %v4929_v42 = vadd.f32 %v4850_v48, %v4459_v7  ;;  %v12915_v29 = vld [vmem:[#allocation3 + $0x190] sm:$0xff]   ;;  %12189 = vmatprep.subr.bf16.mxu0 %v12914_v10  ;;  %v12628_v56 = vpop.f32.mrf.mxu0  ;;  %v15987_v58 = vld [vmem:[#allocation2 + $0x14] sm:$0x1] }
 0x232   : > { %12074 = vmatpush3.bf16.msra.mxu1 %v12895_v33  ;;  %v4460_v11 = vadd.f32 %v4383_v45, %v15832_v27  ;;  %5488 = vst [vmem:[#allocation2 + $0x60] sm:$0xf] %v5487_v3  ;;  %v5242_v9 = vshrl.u32 %v11545_v17, 16  ;;  %v5245_v49 = vshll.u32 %v11545_v17, 16  ;;  %v5225_v25 = vshrl.u32 %v11543_v4, 16  ;;  %v12911_v8 = vld [vmem:[#allocation3 + $0x110] sm:$0xff]   ;;  %12190 = vmatpush3.bf16.msra.mxu0 %v12915_v29 }
 0x233   : > { %12075 = vmatprep.subr.bf16.mxu1 %v12902_v38  ;;  %v5228_v44 = vshll.u32 %v11543_v4, 16  ;;  %v5222_v6 = vor.u32 %v5220_v14, %v5219_v43  ;;  %v5223_v12 = vrot.slane %v5219_v43, 4  ;;  %v5002_v60 = vmax.f32 %v4970_v57, 0.0  ;;  %v5490_v62 = vld [vmem:[#allocation2 + $0x68] sm:$0x1] }
 0x234   : > { %v4968_v37 = vadd.f32 %v15802_v35, %v4929_v42  ;;  %v5244_v48 = vrot.slane %v5242_v9, 7  ;;  %v5227_v33 = vrot.slane %v5225_v25, 7  ;;  %v4932_v27 = vadd.f32 %v12625_v47, %v4462_v26  ;;  %v5483_v38 = vld [vmem:[#allocation2 + $0x5c] sm:$0x1]  ;;  %v4396_v47 = vpop.f32.mrf.mxu1  ;;  %v6174_v22 = vld [vmem:[#allocation2 + $0xc] sm:$0xe] }
 0x235   : > { %v4465_v5 = vadd.f32 %v12594_v28, %v18374_v32  ;;  %v5480_v19 = vsel %vm15850_vm15, %v5222_v6, %v5479_v52  ;;  %v11548_v23 = vpack.c.bf16 %v5002_v60, %v5002_v60  ;;  %v4930_v20 = vadd.f32 %v4853_v63, %v4460_v11  ;;  %v15985_v57 = vld [vmem:[#allocation2 + $0x10] sm:$0xf]  ;;  %v12918_v26 = vld [vmem:[#allocation3 + $0x148] sm:$0xff]   ;;  %v5500_v52 = vld [vmem:[#allocation2 + $0x78] sm:$0xf] }
 0x236   : > { %12076 = vmatpush3.bf16.msra.mxu1 %v12903_v21  ;;  %v5000_v2 = vmax.f32 %v4968_v37, 0.0  ;;  %5481 = vst [vmem:[#allocation2 + $0x54] sm:$0xf] %v5480_v19  ;;  %v5247_v1 = vor.u32 %v5245_v49, %v5244_v48  ;;  %v5249_v45 = vrot.slane %v5244_v48, 4  ;;  %v5230_v55 = vor.u32 %v5228_v44, %v5227_v33  ;;  %v5493_v44 = vld [vmem:[#allocation2 + $0x6c] sm:$0xf] }
 0x237   : > { %12077 = vmatprep.subr.bf16.mxu1 %v12910_v31  ;;  %v5232_v40 = vrot.slane %v5227_v33, 4  ;;  %v5268_v50 = vshrl.u32 %v11548_v23, 16  ;;  %v5271_v39 = vshll.u32 %v11548_v23, 16  ;;  %v4971_v53 = vadd.f32 %v15802_v35, %v4932_v27  ;;  %v15998_v37 = vld [vmem:[#allocation2 + $0xc] sm:$0xf] }
 0x238   : > { %v11546_v7 = vpack.c.bf16 %v5000_v2, %v5000_v2  ;;  %v5248_v14 = vsel %vm15865_vm1, %v5240_v54, %v5247_v1  ;;  %v5491_v21 = vsel %vm15444_vm10, %v5249_v45, %v5490_v62  ;;  %v5231_v17 = vsel %vm15865_vm1, %v5223_v12, %v5230_v55  ;;  %v12595_v55 = vpop.f32.mrf.mxu1 }
 0x239   : > { %v5484_v4 = vsel %vm15444_vm10, %v5232_v40, %v5483_v38  ;;  %5489 = vst [vmem:[#allocation2 + $0x64] sm:$0xf] %v5248_v14  ;;  %5492 = vst [vmem:[#allocation2 + $0x68] sm:$0x1] %v5491_v21  ;;  %v5270_v31 = vrot.slane %v5268_v50, 7  ;;  %v5003_v43 = vmax.f32 %v4971_v53, 0.0  ;;  %v4969_v42 = vadd.f32 %v15802_v35, %v4930_v20  ;;  %v4866_v14 = vpop.f32.mrf.mxu0 }
 0x23a   : > { %12078 = vmatpush3.bf16.msra.mxu1 %v12911_v8  ;;  %5482 = vst [vmem:[#allocation2 + $0x58] sm:$0xf] %v5231_v17  ;;  %5485 = vst [vmem:[#allocation2 + $0x5c] sm:$0x1] %v5484_v4  ;;  %v5251_v54 = vshrl.u32 %v11546_v7, 16  ;;  %v5254_v3 = vshll.u32 %v11546_v7, 16  ;;  %v15991_v11 = vadd.f32 %v4396_v47, %v15716_v13  ;;  %v4935_v28 = vadd.f32 %v12628_v56, %v4465_v5 }
 0x23b   : > { %v11181_v10 = vrot.slane %v6174_v22, 9  ;;  %12079 = vmatprep.subr.bf16.mxu1 %v12918_v26  ;;  %v5273_v9 = vor.u32 %v5271_v39, %v5270_v31  ;;  %v5274_v49 = vrot.slane %v5270_v31, 4  ;;  %v11549_v63 = vpack.c.bf16 %v5003_v43, %v5003_v43  ;;  %v12919_v13 = vld [vmem:[#allocation3 + $0x108] sm:$0xff]  }
 0x23c   : > { %v15993_v25 = vrot.slane %v5251_v54, 7  ;;  %v5001_v29 = vmax.f32 %v4969_v42, 0.0  ;;  %v4974_v6 = vadd.f32 %v15802_v35, %v4935_v28  ;;  %v6230_v12 = vrot.slane %v15985_v57, 5  ;;  %v5504_v20 = vld [vmem:[#allocation2 + $0x80] sm:$0x1] }
 0x23d   : > { %v6233_v60 = vrot.slane %v15987_v58, 5  ;;  %v5501_v8 = vsel %vm15850_vm15, %v5273_v9, %v5500_v52  ;;  %v5276_v27 = vshrl.u32 %v11549_v63, 16  ;;  %v5279_v32 = vshll.u32 %v11549_v63, 16  ;;  %v12922_v21 = vld [vmem:[#allocation3 + $0x1c8] sm:$0xff]   ;;  %v5497_v52 = vld [vmem:[#allocation2 + $0x74] sm:$0x1]  ;;  %v4399_v9 = vpop.f32.mrf.mxu1 }
 0x23e   : > { %v5256_v48 = vor.u32 %v5254_v3, %v15993_v25  ;;  %v5257_v33 = vrot.slane %v15993_v25, 4  ;;  %5502 = vst [vmem:[#allocation2 + $0x78] sm:$0xf] %v5501_v8  ;;  %v11547_v5 = vpack.c.bf16 %v5001_v29, %v5001_v29  ;;  %v5006_v19 = vmax.f32 %v4974_v6, 0.0  ;;  %12080 = vmatpush3.bf16.msra.mxu1 %v12919_v13  ;;  %v12923_v54 = vld [vmem:[#allocation3 + $0x188] sm:$0xff]   ;;  %12191 = vmatprep.subr.bf16.mxu0 %v12922_v21 }
 0x23f   : > { %v6231_v38 = vsel %vm13524_vm7, %v11181_v10, %v6230_v12  ;;  %v5278_v2 = vrot.slane %v5276_v27, 7  ;;  %v6232_v1 = vrot.slane %v6230_v12, 4  ;;  %v5622_v45 = vshrl.u32 %v15998_v37, 16  ;;  %v12876_v10 = vld [vmem:[#allocation2 + $0x24] sm:$0xff]   ;;  %v5514_v29 = vld [vmem:[#allocation2 + $0x90] sm:$0xf]  ;;  %12192 = vmatpush3.bf16.msra.mxu0 %v12923_v54 }
 0x240   : > { %v5494_v23 = vsel %vm15850_vm15, %v5256_v48, %v5493_v44  ;;  %v5259_v40 = vshrl.u32 %v11547_v5, 16  ;;  %v5262_v50 = vshll.u32 %v11547_v5, 16  ;;  %v11552_v39 = vpack.c.bf16 %v5006_v19, %v5006_v19  ;;  %v16022_v8 = vld [vmem:[#allocation2 + $0x18] sm:$0xf]  ;;  %v12629_v48 = vpop.f32.mrf.mxu0 }
 0x241   : > { %5495 = vst [vmem:[#allocation2 + $0x6c] sm:$0xf] %v5494_v23  ;;  %v5625_v7 = vshll.u32 %v15998_v37, 16  ;;  %v5281_v53 = vor.u32 %v5279_v32, %v5278_v2  ;;  %v5283_v47 = vrot.slane %v5278_v2, 4  ;;  %v6234_v56 = vsel %vm13524_vm7, %v6232_v1, %v6233_v60  ;;  %v16032_v23 = vld [vmem:[#allocation2 + $0x20] sm:$0x1]  ;;  %v12598_v1 = vpop.f32.mrf.mxu1 }
 0x242   : > { %v5624_v22 = vrot.slane %v5622_v45, 4  ;;  %v5261_v17 = vrot.slane %v5259_v40, 7  ;;  %v5302_v4 = vshrl.u32 %v11552_v39, 16  ;;  %v5305_v26 = vshll.u32 %v11552_v39, 16 }
 0x243   : > { %v11197_v31 = vcombine.low %v6231_v38, %v6234_v56  ;;  %v5282_v3 = vsel %vm15865_vm1, %v5274_v49, %v5281_v53  ;;  %v5505_v43 = vsel %vm15444_vm10, %v5283_v47, %v5504_v20  ;;  %v5627_v42 = vrot.slane %v5625_v7, 5  ;;  %v16030_v38 = vld [vmem:[#allocation2 + $0x1c] sm:$0xf]  ;;  %v4869_v47 = vpop.f32.mrf.mxu0 }
 0x244   : > { %v5631_v28 = vshll.u32 %v15985_v57, 16  ;;  %5503 = vst [vmem:[#allocation2 + $0x7c] sm:$0xf] %v5282_v3  ;;  %5506 = vst [vmem:[#allocation2 + $0x80] sm:$0x1] %v5505_v43  ;;  %v5264_v25 = vor.u32 %v5262_v50, %v5261_v17  ;;  %v5266_v44 = vrot.slane %v5261_v17, 4  ;;  %v4466_v13 = vadd.f32 %v12595_v55, %v15721_v0 }
 0x245   : > { %v16017_v63 = vrot.slane %v5302_v4, 7  ;;  %6695 = vmatmul.mubr.bf16.gmra.mxu1 %v11197_v31  ;;  %v5635_v49 = vshrl.u32 %v15985_v57, 16  ;;  %v5628_v6 = vor.u32 %v5627_v42, %v5624_v22  ;;  %v5641_v60 = vshll.u32 %v15987_v58, 16  ;;  %v12926_v56 = vld [vmem:[#allocation3 + $0x140] sm:$0xff]   ;;  %v4412_v31 = vpop.f32.mrf.mxu1 }
 0x246   : > { %v5633_v12 = vrot.slane %v5631_v28, 5  ;;  %6702 = vmatprep.mubr.bf16.mxu1 %v12876_v10  ;;  %v5265_v27 = vsel %vm15865_vm1, %v5257_v33, %v5264_v25  ;;  %v5498_v32 = vsel %vm15444_vm10, %v5266_v44, %v5497_v52  ;;  %v4933_v20 = vadd.f32 %v4866_v14, %v15991_v11  ;;  %12081 = vmatprep.subr.bf16.mxu1 %v12926_v56  ;;  %v12927_v42 = vld [vmem:[#allocation3 + $0x100] sm:$0xff]  }
 0x247   : > { %v5307_v5 = vor.u32 %v5305_v26, %v16017_v63  ;;  %v5308_v19 = vrot.slane %v16017_v63, 4  ;;  %5496 = vst [vmem:[#allocation2 + $0x70] sm:$0xf] %v5265_v27  ;;  %5499 = vst [vmem:[#allocation2 + $0x74] sm:$0x1] %v5498_v32  ;;  %v5629_v0 = vrot.slane %v5628_v6, 4  ;;  %v11149_v45 = vcombine.low %v15998_v37, %v15985_v57  ;;  %12082 = vmatpush3.bf16.msra.mxu1 %v12927_v42 }
 0x248   : > { %v5637_v58 = vrot.slane %v5635_v49, 4  ;;  %v5643_v2 = vrot.slane %v5641_v60, 5  ;;  %v5646_v55 = vshrl.u32 %v16022_v8, 16  ;;  %v5649_v40 = vshll.u32 %v16022_v8, 16  ;;  %v18377_v44 = vld [vmem:[#allocation45_spill] sm:$0xff]  ;;  %v12632_v49 = vpop.f32.mrf.mxu0 }
 0x249   : > { %v5515_v33 = vsel %vm15850_vm15, %v5307_v5, %v5514_v29  ;;  %v5634_v39 = vsel %vm13232_vm4, %v5629_v0, %v5633_v12  ;;  %v4972_v53 = vadd.f32 %v15802_v35, %v4933_v20  ;;  %v5655_v11 = vshll.u32 %v16030_v38, 16  ;;  %v6175_v32 = vld [vmem:[#allocation2 + $0x18] sm:$0xe] }
 0x24a   : > { %5516 = vst [vmem:[#allocation2 + $0x90] sm:$0xf] %v5515_v33  ;;  %v5638_v7 = vor.u32 %v5637_v58, %v5633_v12  ;;  %v5648_v22 = vrot.slane %v5646_v55, 4  ;;  %v5651_v14 = vrot.slane %v5649_v40, 5  ;;  %v5659_v21 = vshrl.u32 %v16030_v38, 16  ;;  %v12931_v56 = vld [vmem:[#allocation3 + $0x180] sm:$0xff]  }
 0x24b   : > { %v5665_v57 = vshll.u32 %v16032_v23, 16  ;;  %v5004_v17 = vmax.f32 %v4972_v53, 0.0  ;;  %v5657_v4 = vrot.slane %v5655_v11, 5  ;;  %v6240_v26 = vrot.slane %v16032_v23, 5  ;;  %v16065_v11 = vld [vmem:[%s18129_s2] ss:$0 sm:$0xff] }
 0x24c   : > { %v5639_v37 = vrot.slane %v5638_v7, 4  ;;  %v5652_v54 = vor.u32 %v5651_v14, %v5648_v22  ;;  %v5661_v3 = vrot.slane %v5659_v21, 4  ;;  %v4464_v52 = vadd.f32 %v4399_v9, %v15835_v46  ;;  %v12599_v9 = vpop.f32.mrf.mxu1  ;;  %v5507_v7 = vld [vmem:[#allocation2 + $0x84] sm:$0xf] }
 0x24d   : > { %v5667_v43 = vrot.slane %v5665_v57, 5  ;;  %v11550_v10 = vpack.c.bf16 %v5004_v17, %v5004_v17  ;;  %v4936_v25 = vadd.f32 %v12629_v48, %v4466_v13  ;;  %v4469_v29 = vadd.f32 %v12598_v1, %v18377_v44  ;;  %v12930_v1 = vld [vmem:[#allocation3 + $0x1c0] sm:$0xff]  }
 0x24e   : > { %v5644_v28 = vsel %vm13232_vm4, %v5639_v37, %v5643_v2  ;;  %v5653_v12 = vrot.slane %v5652_v54, 4  ;;  %v5662_v60 = vor.u32 %v5661_v3, %v5657_v4  ;;  %v4934_v27 = vadd.f32 %v4869_v47, %v4464_v52  ;;  %12193 = vmatprep.subr.bf16.mxu0 %v12930_v1  ;;  %v16077_v52 = vld [vmem:[#allocation2 + $0x24] sm:$0xf]  ;;  %v16079_v42 = vpop.f32.mrf.mxu1 }
 0x24f   : > { %v11165_v6 = vcombine.low %v5634_v39, %v5644_v28  ;;  %v5285_v5 = vshrl.u32 %v11550_v10, 16  ;;  %v5288_v0 = vshll.u32 %v11550_v10, 16  ;;  %v4975_v58 = vadd.f32 %v15802_v35, %v4936_v25  ;;  %12194 = vmatpush3.bf16.msra.mxu0 %v12931_v56 }
 0x250   : > { %v4467_v46 = vadd.f32 %v4412_v31, %v15735_v61  ;;  %v5658_v13 = vsel %vm13232_vm4, %v5653_v12, %v5657_v4  ;;  %v5663_v48 = vrot.slane %v5662_v60, 4  ;;  %v4973_v2 = vadd.f32 %v15802_v35, %v4934_v27 }
 0x251   : > { %6951 = vmatprep.mubr.bf16.mxu0 %v11165_v6  ;;  %v4939_v20 = vadd.f32 %v12632_v49, %v4469_v29  ;;  %v16057_v33 = vrot.slane %v5285_v5, 7  ;;  %v5007_v55 = vmax.f32 %v4975_v58, 0.0  ;;  %v11182_v40 = vrot.slane %v6175_v32, 9  ;;  %v5518_v6 = vld [vmem:[#allocation2 + $0x98] sm:$0x1]  ;;  %v12880_v58 = vld [vmem:[#allocation2 + $0x30] sm:$0xff]  }
 0x252   : > { %6952 = vmatmul.mubr.bf16.gmra.mxu0 %v11149_v45  ;;  %v6237_v39 = vrot.slane %v16030_v38, 5  ;;  %v5668_v61 = vsel %vm13232_vm4, %v5663_v48, %v5667_v43  ;;  %v5005_v53 = vmax.f32 %v4973_v2, 0.0  ;;  %v16069_v47 = vadd.f32 %v12599_v9, %v15750_v34  ;;  %v4882_v45 = vpop.f32.mrf.mxu0  ;;  %v12934_v9 = vld [vmem:[#allocation3 + $0x238] sm:$0xff]   ;;  %v5511_v48 = vld [vmem:[#allocation2 + $0x8c] sm:$0x1] }
 0x253   : > { %v4978_v35 = vadd.f32 %v16065_v11, %v4939_v20  ;;  %v5290_v22 = vor.u32 %v5288_v0, %v16057_v33  ;;  %v5291_v14 = vrot.slane %v16057_v33, 4  ;;  %v11166_v21 = vcombine.low %v5658_v13, %v5668_v61  ;;  %v12602_v20 = vpop.f32.mrf.mxu1  ;;  %12638 = vmatprep.subr.bf16.mxu1 %v12934_v9  ;;  %v5528_v61 = vld [vmem:[#allocation2 + $0xa8] sm:$0xf] }
 0x254   : > { %v11553_v57 = vpack.c.bf16 %v5007_v55, %v5007_v55  ;;  %v11551_v37 = vpack.c.bf16 %v5005_v53, %v5005_v53  ;;  %v6238_v4 = vsel %vm13524_vm7, %v11182_v40, %v6237_v39  ;;  %v6239_v31 = vrot.slane %v6237_v39, 4  ;;  %v12633_v29 = vpop.f32.mrf.mxu0 }
 0x255   : > { %v5010_v17 = vmax.f32 %v4978_v35, 0.0  ;;  %v5508_v34 = vsel %vm15850_vm15, %v5290_v22, %v5507_v7  ;;  %6959 = vmatprep.mubr.bf16.mxu0 %v11166_v21  ;;  %v4937_v43 = vadd.f32 %v4882_v45, %v4467_v46  ;;  %v11150_v27 = vcombine.low %v16022_v8, %v16030_v38  ;;  %v16092_v8 = vld [vmem:[#allocation2 + $0x28] sm:$0xf]  ;;  %v16100_v35 = vld [vmem:[#allocation2 + $0x2c] sm:$0x1] }
 0x256   : > { %v5310_v54 = vshrl.u32 %v11553_v57, 16  ;;  %v5313_v3 = vshll.u32 %v11553_v57, 16  ;;  %5509 = vst [vmem:[#allocation2 + $0x84] sm:$0xf] %v5508_v34  ;;  %v5293_v28 = vshrl.u32 %v11551_v37, 16  ;;  %v5296_v10 = vshll.u32 %v11551_v37, 16  ;;  %v4885_v40 = vpop.f32.mrf.mxu0 }
 0x257   : > { %v11556_v25 = vpack.c.bf16 %v5010_v17, %v5010_v17  ;;  %v6241_v44 = vsel %vm13524_vm7, %v6239_v31, %v6240_v26  ;;  %v4976_v60 = vadd.f32 %v16065_v11, %v4937_v43  ;;  %v5670_v46 = vshrl.u32 %v16077_v52, 16 }
 0x258   : > { %v5312_v49 = vrot.slane %v5310_v54, 7  ;;  %v11198_v12 = vcombine.low %v6238_v4, %v6241_v44  ;;  %v5295_v32 = vrot.slane %v5293_v28, 7  ;;  %v5673_v2 = vshll.u32 %v16077_v52, 16  ;;  %v4428_v4 = vpop.f32.mrf.mxu1  ;;  %v5521_v28 = vld [vmem:[#allocation2 + $0x9c] sm:$0xf] }
 0x259   : > { %v5336_v5 = vshrl.u32 %v11556_v25, 16  ;;  %v5339_v0 = vshll.u32 %v11556_v25, 16  ;;  %v5008_v26 = vmax.f32 %v4976_v60, 0.0  ;;  %v5672_v38 = vrot.slane %v5670_v46, 4 }
 0x25a   : > { %v5315_v23 = vor.u32 %v5313_v3, %v5312_v49  ;;  %v5317_v13 = vrot.slane %v5312_v49, 4  ;;  %6703 = vmatmul.mubr.bf16.gmra.mxu1 %v11198_v12  ;;  %6960 = vmatmul.mubr.bf16.gmra.mxu0 %v11150_v27  ;;  %v5298_v1 = vor.u32 %v5296_v10, %v5295_v32  ;;  %v5300_v33 = vrot.slane %v5295_v32, 4  ;;  %v12636_v3 = vpop.f32.mrf.mxu0  ;;  %v6176_v27 = vld [vmem:[#allocation2 + $0x24] sm:$0xe]  ;;  %v9998_v32 = vld [vmem:[%s18132_s5] sm:$0x3] }
 0x25b   : > { %v16090_v55 = vrot.slane %v5336_v5, 7  ;;  %6710 = vmatprep.mubr.bf16.mxu1 %v12880_v58  ;;  %v11554_v53 = vpack.c.bf16 %v5008_v26, %v5008_v26  ;;  %v5675_v45 = vrot.slane %v5673_v2, 5  ;;  %v5679_v17 = vshll.u32 %v16092_v8, 16  ;;  %12732 = vmatprep.subr.msk.bf16.mxu0 %vm921_vm0, %v9998_v32 }
 0x25c   : > { %v5316_v39 = vsel %vm15865_vm1, %v5308_v19, %v5315_v23  ;;  %v5519_v7 = vsel %vm15444_vm10, %v5317_v13, %v5518_v6  ;;  %v5299_v56 = vsel %vm15865_vm1, %v5291_v14, %v5298_v1  ;;  %v5512_v22 = vsel %vm15444_vm10, %v5300_v33, %v5511_v48  ;;  %v4898_v9 = vpop.f32.mrf.mxu0 }
 0x25d   : > { %5517 = vst [vmem:[#allocation2 + $0x94] sm:$0xf] %v5316_v39  ;;  %5520 = vst [vmem:[#allocation2 + $0x98] sm:$0x1] %v5519_v7  ;;  %v5341_v63 = vor.u32 %v5339_v0, %v16090_v55  ;;  %v5342_v19 = vrot.slane %v16090_v55, 4  ;;  %v5319_v21 = vshrl.u32 %v11554_v53, 16  ;;  %v5676_v37 = vor.u32 %v5675_v45, %v5672_v38 }
 0x25e   : > { %5510 = vst [vmem:[#allocation2 + $0x88] sm:$0xf] %v5299_v56  ;;  %5513 = vst [vmem:[#allocation2 + $0x8c] sm:$0x1] %v5512_v22  ;;  %v5322_v57 = vshll.u32 %v11554_v53, 16  ;;  %v5683_v14 = vshrl.u32 %v16092_v8, 16  ;;  %v4468_v44 = vadd.f32 %v16079_v42, %v15838_v51  ;;  %v4940_v12 = vadd.f32 %v12633_v29, %v16069_v47  ;;  %v12603_v51 = vpop.f32.mrf.mxu1 }
 0x25f   : > { %v5529_v31 = vsel %vm15850_vm15, %v5341_v63, %v5528_v61  ;;  %v5689_v34 = vshll.u32 %v16100_v35, 16  ;;  %v6247_v54 = vrot.slane %v16100_v35, 5  ;;  %v16114_v43 = vrot.slane %v5319_v21, 7  ;;  %v16144_v45 = vld [vmem:[#allocation2 + $0x30] sm:$0xf] }
 0x260   : > { %5530 = vst [vmem:[#allocation2 + $0xa8] sm:$0xf] %v5529_v31  ;;  %v5677_v10 = vrot.slane %v5676_v37, 4  ;;  %v5681_v25 = vrot.slane %v5679_v17, 5  ;;  %v5685_v49 = vrot.slane %v5683_v14, 4  ;;  %v4473_v60 = vadd.f32 %v12602_v20, %v15760_v24 }
 0x261   : > { %v5691_v6 = vrot.slane %v5689_v34, 5  ;;  %v5324_v5 = vor.u32 %v5322_v57, %v16114_v43  ;;  %v5325_v0 = vrot.slane %v16114_v43, 4  ;;  %v4938_v46 = vadd.f32 %v4885_v40, %v4468_v44  ;;  %v5532_v31 = vld [vmem:[#allocation2 + $0xb0] sm:$0x1] }
 0x262   : > { %v5682_v58 = vsel %vm13232_vm4, %v5677_v10, %v5681_v25  ;;  %v5686_v42 = vor.u32 %v5685_v49, %v5681_v25  ;;  %v4979_v47 = vadd.f32 %v16065_v11, %v4940_v12  ;;  %v4471_v24 = vadd.f32 %v4428_v4, %v15774_v16  ;;  %v16149_v4 = vld [vmem:[#allocation2 + $0x34] sm:$0xf]  ;;  %v5525_v10 = vld [vmem:[#allocation2 + $0xa4] sm:$0x1] }
 0x263   : > { %v4943_v29 = vadd.f32 %v12636_v3, %v4473_v60  ;;  %v5522_v23 = vsel %vm15850_vm15, %v5324_v5, %v5521_v28  ;;  %v4977_v13 = vadd.f32 %v16065_v11, %v4938_v46  ;;  %v11183_v48 = vrot.slane %v6176_v27, 9 }
 0x264   : > { %v6244_v26 = vrot.slane %v16092_v8, 5  ;;  %5523 = vst [vmem:[#allocation2 + $0x9c] sm:$0xf] %v5522_v23  ;;  %v5687_v2 = vrot.slane %v5686_v42, 4  ;;  %v5011_v20 = vmax.f32 %v4979_v47, 0.0  ;;  %v16136_v33 = vadd.f32 %v12603_v51, %v15786_v36 }
 0x265   : > { %v4982_v1 = vadd.f32 %v16065_v11, %v4943_v29  ;;  %v5009_v38 = vmax.f32 %v4977_v13, 0.0  ;;  %v4941_v39 = vadd.f32 %v4898_v9, %v4471_v24  ;;  %v11151_v35 = vcombine.low %v16077_v52, %v16092_v8  ;;  %v12884_v8 = vld [vmem:[#allocation2 + $0x3c] sm:$0xff]   ;;  %v5585_v29 = vld [vmem:[#allocation2 + $0x38] sm:$0x1]  ;;  %v12637_v9 = vpop.f32.mrf.mxu0 }
 0x266   : > { %v6245_v16 = vsel %vm13524_vm7, %v11183_v48, %v6244_v26  ;;  %v6246_v40 = vrot.slane %v6244_v26, 4  ;;  %v5692_v7 = vsel %vm13232_vm4, %v5687_v2, %v5691_v6  ;;  %v11557_v61 = vpack.c.bf16 %v5011_v20, %v5011_v20 }
 0x267   : > { %v5014_v53 = vmax.f32 %v4982_v1, 0.0  ;;  %v11167_v56 = vcombine.low %v5682_v58, %v5692_v7  ;;  %v11555_v22 = vpack.c.bf16 %v5009_v38, %v5009_v38  ;;  %v4980_v63 = vadd.f32 %v16065_v11, %v4941_v39  ;;  %v5542_v58 = vld [vmem:[#allocation2 + $0xc0] sm:$0xf]  ;;  %v4431_v38 = vpop.f32.mrf.mxu1  ;;  %v6177_v7 = vld [vmem:[#allocation2 + $0x30] sm:$0xe] }
 0x268   : > { %v6248_v36 = vsel %vm13524_vm7, %v6246_v40, %v6247_v54  ;;  %v5344_v21 = vshrl.u32 %v11557_v61, 16  ;;  %v5347_v57 = vshll.u32 %v11557_v61, 16  ;;  %v5694_v3 = vshrl.u32 %v16144_v45, 16 }
 0x269   : > { %v11560_v37 = vpack.c.bf16 %v5014_v53, %v5014_v53  ;;  %v11199_v17 = vcombine.low %v6245_v16, %v6248_v36  ;;  %6967 = vmatprep.mubr.bf16.mxu0 %v11167_v56  ;;  %v5327_v14 = vshrl.u32 %v11555_v22, 16  ;;  %v5330_v34 = vshll.u32 %v11555_v22, 16  ;;  %v4901_v56 = vpop.f32.mrf.mxu0 }
 0x26a   : > { %v5012_v52 = vmax.f32 %v4980_v63, 0.0  ;;  %v5346_v28 = vrot.slane %v5344_v21, 7  ;;  %6968 = vmatmul.mubr.bf16.gmra.mxu0 %v11151_v35  ;;  %v5697_v44 = vshll.u32 %v16144_v45, 16  ;;  %v5696_v12 = vrot.slane %v5694_v3, 4 }
 0x26b   : > { %v5370_v25 = vshrl.u32 %v11560_v37, 16  ;;  %v5373_v54 = vshll.u32 %v11560_v37, 16  ;;  %6711 = vmatmul.mubr.bf16.gmra.mxu1 %v11199_v17  ;;  %v5329_v49 = vrot.slane %v5327_v14, 7  ;;  %v5703_v60 = vshll.u32 %v16149_v4, 16 }
 0x26c   : > { %v11558_v6 = vpack.c.bf16 %v5012_v52, %v5012_v52  ;;  %6718 = vmatprep.mubr.bf16.mxu1 %v12884_v8  ;;  %v5349_v27 = vor.u32 %v5347_v57, %v5346_v28  ;;  %v5351_v32 = vrot.slane %v5346_v28, 4  ;;  %v5699_v46 = vrot.slane %v5697_v44, 5  ;;  %v16179_v57 = vld [vmem:[#allocation2 + $0x3c] sm:$0xf]  ;;  %v16193_v28 = vld [vmem:[#allocation2 + $0x44] sm:$0x1] }
 0x26d   : > { %v16154_v5 = vrot.slane %v5370_v25, 7  ;;  %v5332_v51 = vor.u32 %v5330_v34, %v5329_v49  ;;  %v5334_v42 = vrot.slane %v5329_v49, 4  ;;  %v5705_v40 = vrot.slane %v5703_v60, 5  ;;  %v16186_v34 = vld [vmem:[#allocation2 + $0x40] sm:$0xf] }
 0x26e   : > { %v5353_v47 = vshrl.u32 %v11558_v6, 16  ;;  %v5356_v24 = vshll.u32 %v11558_v6, 16  ;;  %v5350_v23 = vsel %vm15865_vm1, %v5342_v19, %v5349_v27  ;;  %v5533_v13 = vsel %vm15444_vm10, %v5351_v32, %v5532_v31  ;;  %v5535_v19 = vld [vmem:[#allocation2 + $0xb4] sm:$0xf] }
 0x26f   : > { %v5375_v48 = vor.u32 %v5373_v54, %v16154_v5  ;;  %v5376_v26 = vrot.slane %v16154_v5, 4  ;;  %5531 = vst [vmem:[#allocation2 + $0xac] sm:$0xf] %v5350_v23  ;;  %5534 = vst [vmem:[#allocation2 + $0xb0] sm:$0x1] %v5533_v13  ;;  %v5333_v2 = vsel %vm15865_vm1, %v5325_v0, %v5332_v51  ;;  %v5526_v55 = vsel %vm15444_vm10, %v5334_v42, %v5525_v10 }
 0x270   : > { %v16170_v20 = vrot.slane %v5353_v47, 7  ;;  %v5700_v1 = vor.u32 %v5699_v46, %v5696_v12  ;;  %5524 = vst [vmem:[#allocation2 + $0xa0] sm:$0xf] %v5333_v2  ;;  %5527 = vst [vmem:[#allocation2 + $0xa4] sm:$0x1] %v5526_v55  ;;  %v5707_v39 = vshrl.u32 %v16149_v4, 16  ;;  %v4472_v63 = vadd.f32 %v4431_v38, %v15841_v30 }
 0x271   : > { %v5543_v16 = vsel %vm15850_vm15, %v5375_v48, %v5542_v58  ;;  %v5713_v43 = vshll.u32 %v5585_v29, 16  ;;  %v6254_v35 = vrot.slane %v5585_v29, 5  ;;  %v4944_v21 = vadd.f32 %v12637_v9, %v16136_v33  ;;  %v6178_v51 = vld [vmem:[#allocation2 + $0x3c] sm:$0xe]  ;;  %v12888_v47 = vld [vmem:[#allocation2 + $0x48] sm:$0xff]  }
 0x272   : > { %5544 = vst [vmem:[#allocation2 + $0xc0] sm:$0xf] %v5543_v16  ;;  %v5358_v0 = vor.u32 %v5356_v24, %v16170_v20  ;;  %v5359_v61 = vrot.slane %v16170_v20, 4  ;;  %v5701_v53 = vrot.slane %v5700_v1, 4  ;;  %v5709_v22 = vrot.slane %v5707_v39, 4 }
 0x273   : > { %v5715_v36 = vrot.slane %v5713_v43, 5  ;;  %v11184_v31 = vrot.slane %v6177_v7, 9  ;;  %v6251_v14 = vrot.slane %v16149_v4, 5  ;;  %v4983_v8 = vadd.f32 %v16065_v11, %v4944_v21  ;;  %v16204_v9 = vld [vmem:[#allocation2 + $0x48] sm:$0xf] }
 0x274   : > { %v5536_v37 = vsel %vm15850_vm15, %v5358_v0, %v5535_v19  ;;  %v5706_v17 = vsel %vm13232_vm4, %v5701_v53, %v5705_v40  ;;  %v5710_v52 = vor.u32 %v5709_v22, %v5705_v40  ;;  %v4942_v30 = vadd.f32 %v4901_v56, %v4472_v63  ;;  %v5546_v7 = vld [vmem:[#allocation2 + $0xc8] sm:$0x1] }
 0x275   : > { %5537 = vst [vmem:[#allocation2 + $0xb4] sm:$0xf] %v5536_v37  ;;  %v11152_v33 = vcombine.low %v16144_v45, %v16149_v4  ;;  %v6252_v41 = vsel %vm13524_vm7, %v11184_v31, %v6251_v14  ;;  %v6253_v3 = vrot.slane %v6251_v14, 4  ;;  %v5718_v10 = vshrl.u32 %v16179_v57, 16  ;;  %v5539_v37 = vld [vmem:[#allocation2 + $0xbc] sm:$0x1] }
 0x276   : > { %v5721_v25 = vshll.u32 %v16179_v57, 16  ;;  %v5711_v54 = vrot.slane %v5710_v52, 4  ;;  %v5015_v44 = vmax.f32 %v4983_v8, 0.0  ;;  %v4981_v49 = vadd.f32 %v16065_v11, %v4942_v30  ;;  %v16218_v52 = vld [vmem:[#allocation2 + $0x4c] sm:$0xf] }
 0x277   : > { %v5727_v6 = vshll.u32 %v16186_v34, 16  ;;  %v6255_v12 = vsel %vm13524_vm7, %v6253_v3, %v6254_v35  ;;  %v5720_v45 = vrot.slane %v5718_v10, 4  ;;  %v5731_v60 = vshrl.u32 %v16186_v34, 16 }
 0x278   : > { %v5723_v4 = vrot.slane %v5721_v25, 5  ;;  %v5716_v27 = vsel %vm13232_vm4, %v5711_v54, %v5715_v36  ;;  %v11561_v32 = vpack.c.bf16 %v5015_v44, %v5015_v44  ;;  %v5013_v58 = vmax.f32 %v4981_v49, 0.0  ;;  %v6179_v49 = vld [vmem:[#allocation2 + $0x48] sm:$0xe] }
 0x279   : > { %v11200_v46 = vcombine.low %v6252_v41, %v6255_v12  ;;  %v11168_v42 = vcombine.low %v5706_v17, %v5716_v27  ;;  %v5729_v11 = vrot.slane %v5727_v6, 5  ;;  %v5733_v29 = vrot.slane %v5731_v60, 4  ;;  %v5587_v41 = vld [vmem:[#allocation2 + $0x50] sm:$0x1]  ;;  %v16236_v6 = vld [vmem:[#allocation2 + $0x54] sm:$0xf] }
 0x27a   : > { %v5724_v24 = vor.u32 %v5723_v4, %v5720_v45  ;;  %v5378_v23 = vshrl.u32 %v11561_v32, 16  ;;  %v5381_v13 = vshll.u32 %v11561_v32, 16  ;;  %v11559_v48 = vpack.c.bf16 %v5013_v58, %v5013_v58  ;;  %v12892_v12 = vld [vmem:[#allocation2 + $0x54] sm:$0xff]  }
 0x27b   : > { %6719 = vmatmul.mubr.bf16.gmra.mxu1 %v11200_v46  ;;  %v5737_v2 = vshll.u32 %v16193_v28, 16  ;;  %6975 = vmatprep.mubr.bf16.mxu0 %v11168_v42  ;;  %v5734_v19 = vor.u32 %v5733_v29, %v5729_v11  ;;  %v6261_v1 = vrot.slane %v16193_v28, 5  ;;  %v11185_v38 = vrot.slane %v6178_v51, 9  ;;  %v16239_v60 = vld [vmem:[#allocation2 + $0x58] sm:$0xf] }
 0x27c   : > { %6726 = vmatprep.mubr.bf16.mxu1 %v12888_v47  ;;  %v5725_v55 = vrot.slane %v5724_v24, 4  ;;  %v5380_v16 = vrot.slane %v5378_v23, 7  ;;  %v5361_v40 = vshrl.u32 %v11559_v48, 16  ;;  %v5364_v39 = vshll.u32 %v11559_v48, 16  ;;  %6976 = vmatmul.mubr.bf16.gmra.mxu0 %v11152_v33  ;;  %v5588_v51 = vld [vmem:[#allocation2 + $0x5c] sm:$0x1] }
 0x27d   : > { %v5739_v43 = vrot.slane %v5737_v2, 5  ;;  %v5735_v53 = vrot.slane %v5734_v19, 4  ;;  %v6258_v35 = vrot.slane %v16186_v34, 5  ;;  %v11153_v56 = vcombine.low %v16179_v57, %v16186_v34 }
 0x27e   : > { %v5730_v0 = vsel %vm13232_vm4, %v5725_v55, %v5729_v11  ;;  %v5383_v22 = vor.u32 %v5381_v13, %v5380_v16  ;;  %v5385_v36 = vrot.slane %v5380_v16, 4  ;;  %v5363_v63 = vrot.slane %v5361_v40, 7  ;;  %v16248_v55 = vld [vmem:[#allocation2 + $0x60] sm:$0xf] }
 0x27f   : > { %v5742_v21 = vshrl.u32 %v16204_v9, 16  ;;  %v5740_v17 = vsel %vm13232_vm4, %v5735_v53, %v5739_v43  ;;  %v6259_v31 = vsel %vm13524_vm7, %v11185_v38, %v6258_v35  ;;  %v6260_v14 = vrot.slane %v6258_v35, 4 }
 0x280   : > { %v5745_v8 = vshll.u32 %v16204_v9, 16  ;;  %v5384_v57 = vsel %vm15865_vm1, %v5376_v26, %v5383_v22  ;;  %v5547_v34 = vsel %vm15444_vm10, %v5385_v36, %v5546_v7  ;;  %v5366_v30 = vor.u32 %v5364_v39, %v5363_v63  ;;  %v6180_v7 = vld [vmem:[#allocation2 + $0x54] sm:$0xe]  ;;  %v16257_v22 = vld [vmem:[#allocation2 + $0x64] sm:$0xf] }
 0x281   : > { %v5368_v33 = vrot.slane %v5363_v63, 4  ;;  %5545 = vst [vmem:[#allocation2 + $0xc4] sm:$0xf] %v5384_v57  ;;  %5548 = vst [vmem:[#allocation2 + $0xc8] sm:$0x1] %v5547_v34  ;;  %v11169_v3 = vcombine.low %v5730_v0, %v5740_v17  ;;  %v6262_v28 = vsel %vm13524_vm7, %v6260_v14, %v6261_v1  ;;  %v5744_v10 = vrot.slane %v5742_v21, 4 }
 0x282   : > { %v5747_v25 = vrot.slane %v5745_v8, 5  ;;  %v5367_v5 = vsel %vm15865_vm1, %v5359_v61, %v5366_v30  ;;  %v11201_v54 = vcombine.low %v6259_v31, %v6262_v28  ;;  %v5751_v44 = vshll.u32 %v16218_v52, 16  ;;  %v12896_v63 = vld [vmem:[#allocation2 + $0x60] sm:$0xff]   ;;  %v5589_v17 = vld [vmem:[#allocation2 + $0x68] sm:$0x1] }
 0x283   : > { %v5540_v26 = vsel %vm15444_vm10, %v5368_v33, %v5539_v37  ;;  %5538 = vst [vmem:[#allocation2 + $0xb8] sm:$0xf] %v5367_v5  ;;  %6983 = vmatprep.mubr.bf16.mxu0 %v11169_v3  ;;  %v5755_v4 = vshrl.u32 %v16218_v52, 16  ;;  %v5761_v20 = vshll.u32 %v5587_v41, 16  ;;  %v6268_v61 = vrot.slane %v5587_v41, 5 }
 0x284   : > { %5541 = vst [vmem:[#allocation2 + $0xbc] sm:$0x1] %v5540_v26  ;;  %v5748_v45 = vor.u32 %v5747_v25, %v5744_v10  ;;  %6727 = vmatmul.mubr.bf16.gmra.mxu1 %v11201_v54  ;;  %6984 = vmatmul.mubr.bf16.gmra.mxu0 %v11153_v56  ;;  %v5753_v15 = vrot.slane %v5751_v44, 5  ;;  %v6265_v27 = vrot.slane %v16218_v52, 5  ;;  %v11186_v46 = vrot.slane %v6179_v49, 9 }
 0x285   : > { %6734 = vmatprep.mubr.bf16.mxu1 %v12892_v12  ;;  %v5757_v58 = vrot.slane %v5755_v4, 4  ;;  %v5766_v42 = vshrl.u32 %v16236_v6, 16  ;;  %v11154_v24 = vcombine.low %v16204_v9, %v16218_v52  ;;  %v5769_v11 = vshll.u32 %v16236_v6, 16  ;;  %v16273_v49 = vld [vmem:[#allocation2 + $0x6c] sm:$0xf] }
 0x286   : > { %v5749_v32 = vrot.slane %v5748_v45, 4  ;;  %v6267_v47 = vrot.slane %v6265_v27, 4  ;;  %v5775_v29 = vshll.u32 %v16239_v60, 16  ;;  %v5763_v13 = vrot.slane %v5761_v20, 5  ;;  %v16275_v12 = vld [vmem:[#allocation2 + $0x70] sm:$0xf] }
 0x287   : > { %v5758_v23 = vor.u32 %v5757_v58, %v5753_v15  ;;  %v5768_v48 = vrot.slane %v5766_v42, 4  ;;  %v5779_v2 = vshrl.u32 %v16239_v60, 16  ;;  %v5771_v1 = vrot.slane %v5769_v11, 5  ;;  %v12900_v11 = vld [vmem:[#allocation2 + $0x6c] sm:$0xff]  }
 0x288   : > { %v6269_v19 = vsel %vm13524_vm7, %v6267_v47, %v6268_v61  ;;  %v5777_v38 = vrot.slane %v5775_v29, 5  ;;  %v5785_v16 = vshll.u32 %v5588_v51, 16  ;;  %v5754_v9 = vsel %vm13232_vm4, %v5749_v32, %v5753_v15  ;;  %v6181_v15 = vld [vmem:[#allocation2 + $0x60] sm:$0xe] }
 0x289   : > { %v5759_v40 = vrot.slane %v5758_v23, 4  ;;  %v6266_v39 = vsel %vm13524_vm7, %v11186_v46, %v6265_v27  ;;  %v5781_v43 = vrot.slane %v5779_v2, 4  ;;  %v5772_v53 = vor.u32 %v5771_v1, %v5768_v48 }
 0x28a   : > { %v11202_v0 = vcombine.low %v6266_v39, %v6269_v19  ;;  %v6275_v35 = vrot.slane %v5588_v51, 5  ;;  %v6272_v56 = vrot.slane %v16239_v60, 5  ;;  %v5787_v37 = vrot.slane %v5785_v16, 5  ;;  %v5590_v51 = vld [vmem:[#allocation2 + $0x74] sm:$0x1] }
 0x28b   : > { %v5764_v36 = vsel %vm13232_vm4, %v5759_v40, %v5763_v13  ;;  %v5782_v21 = vor.u32 %v5781_v43, %v5777_v38  ;;  %v5790_v31 = vshrl.u32 %v16248_v55, 16  ;;  %v5773_v52 = vrot.slane %v5772_v53, 4  ;;  %v16286_v43 = vld [vmem:[#allocation2 + $0x78] sm:$0xf] }
 0x28c   : > { %v11170_v14 = vcombine.low %v5754_v9, %v5764_v36  ;;  %6735 = vmatmul.mubr.bf16.gmra.mxu1 %v11202_v0  ;;  %v11187_v8 = vrot.slane %v6180_v7, 9  ;;  %v6274_v57 = vrot.slane %v6272_v56, 4  ;;  %v5793_v33 = vshll.u32 %v16248_v55, 16 }
 0x28d   : > { %6742 = vmatprep.mubr.bf16.mxu1 %v12896_v63  ;;  %v5783_v34 = vrot.slane %v5782_v21, 4  ;;  %v5792_v30 = vrot.slane %v5790_v31, 4  ;;  %v5799_v41 = vshll.u32 %v16257_v22, 16  ;;  %v5803_v10 = vshrl.u32 %v16257_v22, 16  ;;  %v6182_v21 = vld [vmem:[#allocation2 + $0x6c] sm:$0xe] }
 0x28e   : > { %6991 = vmatprep.mubr.bf16.mxu0 %v11170_v14  ;;  %v6273_v3 = vsel %vm13524_vm7, %v11187_v8, %v6272_v56  ;;  %v6276_v28 = vsel %vm13524_vm7, %v6274_v57, %v6275_v35  ;;  %v5809_v25 = vshll.u32 %v5589_v17, 16  ;;  %v5778_v5 = vsel %vm13232_vm4, %v5773_v52, %v5777_v38  ;;  %v16294_v56 = vld [vmem:[#allocation2 + $0x7c] sm:$0xf]  ;;  %v5591_v8 = vld [vmem:[#allocation2 + $0x80] sm:$0x1] }
 0x28f   : > { %6992 = vmatmul.mubr.bf16.gmra.mxu0 %v11154_v24  ;;  %v5788_v26 = vsel %vm13232_vm4, %v5783_v34, %v5787_v37  ;;  %v5795_v54 = vrot.slane %v5793_v33, 5  ;;  %v5801_v44 = vrot.slane %v5799_v41, 5  ;;  %v11203_v4 = vcombine.low %v6273_v3, %v6276_v28  ;;  %v12904_v3 = vld [vmem:[#allocation2 + $0x78] sm:$0xff]  }
 0x290   : > { %v11171_v45 = vcombine.low %v5778_v5, %v5788_v26  ;;  %v5805_v20 = vrot.slane %v5803_v10, 4  ;;  %v5811_v27 = vrot.slane %v5809_v25, 5  ;;  %v6282_v32 = vrot.slane %v5589_v17, 5  ;;  %v16305_v26 = vld [vmem:[#allocation2 + $0x84] sm:$0xf] }
 0x291   : > { %v5796_v61 = vor.u32 %v5795_v54, %v5792_v30  ;;  %v6279_v58 = vrot.slane %v16257_v22, 5  ;;  %v5814_v42 = vshrl.u32 %v16273_v49, 16  ;;  %v5817_v47 = vshll.u32 %v16273_v49, 16 }
 0x292   : > { %6999 = vmatprep.mubr.bf16.mxu0 %v11171_v45  ;;  %v5806_v46 = vor.u32 %v5805_v20, %v5801_v44  ;;  %v5823_v24 = vshll.u32 %v16275_v12, 16  ;;  %v11188_v23 = vrot.slane %v6181_v15, 9  ;;  %v5827_v48 = vshrl.u32 %v16275_v12, 16  ;;  %v16313_v20 = vld [vmem:[#allocation2 + $0x88] sm:$0xf] }
 0x293   : > { %v5797_v29 = vrot.slane %v5796_v61, 4  ;;  %v6281_v13 = vrot.slane %v6279_v58, 4  ;;  %v5816_v19 = vrot.slane %v5814_v42, 4  ;;  %v5819_v1 = vrot.slane %v5817_v47, 5 }
 0x294   : > { %6743 = vmatmul.mubr.bf16.gmra.mxu1 %v11203_v4  ;;  %v5807_v2 = vrot.slane %v5806_v46, 4  ;;  %v5825_v38 = vrot.slane %v5823_v24, 5  ;;  %v11155_v16 = vcombine.low %v16236_v6, %v16239_v60  ;;  %v5829_v40 = vrot.slane %v5827_v48, 4 }
 0x295   : > { %6750 = vmatprep.mubr.bf16.mxu1 %v12900_v11  ;;  %v6283_v9 = vsel %vm13524_vm7, %v6281_v13, %v6282_v32  ;;  %v5833_v39 = vshll.u32 %v5590_v51, 16  ;;  %v5802_v7 = vsel %vm13232_vm4, %v5797_v29, %v5801_v44  ;;  %v6280_v53 = vsel %vm13524_vm7, %v11188_v23, %v6279_v58 }
 0x296   : > { %v5812_v0 = vsel %vm13232_vm4, %v5807_v2, %v5811_v27  ;;  %v5820_v35 = vor.u32 %v5819_v1, %v5816_v19  ;;  %v11204_v60 = vcombine.low %v6280_v53, %v6283_v9  ;;  %v11156_v36 = vcombine.low %v16248_v55, %v16257_v22  ;;  %v16330_v53 = vld [vmem:[#allocation2 + $0x94] sm:$0xf] }
 0x297   : > { %7000 = vmatmul.mubr.bf16.gmra.mxu0 %v11155_v16  ;;  %v11172_v6 = vcombine.low %v5802_v7, %v5812_v0  ;;  %v5830_v63 = vor.u32 %v5829_v40, %v5825_v38  ;;  %v5835_v17 = vrot.slane %v5833_v39, 5  ;;  %v6286_v31 = vrot.slane %v16275_v12, 5  ;;  %v16328_v0 = vld [vmem:[#allocation2 + $0x90] sm:$0xf] }
 0x298   : > { %v5821_v37 = vrot.slane %v5820_v35, 4  ;;  %v5838_v14 = vshrl.u32 %v16286_v43, 16  ;;  %v5841_v57 = vshll.u32 %v16286_v43, 16  ;;  %v5847_v34 = vshll.u32 %v16294_v56, 16  ;;  %v12908_v35 = vld [vmem:[#allocation2 + $0x84] sm:$0xff]  }
 0x299   : > { %7007 = vmatprep.mubr.bf16.mxu0 %v11172_v6  ;;  %v5831_v52 = vrot.slane %v5830_v63, 4  ;;  %v5851_v30 = vshrl.u32 %v16294_v56, 16  ;;  %v6289_v33 = vrot.slane %v5590_v51, 5  ;;  %v11189_v41 = vrot.slane %v6182_v21, 9  ;;  %v6183_v51 = vld [vmem:[#allocation2 + $0x78] sm:$0xe] }
 0x29a   : > { %v6288_v55 = vrot.slane %v6286_v31, 4  ;;  %v5840_v22 = vrot.slane %v5838_v14, 4  ;;  %v5843_v10 = vrot.slane %v5841_v57, 5  ;;  %v5849_v25 = vrot.slane %v5847_v34, 5 }
 0x29b   : > { %v5836_v28 = vsel %vm13232_vm4, %v5831_v52, %v5835_v17  ;;  %v5853_v5 = vrot.slane %v5851_v30, 4  ;;  %v5826_v54 = vsel %vm13232_vm4, %v5821_v37, %v5825_v38  ;;  %v6287_v44 = vsel %vm13524_vm7, %v11189_v41, %v6286_v31  ;;  %v6184_v31 = vld [vmem:[#allocation2 + $0x84] sm:$0xe] }
 0x29c   : > { %6751 = vmatmul.mubr.bf16.gmra.mxu1 %v11204_v60  ;;  %v11157_v45 = vcombine.low %v16273_v49, %v16275_v12  ;;  %v5857_v4 = vshll.u32 %v5591_v8, 16  ;;  %v11173_v15 = vcombine.low %v5826_v54, %v5836_v28  ;;  %v6290_v61 = vsel %vm13524_vm7, %v6288_v55, %v6289_v33  ;;  %v5592_v12 = vld [vmem:[#allocation2 + $0x8c] sm:$0x1] }
 0x29d   : > { %6758 = vmatprep.mubr.bf16.mxu1 %v12904_v3  ;;  %v5844_v27 = vor.u32 %v5843_v10, %v5840_v22  ;;  %v5854_v32 = vor.u32 %v5853_v5, %v5849_v25  ;;  %v6296_v46 = vrot.slane %v5591_v8, 5  ;;  %v6293_v42 = vrot.slane %v16294_v56, 5  ;;  %v5593_v8 = vld [vmem:[#allocation2 + $0x98] sm:$0x1] }
 0x29e   : > { %v5859_v58 = vrot.slane %v5857_v4, 5  ;;  %v5862_v47 = vshrl.u32 %v16305_v26, 16  ;;  %v5865_v11 = vshll.u32 %v16305_v26, 16  ;;  %v5871_v29 = vshll.u32 %v16313_v20, 16 }
 0x29f   : > { %7008 = vmatmul.mubr.bf16.gmra.mxu0 %v11156_v36  ;;  %v5845_v24 = vrot.slane %v5844_v27, 4  ;;  %v5855_v49 = vrot.slane %v5854_v32, 4  ;;  %v11205_v23 = vcombine.low %v6287_v44, %v6290_v61  ;;  %v6295_v13 = vrot.slane %v6293_v42, 4  ;;  %v16345_v44 = vld [vmem:[#allocation2 + $0x9c] sm:$0xf]  ;;  %v12912_v32 = vld [vmem:[#allocation2 + $0x90] sm:$0xff]  }
 0x2a0   : > { %7015 = vmatprep.mubr.bf16.mxu0 %v11173_v15  ;;  %v5864_v48 = vrot.slane %v5862_v47, 4  ;;  %v5875_v2 = vshrl.u32 %v16313_v20, 16  ;;  %v11190_v1 = vrot.slane %v6183_v51, 9  ;;  %v5867_v38 = vrot.slane %v5865_v11, 5  ;;  %v16353_v27 = vld [vmem:[#allocation2 + $0xa0] sm:$0xf] }
 0x2a1   : > { %v5860_v19 = vsel %vm13232_vm4, %v5855_v49, %v5859_v58  ;;  %v5873_v16 = vrot.slane %v5871_v29, 5  ;;  %v5850_v9 = vsel %vm13232_vm4, %v5845_v24, %v5849_v25  ;;  %v6297_v40 = vsel %vm13524_vm7, %v6295_v13, %v6296_v46 }
 0x2a2   : > { %v5877_v39 = vrot.slane %v5875_v2, 4  ;;  %v5881_v7 = vshll.u32 %v5592_v12, 16  ;;  %v11174_v6 = vcombine.low %v5850_v9, %v5860_v19  ;;  %v6294_v60 = vsel %vm13524_vm7, %v11190_v1, %v6293_v42  ;;  %v6185_v42 = vld [vmem:[#allocation2 + $0x90] sm:$0xe] }
 0x2a3   : > { %v11158_v36 = vcombine.low %v16286_v43, %v16294_v56  ;;  %v5868_v63 = vor.u32 %v5867_v38, %v5864_v48  ;;  %v11206_v21 = vcombine.low %v6294_v60, %v6297_v40  ;;  %v6303_v17 = vrot.slane %v5592_v12, 5  ;;  %v5594_v12 = vld [vmem:[#allocation2 + $0xa4] sm:$0x1] }
 0x2a4   : > { %6759 = vmatmul.mubr.bf16.gmra.mxu1 %v11205_v23  ;;  %v5878_v37 = vor.u32 %v5877_v39, %v5873_v16  ;;  %v6300_v14 = vrot.slane %v16313_v20, 5  ;;  %v5886_v57 = vshrl.u32 %v16328_v0, 16  ;;  %v5889_v34 = vshll.u32 %v16328_v0, 16 }
 0x2a5   : > { %6766 = vmatprep.mubr.bf16.mxu1 %v12908_v35  ;;  %v5869_v52 = vrot.slane %v5868_v63, 4  ;;  %v5895_v30 = vshll.u32 %v16330_v53, 16  ;;  %v5883_v41 = vrot.slane %v5881_v7, 5  ;;  %v5899_v56 = vshrl.u32 %v16330_v53, 16  ;;  %v16366_v35 = vld [vmem:[#allocation2 + $0xa8] sm:$0xf] }
 0x2a6   : > { %v5879_v33 = vrot.slane %v5878_v37, 4  ;;  %v6302_v43 = vrot.slane %v6300_v14, 4  ;;  %v11191_v55 = vrot.slane %v6184_v31, 9  ;;  %v5888_v22 = vrot.slane %v5886_v57, 4  ;;  %v16374_v37 = vld [vmem:[#allocation2 + $0xac] sm:$0xf] }
 0x2a7   : > { %7016 = vmatmul.mubr.bf16.gmra.mxu0 %v11157_v45  ;;  %v5891_v3 = vrot.slane %v5889_v34, 5  ;;  %v5897_v28 = vrot.slane %v5895_v30, 5  ;;  %v5901_v5 = vrot.slane %v5899_v56, 4  ;;  %v5905_v54 = vshll.u32 %v5593_v8, 16  ;;  %v5595_v30 = vld [vmem:[#allocation2 + $0xb0] sm:$0x1] }
 0x2a8   : > { %7023 = vmatprep.mubr.bf16.mxu0 %v11174_v6  ;;  %v5884_v10 = vsel %vm13232_vm4, %v5879_v33, %v5883_v41  ;;  %v6304_v25 = vsel %vm13524_vm7, %v6302_v43, %v6303_v17  ;;  %v5874_v4 = vsel %vm13232_vm4, %v5869_v52, %v5873_v16  ;;  %v6301_v45 = vsel %vm13524_vm7, %v11191_v55, %v6300_v14 }
 0x2a9   : > { %v11159_v15 = vcombine.low %v16305_v26, %v16313_v20  ;;  %v5892_v61 = vor.u32 %v5891_v3, %v5888_v22  ;;  %v11175_v58 = vcombine.low %v5874_v4, %v5884_v10  ;;  %v11207_v46 = vcombine.low %v6301_v45, %v6304_v25  ;;  %v12916_v22 = vld [vmem:[#allocation2 + $0x9c] sm:$0xff]  }
 0x2aa   : > { %v5902_v51 = vor.u32 %v5901_v5, %v5897_v28  ;;  %v6307_v47 = vrot.slane %v16330_v53, 5  ;;  %v6310_v49 = vrot.slane %v5593_v8, 5  ;;  %v5910_v11 = vshrl.u32 %v16345_v44, 16 }
 0x2ab   : > { %v5893_v24 = vrot.slane %v5892_v61, 4  ;;  %v5913_v29 = vshll.u32 %v16345_v44, 16  ;;  %v5907_v13 = vrot.slane %v5905_v54, 5  ;;  %v5919_v2 = vshll.u32 %v16353_v27, 16  ;;  %v16389_v61 = vld [vmem:[#allocation2 + $0xb4] sm:$0xf] }
 0x2ac   : > { %6767 = vmatmul.mubr.bf16.gmra.mxu1 %v11206_v21  ;;  %v5903_v23 = vrot.slane %v5902_v51, 4  ;;  %v6309_v48 = vrot.slane %v6307_v47, 4  ;;  %v11192_v19 = vrot.slane %v6185_v42, 9  ;;  %v5912_v1 = vrot.slane %v5910_v11, 4  ;;  %v16399_v42 = vld [vmem:[#allocation2 + $0xb8] sm:$0xf] }
 0x2ad   : > { %6774 = vmatprep.mubr.bf16.mxu1 %v12912_v32  ;;  %v5915_v38 = vrot.slane %v5913_v29, 5  ;;  %v5923_v16 = vshrl.u32 %v16353_v27, 16  ;;  %v5921_v39 = vrot.slane %v5919_v2, 5  ;;  %v5929_v7 = vshll.u32 %v5594_v12, 16  ;;  %v6187_v11 = vld [vmem:[#allocation2 + $0xa8] sm:$0xe] }
 0x2ae   : > { %v5908_v9 = vsel %vm13232_vm4, %v5903_v23, %v5907_v13  ;;  %v16364_v40 = vsel %vm13524_vm7, %v6309_v48, %v6310_v49  ;;  %v5898_v6 = vsel %vm13232_vm4, %v5893_v24, %v5897_v28  ;;  %v16372_v60 = vsel %vm13524_vm7, %v11192_v19, %v6307_v47  ;;  %v5596_v19 = vld [vmem:[#allocation2 + $0xbc] sm:$0x1] }
 0x2af   : > { %7024 = vmatmul.mubr.bf16.gmra.mxu0 %v11158_v36  ;;  %v5916_v63 = vor.u32 %v5915_v38, %v5912_v1  ;;  %v5925_v21 = vrot.slane %v5923_v16, 4  ;;  %v11176_v17 = vcombine.low %v5898_v6, %v5908_v9  ;;  %v11208_v31 = vcombine.low %v16372_v60, %v16364_v40  ;;  %v6186_v36 = vld [vmem:[#allocation2 + $0x9c] sm:$0xe]  ;;  %v12920_v60 = vld [vmem:[#allocation2 + $0xa8] sm:$0xff]  }
 0x2b0   : > { %7031 = vmatprep.mubr.bf16.mxu0 %v11175_v58  ;;  %v11160_v14 = vcombine.low %v16328_v0, %v16330_v53  ;;  %v6314_v52 = vrot.slane %v16353_v27, 5  ;;  %v5931_v34 = vrot.slane %v5929_v7, 5  ;;  %v5934_v33 = vshrl.u32 %v16366_v35, 16  ;;  %v16441_v0 = vld [vmem:[#allocation2 + $0x1c] sm:$0xf] }
 0x2b1   : > { %v5917_v8 = vrot.slane %v5916_v63, 4  ;;  %v5926_v57 = vor.u32 %v5925_v21, %v5921_v39  ;;  %v6317_v41 = vrot.slane %v5594_v12, 5  ;;  %v5937_v56 = vshll.u32 %v16366_v35, 16 }
 0x2b2   : > { %v6316_v43 = vrot.slane %v6314_v52, 4  ;;  %v5943_v55 = vshll.u32 %v16374_v37, 16  ;;  %v11193_v28 = vrot.slane %v6186_v36, 9  ;;  %v5936_v10 = vrot.slane %v5934_v33, 4  ;;  %v6188_v33 = vld [vmem:[#allocation2 + $0xb4] sm:$0xe] }
 0x2b3   : > { %v5927_v3 = vrot.slane %v5926_v57, 4  ;;  %v5947_v25 = vshrl.u32 %v16374_v37, 16  ;;  %v5939_v54 = vrot.slane %v5937_v56, 5  ;;  %v5953_v45 = vshll.u32 %v5595_v30, 16 }
 0x2b4   : > { %6775 = vmatmul.mubr.bf16.gmra.mxu1 %v11207_v46  ;;  %v16387_v5 = vsel %vm13524_vm7, %v6316_v43, %v6317_v41  ;;  %v5945_v4 = vrot.slane %v5943_v55, 5  ;;  %v5922_v32 = vsel %vm13232_vm4, %v5917_v8, %v5921_v39  ;;  %v16395_v58 = vsel %vm13524_vm7, %v11193_v28, %v6314_v52  ;;  %v7073_v52 = vld [vmem:[#allocation2 + $0x10] sm:$0xf]  ;;  %v7074_v41 = vld [vmem:[#allocation2 + $0x14] sm:$0x1] }
 0x2b5   : > { %6782 = vmatprep.mubr.bf16.mxu1 %v12916_v22  ;;  %v11161_v46 = vcombine.low %v16345_v44, %v16353_v27  ;;  %v5949_v51 = vrot.slane %v5947_v25, 4  ;;  %v5932_v47 = vsel %vm13232_vm4, %v5927_v3, %v5931_v34  ;;  %v11209_v24 = vcombine.low %v16395_v58, %v16387_v5  ;;  %v7504_v25 = vld [vmem:[#allocation2 + $0xc] sm:$0xe] }
 0x2b6   : > { %v5940_v49 = vor.u32 %v5939_v54, %v5936_v10  ;;  %v6324_v12 = vrot.slane %v5595_v30, 5  ;;  %v5955_v23 = vrot.slane %v5953_v45, 5  ;;  %v6321_v13 = vrot.slane %v16374_v37, 5 }
 0x2b7   : > { %7032 = vmatmul.mubr.bf16.gmra.mxu0 %v11159_v15  ;;  %v5950_v29 = vor.u32 %v5949_v51, %v5945_v4  ;;  %v5958_v48 = vshrl.u32 %v16389_v61, 16  ;;  %v5961_v1 = vshll.u32 %v16389_v61, 16  ;;  %v5967_v38 = vshll.u32 %v16399_v42, 16  ;;  %v16433_v51 = vld [vmem:[#allocation2 + $0x18] sm:$0xf] }
 0x2b8   : > { %7039 = vmatprep.mubr.bf16.mxu0 %v11176_v17  ;;  %v5941_v2 = vrot.slane %v5940_v49, 4  ;;  %v5971_v16 = vshrl.u32 %v16399_v42, 16  ;;  %v11194_v40 = vrot.slane %v6187_v11, 9  ;;  %v6323_v39 = vrot.slane %v6321_v13, 4 }
 0x2b9   : > { %v5951_v9 = vrot.slane %v5950_v29, 4  ;;  %v5960_v26 = vrot.slane %v5958_v48, 4  ;;  %v11177_v20 = vcombine.low %v5922_v32, %v5932_v47  ;;  %v5963_v15 = vrot.slane %v5961_v1, 5 }
 0x2ba   : > { %v5969_v7 = vrot.slane %v5967_v38, 5  ;;  %v5973_v6 = vrot.slane %v5971_v16, 4  ;;  %v16417_v21 = vsel %vm13524_vm7, %v11194_v40, %v6321_v13  ;;  %v11162_v17 = vcombine.low %v16366_v35, %v16374_v37  ;;  %v7072_v38 = vld [vmem:[#allocation2 + $0xc] sm:$0xf]  ;;  %v12924_v16 = vld [vmem:[#allocation2 + $0xb4] sm:$0xff]  }
 0x2bb   : > { %v5956_v63 = vsel %vm13232_vm4, %v5951_v9, %v5955_v23  ;;  %v5977_v36 = vshll.u32 %v5596_v19, 16  ;;  %v5946_v8 = vsel %vm13232_vm4, %v5941_v2, %v5945_v4  ;;  %v16425_v57 = vsel %vm13524_vm7, %v6323_v39, %v6324_v12  ;;  %v7080_v37 = vld [vmem:[#allocation2 + $0x2c] sm:$0x1] }
 0x2bc   : > { %6783 = vmatmul.mubr.bf16.gmra.mxu1 %v11208_v31  ;;  %v5964_v34 = vor.u32 %v5963_v15, %v5960_v26  ;;  %v5974_v30 = vor.u32 %v5973_v6, %v5969_v7  ;;  %v11178_v43 = vcombine.low %v5946_v8, %v5956_v63  ;;  %v6331_v55 = vrot.slane %v5596_v19, 5  ;;  %v8163_v19 = vld [vmem:[#allocation2 + $0x20] sm:$0x1] }
 0x2bd   : > { %6790 = vmatprep.mubr.bf16.mxu1 %v12920_v60  ;;  %v5979_v56 = vrot.slane %v5977_v36, 5  ;;  %v6328_v22 = vrot.slane %v16399_v42, 5  ;;  %v7130_v31 = vshll.u32 %v7073_v52, 16  ;;  %v7134_v10 = vshrl.u32 %v7073_v52, 16  ;;  %v16467_v60 = vld [vmem:[#allocation2 + $0x1c] sm:$0xf] }
 0x2be   : > { %v5965_v3 = vrot.slane %v5964_v34, 4  ;;  %v5975_v28 = vrot.slane %v5974_v30, 4  ;;  %v11210_v54 = vcombine.low %v16417_v21, %v16425_v57  ;;  %v11195_v4 = vrot.slane %v6188_v33, 9  ;;  %v7077_v34 = vld [vmem:[#allocation2 + $0x20] sm:$0x1] }
 0x2bf   : > { %7040 = vmatmul.mubr.bf16.gmra.mxu0 %v11160_v14  ;;  %v6330_v45 = vrot.slane %v6328_v22, 4  ;;  %v7140_v32 = vshll.u32 %v7074_v41, 16  ;;  %v11163_v49 = vcombine.low %v16389_v61, %v16399_v42  ;;  %v16439_v12 = vrot.slane %v7130_v31, 5  ;;  %v16567_v42 = vld [vmem:[#allocation2 + $0x34] sm:$0xf] }
 0x2c0   : > { %7047 = vmatprep.mubr.bf16.mxu0 %v11177_v20  ;;  %v5980_v47 = vsel %vm13232_vm4, %v5975_v28, %v5979_v56  ;;  %v7136_v11 = vrot.slane %v7134_v10, 4  ;;  %v5970_v53 = vsel %vm13232_vm4, %v5965_v3, %v5969_v7  ;;  %v16447_v14 = vsel %vm13524_vm7, %v11195_v4, %v6328_v22  ;;  %v7505_v22 = vld [vmem:[#allocation2 + $0x18] sm:$0xe] }
 0x2c1   : > { %v11260_v29 = vrot.slane %v7504_v25, 9  ;;  %v7570_v23 = vrot.slane %v7073_v52, 5  ;;  %v16449_v13 = vcombine.low %v5970_v53, %v5980_v47  ;;  %v16453_v48 = vsel %vm13524_vm7, %v6330_v45, %v6331_v55  ;;  %v16490_v25 = vld [vmem:[#allocation2 + $0x24] sm:$0xf]  ;;  %v16494_v45 = vld [vmem:[#allocation2 + $0x28] sm:$0xf] }
 0x2c2   : > { %v7137_v2 = vor.u32 %v7136_v11, %v16439_v12  ;;  %v8180_v1 = vshrl.u32 %v16433_v51, 16  ;;  %v16457_v9 = vrot.slane %v7140_v32, 5  ;;  %v8183_v39 = vshll.u32 %v16433_v51, 16  ;;  %v12928_v53 = vld [vmem:[#allocation2 + $0xc0] sm:$0xff]  }
 0x2c3   : > { %v7572_v40 = vrot.slane %v7570_v23, 4  ;;  %v8189_v26 = vshll.u32 %v16441_v0, 16  ;;  %v7573_v15 = vrot.slane %v7074_v41, 5  ;;  %v8193_v6 = vshrl.u32 %v16441_v0, 16 }
 0x2c4   : > { %6791 = vmatmul.mubr.bf16.gmra.mxu1 %v11209_v24  ;;  %v16464_v20 = vrot.slane %v7137_v2, 4  ;;  %v8182_v7 = vrot.slane %v8180_v1, 4  ;;  %v11211_v63 = vcombine.low %v16447_v14, %v16453_v48  ;;  %v8185_v36 = vrot.slane %v8183_v39, 5  ;;  %v12963_v14 = vld [vmem:[%s18132_s5] sm:$0x3] }
 0x2c5   : > { %6798 = vmatprep.mubr.bf16.mxu1 %v12924_v16  ;;  %v8191_v52 = vrot.slane %v8189_v26, 5  ;;  %v8199_v8 = vshll.u32 %v8163_v19, 16  ;;  %v16473_v5 = vsel %vm13524_vm7, %v11260_v29, %v7570_v23  ;;  %v16477_v58 = vsel %vm13524_vm7, %v7572_v40, %v7573_v15 }
 0x2c6   : > { %v8195_v24 = vrot.slane %v8193_v6, 4  ;;  %v11324_v30 = vcombine.low %v16433_v51, %v16441_v0  ;;  %v8186_v33 = vor.u32 %v8185_v36, %v8182_v7  ;;  %v7121_v41 = vshrl.u32 %v7072_v38, 16  ;;  %v7075_v6 = vld [vmem:[#allocation2 + $0x18] sm:$0xf]  ;;  %v16596_v0 = vld [vmem:[#allocation2 + $0x40] sm:$0xf] }
 0x2c7   : > { %7048 = vmatmul.mubr.bf16.gmra.mxu0 %v11161_v46  ;;  %v7124_v56 = vshll.u32 %v7072_v38, 16  ;;  %v7158_v55 = vshrl.u32 %v16467_v60, 16  ;;  %v7143_v3 = vsel %vm13232_vm4, %v16464_v20, %v16457_v9  ;;  %v7164_v31 = vshll.u32 %v7077_v34, 16  ;;  %v8164_v38 = vld [vmem:[#allocation2 + $0x2c] sm:$0x1] }
 0x2c8   : > { %7055 = vmatprep.mubr.bf16.mxu0 %v11178_v43  ;;  %v8196_v28 = vor.u32 %v8195_v24, %v8191_v52  ;;  %v7577_v10 = vrot.slane %v16467_v60, 5  ;;  %v11292_v44 = vcombine.low %v16473_v5, %v16477_v58  ;;  %v8201_v27 = vrot.slane %v8199_v8, 5  ;;  %v16523_v58 = vld [vmem:[#allocation2 + $0x28] sm:$0xf] }
 0x2c9   : > { %v7123_v46 = vrot.slane %v7121_v41, 4  ;;  %v7126_v4 = vrot.slane %v7124_v56, 5  ;;  %v8187_v43 = vrot.slane %v8186_v33, 4  ;;  %v16496_v47 = vrot.slane %v7158_v55, 4 }
 0x2ca   : > { %v8197_v32 = vrot.slane %v8196_v28, 4  ;;  %v11261_v11 = vrot.slane %v7505_v22, 9  ;;  %v16498_v23 = vrot.slane %v7164_v31, 5  ;;  %v7579_v2 = vrot.slane %v7577_v10, 4 }
 0x2cb   : > { %v7127_v29 = vor.u32 %v7126_v4, %v7123_v46  ;;  %v8204_v19 = vshrl.u32 %v16490_v25, 16  ;;  %v8207_v16 = vshll.u32 %v16490_v25, 16  ;;  %v8213_v9 = vshll.u32 %v16494_v45, 16 }
 0x2cc   : > { %6799 = vmatmul.mubr.bf16.gmra.mxu1 %v11210_v54  ;;  %v8202_v1 = vsel %vm13232_vm4, %v8197_v32, %v8201_v27  ;;  %v8217_v40 = vshrl.u32 %v16494_v45, 16  ;;  %v16511_v26 = vsel %vm13524_vm7, %v11261_v11, %v7577_v10  ;;  %v7580_v20 = vrot.slane %v7077_v34, 5  ;;  %v16544_v11 = vld [vmem:[#allocation2 + $0x30] sm:$0xf] }
 0x2cd   : > { %6806 = vmatprep.mubr.bf16.mxu1 %v12928_v53  ;;  %v7128_v39 = vrot.slane %v7127_v29, 4  ;;  %v8206_v15 = vrot.slane %v8204_v19, 4  ;;  %v8192_v21 = vsel %vm13232_vm4, %v8187_v43, %v8191_v52  ;;  %v8209_v57 = vrot.slane %v8207_v16, 5  ;;  %v16546_v53 = vld [vmem:[#allocation2 + $0x34] sm:$0xf] }
 0x2ce   : > { %v8215_v54 = vrot.slane %v8213_v9, 5  ;;  %v8219_v7 = vrot.slane %v8217_v40, 4  ;;  %v11340_v36 = vcombine.low %v8192_v21, %v8202_v1  ;;  %v16520_v8 = vsel %vm13524_vm7, %v7579_v2, %v7580_v20  ;;  %v7506_v2 = vld [vmem:[#allocation2 + $0x24] sm:$0xe]  ;;  %v8165_v9 = vld [vmem:[#allocation2 + $0x38] sm:$0x1] }
 0x2cf   : > { %7056 = vmatmul.mubr.bf16.gmra.mxu0 %v11162_v17  ;;  %v8223_v5 = vshll.u32 %v8164_v38, 16  ;;  %v18163_v34 = vrot.slane %v16494_v45, 5  ;;  %v7133_v52 = vsel %vm13232_vm4, %v7128_v39, %v16439_v12  ;;  %v8210_v24 = vor.u32 %v8209_v57, %v8206_v15  ;;  %v7078_v57 = vld [vmem:[#allocation2 + $0x24] sm:$0xf] }
 0x2d0   : > { %7063 = vmatprep.mubr.bf16.mxu0 %v16449_v13  ;;  %v8220_v33 = vor.u32 %v8219_v7, %v8215_v54  ;;  %v9105_v35 = vrot.slane %v8164_v38, 5  ;;  %v7145_v56 = vshrl.u32 %v7075_v6, 16  ;;  %v7148_v55 = vshll.u32 %v7075_v6, 16 }
 0x2d1   : > { %v8225_v17 = vrot.slane %v8223_v5, 5  ;;  %v9104_v41 = vrot.slane %v18163_v34, 4  ;;  %v8211_v22 = vrot.slane %v8210_v24, 4  ;;  %v7154_v31 = vshll.u32 %v16467_v60, 16  ;;  %v7083_v24 = vld [vmem:[#allocation2 + $0x38] sm:$0x1] }
 0x2d2   : > { %v8221_v28 = vrot.slane %v8220_v33, 4  ;;  %v7182_v13 = vshrl.u32 %v16523_v58, 16  ;;  %v7147_v12 = vrot.slane %v7145_v56, 4  ;;  %v7150_v27 = vrot.slane %v7148_v55, 5 }
 0x2d3   : > { %v16535_v10 = vsel %vm13524_vm7, %v9104_v41, %v9105_v35  ;;  %v7188_v46 = vshll.u32 %v7080_v37, 16  ;;  %v11276_v4 = vcombine.low %v7133_v52, %v7143_v3  ;;  %v11293_v43 = vcombine.low %v16511_v26, %v16520_v8  ;;  %v12936_v52 = vld [vmem:[#allocation3 + $0x230] sm:$0xff]  }
 0x2d4   : > { %6807 = vmatmul.mubr.bf16.gmra.mxu1 %v11211_v63  ;;  %v8226_v60 = vsel %vm13232_vm4, %v8221_v28, %v8225_v17  ;;  %v7156_v32 = vrot.slane %v7154_v31, 5  ;;  %v8216_v29 = vsel %vm13232_vm4, %v8211_v22, %v8215_v54  ;;  %v10096_v48 = vsel %vm921_vm0, %v12963_v14, 0  ;;  %v12964_v28 = vld [vmem:[#allocation3 + $0x238] sm:$0xff]  }
 0x2d5   : > { %7969 = vmatprep.mubr.bf16.mxu1 %v11292_v44  ;;  %v7151_v63 = vor.u32 %v7150_v27, %v7147_v12  ;;  %v16554_v3 = vrot.slane %v7182_v13, 4  ;;  %v11341_v19 = vcombine.low %v8216_v29, %v8226_v60  ;;  %v16557_v38 = vrot.slane %v7188_v46, 5  ;;  %v7507_v46 = vld [vmem:[#allocation2 + $0x30] sm:$0xe]  ;;  %v12939_v29 = vld [vmem:[#allocation3 + $0x228] sm:$0xff]  }
 0x2d6   : > { %v7161_v1 = vor.u32 %v16496_v47, %v7156_v32  ;;  %v7584_v44 = vrot.slane %v16523_v58, 5  ;;  %v8228_v40 = vshrl.u32 %v16544_v11, 16  ;;  %v8231_v39 = vshll.u32 %v16544_v11, 16 }
 0x2d7   : > { %7064 = vmatmul.mubr.bf16.gmra.mxu0 %v11163_v49  ;;  %v7152_v16 = vrot.slane %v7151_v63, 4  ;;  %v8237_v26 = vshll.u32 %v16546_v53, 16  ;;  %v11262_v15 = vrot.slane %v7506_v2, 9  ;;  %v8241_v21 = vshrl.u32 %v16546_v53, 16  ;;  %v16591_v2 = vld [vmem:[#allocation2 + $0x3c] sm:$0xf] }
 0x2d8   : > { %8884 = vmatprep.mubr.bf16.mxu0 %v11340_v36  ;;  %v7162_v20 = vrot.slane %v7161_v1, 4  ;;  %v7586_v47 = vrot.slane %v7584_v44, 4  ;;  %v7587_v54 = vrot.slane %v7080_v37, 5  ;;  %v8230_v7 = vrot.slane %v8228_v40, 4 }
 0x2d9   : > { %v8233_v6 = vrot.slane %v8231_v39, 5  ;;  %v8239_v61 = vrot.slane %v8237_v26, 5  ;;  %v16571_v49 = vsel %vm13524_vm7, %v11262_v15, %v7584_v44  ;;  %v11325_v8 = vcombine.low %v16490_v25, %v16494_v45  ;;  %v16602_v26 = vld [vmem:[#allocation2 + $0x44] sm:$0x1] }
 0x2da   : > { %v8243_v36 = vrot.slane %v8241_v21, 4  ;;  %v8247_v5 = vshll.u32 %v8165_v9, 16  ;;  %v7157_v33 = vsel %vm13232_vm4, %v7152_v16, %v7156_v32  ;;  %v7167_v35 = vsel %vm13232_vm4, %v7162_v20, %v16498_v23 }
 0x2db   : > { %v8234_v37 = vor.u32 %v8233_v6, %v8230_v7  ;;  %v7169_v17 = vshrl.u32 %v7078_v57, 16  ;;  %v7588_v41 = vsel %vm13524_vm7, %v7586_v47, %v7587_v54  ;;  %v7172_v55 = vshll.u32 %v7078_v57, 16  ;;  %v7081_v7 = vld [vmem:[#allocation2 + $0x30] sm:$0xf] }
 0x2dc   : > { %7970 = vmatmul.mubr.bf16.vlgmr.msra.gmra.mxu1 %v11276_v4  ;;  %v8244_v56 = vor.u32 %v8243_v36, %v8239_v61  ;;  %v7178_v22 = vshll.u32 %v16523_v58, 16  ;;  %v7206_v12 = vshrl.u32 %v16567_v42, 16  ;;  %v7212_v27 = vshll.u32 %v7083_v24, 16 }
 0x2dd   : > { %12639 = vmatpush3.bf16.msra.mxu1 %v12964_v28  ;;  %7977 = vmatprep.mubr.bf16.mxu1 %v11293_v43  ;;  %v8235_v31 = vrot.slane %v8234_v37, 4  ;;  %v7171_v13 = vrot.slane %v7169_v17, 4  ;;  %v8249_v60 = vrot.slane %v8247_v5, 5  ;;  %v7174_v4 = vrot.slane %v7172_v55, 5  ;;  %v16615_v5 = vld [vmem:[#allocation2 + $0x40] sm:$0xf] }
 0x2de   : > { %v8245_v23 = vrot.slane %v8244_v56, 4  ;;  %12640 = vmatprep.subr.bf16.mxu1 %v12936_v52  ;;  %v7180_v32 = vrot.slane %v7178_v22, 5  ;;  %v11277_v58 = vcombine.low %v7157_v33, %v7167_v35  ;;  %v11294_v14 = vcombine.low %v16571_v49, %v7588_v41  ;;  %v7086_v37 = vld [vmem:[#allocation2 + $0x44] sm:$0x1]  ;;  %v12945_v22 = vld [vmem:[#allocation3 + $0x218] sm:$0xff]  }
 0x2df   : > { %8885 = vmatmul.mubr.bf16.vlgmr.msra.gmra.mxu0 %v11324_v30  ;;  %v8240_v43 = vsel %vm13232_vm4, %v8235_v31, %v8239_v61  ;;  %v7591_v63 = vrot.slane %v16567_v42, 5  ;;  %v7175_v44 = vor.u32 %v7174_v4, %v7171_v13  ;;  %v11263_v51 = vrot.slane %v7507_v46, 9 }
 0x2e0   : > { %8892 = vmatprep.mubr.bf16.mxu0 %v11341_v19  ;;  %12687 = vmatpush3.bf16.msra.mxu0 %v10096_v48  ;;  %v8250_v1 = vsel %vm13232_vm4, %v8245_v23, %v8249_v60  ;;  %v7185_v16 = vor.u32 %v16554_v3, %v7180_v32  ;;  %v16598_v30 = vrot.slane %v7206_v12, 4  ;;  %v16600_v9 = vrot.slane %v7212_v27, 5  ;;  %v12942_v3 = vld [vmem:[#allocation3 + $0x220] sm:$0xff]  }
 0x2e1   : > { %12641 = vmatpush3.bf16.msra.mxu1 %v12936_v52  ;;  %v7593_v40 = vrot.slane %v7591_v63, 4  ;;  %v7594_v39 = vrot.slane %v7083_v24, 5  ;;  %v7176_v19 = vrot.slane %v7175_v44, 4  ;;  %v8252_v20 = vshrl.u32 %v16591_v2, 16  ;;  %v7508_v12 = vld [vmem:[#allocation2 + $0x3c] sm:$0xe] }
 0x2e2   : > { %v7186_v48 = vrot.slane %v7185_v16, 4  ;;  %v8255_v15 = vshll.u32 %v16591_v2, 16  ;;  %12642 = vmatprep.subr.bf16.mxu1 %v12939_v29  ;;  %v11342_v47 = vcombine.low %v8240_v43, %v8250_v1  ;;  %v8261_v57 = vshll.u32 %v16596_v0, 16  ;;  %v12948_v1 = vld [vmem:[#allocation3 + $0x210] sm:$0xff]  }
 0x2e3   : > { %v7595_v21 = vsel %vm13524_vm7, %v7593_v40, %v7594_v39  ;;  %v8265_v54 = vshrl.u32 %v16596_v0, 16  ;;  %v7592_v6 = vsel %vm13524_vm7, %v11263_v51, %v7591_v63  ;;  %v11326_v61 = vcombine.low %v16544_v11, %v16546_v53  ;;  %v16632_v63 = vld [vmem:[#allocation2 + $0x4c] sm:$0xf] }
 0x2e4   : > { %7978 = vmatmul.mubr.bf16.gmra.mxu1 %v11277_v58  ;;  %v8254_v49 = vrot.slane %v8252_v20, 4  ;;  %v8271_v36 = vshll.u32 %v16602_v26, 16  ;;  %v7191_v52 = vsel %vm13232_vm4, %v7186_v48, %v16557_v38  ;;  %v8257_v24 = vrot.slane %v8255_v15, 5 }
 0x2e5   : > { %7985 = vmatprep.mubr.bf16.mxu1 %v11294_v14  ;;  %v8263_v33 = vrot.slane %v8261_v57, 5  ;;  %v8267_v35 = vrot.slane %v8265_v54, 4  ;;  %12643 = vmatpush3.bf16.msra.mxu1 %v12939_v29  ;;  %v7181_v17 = vsel %vm13232_vm4, %v7176_v19, %v7180_v32  ;;  %v11295_v41 = vcombine.low %v7592_v6, %v7595_v21  ;;  %v16627_v14 = vld [vmem:[#allocation2 + $0x48] sm:$0xf] }
 0x2e6   : > { %v7193_v56 = vshrl.u32 %v7081_v7, 16  ;;  %v7196_v55 = vshll.u32 %v7081_v7, 16  ;;  %12644 = vmatprep.subr.bf16.mxu1 %v12942_v3  ;;  %v8258_v28 = vor.u32 %v8257_v24, %v8254_v49  ;;  %v7202_v38 = vshll.u32 %v16567_v42, 16 }
 0x2e7   : > { %8893 = vmatmul.mubr.bf16.gmra.mxu0 %v11325_v8  ;;  %v8268_v31 = vor.u32 %v8267_v35, %v8263_v33  ;;  %v7230_v13 = vshrl.u32 %v16615_v5, 16  ;;  %v11278_v27 = vcombine.low %v7181_v17, %v7191_v52  ;;  %v7236_v60 = vshll.u32 %v7086_v37, 16  ;;  %v7089_v35 = vld [vmem:[#allocation2 + $0x50] sm:$0x1] }
 0x2e8   : > { %8900 = vmatprep.mubr.bf16.mxu0 %v11342_v47  ;;  %v7195_v46 = vrot.slane %v7193_v56, 4  ;;  %v7198_v23 = vrot.slane %v7196_v55, 5  ;;  %v8259_v4 = vrot.slane %v8258_v28, 4  ;;  %v8273_v29 = vrot.slane %v8271_v36, 5 }
 0x2e9   : > { %v8269_v32 = vrot.slane %v8268_v31, 4  ;;  %v7204_v58 = vrot.slane %v7202_v38, 5  ;;  %12645 = vmatpush3.bf16.msra.mxu1 %v12942_v3  ;;  %v16629_v8 = vrot.slane %v7230_v13, 4  ;;  %v11264_v43 = vrot.slane %v7508_v12, 9  ;;  %v8167_v3 = vld [vmem:[#allocation2 + $0x50] sm:$0x1] }
 0x2ea   : > { %v7199_v25 = vor.u32 %v7198_v23, %v7195_v46  ;;  %v7598_v42 = vrot.slane %v16615_v5, 5  ;;  %12646 = vmatprep.subr.bf16.mxu1 %v12945_v22  ;;  %v16637_v51 = vrot.slane %v7236_v60, 5  ;;  %v7601_v40 = vrot.slane %v7086_v37, 5  ;;  %v12954_v13 = vld [vmem:[#allocation3 + $0x200] sm:$0xff]  }
 0x2eb   : > { %v8274_v44 = vsel %vm13232_vm4, %v8269_v32, %v8273_v29  ;;  %v7209_v16 = vor.u32 %v16598_v30, %v7204_v58  ;;  %v8264_v39 = vsel %vm13232_vm4, %v8259_v4, %v8263_v33  ;;  %v11327_v20 = vcombine.low %v16591_v2, %v16596_v0  ;;  %v7084_v2 = vld [vmem:[#allocation2 + $0x3c] sm:$0xf]  ;;  %v12951_v0 = vld [vmem:[#allocation3 + $0x208] sm:$0xff]   ;;  %v16659_v33 = vld [vmem:[#allocation2 + $0x4c] sm:$0xf] }
 0x2ec   : > { %7986 = vmatmul.mubr.bf16.gmra.mxu1 %v11278_v27  ;;  %v7200_v19 = vrot.slane %v7199_v25, 4  ;;  %v7600_v48 = vrot.slane %v7598_v42, 4  ;;  %v8276_v47 = vshrl.u32 %v16627_v14, 16  ;;  %v8279_v21 = vshll.u32 %v16627_v14, 16 }
 0x2ed   : > { %7993 = vmatprep.mubr.bf16.mxu1 %v11295_v41  ;;  %v7210_v15 = vrot.slane %v7209_v16, 4  ;;  %v8285_v30 = vshll.u32 %v16632_v63, 16  ;;  %12647 = vmatpush3.bf16.msra.mxu1 %v12945_v22  ;;  %v11343_v57 = vcombine.low %v8264_v39, %v8274_v44  ;;  %v7599_v54 = vsel %vm13524_vm7, %v11264_v43, %v7598_v42  ;;  %v7509_v22 = vld [vmem:[#allocation2 + $0x48] sm:$0xe] }
 0x2ee   : > { %v7602_v7 = vsel %vm13524_vm7, %v7600_v48, %v7601_v40  ;;  %v8289_v6 = vshrl.u32 %v16632_v63, 16  ;;  %12648 = vmatprep.subr.bf16.mxu1 %v12948_v1  ;;  %v7205_v49 = vsel %vm13232_vm4, %v7200_v19, %v7204_v58  ;;  %v8278_v52 = vrot.slane %v8276_v47, 4 }
 0x2ef   : > { %8901 = vmatmul.mubr.bf16.gmra.mxu0 %v11326_v61  ;;  %v7215_v36 = vsel %vm13232_vm4, %v7210_v15, %v16600_v9  ;;  %v8281_v24 = vrot.slane %v8279_v21, 5  ;;  %v11296_v37 = vcombine.low %v7599_v54, %v7602_v7  ;;  %v8287_v17 = vrot.slane %v8285_v30, 5  ;;  %v16680_v21 = vld [vmem:[#allocation2 + $0x5c] sm:$0x1] }
 0x2f0   : > { %8908 = vmatprep.mubr.bf16.mxu0 %v11343_v57  ;;  %v8291_v41 = vrot.slane %v8289_v6, 4  ;;  %v8295_v56 = vshll.u32 %v8167_v3, 16  ;;  %v7217_v11 = vshrl.u32 %v7084_v2, 16  ;;  %v7220_v53 = vshll.u32 %v7084_v2, 16  ;;  %v7087_v3 = vld [vmem:[#allocation2 + $0x48] sm:$0xf] }
 0x2f1   : > { %v8282_v55 = vor.u32 %v8281_v24, %v8278_v52  ;;  %v7226_v61 = vshll.u32 %v16615_v5, 16  ;;  %12649 = vmatpush3.bf16.msra.mxu1 %v12948_v1  ;;  %v11279_v28 = vcombine.low %v7205_v49, %v7215_v36  ;;  %v7254_v9 = vshrl.u32 %v16659_v33, 16  ;;  %v16664_v5 = vld [vmem:[#allocation2 + $0x54] sm:$0xf]  ;;  %v16671_v1 = vld [vmem:[#allocation2 + $0x58] sm:$0xf] }
 0x2f2   : > { %v8292_v31 = vor.u32 %v8291_v41, %v8287_v17  ;;  %v7260_v38 = vshll.u32 %v7089_v35, 16  ;;  %12650 = vmatprep.subr.bf16.mxu1 %v12951_v0  ;;  %v7219_v27 = vrot.slane %v7217_v11, 4  ;;  %v7222_v46 = vrot.slane %v7220_v53, 5 }
 0x2f3   : > { %v8283_v12 = vrot.slane %v8282_v55, 4  ;;  %v7228_v23 = vrot.slane %v7226_v61, 5  ;;  %v8297_v4 = vrot.slane %v8295_v56, 5  ;;  %v11265_v32 = vrot.slane %v7509_v22, 9  ;;  %v7092_v55 = vld [vmem:[#allocation2 + $0x5c] sm:$0x1] }
 0x2f4   : > { %7994 = vmatmul.mubr.bf16.gmra.mxu1 %v11279_v28  ;;  %v8293_v60 = vrot.slane %v8292_v31, 4  ;;  %v7605_v29 = vrot.slane %v16659_v33, 5  ;;  %v7223_v58 = vor.u32 %v7222_v46, %v7219_v27  ;;  %v16667_v43 = vrot.slane %v7254_v9, 4  ;;  %v7510_v22 = vld [vmem:[#allocation2 + $0x54] sm:$0xe] }
 0x2f5   : > { %8001 = vmatprep.mubr.bf16.mxu1 %v11296_v37  ;;  %v7233_v25 = vor.u32 %v16629_v8, %v7228_v23  ;;  %v16669_v42 = vrot.slane %v7260_v38, 5  ;;  %12651 = vmatpush3.bf16.msra.mxu1 %v12951_v0  ;;  %v8288_v44 = vsel %vm13232_vm4, %v8283_v12, %v8287_v17  ;;  %v7608_v39 = vrot.slane %v7089_v35, 5  ;;  %v16692_v0 = vld [vmem:[#allocation2 + $0x58] sm:$0xf]  ;;  %v16694_v35 = vpop.f32.mrf.mxu1 }
 0x2f6   : > { %v8298_v16 = vsel %vm13232_vm4, %v8293_v60, %v8297_v4  ;;  %v7607_v40 = vrot.slane %v7605_v29, 4  ;;  %12652 = vmatprep.subr.bf16.mxu1 %v12954_v13  ;;  %v7224_v48 = vrot.slane %v7223_v58, 4  ;;  %v8300_v15 = vshrl.u32 %v16664_v5, 16 }
 0x2f7   : > { %8909 = vmatmul.mubr.bf16.gmra.mxu0 %v11327_v20  ;;  %v11344_v19 = vcombine.low %v8288_v44, %v8298_v16  ;;  %v7234_v8 = vrot.slane %v7233_v25, 4  ;;  %v8303_v30 = vshll.u32 %v16664_v5, 16  ;;  %v8309_v57 = vshll.u32 %v16671_v1, 16  ;;  %v16713_v44 = vld [vmem:[#allocation2 + $0x64] sm:$0xf] }
 0x2f8   : > { %v7609_v47 = vsel %vm13524_vm7, %v7607_v40, %v7608_v39  ;;  %v8313_v54 = vshrl.u32 %v16671_v1, 16  ;;  %v7229_v20 = vsel %vm13232_vm4, %v7224_v48, %v7228_v23  ;;  %v7606_v6 = vsel %vm13524_vm7, %v11265_v32, %v7605_v29  ;;  %v16701_v23 = vpop.f32.mrf.mxu1  ;;  %v16706_v29 = vld [vmem:[#allocation2 + $0x60] sm:$0xf] }
 0x2f9   : > { %8916 = vmatprep.mubr.bf16.mxu0 %v11344_v19  ;;  %v7239_v7 = vsel %vm13232_vm4, %v7234_v8, %v16637_v51  ;;  %v8302_v2 = vrot.slane %v8300_v15, 4  ;;  %12653 = vmatpush3.bf16.msra.mxu1 %v12954_v13  ;;  %v8305_v36 = vrot.slane %v8303_v30, 5  ;;  %v8311_v52 = vrot.slane %v8309_v57, 5  ;;  %v8169_v15 = vld [vmem:[#allocation2 + $0x68] sm:$0x1] }
 0x2fa   : > { %v11280_v49 = vcombine.low %v7229_v20, %v7239_v7  ;;  %v8315_v24 = vrot.slane %v8313_v54, 4  ;;  %v11297_v37 = vcombine.low %v7606_v6, %v7609_v47  ;;  %v8319_v17 = vshll.u32 %v16680_v21, 16  ;;  %v16721_v30 = vpop.f32.mrf.mxu1  ;;  %v7090_v7 = vld [vmem:[#allocation2 + $0x54] sm:$0xf] }
 0x2fb   : > { %v7241_v41 = vshrl.u32 %v7087_v3, 16  ;;  %v7244_v56 = vshll.u32 %v7087_v3, 16  ;;  %v8306_v51 = vor.u32 %v8305_v36, %v8302_v2  ;;  %v7250_v53 = vshll.u32 %v16659_v33, 16  ;;  %18378 = vst [vmem:[#allocation10_spill] sm:$0xff] %v16721_v30  ;;  %v7511_v36 = vld [vmem:[#allocation2 + $0x60] sm:$0xe] }
 0x2fc   : > { %8002 = vmatmul.mubr.bf16.gmra.mxu1 %v11280_v49  ;;  %v8316_v11 = vor.u32 %v8315_v24, %v8311_v52  ;;  %v7278_v61 = vshrl.u32 %v16692_v0, 16  ;;  %v11328_v28 = vcombine.low %v16627_v14, %v16632_v63  ;;  %v8321_v31 = vrot.slane %v8319_v17, 5 }
 0x2fd   : > { %8009 = vmatprep.mubr.bf16.mxu1 %v11297_v37  ;;  %v7243_v9 = vrot.slane %v7241_v41, 4  ;;  %v7246_v38 = vrot.slane %v7244_v56, 5  ;;  %v8307_v13 = vrot.slane %v8306_v51, 4  ;;  %v7252_v27 = vrot.slane %v7250_v53, 5  ;;  %v16734_v41 = vld [vmem:[#allocation2 + $0x64] sm:$0xf] }
 0x2fe   : > { %v8317_v12 = vrot.slane %v8316_v11, 4  ;;  %v7284_v46 = vshll.u32 %v7092_v55, 16  ;;  %v16703_v4 = vrot.slane %v7278_v61, 4  ;;  %v11266_v33 = vrot.slane %v7510_v22, 9  ;;  %v7095_v53 = vld [vmem:[#allocation2 + $0x68] sm:$0x1]  ;;  %v16737_v61 = vpop.f32.mrf.mxu1 }
 0x2ff   : > { %8917 = vmatmul.mubr.bf16.gmra.mxu0 %v11328_v28  ;;  %v7247_v60 = vor.u32 %v7246_v38, %v7243_v9  ;;  %v7612_v32 = vrot.slane %v16692_v0, 5  ;;  %v8312_v14 = vsel %vm13232_vm4, %v8307_v13, %v8311_v52  ;;  %v7257_v58 = vor.u32 %v16667_v43, %v7252_v27  ;;  %18380 = vst [vmem:[#allocation30_spill] sm:$0xff] %v16737_v61 }
 0x300   : > { %v8322_v63 = vsel %vm13232_vm4, %v8317_v12, %v8321_v31  ;;  %v7615_v25 = vrot.slane %v7092_v55, 5  ;;  %v11329_v8 = vcombine.low %v16664_v5, %v16671_v1  ;;  %v8324_v3 = vshrl.u32 %v16706_v29, 16  ;;  %v16729_v5 = vpop.f32.mrf.mxu0 }
 0x301   : > { %v11345_v16 = vcombine.low %v8312_v14, %v8322_v63  ;;  %v7248_v40 = vrot.slane %v7247_v60, 4  ;;  %v7613_v39 = vsel %vm13524_vm7, %v11266_v33, %v7612_v32  ;;  %v7614_v19 = vrot.slane %v7612_v32, 4  ;;  %18379 = vst [vmem:[#allocation25_spill] sm:$0xff] %v16729_v5 }
 0x302   : > { %v7258_v48 = vrot.slane %v7257_v58, 4  ;;  %v8327_v47 = vshll.u32 %v16706_v29, 16  ;;  %v8333_v54 = vshll.u32 %v16713_v44, 16  ;;  %v8337_v20 = vshrl.u32 %v16713_v44, 16  ;;  %v16739_v31 = vpop.f32.mrf.mxu0 }
 0x303   : > { %8924 = vmatprep.mubr.bf16.mxu0 %v11345_v16  ;;  %v7253_v43 = vsel %vm13232_vm4, %v7248_v40, %v7252_v27  ;;  %v7616_v57 = vsel %vm13524_vm7, %v7614_v19, %v7615_v25  ;;  %v8326_v2 = vrot.slane %v8324_v3, 4  ;;  %v8343_v17 = vshll.u32 %v8169_v15, 16  ;;  %18381 = vst [vmem:[#allocation34_spill] sm:$0xff] %v16739_v31  ;;  %v16741_v27 = vld [vmem:[#allocation2 + $0x6c] sm:$0xf] }
 0x304   : > { %v7263_v1 = vsel %vm13232_vm4, %v7258_v48, %v16669_v42  ;;  %v11298_v6 = vcombine.low %v7613_v39, %v7616_v57  ;;  %v8329_v49 = vrot.slane %v8327_v47, 5  ;;  %v8335_v24 = vrot.slane %v8333_v54, 5  ;;  %v16748_v25 = vld [vmem:[#allocation2 + $0x70] sm:$0xf]  ;;  %v16756_v48 = vld [vmem:[#allocation2 + $0x74] sm:$0x1]  ;;  %v16759_v15 = vpop.f32.mrf.mxu0 }
 0x305   : > { %v11281_v52 = vcombine.low %v7253_v43, %v7263_v1  ;;  %v8339_v37 = vrot.slane %v8337_v20, 4  ;;  %v7265_v55 = vshrl.u32 %v7090_v7, 16  ;;  %v7268_v51 = vshll.u32 %v7090_v7, 16  ;;  %v16750_v16 = vpop.f32.mrf.mxu1  ;;  %18382 = vst [vmem:[#allocation14_spill] sm:$0xff] %v16756_v48  ;;  %18383 = vst [vmem:[#allocation24_spill] sm:$0xff] %v16759_v15 }
 0x306   : > { %v8330_v56 = vor.u32 %v8329_v49, %v8326_v2  ;;  %v7274_v11 = vshll.u32 %v16692_v0, 16  ;;  %v7286_v42 = vrot.slane %v7284_v46, 5  ;;  %v8345_v28 = vrot.slane %v8343_v17, 5  ;;  %v7093_v2 = vld [vmem:[#allocation2 + $0x60] sm:$0xf]  ;;  %v16775_v17 = vpop.f32.mrf.mxu0 }
 0x307   : > { %8010 = vmatmul.mubr.bf16.gmra.mxu1 %v11281_v52  ;;  %8925 = vmatmul.mubr.bf16.gmra.mxu0 %v11329_v8  ;;  %v8340_v22 = vor.u32 %v8339_v37, %v8335_v24  ;;  %v7267_v38 = vrot.slane %v7265_v55, 4  ;;  %v7270_v13 = vrot.slane %v7268_v51, 5  ;;  %v7302_v0 = vshrl.u32 %v16734_v41, 16  ;;  %v16771_v49 = vpop.f32.mrf.mxu1  ;;  %18384 = vst [vmem:[#allocation16_spill] sm:$0xff] %v16775_v17  ;;  %v7111_v15 = vld [vmem:[#allocation2 + $0xa8] sm:$0xf] }
 0x308   : > { %8017 = vmatprep.mubr.bf16.mxu1 %v11298_v6  ;;  %v8331_v9 = vrot.slane %v8330_v56, 4  ;;  %v7276_v12 = vrot.slane %v7274_v11, 5  ;;  %v7308_v33 = vshll.u32 %v7095_v53, 16  ;;  %v11267_v32 = vrot.slane %v7511_v36, 9  ;;  %v16777_v11 = vld [vmem:[#allocation2 + $0x70] sm:$0xf] }
 0x309   : > { %v8341_v60 = vrot.slane %v8340_v22, 4  ;;  %v7271_v14 = vor.u32 %v7270_v13, %v7267_v38  ;;  %v7619_v58 = vrot.slane %v16734_v41, 5  ;;  %v7622_v39 = vrot.slane %v7095_v53, 5 }
 0x30a   : > { %v8336_v46 = vsel %vm13232_vm4, %v8331_v9, %v8335_v24  ;;  %v7281_v63 = vor.u32 %v16703_v4, %v7276_v12  ;;  %v11330_v19 = vcombine.low %v16706_v29, %v16713_v44  ;;  %v8348_v8 = vshrl.u32 %v16741_v27, 16  ;;  %v16780_v9 = vld [vmem:[#allocation2 + $0x74] sm:$0x1] }
 0x30b   : > { %v8346_v40 = vsel %vm13232_vm4, %v8341_v60, %v8345_v28  ;;  %v7272_v3 = vrot.slane %v7271_v14, 4  ;;  %v7620_v43 = vsel %vm13524_vm7, %v11267_v32, %v7619_v58  ;;  %v7621_v57 = vrot.slane %v7619_v58, 4  ;;  %v7512_v32 = vld [vmem:[#allocation2 + $0x6c] sm:$0xe] }
 0x30c   : > { %v11346_v4 = vcombine.low %v8336_v46, %v8346_v40  ;;  %v7282_v47 = vrot.slane %v7281_v63, 4  ;;  %v8350_v54 = vrot.slane %v8348_v8, 4  ;;  %v8351_v20 = vshll.u32 %v16741_v27, 16 }
 0x30d   : > { %v8357_v7 = vshll.u32 %v16748_v25, 16  ;;  %v7277_v29 = vsel %vm13232_vm4, %v7272_v3, %v7276_v12  ;;  %v8361_v1 = vshrl.u32 %v16748_v25, 16  ;;  %v8367_v6 = vshll.u32 %v16756_v48, 16 }
 0x30e   : > { %8932 = vmatprep.mubr.bf16.mxu0 %v11346_v4  ;;  %v7287_v44 = vsel %vm13232_vm4, %v7282_v47, %v7286_v42  ;;  %v7623_v52 = vsel %vm13524_vm7, %v7621_v57, %v7622_v39  ;;  %v8353_v24 = vrot.slane %v8351_v20, 5  ;;  %v7304_v56 = vrot.slane %v7302_v0, 4  ;;  %v16784_v0 = vpop.f32.mrf.mxu1  ;;  %v16795_v57 = vld [vmem:[#allocation2 + $0x7c] sm:$0xf] }
 0x30f   : > { %v11282_v36 = vcombine.low %v7277_v29, %v7287_v44  ;;  %8933 = vmatmul.mubr.bf16.gmra.mxu0 %v11330_v19  ;;  %v8359_v37 = vrot.slane %v8357_v7, 5  ;;  %v11299_v55 = vcombine.low %v7620_v43, %v7623_v52  ;;  %v8363_v51 = vrot.slane %v8361_v1, 4 }
 0x310   : > { %v8354_v53 = vor.u32 %v8353_v24, %v8350_v54  ;;  %v7289_v42 = vshrl.u32 %v7093_v2, 16  ;;  %v7292_v22 = vshll.u32 %v7093_v2, 16  ;;  %v7298_v28 = vshll.u32 %v16734_v41, 16  ;;  %v16804_v1 = vpop.f32.mrf.mxu1  ;;  %v7096_v24 = vld [vmem:[#allocation2 + $0x6c] sm:$0xf] }
 0x311   : > { %8018 = vmatmul.mubr.bf16.gmra.mxu1 %v11282_v36  ;;  %v7310_v13 = vrot.slane %v7308_v33, 5  ;;  %v8364_v12 = vor.u32 %v8363_v51, %v8359_v37  ;;  %v8369_v60 = vrot.slane %v8367_v6, 5  ;;  %v7326_v41 = vshrl.u32 %v16777_v11, 16  ;;  %v16791_v33 = vld [vmem:[#allocation2 + $0x78] sm:$0xf] }
 0x312   : > { %v16782_v38 = vpop.f32.mrf.mxu0  ;;  %8025 = vmatprep.mubr.bf16.mxu1 %v11299_v55  ;;  %v8355_v46 = vrot.slane %v8354_v53, 4  ;;  %v7291_v14 = vrot.slane %v7289_v42, 4  ;;  %v7294_v63 = vrot.slane %v7292_v22, 5  ;;  %v7300_v58 = vrot.slane %v7298_v28, 5 }
 0x313   : > { %v8365_v39 = vrot.slane %v8364_v12, 4  ;;  %v7332_v19 = vshll.u32 %v16780_v9, 16  ;;  %v7626_v8 = vrot.slane %v16777_v11, 5  ;;  %v11268_v43 = vrot.slane %v7512_v32, 9 }
 0x314   : > { %v16786_v40 = vpop.f32.mrf.mxu0  ;;  %v8360_v4 = vsel %vm13232_vm4, %v8355_v46, %v8359_v37  ;;  %v7295_v3 = vor.u32 %v7294_v63, %v7291_v14  ;;  %v7305_v47 = vor.u32 %v7304_v56, %v7300_v58  ;;  %v7629_v29 = vrot.slane %v16780_v9, 5  ;;  %v8171_v56 = vld [vmem:[#allocation2 + $0x80] sm:$0x1] }
 0x315   : > { %v8370_v20 = vsel %vm13232_vm4, %v8365_v39, %v8369_v60  ;;  %v7628_v7 = vrot.slane %v7626_v8, 4  ;;  %v11331_v44 = vcombine.low %v16741_v27, %v16748_v25  ;;  %v8372_v52 = vshrl.u32 %v16791_v33, 16 }
 0x316   : > { %v16797_v54 = vpop.f32.mrf.mxu0  ;;  %v11347_v6 = vcombine.low %v8360_v4, %v8370_v20  ;;  %v7296_v2 = vrot.slane %v7295_v3, 4  ;;  %v7306_v36 = vrot.slane %v7305_v47, 4  ;;  %v8375_v55 = vshll.u32 %v16791_v33, 16  ;;  %v16823_v20 = vld [vmem:[#allocation2 + $0x7c] sm:$0xf] }
 0x317   : > { %v7630_v37 = vsel %vm13524_vm7, %v7628_v7, %v7629_v29  ;;  %v8381_v51 = vshll.u32 %v16795_v57, 16  ;;  %v8385_v53 = vshrl.u32 %v16795_v57, 16  ;;  %v7627_v22 = vsel %vm13524_vm7, %v11268_v43, %v7626_v8  ;;  %v16883_v7 = vld [vmem:[#allocation2 + $0x90] sm:$0xf] }
 0x318   : > { %v16812_v42 = vpop.f32.mrf.mxu0  ;;  %8940 = vmatprep.mubr.bf16.mxu0 %v11347_v6  ;;  %v7301_v27 = vsel %vm13232_vm4, %v7296_v2, %v7300_v58  ;;  %v7311_v25 = vsel %vm13232_vm4, %v7306_v36, %v7310_v13  ;;  %v8374_v28 = vrot.slane %v8372_v52, 4  ;;  %v8377_v12 = vrot.slane %v8375_v55, 5  ;;  %v7513_v6 = vld [vmem:[#allocation2 + $0x78] sm:$0xe] }
 0x319   : > { %v11283_v9 = vcombine.low %v7301_v27, %v7311_v25  ;;  %8941 = vmatmul.mubr.bf16.gmra.mxu0 %v11331_v44  ;;  %v8383_v60 = vrot.slane %v8381_v51, 5  ;;  %v8387_v32 = vrot.slane %v8385_v53, 4  ;;  %v11300_v14 = vcombine.low %v7627_v22, %v7630_v37  ;;  %v16833_v53 = vld [vmem:[#allocation2 + $0x84] sm:$0xf] }
 0x31a   : > { %v16820_v46 = vpop.f32.mrf.mxu1  ;;  %v8391_v63 = vshll.u32 %v8171_v56, 16  ;;  %v7313_v39 = vshrl.u32 %v7096_v24, 16  ;;  %v7316_v4 = vshll.u32 %v7096_v24, 16  ;;  %v7328_v58 = vrot.slane %v7326_v41, 4  ;;  %v16825_v8 = vpop.f32.mrf.mxu0  ;;  %v7101_v24 = vld [vmem:[#allocation2 + $0x80] sm:$0x1] }
 0x31b   : > { %8026 = vmatmul.mubr.bf16.gmra.mxu1 %v11283_v9  ;;  %v8378_v3 = vor.u32 %v8377_v12, %v8374_v28  ;;  %v8388_v47 = vor.u32 %v8387_v32, %v8383_v60  ;;  %v7322_v13 = vshll.u32 %v16777_v11, 16  ;;  %v7334_v11 = vrot.slane %v7332_v19, 5  ;;  %v16839_v9 = vld [vmem:[#allocation2 + $0x88] sm:$0xf] }
 0x31c   : > { %8033 = vmatprep.mubr.bf16.mxu1 %v11300_v14  ;;  %v7315_v29 = vrot.slane %v7313_v39, 4  ;;  %v7318_v44 = vrot.slane %v7316_v4, 5  ;;  %v8393_v52 = vrot.slane %v8391_v63, 5  ;;  %v16829_v37 = vpop.f32.mrf.mxu1  ;;  %v7350_v55 = vshrl.u32 %v16823_v20, 16  ;;  %v16841_v12 = vpop.f32.mrf.mxu0 }
 0x31d   : > { %v8379_v2 = vrot.slane %v8378_v3, 4  ;;  %v8389_v36 = vrot.slane %v8388_v47, 4  ;;  %v7324_v41 = vrot.slane %v7322_v13, 5  ;;  %v7633_v51 = vrot.slane %v16823_v20, 5 }
 0x31e   : > { %v7319_v56 = vor.u32 %v7318_v44, %v7315_v29  ;;  %v11269_v28 = vrot.slane %v7513_v6, 9  ;;  %v7636_v63 = vrot.slane %v7101_v24, 5  ;;  %v11332_v4 = vcombine.low %v16791_v33, %v16795_v57  ;;  %v16854_v29 = vld [vmem:[#allocation2 + $0x8c] sm:$0x1] }
 0x31f   : > { %v8384_v27 = vsel %vm13232_vm4, %v8379_v2, %v8383_v60  ;;  %v8394_v25 = vsel %vm13232_vm4, %v8389_v36, %v8393_v52  ;;  %v7329_v22 = vor.u32 %v7328_v58, %v7324_v41  ;;  %v7635_v14 = vrot.slane %v7633_v51, 4  ;;  %v16850_v58 = vpop.f32.mrf.mxu1  ;;  %18386 = vst [vmem:[#allocation21_spill] sm:$0xff] %v16854_v29  ;;  %v7099_v2 = vld [vmem:[#allocation2 + $0x78] sm:$0xf]  ;;  %v16864_v36 = vpop.f32.mrf.mxu0 }
 0x320   : > { %v11348_v19 = vcombine.low %v8384_v27, %v8394_v25  ;;  %v7320_v32 = vrot.slane %v7319_v56, 4  ;;  %v16847_v60 = vadd.f32 %v16701_v23, %v16694_v35  ;;  %v8396_v3 = vshrl.u32 %v16833_v53, 16  ;;  %v16867_v25 = vld [vmem:[#allocation2 + $0x88] sm:$0xf] }
 0x321   : > { %v7330_v39 = vrot.slane %v7329_v22, 4  ;;  %v7356_v47 = vshll.u32 %v7101_v24, 16  ;;  %v7637_v13 = vsel %vm13524_vm7, %v7635_v14, %v7636_v63  ;;  %v8399_v44 = vshll.u32 %v16833_v53, 16 }
 0x322   : > { %18385 = vst [vmem:[#allocation17_spill] sm:$0xff] %v16847_v60  ;;  %8948 = vmatprep.mubr.bf16.mxu0 %v11348_v19  ;;  %v8405_v6 = vshll.u32 %v16839_v9, 16  ;;  %v7325_v33 = vsel %vm13232_vm4, %v7320_v32, %v7324_v41  ;;  %v7634_v23 = vsel %vm13524_vm7, %v11269_v28, %v7633_v51  ;;  %v8398_v57 = vrot.slane %v8396_v3, 4  ;;  %v16871_v32 = vpop.f32.mrf.mxu1 }
 0x323   : > { %v7335_v35 = vsel %vm13232_vm4, %v7330_v39, %v7334_v11  ;;  %8949 = vmatmul.mubr.bf16.gmra.mxu0 %v11332_v4  ;;  %v8401_v24 = vrot.slane %v8399_v44, 5  ;;  %v8409_v27 = vshrl.u32 %v16839_v9, 16  ;;  %v7352_v22 = vrot.slane %v7350_v55, 4  ;;  %v7104_v39 = vld [vmem:[#allocation2 + $0x8c] sm:$0x1] }
 0x324   : > { %v11284_v52 = vcombine.low %v7325_v33, %v7335_v35  ;;  %v8407_v56 = vrot.slane %v8405_v6, 5  ;;  %v11301_v19 = vcombine.low %v7634_v23, %v7637_v13  ;;  %v8415_v11 = vshll.u32 %v16854_v29, 16  ;;  %v7514_v55 = vld [vmem:[#allocation2 + $0x84] sm:$0xe]  ;;  %v16876_v13 = vpop.f32.mrf.mxu0 }
 0x325   : > { %v8402_v51 = vor.u32 %v8401_v24, %v8398_v57  ;;  %v8411_v28 = vrot.slane %v8409_v27, 4  ;;  %v7337_v14 = vshrl.u32 %v7099_v2, 16  ;;  %v7340_v63 = vshll.u32 %v7099_v2, 16 }
 0x326   : > { %8034 = vmatmul.mubr.bf16.gmra.mxu1 %v11284_v52  ;;  %v7358_v4 = vrot.slane %v7356_v47, 5  ;;  %v7346_v44 = vshll.u32 %v16823_v20, 16  ;;  %v7374_v6 = vshrl.u32 %v16867_v25, 16  ;;  %v8417_v57 = vrot.slane %v8415_v11, 5 }
 0x327   : > { %8041 = vmatprep.mubr.bf16.mxu1 %v11301_v19  ;;  %v8403_v33 = vrot.slane %v8402_v51, 4  ;;  %v8412_v35 = vor.u32 %v8411_v28, %v8407_v56  ;;  %v7339_v23 = vrot.slane %v7337_v14, 4  ;;  %v7342_v52 = vrot.slane %v7340_v63, 5  ;;  %v16889_v63 = vld [vmem:[#allocation2 + $0x94] sm:$0xf] }
 0x328   : > { %v7348_v24 = vrot.slane %v7346_v44, 5  ;;  %v16878_v27 = vrot.slane %v7374_v6, 4  ;;  %v7380_v2 = vshll.u32 %v7104_v39, 16  ;;  %v11270_v41 = vrot.slane %v7514_v55, 9 }
 0x329   : > { %v8413_v19 = vrot.slane %v8412_v35, 4  ;;  %v7343_v3 = vor.u32 %v7342_v52, %v7339_v23  ;;  %v7640_v20 = vrot.slane %v16867_v25, 5  ;;  %v8408_v51 = vsel %vm13232_vm4, %v8403_v33, %v8407_v56 }
 0x32a   : > { %v7353_v28 = vor.u32 %v7352_v22, %v7348_v24  ;;  %v7643_v14 = vrot.slane %v7104_v39, 5  ;;  %v11333_v11 = vcombine.low %v16833_v53, %v16839_v9  ;;  %v16891_v44 = vpop.f32.mrf.mxu0  ;;  %v11867_v56 = vadd.f32 %v16771_v49, %v16750_v16  ;;  %v8173_v22 = vld [vmem:[#allocation2 + $0x98] sm:$0x1] }
 0x32b   : > { %v16880_v47 = vpop.f32.mrf.mxu1  ;;  %v8418_v6 = vsel %vm13232_vm4, %v8413_v19, %v8417_v57  ;;  %v7344_v55 = vrot.slane %v7343_v3, 4  ;;  %v7641_v35 = vsel %vm13524_vm7, %v11270_v41, %v7640_v20  ;;  %v7642_v23 = vrot.slane %v7640_v20, 4  ;;  %v7102_v20 = vld [vmem:[#allocation2 + $0x84] sm:$0xf] }
 0x32c   : > { %v11349_v52 = vcombine.low %v8408_v51, %v8418_v6  ;;  %v7354_v43 = vrot.slane %v7353_v28, 4  ;;  %v8420_v53 = vshrl.u32 %v16883_v7, 16  ;;  %v8423_v33 = vshll.u32 %v16883_v7, 16  ;;  %v16911_v51 = vpop.f32.mrf.mxu0 }
 0x32d   : > { %v16900_v9 = vpop.f32.mrf.mxu1  ;;  %v7349_v39 = vsel %vm13232_vm4, %v7344_v55, %v7348_v24  ;;  %v7644_v3 = vsel %vm13524_vm7, %v7642_v23, %v7643_v14  ;;  %v8429_v41 = vshll.u32 %v16889_v63, 16  ;;  %v8433_v19 = vshrl.u32 %v16889_v63, 16 }
 0x32e   : > { %8956 = vmatprep.mubr.bf16.mxu0 %v11349_v52  ;;  %v7359_v57 = vsel %vm13232_vm4, %v7354_v43, %v7358_v4  ;;  %v11302_v16 = vcombine.low %v7641_v35, %v7644_v3  ;;  %v8422_v49 = vrot.slane %v8420_v53, 4  ;;  %v8425_v24 = vrot.slane %v8423_v33, 5  ;;  %v16919_v4 = vld [vmem:[#allocation2 + $0x94] sm:$0xf] }
 0x32f   : > { %v11285_v28 = vcombine.low %v7349_v39, %v7359_v57  ;;  %8957 = vmatmul.mubr.bf16.gmra.mxu0 %v11333_v11  ;;  %v8431_v6 = vrot.slane %v8429_v41, 5  ;;  %v8439_v14 = vshll.u32 %v8173_v22, 16  ;;  %v8435_v55 = vrot.slane %v8433_v19, 4  ;;  %v16921_v35 = vpop.f32.mrf.mxu1  ;;  %v7107_v22 = vld [vmem:[#allocation2 + $0x98] sm:$0x1] }
 0x330   : > { %v11979_v23 = vadd.f32 %v16786_v40, %v16782_v38  ;;  %v11870_v52 = vadd.f32 %v16804_v1, %v16784_v0  ;;  %v11982_v43 = vadd.f32 %v16812_v42, %v16797_v54  ;;  %v7382_v53 = vrot.slane %v7380_v2, 5  ;;  %v7515_v40 = vld [vmem:[#allocation2 + $0x90] sm:$0xe]  ;;  %v16928_v54 = vpop.f32.mrf.mxu0 }
 0x331   : > { %8042 = vmatmul.mubr.bf16.gmra.mxu1 %v11285_v28  ;;  %v8426_v11 = vor.u32 %v8425_v24, %v8422_v49  ;;  %v7361_v39 = vshrl.u32 %v7102_v20, 16  ;;  %v7364_v3 = vshll.u32 %v7102_v20, 16  ;;  %v8436_v33 = vor.u32 %v8435_v55, %v8431_v6 }
 0x332   : > { %8049 = vmatprep.mubr.bf16.mxu1 %v11302_v16  ;;  %v16923_v41 = vadd.f32 %v11979_v23, %v11867_v56  ;;  %v16925_v38 = vadd.f32 %v11982_v43, %v11870_v52  ;;  %v7370_v0 = vshll.u32 %v16867_v25, 16  ;;  %v7398_v2 = vshrl.u32 %v16919_v4, 16  ;;  %v16931_v16 = vpop.f32.mrf.mxu1  ;;  %v16936_v23 = vld [vmem:[#allocation2 + $0x9c] sm:$0xf] }
 0x333   : > { %v8427_v1 = vrot.slane %v8426_v11, 4  ;;  %v7363_v42 = vrot.slane %v7361_v39, 4  ;;  %v7366_v57 = vrot.slane %v7364_v3, 5  ;;  %v8437_v49 = vrot.slane %v8436_v33, 4  ;;  %v16945_v39 = vld [vmem:[#allocation2 + $0xa0] sm:$0xf]  ;;  %v16947_v3 = vpop.f32.mrf.mxu0 }
 0x334   : > { %18387 = vst [vmem:[#allocation27_spill] sm:$0xff] %v16923_v41  ;;  %18388 = vst [vmem:[#allocation20_spill] sm:$0xff] %v16925_v38  ;;  %v8441_v19 = vrot.slane %v8439_v14, 5  ;;  %v7372_v20 = vrot.slane %v7370_v0, 5  ;;  %v7404_v28 = vshll.u32 %v7107_v22, 16  ;;  %v11271_v55 = vrot.slane %v7515_v40, 9 }
 0x335   : > { %v8432_v56 = vsel %vm13232_vm4, %v8427_v1, %v8431_v6  ;;  %v7367_v24 = vor.u32 %v7366_v57, %v7363_v42  ;;  %v7647_v25 = vrot.slane %v16919_v4, 5  ;;  %v16941_v11 = vrot.slane %v7398_v2, 4 }
 0x336   : > { %v8442_v52 = vsel %vm13232_vm4, %v8437_v49, %v8441_v19  ;;  %v7377_v43 = vor.u32 %v16878_v27, %v7372_v20  ;;  %v16943_v14 = vrot.slane %v7404_v28, 5  ;;  %v7650_v40 = vrot.slane %v7107_v22, 5  ;;  %v16960_v28 = vld [vmem:[#allocation2 + $0xa4] sm:$0x1] }
 0x337   : > { %v11350_v6 = vcombine.low %v8432_v56, %v8442_v52  ;;  %v7368_v33 = vrot.slane %v7367_v24, 4  ;;  %v7649_v0 = vrot.slane %v7647_v25, 4  ;;  %v11334_v42 = vcombine.low %v16883_v7, %v16889_v63  ;;  %18389 = vst [vmem:[#allocation15_spill] sm:$0xff] %v16960_v28  ;;  %v7105_v24 = vld [vmem:[#allocation2 + $0x90] sm:$0xf] }
 0x338   : > { %v7378_v1 = vrot.slane %v7377_v43, 4  ;;  %v11873_v57 = vadd.f32 %v16829_v37, %v16820_v46  ;;  %v8444_v27 = vshrl.u32 %v16936_v23, 16  ;;  %v7648_v49 = vsel %vm13524_vm7, %v11271_v55, %v7647_v25 }
 0x339   : > { %8964 = vmatprep.mubr.bf16.mxu0 %v11350_v6  ;;  %v7651_v19 = vsel %vm13524_vm7, %v7649_v0, %v7650_v40  ;;  %v8447_v22 = vshll.u32 %v16936_v23, 16  ;;  %v8453_v7 = vshll.u32 %v16945_v39, 16  ;;  %v7373_v46 = vsel %vm13232_vm4, %v7368_v33, %v7372_v20  ;;  %v16977_v33 = vld [vmem:[#allocation2 + $0xa0] sm:$0xf] }
 0x33a   : > { %v7383_v37 = vsel %vm13232_vm4, %v7378_v1, %v7382_v53  ;;  %8965 = vmatmul.mubr.bf16.gmra.mxu0 %v11334_v42  ;;  %v8446_v63 = vrot.slane %v8444_v27, 4  ;;  %v8457_v56 = vshrl.u32 %v16945_v39, 16  ;;  %v11303_v43 = vcombine.low %v7648_v49, %v7651_v19 }
 0x33b   : > { %v16954_v2 = vpop.f32.mrf.mxu1  ;;  %v11286_v52 = vcombine.low %v7373_v46, %v7383_v37  ;;  %v8449_v6 = vrot.slane %v8447_v22, 5  ;;  %v8455_v0 = vrot.slane %v8453_v7, 5  ;;  %v8463_v34 = vshll.u32 %v16960_v28, 16  ;;  %v16990_v37 = vld [vmem:[#allocation2 + $0xa4] sm:$0x1] }
 0x33c   : > { %v16969_v55 = vpop.f32.mrf.mxu0  ;;  %v8459_v40 = vrot.slane %v8457_v56, 4  ;;  %v11985_v53 = vadd.f32 %v16841_v12, %v16825_v8  ;;  %v11876_v49 = vadd.f32 %v16871_v32, %v16850_v58  ;;  %v11988_v19 = vadd.f32 %v16876_v13, %v16864_v36  ;;  %v7516_v56 = vld [vmem:[#allocation2 + $0x9c] sm:$0xe] }
 0x33d   : > { %v16971_v25 = vpop.f32.mrf.mxu1  ;;  %8050 = vmatmul.mubr.bf16.gmra.mxu1 %v11286_v52  ;;  %v8450_v27 = vor.u32 %v8449_v6, %v8446_v63  ;;  %v7385_v22 = vshrl.u32 %v7105_v24, 16  ;;  %v7388_v8 = vshll.u32 %v7105_v24, 16  ;;  %v7394_v12 = vshll.u32 %v16919_v4, 16 }
 0x33e   : > { %v16979_v1 = vpop.f32.mrf.mxu0  ;;  %8057 = vmatprep.mubr.bf16.mxu1 %v11303_v43  ;;  %v8460_v7 = vor.u32 %v8459_v40, %v8455_v0  ;;  %v16987_v46 = vadd.f32 %v11985_v53, %v11873_v57  ;;  %v16996_v58 = vadd.f32 %v11988_v19, %v11876_v49  ;;  %v7422_v36 = vshrl.u32 %v16977_v33, 16 }
 0x33f   : > { %v16981_v42 = vpop.f32.mrf.mxu1  ;;  %v8451_v52 = vrot.slane %v8450_v27, 4  ;;  %v7387_v32 = vrot.slane %v7385_v22, 4  ;;  %v8465_v43 = vrot.slane %v8463_v34, 5  ;;  %v7390_v57 = vrot.slane %v7388_v8, 5  ;;  %v17010_v34 = vld [vmem:[#allocation2 + $0xa8] sm:$0xf] }
 0x340   : > { %18390 = vst [vmem:[#allocation26_spill] sm:$0xff] %v16987_v46  ;;  %v16992_v20 = vpop.f32.mrf.mxu0  ;;  %18391 = vst [vmem:[#allocation12_spill] sm:$0xff] %v16996_v58  ;;  %v8461_v13 = vrot.slane %v8460_v7, 4  ;;  %v7396_v6 = vrot.slane %v7394_v12, 5  ;;  %v11272_v53 = vrot.slane %v7516_v56, 9  ;;  %v7654_v46 = vrot.slane %v16977_v33, 5 }
 0x341   : > { %v16994_v63 = vpop.f32.mrf.mxu1  ;;  %v8456_v4 = vsel %vm13232_vm4, %v8451_v52, %v8455_v0  ;;  %v7391_v49 = vor.u32 %v7390_v57, %v7387_v32  ;;  %v17008_v22 = vrot.slane %v7422_v36, 4  ;;  %v17012_v7 = vld [vmem:[#allocation2 + $0xac] sm:$0xf]  ;;  %v11879_v36 = vadd.f32 %v16900_v9, %v16880_v47 }
 0x342   : > { %v16999_v24 = vpop.f32.mrf.mxu0  ;;  %v8466_v27 = vsel %vm13232_vm4, %v8461_v13, %v8465_v43  ;;  %v7401_v19 = vor.u32 %v16941_v11, %v7396_v6  ;;  %v7655_v56 = vsel %vm13524_vm7, %v11272_v53, %v7654_v46  ;;  %v7656_v52 = vrot.slane %v7654_v46, 4  ;;  %v8175_v53 = vld [vmem:[#allocation2 + $0xb0] sm:$0x1] }
 0x343   : > { %v11351_v12 = vcombine.low %v8456_v4, %v8466_v27  ;;  %v7657_v13 = vrot.slane %v16990_v37, 5  ;;  %v7392_v32 = vrot.slane %v7391_v49, 4  ;;  %v11335_v11 = vcombine.low %v16936_v23, %v16945_v39 }
 0x344   : > { %v17014_v8 = vpop.f32.mrf.mxu1  ;;  %v17016_v0 = vpop.f32.mrf.mxu0  ;;  %v7402_v43 = vrot.slane %v7401_v19, 4  ;;  %v8468_v46 = vshrl.u32 %v17010_v34, 16  ;;  %v8471_v27 = vshll.u32 %v17010_v34, 16  ;;  %v8477_v49 = vshll.u32 %v17012_v7, 16  ;;  %v7108_v19 = vld [vmem:[#allocation2 + $0x9c] sm:$0xf] }
 0x345   : > { %8972 = vmatprep.mubr.bf16.mxu0 %v11351_v12  ;;  %v7658_v4 = vsel %vm13524_vm7, %v7656_v52, %v7657_v13  ;;  %v7397_v23 = vsel %vm13232_vm4, %v7392_v32, %v7396_v6  ;;  %v8481_v39 = vshrl.u32 %v17012_v7, 16  ;;  %v8487_v17 = vshll.u32 %v8175_v53, 16 }
 0x346   : > { %v17025_v57 = vpop.f32.mrf.mxu1  ;;  %v17027_v40 = vpop.f32.mrf.mxu0  ;;  %v7407_v47 = vsel %vm13232_vm4, %v7402_v43, %v16943_v14  ;;  %v11304_v9 = vcombine.low %v7655_v56, %v7658_v4  ;;  %8973 = vmatmul.mubr.bf16.gmra.mxu0 %v11335_v11  ;;  %v8470_v58 = vrot.slane %v8468_v46, 4  ;;  %v8473_v38 = vrot.slane %v8471_v27, 5  ;;  %v17052_v46 = vld [vmem:[#allocation2 + $0xac] sm:$0xf]  ;;  %v7113_v27 = vld [vmem:[#allocation2 + $0xb0] sm:$0x1] }
 0x347   : > { %v11287_v13 = vcombine.low %v7397_v23, %v7407_v47  ;;  %v8479_v41 = vrot.slane %v8477_v49, 5  ;;  %v8483_v60 = vrot.slane %v8481_v39, 4  ;;  %v11991_v6 = vadd.f32 %v16911_v51, %v16891_v44  ;;  %v7517_v23 = vld [vmem:[#allocation2 + $0xa8] sm:$0xe] }
 0x348   : > { %v17040_v12 = vpop.f32.mrf.mxu1  ;;  %v17042_v52 = vpop.f32.mrf.mxu0  ;;  %v11882_v14 = vadd.f32 %v16931_v16, %v16921_v35  ;;  %v8474_v32 = vor.u32 %v8473_v38, %v8470_v58  ;;  %v11994_v43 = vadd.f32 %v16947_v3, %v16928_v54  ;;  %v7409_v11 = vshrl.u32 %v7108_v19, 16 }
 0x349   : > { %8058 = vmatmul.mubr.bf16.gmra.mxu1 %v11287_v13  ;;  %v7412_v4 = vshll.u32 %v7108_v19, 16  ;;  %v8484_v53 = vor.u32 %v8483_v60, %v8479_v41  ;;  %v8489_v44 = vrot.slane %v8487_v17, 5  ;;  %v17056_v51 = vadd.f32 %v11991_v6, %v11879_v36 }
 0x34a   : > { %v17048_v56 = vpop.f32.mrf.mxu1  ;;  %v17054_v49 = vpop.f32.mrf.mxu0  ;;  %8065 = vmatprep.mubr.bf16.mxu1 %v11304_v9  ;;  %v7418_v35 = vshll.u32 %v16977_v33, 16  ;;  %v8475_v38 = vrot.slane %v8474_v32, 4  ;;  %v17061_v58 = vadd.f32 %v11994_v43, %v11882_v14  ;;  %v7411_v54 = vrot.slane %v7409_v11, 4 }
 0x34b   : > { %18392 = vst [vmem:[#allocation19_spill] sm:$0xff] %v17056_v51  ;;  %v7414_v3 = vrot.slane %v7412_v4, 5  ;;  %v8485_v47 = vrot.slane %v8484_v53, 4  ;;  %v7446_v19 = vshrl.u32 %v17052_v46, 16  ;;  %v7452_v13 = vshll.u32 %v7113_v27, 16 }
 0x34c   : > { %v17059_v16 = vpop.f32.mrf.mxu1  ;;  %18393 = vst [vmem:[#allocation11_spill] sm:$0xff] %v17061_v58  ;;  %v7420_v39 = vrot.slane %v7418_v35, 5  ;;  %v18394_v17 = vshll.u32 %v16990_v37, 16  ;;  %v8480_v33 = vsel %vm13232_vm4, %v8475_v38, %v8479_v41  ;;  %v7661_v6 = vrot.slane %v17052_v46, 5  ;;  %v17078_v53 = vld [vmem:[#allocation2 + $0xb4] sm:$0xf] }
 0x34d   : > { %v7415_v36 = vor.u32 %v7414_v3, %v7411_v54  ;;  %v8490_v32 = vsel %vm13232_vm4, %v8485_v47, %v8489_v44  ;;  %v17076_v11 = vrot.slane %v7446_v19, 4  ;;  %v11273_v4 = vrot.slane %v7517_v23, 9  ;;  %v17080_v37 = vld [vmem:[#allocation2 + $0xb8] sm:$0xf] }
 0x34e   : > { %v17064_v9 = vpop.f32.mrf.mxu1  ;;  %v7430_v60 = vrot.slane %v18394_v17, 5  ;;  %v7425_v43 = vor.u32 %v17008_v22, %v7420_v39  ;;  %v11352_v41 = vcombine.low %v8480_v33, %v8490_v32  ;;  %v17084_v54 = vrot.slane %v7452_v13, 5  ;;  %v17086_v17 = vld [vmem:[#allocation2 + $0xbc] sm:$0x1] }
 0x34f   : > { %v17071_v14 = vpop.f32.mrf.mxu0  ;;  %v7416_v38 = vrot.slane %v7415_v36, 4  ;;  %v7663_v3 = vrot.slane %v7661_v6, 4  ;;  %18395 = vst [vmem:[#allocation22_spill] sm:$0xff] %v17086_v17  ;;  %v7664_v22 = vrot.slane %v7113_v27, 5  ;;  %v11336_v23 = vcombine.low %v17010_v34, %v17012_v7 }
 0x350   : > { %v17082_v35 = vpop.f32.mrf.mxu1  ;;  %v7426_v44 = vrot.slane %v7425_v43, 4  ;;  %v11885_v47 = vadd.f32 %v16971_v25, %v16954_v2  ;;  %8980 = vmatprep.mubr.bf16.mxu0 %v11352_v41  ;;  %v8492_v33 = vshrl.u32 %v17078_v53, 16  ;;  %v8495_v36 = vshll.u32 %v17078_v53, 16 }
 0x351   : > { %v17088_v58 = vpop.f32.mrf.mxu0  ;;  %v7421_v13 = vsel %vm13232_vm4, %v7416_v38, %v7420_v39  ;;  %v8501_v32 = vshll.u32 %v17080_v37, 16  ;;  %v7665_v2 = vsel %vm13524_vm7, %v7663_v3, %v7664_v22  ;;  %8981 = vmatmul.mubr.bf16.gmra.mxu0 %v11336_v23  ;;  %v8505_v25 = vshrl.u32 %v17080_v37, 16  ;;  %v17115_v22 = vld [vmem:[#allocation2 + $0xb8] sm:$0xf] }
 0x352   : > { %v17094_v19 = vpop.f32.mrf.mxu1  ;;  %v7431_v34 = vsel %vm13232_vm4, %v7426_v44, %v7430_v60  ;;  %v8511_v7 = vshll.u32 %v17086_v17, 16  ;;  %v7662_v41 = vsel %vm13524_vm7, %v11273_v4, %v7661_v6  ;;  %v8494_v38 = vrot.slane %v8492_v33, 4 }
 0x353   : > { %v17101_v43 = vpop.f32.mrf.mxu0  ;;  %v11288_v39 = vcombine.low %v7421_v13, %v7431_v34  ;;  %v8497_v51 = vrot.slane %v8495_v36, 5  ;;  %v11305_v60 = vcombine.low %v7662_v41, %v7665_v2  ;;  %v8503_v44 = vrot.slane %v8501_v32, 5  ;;  %v7116_v41 = vld [vmem:[#allocation2 + $0xbc] sm:$0x1] }
 0x354   : > { %v17109_v27 = vpop.f32.mrf.mxu1  ;;  %v8507_v30 = vrot.slane %v8505_v25, 4  ;;  %v8513_v3 = vrot.slane %v8511_v7, 5  ;;  %v11997_v13 = vadd.f32 %v16979_v1, %v16969_v55  ;;  %v11888_v6 = vadd.f32 %v16994_v63, %v16981_v42  ;;  %v7518_v25 = vld [vmem:[#allocation2 + $0xb4] sm:$0xe] }
 0x355   : > { %v17113_v61 = vpop.f32.mrf.mxu0  ;;  %8066 = vmatmul.mubr.bf16.gmra.mxu1 %v11288_v39  ;;  %v8498_v31 = vor.u32 %v8497_v51, %v8494_v38  ;;  %v12000_v4 = vadd.f32 %v16999_v24, %v16992_v20  ;;  %v7433_v32 = vshrl.u32 %v7111_v15, 16  ;;  %v7436_v34 = vshll.u32 %v7111_v15, 16 }
 0x356   : > { %v17117_v23 = vpop.f32.mrf.mxu1  ;;  %8073 = vmatprep.mubr.bf16.mxu1 %v11305_v60  ;;  %v8508_v36 = vor.u32 %v8507_v30, %v8503_v44  ;;  %v7442_v2 = vshll.u32 %v17052_v46, 16  ;;  %v17130_v39 = vadd.f32 %v11997_v13, %v11885_v47  ;;  %v7470_v1 = vshrl.u32 %v17115_v22, 16 }
 0x357   : > { %v17125_v33 = vpop.f32.mrf.mxu0  ;;  %v8499_v51 = vrot.slane %v8498_v31, 4  ;;  %v17132_v55 = vadd.f32 %v12000_v4, %v11888_v6  ;;  %v7435_v63 = vrot.slane %v7433_v32, 4  ;;  %v7438_v24 = vrot.slane %v7436_v34, 5  ;;  %v17150_v32 = vld [vmem:[#allocation2 + $0xc0] sm:$0xf] }
 0x358   : > { %v17128_v7 = vpop.f32.mrf.mxu1  ;;  %18396 = vst [vmem:[#allocation31_spill] sm:$0xff] %v17130_v39  ;;  %v8509_v20 = vrot.slane %v8508_v36, 4  ;;  %v7444_v30 = vrot.slane %v7442_v2, 5  ;;  %v17142_v47 = vrot.slane %v7470_v1, 4  ;;  %v11274_v38 = vrot.slane %v7518_v25, 9 }
 0x359   : > { %18397 = vst [vmem:[#allocation13_spill] sm:$0xff] %v17132_v55  ;;  %v17135_v42 = vpop.f32.mrf.mxu0  ;;  %v8504_v46 = vsel %vm13232_vm4, %v8499_v51, %v8503_v44  ;;  %v7439_v6 = vor.u32 %v7438_v24, %v7435_v63  ;;  %v7668_v36 = vrot.slane %v17115_v22, 5  ;;  %v17152_v34 = vld [vmem:[#allocation2 + $0xc4] sm:$0xf]  ;;  %v7476_v51 = vshll.u32 %v7116_v41, 16 }
 0x35a   : > { %v17137_v15 = vpop.f32.mrf.mxu1  ;;  %v8514_v13 = vsel %vm13232_vm4, %v8509_v20, %v8513_v3  ;;  %v7449_v4 = vor.u32 %v17076_v11, %v7444_v30  ;;  %v7671_v1 = vrot.slane %v7116_v41, 5  ;;  %v11337_v25 = vcombine.low %v17078_v53, %v17080_v37 }
 0x35b   : > { %v17144_v60 = vpop.f32.mrf.mxu0  ;;  %v11353_v2 = vcombine.low %v8504_v46, %v8514_v13  ;;  %v7440_v3 = vrot.slane %v7439_v6, 4  ;;  %v7669_v11 = vsel %vm13524_vm7, %v11274_v38, %v7668_v36  ;;  %v7670_v63 = vrot.slane %v7668_v36, 4  ;;  %v8177_v46 = vld [vmem:[#allocation2 + $0xc8] sm:$0x1] }
 0x35c   : > { %v17154_v44 = vpop.f32.mrf.mxu1  ;;  %v7450_v20 = vrot.slane %v7449_v4, 4  ;;  %v11891_v55 = vadd.f32 %v17025_v57, %v17014_v8  ;;  %v8516_v41 = vshrl.u32 %v17150_v32, 16  ;;  %v8519_v13 = vshll.u32 %v17150_v32, 16  ;;  %v7114_v57 = vld [vmem:[#allocation2 + $0xb4] sm:$0xf] }
 0x35d   : > { %v17158_v31 = vpop.f32.mrf.mxu0  ;;  %8988 = vmatprep.mubr.bf16.mxu0 %v11353_v2  ;;  %v8525_v53 = vshll.u32 %v17152_v34, 16  ;;  %v7445_v6 = vsel %vm13232_vm4, %v7440_v3, %v7444_v30  ;;  %v7672_v4 = vsel %vm13524_vm7, %v7670_v63, %v7671_v1  ;;  %v8529_v8 = vshrl.u32 %v17152_v34, 16 }
 0x35e   : > { %v17162_v24 = vpop.f32.mrf.mxu1  ;;  %v7455_v38 = vsel %vm13232_vm4, %v7450_v20, %v17084_v54  ;;  %8989 = vmatmul.mubr.bf16.gmra.mxu0 %v11337_v25  ;;  %v11306_v39 = vcombine.low %v7669_v11, %v7672_v4  ;;  %v8518_v5 = vrot.slane %v8516_v41, 4  ;;  %v8521_v17 = vrot.slane %v8519_v13, 5  ;;  %v17191_v41 = vld [vmem:[#allocation2 + $0xc4] sm:$0xf] }
 0x35f   : > { %v17169_v37 = vpop.f32.mrf.mxu0  ;;  %v11289_v2 = vcombine.low %v7445_v6, %v7455_v38  ;;  %v8527_v30 = vrot.slane %v8525_v53, 5  ;;  %v8531_v3 = vrot.slane %v8529_v8, 4  ;;  %v8535_v29 = vshll.u32 %v8177_v46, 16 }
 0x360   : > { %v17179_v36 = vpop.f32.mrf.mxu1  ;;  %v12003_v54 = vadd.f32 %v17027_v40, %v17016_v0  ;;  %v8522_v1 = vor.u32 %v8521_v17, %v8518_v5  ;;  %v11894_v25 = vadd.f32 %v17048_v56, %v17040_v12  ;;  %v12006_v11 = vadd.f32 %v17054_v49, %v17042_v52  ;;  %v17197_v0 = vld [vmem:[#allocation2 + $0xc8] sm:$0x1]  ;;  %v7519_v5 = vld [vmem:[#allocation2 + $0xc0] sm:$0xe] }
 0x361   : > { %v17181_v28 = vpop.f32.mrf.mxu0  ;;  %8074 = vmatmul.mubr.bf16.gmra.mxu1 %v11289_v2  ;;  %v7457_v63 = vshrl.u32 %v7114_v57, 16  ;;  %v7478_v53 = vrot.slane %v7476_v51, 5  ;;  %v8532_v46 = vor.u32 %v8531_v3, %v8527_v30  ;;  %v7460_v40 = vshll.u32 %v7114_v57, 16 }
 0x362   : > { %v17185_v20 = vpop.f32.mrf.mxu1  ;;  %8081 = vmatprep.mubr.bf16.mxu1 %v11306_v39  ;;  %v17195_v6 = vadd.f32 %v12003_v54, %v11891_v55  ;;  %v8523_v12 = vrot.slane %v8522_v1, 4  ;;  %v17201_v56 = vadd.f32 %v12006_v11, %v11894_v25  ;;  %v7466_v49 = vshll.u32 %v17115_v22, 16 }
 0x363   : > { %v17193_v13 = vpop.f32.mrf.mxu0  ;;  %v7459_v52 = vrot.slane %v7457_v63, 4  ;;  %v8533_v4 = vrot.slane %v8532_v46, 4  ;;  %v8537_v51 = vrot.slane %v8535_v29, 5  ;;  %v7462_v39 = vrot.slane %v7460_v40, 5 }
 0x364   : > { %18398 = vst [vmem:[#allocation35_spill] sm:$0xff] %v17195_v6  ;;  %v17199_v17 = vpop.f32.mrf.mxu1  ;;  %18399 = vst [vmem:[#allocation36_spill] sm:$0xff] %v17201_v56  ;;  %v7494_v55 = vshrl.u32 %v17191_v41, 16  ;;  %v7468_v57 = vrot.slane %v7466_v49, 5  ;;  %v7500_v2 = vshll.u32 %v17197_v0, 16  ;;  %v11275_v3 = vrot.slane %v7519_v5, 9 }
 0x365   : > { %v17204_v38 = vpop.f32.mrf.mxu0  ;;  %v7675_v54 = vrot.slane %v17191_v41, 5  ;;  %v8528_v22 = vsel %vm13232_vm4, %v8523_v12, %v8527_v30  ;;  %v8538_v25 = vsel %vm13232_vm4, %v8533_v4, %v8537_v51  ;;  %v7463_v29 = vor.u32 %v7462_v39, %v7459_v52  ;;  %v7117_v56 = vld [vmem:[#allocation2 + $0xc0] sm:$0xf] }
 0x366   : > { %v17207_v8 = vpop.f32.mrf.mxu1  ;;  %v17217_v11 = vrot.slane %v7494_v55, 4  ;;  %v11354_v46 = vcombine.low %v8528_v22, %v8538_v25  ;;  %v7473_v40 = vor.u32 %v17142_v47, %v7468_v57  ;;  %v7678_v30 = vrot.slane %v17197_v0, 5  ;;  %v327_v0 = vld [vmem:[#allocation2 + $0xcc] sm:$0x1] }
 0x367   : > { %v17211_v1 = vpop.f32.mrf.mxu0  ;;  %v7676_v5 = vsel %vm13524_vm7, %v11275_v3, %v7675_v54  ;;  %v7677_v49 = vrot.slane %v7675_v54, 4  ;;  %v7464_v48 = vrot.slane %v7463_v29, 4  ;;  %v11338_v12 = vcombine.low %v17150_v32, %v17152_v34  ;;  %v383_v54 = vld [vmem:[#allocation2 + $0xd4] sm:$0x1]  ;;  %v9045_v29 = vld [vmem:[#allocation2 + $0x18] sm:$0xe] }
 0x368   : > { %v17219_v63 = vpop.f32.mrf.mxu1  ;;  %v11897_v52 = vadd.f32 %v17064_v9, %v17059_v16  ;;  %8996 = vmatprep.mubr.bf16.mxu0 %v11354_v46  ;;  %v7474_v47 = vrot.slane %v7473_v40, 4  ;;  %v12009_v51 = vadd.f32 %v17088_v58, %v17071_v14  ;;  %v11900_v39 = vadd.f32 %v17094_v19, %v17082_v35  ;;  %v17245_v58 = vld [vmem:[#allocation2 + $0xd0] sm:$0xf] }
 0x369   : > { %v17224_v6 = vpop.f32.mrf.mxu0  ;;  %v12012_v55 = vadd.f32 %v17113_v61, %v17101_v43  ;;  %v7469_v32 = vsel %vm13232_vm4, %v7464_v48, %v7468_v57  ;;  %v7679_v16 = vsel %vm13524_vm7, %v7677_v49, %v7678_v30  ;;  %8997 = vmatmul.mubr.bf16.gmra.mxu0 %v11338_v12  ;;  %v7481_v9 = vshrl.u32 %v7117_v56, 16 }
 0x36a   : > { %v17231_v4 = vpop.f32.mrf.mxu1  ;;  %v7484_v34 = vshll.u32 %v7117_v56, 16  ;;  %v7479_v61 = vsel %vm13232_vm4, %v7474_v47, %v7478_v53  ;;  %v11307_v35 = vcombine.low %v7676_v5, %v7679_v16  ;;  %v17251_v19 = vadd.f32 %v12009_v51, %v11897_v52 }
 0x36b   : > { %v17239_v3 = vpop.f32.mrf.mxu0  ;;  %v17253_v43 = vadd.f32 %v12012_v55, %v11900_v39  ;;  %v11290_v57 = vcombine.low %v7469_v32, %v7479_v61  ;;  %v7483_v22 = vrot.slane %v7481_v9, 4  ;;  %v7490_v56 = vshll.u32 %v17191_v41, 16  ;;  %v12965_v41 = vld [vmem:[#allocation2 + $0x1c] sm:$0xf]  ;;  %v9046_v32 = vld [vmem:[#allocation2 + $0x24] sm:$0xe] }
 0x36c   : > { %v17247_v14 = vpop.f32.mrf.mxu1  ;;  %18400 = vst [vmem:[#allocation32_spill] sm:$0xff] %v17251_v19  ;;  %v7486_v25 = vrot.slane %v7484_v34, 5  ;;  %v328_v40 = vsel %vm15444_vm10, 0, %v327_v0  ;;  %v384_v53 = vsel %vm15465_vm12, 0, %v383_v54  ;;  %v8549_v5 = vshll.u32 %v17245_v58, 16 }
 0x36d   : > { %18401 = vst [vmem:[#allocation33_spill] sm:$0xff] %v17253_v43  ;;  %v17255_v48 = vpop.f32.mrf.mxu0  ;;  %v8553_v49 = vshrl.u32 %v17245_v58, 16  ;;  %8082 = vmatmul.mubr.bf16.gmra.mxu1 %v11290_v57  ;;  %v7502_v12 = vrot.slane %v7500_v2, 5  ;;  %v7492_v47 = vrot.slane %v7490_v56, 5  ;;  %329 = vst [vmem:[#allocation2 + $0xcc] sm:$0x1] %v328_v40  ;;  %v11903_v0 = vadd.f32 %v17117_v23, %v17109_v27 }
 0x36e   : > { %v17258_v46 = vpop.f32.mrf.mxu1  ;;  %v7487_v52 = vor.u32 %v7486_v25, %v7483_v22  ;;  %385 = vst [vmem:[#allocation2 + $0xd4] sm:$0x1] %v384_v53  ;;  %v9095_v51 = vrot.slane %v12965_v41, 5  ;;  %8089 = vmatprep.mubr.bf16.mxu1 %v11307_v35  ;;  %v17270_v59 = vrot.slane %v8549_v5, 5  ;;  %v11372_v55 = vrot.slane %v9045_v29, 9 }
 0x36f   : > { %v17266_v30 = vpop.f32.mrf.mxu0  ;;  %v8555_v18 = vrot.slane %v8553_v49, 4  ;;  %v7497_v9 = vor.u32 %v17217_v11, %v7492_v47  ;;  %v12966_v54 = vld [vmem:[#allocation2 + $0x20] sm:$0x1]  ;;  %v12015_v22 = vadd.f32 %v17135_v42, %v17125_v33  ;;  %v11906_v27 = vadd.f32 %v17137_v15, %v17128_v7  ;;  %v11412_v25 = vld [vmem:[%s13194_s26 + $0xc] sm:$0xf] }
 0x370   : > { %v17268_v39 = vpop.f32.mrf.mxu1  ;;  %v7488_v2 = vrot.slane %v7487_v52, 4  ;;  %v9097_v34 = vrot.slane %v9095_v51, 4  ;;  %v9098_v61 = vrot.slane %v12966_v54, 5  ;;  %v12018_v23 = vadd.f32 %v17158_v31, %v17144_v60  ;;  %v11413_v5 = vld [vmem:[%s13194_s26 + $0x10] sm:$0xf] }
 0x371   : > { %v17274_v16 = vpop.f32.mrf.mxu0  ;;  %v8556_v35 = vor.u32 %v8555_v18, %v17270_v59  ;;  %v7498_v29 = vrot.slane %v7497_v9, 4  ;;  %v9096_v40 = vsel %vm13524_vm7, %v11372_v55, %v9095_v51  ;;  %v11373_v53 = vrot.slane %v9046_v32, 9  ;;  %v9047_v18 = vld [vmem:[#allocation2 + $0x30] sm:$0xe] }
 0x372   : > { %v17277_v57 = vpop.f32.mrf.mxu1  ;;  %v7493_v11 = vsel %vm13232_vm4, %v7488_v2, %v7492_v47  ;;  %v9099_v7 = vsel %vm13524_vm7, %v9097_v34, %v9098_v61  ;;  %v17300_v42 = vadd.f32 %v12015_v22, %v11903_v0  ;;  %v17302_v15 = vadd.f32 %v12018_v23, %v11906_v27  ;;  %v11414_v27 = vld [vmem:[%s13194_s26 + $0x14] sm:$0x1] }
 0x373   : > { %v17287_v56 = vpop.f32.mrf.mxu0  ;;  %v17296_v33 = vrot.slane %v8556_v35, 4  ;;  %v7503_v60 = vsel %vm13232_vm4, %v7498_v29, %v7502_v12  ;;  %v18404_v52 = vrot.slane %v16494_v45, 5  ;;  %v9576_v41 = vshrl.u32 %v11412_v25, 16 }
 0x374   : > { %v17294_v49 = vpop.f32.mrf.mxu1  ;;  %18402 = vst [vmem:[#allocation23_spill] sm:$0xff] %v17300_v42  ;;  %18403 = vst [vmem:[#allocation37_spill] sm:$0xff] %v17302_v15  ;;  %v9579_v51 = vshll.u32 %v11412_v25, 16  ;;  %v11291_v0 = vcombine.low %v7493_v11, %v7503_v60  ;;  %v17316_v32 = vld [vmem:[#allocation2 + $0xcc] sm:$0xf]  ;;  %v9585_v12 = vshll.u32 %v11413_v5, 16  ;;  %v11388_v22 = vcombine.low %v9096_v40, %v9099_v7 }
 0x375   : > { %v17304_v31 = vpop.f32.mrf.mxu0  ;;  %v17312_v47 = vsel %vm13524_vm7, %v11373_v53, %v18404_v52  ;;  %v8178_v2 = vld [vmem:[#allocation2 + $0xd4] sm:$0x1]  ;;  %v9589_v34 = vshrl.u32 %v11413_v5, 16  ;;  %v8540_v54 = vshrl.u32 %v17316_v32, 16  ;;  %v8543_v61 = vshll.u32 %v17316_v32, 16 }
 0x376   : > { %v17314_v55 = vpop.f32.mrf.mxu1  ;;  %v11389_v9 = vcombine.low %v17312_v47, %v16535_v10  ;;  %v8559_v35 = vshll.u32 %v8178_v2, 16  ;;  %8090 = vmatmul.mubr.bf16.gmra.mxu1 %v11291_v0  ;;  %v9578_v11 = vrot.slane %v9576_v41, 4  ;;  %v9581_v10 = vrot.slane %v9579_v51, 5  ;;  %v12967_v15 = vld [vmem:[#allocation2 + $0x34] sm:$0xf] }
 0x377   : > { %v17320_v45 = vpop.f32.mrf.mxu0  ;;  %v9587_v29 = vrot.slane %v9585_v12, 5  ;;  %v8542_v5 = vrot.slane %v8540_v54, 4  ;;  %v8545_v60 = vrot.slane %v8543_v61, 5  ;;  %12654 = vmatprep.mubr.bf16.mxu1 %v11388_v22  ;;  %v9591_v47 = vrot.slane %v9589_v34, 4  ;;  %v11415_v25 = vld [vmem:[%s13194_s26 + $0x18] sm:$0xf] }
 0x378   : > { %v17325_v23 = vpop.f32.mrf.mxu1  ;;  %v8561_v52 = vrot.slane %v8559_v35, 5  ;;  %v9582_v7 = vor.u32 %v9581_v10, %v9578_v11  ;;  %v9595_v2 = vshll.u32 %v11414_v27, 16  ;;  %v11374_v0 = vrot.slane %v9047_v18, 9  ;;  %v12968_v54 = vld [vmem:[#allocation2 + $0x38] sm:$0x1] }
 0x379   : > { %v17329_v53 = vpop.f32.mrf.mxu0  ;;  %v9109_v42 = vrot.slane %v12967_v15, 5  ;;  %v8546_v41 = vor.u32 %v8545_v60, %v8542_v5  ;;  %v9592_v12 = vor.u32 %v9591_v47, %v9587_v29  ;;  %v9112_v61 = vrot.slane %v12968_v54, 5  ;;  %v11416_v34 = vld [vmem:[%s13194_s26 + $0x1c] sm:$0xf] }
 0x37a   : > { %v17331_v40 = vpop.f32.mrf.mxu1  ;;  %v8562_v51 = vsel %vm13232_vm4, %v17296_v33, %v8561_v52  ;;  %v9583_v22 = vrot.slane %v9582_v7, 4  ;;  %v9597_v27 = vrot.slane %v9595_v2, 5  ;;  %v9600_v60 = vshrl.u32 %v11415_v25, 16  ;;  %v11417_v7 = vld [vmem:[%s13194_s26 + $0x20] sm:$0x1] }
 0x37b   : > { %v17334_v43 = vpop.f32.mrf.mxu0  ;;  %v9110_v15 = vsel %vm13524_vm7, %v11374_v0, %v9109_v42  ;;  %v9111_v18 = vrot.slane %v9109_v42, 4  ;;  %v8547_v10 = vrot.slane %v8546_v41, 4  ;;  %v9593_v5 = vrot.slane %v9592_v12, 4  ;;  %v9048_v12 = vld [vmem:[#allocation2 + $0x3c] sm:$0xe] }
 0x37c   : > { %v17340_v35 = vpop.f32.mrf.mxu1  ;;  %v9603_v19 = vshll.u32 %v11415_v25, 16  ;;  %v9588_v52 = vsel %vm13232_vm4, %v9583_v22, %v9587_v29  ;;  %v9609_v2 = vshll.u32 %v11416_v34, 16  ;;  %v9613_v54 = vshrl.u32 %v11416_v34, 16 }
 0x37d   : > { %18405 = vst [vmem:[#allocation38_spill] sm:$0xff] %v17340_v35  ;;  %v17344_v11 = vpop.f32.mrf.mxu0  ;;  %v9113_v47 = vsel %vm13524_vm7, %v9111_v18, %v9112_v61  ;;  %v8552_v42 = vsel %vm13232_vm4, %v8547_v10, %v17270_v59  ;;  %v9598_v25 = vsel %vm13232_vm4, %v9593_v5, %v9597_v27  ;;  %v9602_v41 = vrot.slane %v9600_v60, 4  ;;  %v11418_v10 = vld [vmem:[%s13194_s26 + $0x24] sm:$0xf] }
 0x37e   : > { %v17346_v33 = vpop.f32.mrf.mxu1  ;;  %v11390_v0 = vcombine.low %v9110_v15, %v9113_v47  ;;  %v11355_v22 = vcombine.low %v8552_v42, %v8562_v51  ;;  %12655 = vmatmul.mubr.bf16.vlgmr.msra.gmra.mxu1 %v11389_v9  ;;  %v11461_v61 = vcombine.low %v9588_v52, %v9598_v25  ;;  %v9605_v34 = vrot.slane %v9603_v19, 5  ;;  %v11419_v52 = vld [vmem:[%s13194_s26 + $0x28] sm:$0xf] }
 0x37f   : > { %18406 = vst [vmem:[#allocation39_spill] sm:$0xff] %v17346_v33  ;;  %v17353_v35 = vpop.f32.mrf.mxu0  ;;  %v9611_v18 = vrot.slane %v9609_v2, 5  ;;  %v9615_v33 = vrot.slane %v9613_v54, 4  ;;  %v9619_v59 = vshll.u32 %v11417_v7, 16  ;;  %v11909_v27 = vadd.f32 %v17162_v24, %v17154_v44  ;;  %v12969_v7 = vld [vmem:[#allocation2 + $0x40] sm:$0xf] }
 0x380   : > { %18407 = vst [vmem:[#allocation40_spill] sm:$0xff] %v17353_v35  ;;  %v17360_v29 = vpop.f32.mrf.mxu1  ;;  %12658 = vmatprep.mubr.bf16.mxu1 %v11390_v0  ;;  %v12021_v15 = vadd.f32 %v17181_v28, %v17169_v37  ;;  %9004 = vmatprep.mubr.bf16.mxu0 %v11355_v22  ;;  %v9606_v9 = vor.u32 %v9605_v34, %v9602_v41  ;;  %v11375_v60 = vrot.slane %v9048_v12, 9  ;;  %v9116_v2 = vrot.slane %v12969_v7, 5 }
 0x381   : > { %v17362_v35 = vpop.f32.mrf.mxu0  ;;  %v11912_v19 = vadd.f32 %v17185_v20, %v17179_v36  ;;  %v12024_v51 = vadd.f32 %v17204_v38, %v17193_v13  ;;  %v18408_v44 = vcombine.low %v17316_v32, %v17245_v58  ;;  %v9616_v28 = vor.u32 %v9615_v33, %v9611_v18  ;;  %v11420_v13 = vld [vmem:[%s13194_s26 + $0x2c] sm:$0x1] }
 0x382   : > { %v17369_v5 = vpop.f32.mrf.mxu1  ;;  %v9621_v24 = vrot.slane %v9619_v59, 5  ;;  %v17381_v37 = vadd.f32 %v12021_v15, %v11909_v27  ;;  %v9607_v36 = vrot.slane %v9606_v9, 4  ;;  %v9624_v38 = vshrl.u32 %v11418_v10, 16  ;;  %v9049_v59 = vld [vmem:[#allocation2 + $0x48] sm:$0xe] }
 0x383   : > { %v17376_v47 = vpop.f32.mrf.mxu0  ;;  %9005 = vmatmul.mubr.bf16.gmra.mxu0 %v18408_v44  ;;  %v17386_v20 = vadd.f32 %v12024_v51, %v11912_v19  ;;  %v9627_v42 = vshll.u32 %v11418_v10, 16  ;;  %v9617_v58 = vrot.slane %v9616_v28, 4  ;;  %v9117_v32 = vsel %vm13524_vm7, %v11375_v60, %v9116_v2  ;;  %v11421_v60 = vld [vmem:[%s13194_s26 + $0x30] sm:$0xf] }
 0x384   : > { %18409 = vst [vmem:[#allocation29_spill] sm:$0xff] %v17381_v37  ;;  %v17383_v54 = vpop.f32.mrf.mxu1  ;;  %12688 = vmatprep.mubr.msk.bf16.mxu0 %vm872_vm3, %v11461_v61  ;;  %v9118_v33 = vrot.slane %v9116_v2, 4  ;;  %v9633_v0 = vshll.u32 %v11419_v52, 16  ;;  %v9612_v12 = vsel %vm13232_vm4, %v9607_v36, %v9611_v18  ;;  %v9626_v22 = vrot.slane %v9624_v38, 4  ;;  %v11422_v2 = vld [vmem:[%s13194_s26 + $0x34] sm:$0xf] }
 0x385   : > { %18410 = vst [vmem:[#allocation28_spill] sm:$0xff] %v17386_v20  ;;  %v17389_v25 = vpop.f32.mrf.mxu0  ;;  %v9629_v61 = vrot.slane %v9627_v42, 5  ;;  %v9637_v34 = vshrl.u32 %v11419_v52, 16  ;;  %v9622_v15 = vsel %vm13232_vm4, %v9617_v58, %v9621_v24  ;;  %v18411_v10 = vrot.slane %v16602_v26, 5  ;;  %v12970_v42 = vld [vmem:[#allocation2 + $0x4c] sm:$0xf] }
 0x386   : > { %v17393_v41 = vpop.f32.mrf.mxu1  ;;  %v9635_v19 = vrot.slane %v9633_v0, 5  ;;  %v9643_v51 = vshll.u32 %v11420_v13, 16  ;;  %v11462_v18 = vcombine.low %v9612_v12, %v9622_v15  ;;  %v11376_v24 = vrot.slane %v9049_v59, 9  ;;  %v12971_v58 = vld [vmem:[#allocation2 + $0x50] sm:$0x1] }
 0x387   : > { %v17397_v27 = vpop.f32.mrf.mxu0  ;;  %v9120_v9 = vsel %vm13524_vm7, %v9118_v33, %v18411_v10  ;;  %v9630_v52 = vor.u32 %v9629_v61, %v9626_v22  ;;  %v9639_v7 = vrot.slane %v9637_v34, 4  ;;  %v9123_v26 = vrot.slane %v12970_v42, 5  ;;  %v11423_v10 = vld [vmem:[%s13194_s26 + $0x38] sm:$0x1] }
 0x388   : > { %v17406_v44 = vpop.f32.mrf.mxu1  ;;  %v11391_v28 = vcombine.low %v9117_v32, %v9120_v9  ;;  %v9645_v38 = vrot.slane %v9643_v51, 5  ;;  %v9126_v20 = vrot.slane %v12971_v58, 5  ;;  %v9648_v12 = vshrl.u32 %v11421_v60, 16  ;;  %v9050_v58 = vld [vmem:[#allocation2 + $0x54] sm:$0xe] }
 0x389   : > { %v17409_v36 = vpop.f32.mrf.mxu0  ;;  %v9631_v13 = vrot.slane %v9630_v52, 4  ;;  %v9640_v0 = vor.u32 %v9639_v7, %v9635_v19  ;;  %v9651_v15 = vshll.u32 %v11421_v60, 16  ;;  %v9124_v22 = vsel %vm13524_vm7, %v11376_v24, %v9123_v26 }
 0x38a   : > { %v17411_v33 = vpop.f32.mrf.mxu1  ;;  %12659 = vmatmul.mubr.bf16.gmra.mxu1 %v11391_v28  ;;  %v9125_v61 = vrot.slane %v9123_v26, 4  ;;  %v9657_v34 = vshll.u32 %v11422_v2, 16  ;;  %v9661_v59 = vshrl.u32 %v11422_v2, 16  ;;  %v9650_v52 = vrot.slane %v9648_v12, 4 }
 0x38b   : > { %v17414_v32 = vpop.f32.mrf.mxu0  ;;  %12689 = vmatmul.mubr.msk.bf16.vlgmr.msra.gmra.mxu0 %vm872_vm3, %v11462_v18  ;;  %v9636_v51 = vsel %vm13232_vm4, %v9631_v13, %v9635_v19  ;;  %v9641_v28 = vrot.slane %v9640_v0, 4  ;;  %v9653_v7 = vrot.slane %v9651_v15, 5  ;;  %v9667_v26 = vshll.u32 %v11423_v10, 16  ;;  %v11424_v0 = vld [vmem:[%s13194_s26 + $0x3c] sm:$0xf] }
 0x38c   : > { %v17419_v9 = vpop.f32.mrf.mxu1  ;;  %v9127_v18 = vsel %vm13524_vm7, %v9125_v61, %v9126_v20  ;;  %v9659_v42 = vrot.slane %v9657_v34, 5  ;;  %v9663_v24 = vrot.slane %v9661_v59, 4  ;;  %v11915_v13 = vadd.f32 %v17207_v8, %v17199_v17  ;;  %v11425_v34 = vld [vmem:[%s13194_s26 + $0x40] sm:$0xf] }
 0x38d   : > { %18412 = vst [vmem:[#allocation41_spill] sm:$0xff] %v17419_v9  ;;  %v17423_v60 = vpop.f32.mrf.mxu0  ;;  %v9646_v9 = vsel %vm13232_vm4, %v9641_v28, %v9645_v38  ;;  %v11392_v37 = vcombine.low %v9124_v22, %v9127_v18  ;;  %v9654_v19 = vor.u32 %v9653_v7, %v9650_v52  ;;  %v9669_v61 = vrot.slane %v9667_v26, 5  ;;  %v9051_v18 = vld [vmem:[#allocation2 + $0x60] sm:$0xe] }
 0x38e   : > { %v17427_v2 = vpop.f32.mrf.mxu1  ;;  %v11463_v15 = vcombine.low %v9636_v51, %v9646_v9  ;;  %v9664_v20 = vor.u32 %v9663_v24, %v9659_v42  ;;  %v12027_v10 = vadd.f32 %v17224_v6, %v17211_v1  ;;  %v11918_v22 = vadd.f32 %v17231_v4, %v17219_v63  ;;  %v12972_v6 = vld [vmem:[#allocation2 + $0x58] sm:$0xf]  ;;  %v11426_v4 = vld [vmem:[%s13194_s26 + $0x44] sm:$0x1] }
 0x38f   : > { %18413 = vst [vmem:[#allocation42_spill] sm:$0xff] %v17427_v2  ;;  %v17434_v12 = vpop.f32.mrf.mxu0  ;;  %12662 = vmatprep.mubr.bf16.mxu1 %v11392_v37  ;;  %v9655_v38 = vrot.slane %v9654_v19, 4  ;;  %v12030_v17 = vadd.f32 %v17255_v48, %v17239_v3  ;;  %v11377_v8 = vrot.slane %v9050_v58, 9  ;;  %v9130_v1 = vrot.slane %v12972_v6, 5 }
 0x390   : > { %18414 = vst [vmem:[#allocation43_spill] sm:$0xff] %v17434_v12  ;;  %v17439_v59 = vpop.f32.mrf.mxu1  ;;  %12692 = vmatprep.mubr.msk.bf16.mxu0 %vm872_vm3, %v11463_v15  ;;  %v9665_v9 = vrot.slane %v9664_v20, 4  ;;  %v17448_v51 = vadd.f32 %v12027_v10, %v11915_v13  ;;  %v9672_v52 = vshrl.u32 %v11424_v0, 16  ;;  %v9675_v3 = vshll.u32 %v11424_v0, 16  ;;  %v11427_v0 = vld [vmem:[%s13194_s26 + $0x48] sm:$0xf] }
 0x391   : > { %v17445_v28 = vpop.f32.mrf.mxu0  ;;  %v9660_v37 = vsel %vm13232_vm4, %v9655_v38, %v9659_v42  ;;  %v17454_v63 = vadd.f32 %v12030_v17, %v11918_v22  ;;  %v9681_v48 = vshll.u32 %v11425_v34, 16  ;;  %v9131_v58 = vsel %vm13524_vm7, %v11377_v8, %v9130_v1  ;;  %v12973_v8 = vld [vmem:[#allocation2 + $0x64] sm:$0xf] }
 0x392   : > { %18415 = vst [vmem:[#allocation44_spill] sm:$0xff] %v17445_v28  ;;  %18416 = vst [vmem:[#allocation18_spill] sm:$0xff] %v17448_v51  ;;  %v17450_v7 = vpop.f32.mrf.mxu1  ;;  %v9670_v26 = vsel %vm13232_vm4, %v9665_v9, %v9669_v61  ;;  %v9132_v19 = vrot.slane %v9130_v1, 4  ;;  %v9674_v13 = vrot.slane %v9672_v52, 4  ;;  %v9677_v20 = vrot.slane %v9675_v3, 5 }
 0x393   : > { %18417 = vst [vmem:[#allocation9_spill] sm:$0xff] %v17454_v63  ;;  %v17457_v24 = vpop.f32.mrf.mxu0  ;;  %v11464_v42 = vcombine.low %v9660_v37, %v9670_v26  ;;  %v9683_v10 = vrot.slane %v9681_v48, 5  ;;  %v9685_v38 = vshrl.u32 %v11425_v34, 16  ;;  %v18419_v17 = vrot.slane %v16680_v21, 5  ;;  %v11428_v52 = vld [vmem:[%s13194_s26 + $0x4c] sm:$0xf] }
 0x394   : > { %v17463_v15 = vpop.f32.mrf.mxu1  ;;  %v9691_v9 = vshll.u32 %v11426_v4, 16  ;;  %v11378_v6 = vrot.slane %v9051_v18, 9  ;;  %v9137_v1 = vrot.slane %v12973_v8, 5  ;;  %v9678_v34 = vor.u32 %v9677_v20, %v9674_v13  ;;  %v12974_v48 = vld [vmem:[#allocation2 + $0x68] sm:$0x1] }
 0x395   : > { %18418 = vst [vmem:[#allocation45_spill] sm:$0xff] %v17463_v15  ;;  %v17466_v22 = vpop.f32.mrf.mxu0  ;;  %v9134_v61 = vsel %vm13524_vm7, %v9132_v19, %v18419_v17  ;;  %12693 = vmatmul.mubr.msk.bf16.gmra.mxu0 %vm872_vm3, %v11464_v42  ;;  %v9687_v3 = vrot.slane %v9685_v38, 4  ;;  %v9140_v26 = vrot.slane %v12974_v48, 5  ;;  %v11429_v15 = vld [vmem:[%s13194_s26 + $0x50] sm:$0x1]  ;;  %v9696_v19 = vshrl.u32 %v11427_v0, 16 }
 0x396   : > { %v17473_v2 = vpop.f32.mrf.mxu1  ;;  %v11393_v37 = vcombine.low %v9131_v58, %v9134_v61  ;;  %v9693_v21 = vrot.slane %v9691_v9, 5  ;;  %v9138_v4 = vsel %vm13524_vm7, %v11378_v6, %v9137_v1  ;;  %v9139_v18 = vrot.slane %v9137_v1, 4 }
 0x397   : > { %18420 = vst [vmem:[#allocation46_spill] sm:$0xff] %v17473_v2  ;;  %v17477_v28 = vpop.f32.mrf.mxu0  ;;  %v9679_v8 = vrot.slane %v9678_v34, 4  ;;  %v9688_v2 = vor.u32 %v9687_v3, %v9683_v10  ;;  %v9699_v42 = vshll.u32 %v11427_v0, 16  ;;  %v9705_v58 = vshll.u32 %v11428_v52, 16  ;;  %v9052_v0 = vld [vmem:[#allocation2 + $0x6c] sm:$0xe] }
 0x398   : > { %18421 = vst [vmem:[#allocation47_spill] sm:$0xff] %v17477_v28  ;;  %v17481_v17 = vpop.f32.mrf.mxu1  ;;  %12663 = vmatmul.mubr.bf16.gmra.mxu1 %v11393_v37  ;;  %v9141_v20 = vsel %vm13524_vm7, %v9139_v18, %v9140_v26  ;;  %v9698_v38 = vrot.slane %v9696_v19, 4  ;;  %v9709_v61 = vshrl.u32 %v11428_v52, 16  ;;  %v9715_v9 = vshll.u32 %v11429_v15, 16  ;;  %v11430_v52 = vld [vmem:[%s13194_s26 + $0x54] sm:$0xf] }
 0x399   : > { %18422 = vst [vmem:[#allocation48_spill] sm:$0xff] %v17481_v17  ;;  %v17483_v13 = vpop.f32.mrf.mxu0  ;;  %v9684_v6 = vsel %vm13232_vm4, %v9679_v8, %v9683_v10  ;;  %v9689_v1 = vrot.slane %v9688_v2, 4  ;;  %v11394_v37 = vcombine.low %v9138_v4, %v9141_v20  ;;  %v9701_v34 = vrot.slane %v9699_v42, 5  ;;  %v11431_v19 = vld [vmem:[%s13194_s26 + $0x58] sm:$0xf] }
 0x39a   : > { %18423 = vst [vmem:[#allocation49_spill] sm:$0xff] %v17483_v13  ;;  %v17487_v48 = vpop.f32.mrf.mxu1  ;;  %v9707_v13 = vrot.slane %v9705_v58, 5  ;;  %v9711_v28 = vrot.slane %v9709_v61, 4  ;;  %v9717_v17 = vrot.slane %v9715_v9, 5  ;;  %v11921_v26 = vadd.f32 %v17258_v46, %v17247_v14  ;;  %v12975_v61 = vld [vmem:[#allocation2 + $0x70] sm:$0xf] }
 0x39b   : > { %18424 = vst [vmem:[#allocation50_spill] sm:$0xff] %v17487_v48  ;;  %v17491_v3 = vpop.f32.mrf.mxu0  ;;  %v9694_v18 = vsel %vm13232_vm4, %v9689_v1, %v9693_v21  ;;  %12666 = vmatprep.mubr.bf16.mxu1 %v11394_v37  ;;  %v9702_v2 = vor.u32 %v9701_v34, %v9698_v38  ;;  %v12033_v10 = vadd.f32 %v17274_v16, %v17266_v30  ;;  %v11379_v58 = vrot.slane %v9052_v0, 9  ;;  %v9053_v9 = vld [vmem:[#allocation2 + $0x78] sm:$0xe] }
 0x39c   : > { %18425 = vst [vmem:[#allocation51_spill] sm:$0xff] %v17491_v3  ;;  %v17496_v15 = vpop.f32.mrf.mxu1  ;;  %v11924_v4 = vadd.f32 %v17277_v57, %v17268_v39  ;;  %v11465_v42 = vcombine.low %v9684_v6, %v9694_v18  ;;  %v9712_v14 = vor.u32 %v9711_v28, %v9707_v13  ;;  %v12036_v46 = vadd.f32 %v17304_v31, %v17287_v56  ;;  %v11432_v6 = vld [vmem:[%s13194_s26 + $0x5c] sm:$0x1]  ;;  %v11435_v3 = vld [vmem:[%s13194_s26 + $0x68] sm:$0x1] }
 0x39d   : > { %v17505_v8 = vpop.f32.mrf.mxu0  ;;  %v9703_v21 = vrot.slane %v9702_v2, 4  ;;  %v17511_v38 = vadd.f32 %v12033_v10, %v11921_v26  ;;  %v9144_v30 = vrot.slane %v12975_v61, 5  ;;  %v9720_v16 = vshrl.u32 %v11430_v52, 16  ;;  %v18429_v61 = vld [vmem:[#allocation14_spill] sm:$0xff] }
 0x39e   : > { %18426 = vst [vmem:[#allocation52_spill] sm:$0xff] %v17505_v8  ;;  %v17509_v20 = vpop.f32.mrf.mxu1  ;;  %12696 = vmatprep.mubr.msk.bf16.mxu0 %vm872_vm3, %v11465_v42  ;;  %v9713_v57 = vrot.slane %v9712_v14, 4  ;;  %v17516_v28 = vadd.f32 %v12036_v46, %v11924_v4  ;;  %v9723_v56 = vshll.u32 %v11430_v52, 16  ;;  %v9729_v31 = vshll.u32 %v11431_v19, 16  ;;  %v11433_v42 = vld [vmem:[%s13194_s26 + $0x60] sm:$0xf] }
 0x39f   : > { %18427 = vst [vmem:[#allocation53_spill] sm:$0xff] %v17511_v38  ;;  %v17513_v39 = vpop.f32.mrf.mxu0  ;;  %v9708_v37 = vsel %vm13232_vm4, %v9703_v21, %v9707_v13  ;;  %v9145_v34 = vsel %vm13524_vm7, %v11379_v58, %v9144_v30  ;;  %v9146_v0 = vrot.slane %v9144_v30, 4  ;;  %v9722_v26 = vrot.slane %v9720_v16, 4 }
 0x3a0   : > { %18428 = vst [vmem:[#allocation54_spill] sm:$0xff] %v17516_v28  ;;  %v17519_v1 = vpop.f32.mrf.mxu1  ;;  %v9718_v2 = vsel %vm13232_vm4, %v9713_v57, %v9717_v17  ;;  %v9725_v10 = vrot.slane %v9723_v56, 5  ;;  %v9731_v4 = vrot.slane %v9729_v31, 5  ;;  %v9733_v52 = vshrl.u32 %v11431_v19, 16  ;;  %v12976_v56 = vld [vmem:[#allocation2 + $0x7c] sm:$0xf] }
 0x3a1   : > { %v17525_v18 = vpop.f32.mrf.mxu0  ;;  %v11466_v46 = vcombine.low %v9708_v37, %v9718_v2  ;;  %v18430_v13 = vrot.slane %v18429_v61, 5  ;;  %v9739_v21 = vshll.u32 %v11432_v6, 16  ;;  %v11380_v30 = vrot.slane %v9053_v9, 9  ;;  %v11434_v19 = vld [vmem:[%s13194_s26 + $0x64] sm:$0xf] }
 0x3a2   : > { %v17530_v14 = vpop.f32.mrf.mxu1  ;;  %v9726_v17 = vor.u32 %v9725_v10, %v9722_v26  ;;  %v9735_v57 = vrot.slane %v9733_v52, 4  ;;  %v9151_v31 = vrot.slane %v12976_v56, 5  ;;  %v12977_v2 = vld [vmem:[#allocation2 + $0x80] sm:$0x1]  ;;  %v9744_v12 = vshrl.u32 %v11433_v42, 16 }
 0x3a3   : > { %v9148_v58 = vsel %vm13524_vm7, %v9146_v0, %v18430_v13  ;;  %v17536_v16 = vpop.f32.mrf.mxu0  ;;  %12697 = vmatmul.mubr.msk.bf16.gmra.mxu0 %vm872_vm3, %v11466_v46  ;;  %v9741_v37 = vrot.slane %v9739_v21, 5  ;;  %v9154_v61 = vrot.slane %v12977_v2, 5  ;;  %v9747_v0 = vshll.u32 %v11433_v42, 16  ;;  %v9054_v28 = vld [vmem:[#allocation2 + $0x84] sm:$0xe] }
 0x3a4   : > { %v11395_v48 = vcombine.low %v9145_v34, %v9148_v58  ;;  %v17539_v8 = vpop.f32.mrf.mxu1  ;;  %v9727_v9 = vrot.slane %v9726_v17, 4  ;;  %v9736_v34 = vor.u32 %v9735_v57, %v9731_v4  ;;  %v9152_v26 = vsel %vm13524_vm7, %v11380_v30, %v9151_v31 }
 0x3a5   : > { %v17543_v6 = vpop.f32.mrf.mxu0  ;;  %v9153_v10 = vrot.slane %v9151_v31, 4  ;;  %v9746_v13 = vrot.slane %v9744_v12, 4  ;;  %v9749_v58 = vrot.slane %v9747_v0, 5  ;;  %v9753_v46 = vshll.u32 %v11434_v19, 16 }
 0x3a6   : > { %12667 = vmatmul.mubr.bf16.gmra.mxu1 %v11395_v48  ;;  %v17547_v52 = vpop.f32.mrf.mxu1  ;;  %v9757_v21 = vshrl.u32 %v11434_v19, 16  ;;  %v9732_v42 = vsel %vm13232_vm4, %v9727_v9, %v9731_v4  ;;  %v9737_v2 = vrot.slane %v9736_v34, 4  ;;  %v9763_v17 = vshll.u32 %v11435_v3, 16 }
 0x3a7   : > { %v17549_v56 = vpop.f32.mrf.mxu0  ;;  %v9155_v48 = vsel %vm13524_vm7, %v9153_v10, %v9154_v61  ;;  %v9750_v31 = vor.u32 %v9749_v58, %v9746_v13  ;;  %v9755_v12 = vrot.slane %v9753_v46, 5  ;;  %v11927_v4 = vadd.f32 %v17314_v55, %v17294_v49  ;;  %v11436_v61 = vld [vmem:[%s13194_s26 + $0x6c] sm:$0xf]  ;;  %v11437_v58 = vld [vmem:[%s13194_s26 + $0x70] sm:$0xf] }
 0x3a8   : > { %v17555_v57 = vpop.f32.mrf.mxu1  ;;  %v11396_v30 = vcombine.low %v9152_v26, %v9155_v48  ;;  %v9759_v0 = vrot.slane %v9757_v21, 4  ;;  %v9742_v38 = vsel %vm13232_vm4, %v9737_v2, %v9741_v37  ;;  %v9765_v63 = vrot.slane %v9763_v17, 5 }
 0x3a9   : > { %v17557_v19 = vpop.f32.mrf.mxu0  ;;  %v12039_v3 = vadd.f32 %v17329_v53, %v17320_v45  ;;  %v11467_v34 = vcombine.low %v9732_v42, %v9742_v38  ;;  %v9751_v26 = vrot.slane %v9750_v31, 4  ;;  %v11930_v13 = vadd.f32 %v17331_v40, %v17325_v23  ;;  %v12978_v45 = vld [vmem:[#allocation2 + $0x88] sm:$0xf]  ;;  %v11438_v40 = vld [vmem:[%s13194_s26 + $0x74] sm:$0x1] }
 0x3aa   : > { %v17566_v9 = vpop.f32.mrf.mxu1  ;;  %12670 = vmatprep.mubr.bf16.mxu1 %v11396_v30  ;;  %v9760_v10 = vor.u32 %v9759_v0, %v9755_v12  ;;  %v12042_v49 = vadd.f32 %v17344_v11, %v17334_v43  ;;  %v11381_v55 = vrot.slane %v9054_v28, 9  ;;  %v9158_v53 = vrot.slane %v12978_v45, 5  ;;  %v9055_v30 = vld [vmem:[#allocation2 + $0x90] sm:$0xe] }
 0x3ab   : > { %v17571_v37 = vpop.f32.mrf.mxu0  ;;  %v17573_v46 = vadd.f32 %v12039_v3, %v11927_v4  ;;  %12700 = vmatprep.mubr.msk.bf16.mxu0 %vm872_vm3, %v11467_v34  ;;  %v9756_v38 = vsel %vm13232_vm4, %v9751_v26, %v9755_v12  ;;  %v9768_v42 = vshrl.u32 %v11436_v61, 16  ;;  %v9771_v2 = vshll.u32 %v11436_v61, 16  ;;  %v11439_v61 = vld [vmem:[%s13194_s26 + $0x78] sm:$0xf] }
 0x3ac   : > { %v17577_v21 = vpop.f32.mrf.mxu1  ;;  %v9761_v23 = vrot.slane %v9760_v10, 4  ;;  %v17585_v17 = vadd.f32 %v12042_v49, %v11930_v13  ;;  %v9159_v43 = vsel %vm13524_vm7, %v11381_v55, %v9158_v53  ;;  %v9160_v11 = vrot.slane %v9158_v53, 4  ;;  %v18433_v10 = vld [vmem:[#allocation21_spill] sm:$0xff] }
 0x3ad   : > { %18431 = vst [vmem:[#allocation14_spill] sm:$0xff] %v17573_v46  ;;  %v17583_v48 = vpop.f32.mrf.mxu0  ;;  %v9777_v28 = vshll.u32 %v11437_v58, 16  ;;  %v9770_v0 = vrot.slane %v9768_v42, 4  ;;  %v9773_v4 = vrot.slane %v9771_v2, 5  ;;  %v9781_v3 = vshrl.u32 %v11437_v58, 16 }
 0x3ae   : > { %18432 = vst [vmem:[#allocation55_spill] sm:$0xff] %v17585_v17  ;;  %v17589_v31 = vpop.f32.mrf.mxu1  ;;  %v9766_v12 = vsel %vm13232_vm4, %v9761_v23, %v9765_v63  ;;  %v18434_v13 = vrot.slane %v18433_v10, 5  ;;  %v9787_v45 = vshll.u32 %v11438_v40, 16  ;;  %v11440_v53 = vld [vmem:[%s13194_s26 + $0x7c] sm:$0xf]  ;;  %v11382_v42 = vrot.slane %v9055_v30, 9 }
 0x3af   : > { %v17594_v34 = vpop.f32.mrf.mxu0  ;;  %v11468_v26 = vcombine.low %v9756_v38, %v9766_v12  ;;  %v9779_v55 = vrot.slane %v9777_v28, 5  ;;  %v9774_v63 = vor.u32 %v9773_v4, %v9770_v0  ;;  %v9783_v23 = vrot.slane %v9781_v3, 4  ;;  %v12979_v2 = vld [vmem:[#allocation2 + $0x94] sm:$0xf]  ;;  %v12980_v10 = vld [vmem:[#allocation2 + $0x98] sm:$0x1] }
 0x3b0   : > { %v9162_v49 = vsel %vm13524_vm7, %v9160_v11, %v18434_v13  ;;  %v17601_v17 = vpop.f32.mrf.mxu1  ;;  %v9789_v38 = vrot.slane %v9787_v45, 5  ;;  %v9165_v12 = vrot.slane %v12979_v2, 5  ;;  %v9168_v51 = vrot.slane %v12980_v10, 5 }
 0x3b1   : > { %18435 = vst [vmem:[#allocation21_spill] sm:$0xff] %v17601_v17  ;;  %v11397_v46 = vcombine.low %v9159_v43, %v9162_v49  ;;  %v17603_v58 = vpop.f32.mrf.mxu0  ;;  %12701 = vmatmul.mubr.msk.bf16.gmra.mxu0 %vm872_vm3, %v11468_v26  ;;  %v9792_v11 = vshrl.u32 %v11439_v61, 16  ;;  %v9775_v40 = vrot.slane %v9774_v63, 4  ;;  %v9784_v13 = vor.u32 %v9783_v23, %v9779_v55  ;;  %v11441_v43 = vld [vmem:[%s13194_s26 + $0x80] sm:$0x1] }
 0x3b2   : > { %18436 = vst [vmem:[#allocation56_spill] sm:$0xff] %v17603_v58  ;;  %v17606_v28 = vpop.f32.mrf.mxu1  ;;  %v9795_v49 = vshll.u32 %v11439_v61, 16  ;;  %v9801_v0 = vshll.u32 %v11440_v53, 16  ;;  %v9166_v30 = vsel %vm13524_vm7, %v11382_v42, %v9165_v12  ;;  %v9167_v3 = vrot.slane %v9165_v12, 4  ;;  %v18441_v12 = vld [vmem:[#allocation38_spill] sm:$0xff] }
 0x3b3   : > { %18437 = vst [vmem:[#allocation57_spill] sm:$0xff] %v17606_v28  ;;  %12671 = vmatmul.mubr.bf16.gmra.mxu1 %v11397_v46  ;;  %v17609_v4 = vpop.f32.mrf.mxu0  ;;  %v9794_v26 = vrot.slane %v9792_v11, 4  ;;  %v9805_v45 = vshrl.u32 %v11440_v53, 16  ;;  %v9780_v10 = vsel %vm13232_vm4, %v9775_v40, %v9779_v55  ;;  %v9785_v46 = vrot.slane %v9784_v13, 4  ;;  %v18442_v11 = vld [vmem:[#allocation39_spill] sm:$0xff] }
 0x3b4   : > { %18438 = vst [vmem:[#allocation58_spill] sm:$0xff] %v17609_v4  ;;  %v17613_v2 = vpop.f32.mrf.mxu1  ;;  %v9797_v63 = vrot.slane %v9795_v49, 5  ;;  %v9803_v23 = vrot.slane %v9801_v0, 5  ;;  %v9169_v61 = vsel %vm13524_vm7, %v9167_v3, %v9168_v51  ;;  %v9811_v42 = vshll.u32 %v11441_v43, 16  ;;  %v9056_v17 = vld [vmem:[#allocation2 + $0x9c] sm:$0xe] }
 0x3b5   : > { %18439 = vst [vmem:[#allocation59_spill] sm:$0xff] %v17613_v2  ;;  %v17617_v28 = vpop.f32.mrf.mxu0  ;;  %v9807_v4 = vrot.slane %v9805_v45, 4  ;;  %v11933_v53 = vadd.f32 %v18442_v11, %v18441_v12  ;;  %v9790_v55 = vsel %vm13232_vm4, %v9785_v46, %v9789_v38  ;;  %v11398_v40 = vcombine.low %v9166_v30, %v9169_v61  ;;  %v18443_v49 = vld [vmem:[#allocation40_spill] sm:$0xff]  ;;  %v11443_v12 = vld [vmem:[%s13194_s26 + $0x88] sm:$0xf] }
 0x3b6   : > { %18440 = vst [vmem:[#allocation60_spill] sm:$0xff] %v17617_v28  ;;  %v17623_v2 = vpop.f32.mrf.mxu1  ;;  %v9798_v13 = vor.u32 %v9797_v63, %v9794_v26  ;;  %v12045_v0 = vadd.f32 %v17362_v35, %v18443_v49  ;;  %v11442_v28 = vld [vmem:[%s13194_s26 + $0x84] sm:$0xf]  ;;  %v11469_v51 = vcombine.low %v9780_v10, %v9790_v55  ;;  %v9813_v43 = vrot.slane %v9811_v42, 5  ;;  %v12981_v10 = vld [vmem:[#allocation2 + $0xa0] sm:$0xf] }
 0x3b7   : > { %v17630_v58 = vpop.f32.mrf.mxu0  ;;  %v9808_v3 = vor.u32 %v9807_v4, %v9803_v23  ;;  %v11936_v45 = vadd.f32 %v17369_v5, %v17360_v29  ;;  %12674 = vmatprep.mubr.bf16.mxu1 %v11398_v40  ;;  %v12048_v35 = vadd.f32 %v17389_v25, %v17376_v47  ;;  %v11383_v26 = vrot.slane %v9056_v17, 9  ;;  %v11444_v55 = vld [vmem:[%s13194_s26 + $0x8c] sm:$0x1]  ;;  %v9057_v17 = vld [vmem:[#allocation2 + $0xa8] sm:$0xe] }
 0x3b8   : > { %v17635_v11 = vpop.f32.mrf.mxu1  ;;  %v9799_v38 = vrot.slane %v9798_v13, 4  ;;  %v17637_v30 = vadd.f32 %v12045_v0, %v11933_v53  ;;  %12704 = vmatprep.mubr.msk.bf16.mxu0 %vm872_vm3, %v11469_v51  ;;  %v9172_v63 = vrot.slane %v12981_v10, 5  ;;  %v9816_v29 = vshrl.u32 %v11442_v28, 16  ;;  %v18449_v10 = vld [vmem:[#allocation15_spill] sm:$0xff] }
 0x3b9   : > { %v17641_v46 = vpop.f32.mrf.mxu0  ;;  %v9809_v4 = vrot.slane %v9808_v3, 4  ;;  %v9819_v5 = vshll.u32 %v11442_v28, 16  ;;  %v17648_v53 = vadd.f32 %v12048_v35, %v11936_v45  ;;  %v9825_v47 = vshll.u32 %v11443_v12, 16  ;;  %v18480_v50 = vld [vmem:[#allocation56_spill] sm:$0xff] }
 0x3ba   : > { %18444 = vst [vmem:[#allocation38_spill] sm:$0xff] %v17637_v30  ;;  %v17644_v61 = vpop.f32.mrf.mxu1  ;;  %v9804_v42 = vsel %vm13232_vm4, %v9799_v38, %v9803_v23  ;;  %v9829_v25 = vshrl.u32 %v11443_v12, 16  ;;  %v9173_v28 = vsel %vm13524_vm7, %v11383_v26, %v9172_v63  ;;  %v9174_v49 = vrot.slane %v9172_v63, 4  ;;  %v11445_v12 = vld [vmem:[%s13194_s26 + $0x90] sm:$0xf] }
 0x3bb   : > { %18445 = vst [vmem:[#allocation39_spill] sm:$0xff] %v17648_v53  ;;  %v17651_v40 = vpop.f32.mrf.mxu0  ;;  %v9814_v13 = vsel %vm13232_vm4, %v9809_v4, %v9813_v43  ;;  %v9818_v0 = vrot.slane %v9816_v29, 4  ;;  %v9821_v3 = vrot.slane %v9819_v5, 5  ;;  %v9827_v45 = vrot.slane %v9825_v47, 5  ;;  %v12982_v26 = vld [vmem:[#allocation2 + $0xac] sm:$0xf] }
 0x3bc   : > { %18446 = vst [vmem:[#allocation40_spill] sm:$0xff] %v17651_v40  ;;  %v17657_v51 = vpop.f32.mrf.mxu1  ;;  %v11470_v23 = vcombine.low %v9804_v42, %v9814_v13  ;;  %v9831_v38 = vrot.slane %v9829_v25, 4  ;;  %v18450_v53 = vrot.slane %v18449_v10, 5  ;;  %v9835_v4 = vshll.u32 %v11444_v55, 16  ;;  %v11446_v29 = vld [vmem:[%s13194_s26 + $0x94] sm:$0xf] }
 0x3bd   : > { %18447 = vst [vmem:[#allocation61_spill] sm:$0xff] %v17657_v51  ;;  %v17660_v35 = vpop.f32.mrf.mxu0  ;;  %v11384_v30 = vrot.slane %v9057_v17, 9  ;;  %v9179_v63 = vrot.slane %v12982_v26, 5  ;;  %v9822_v42 = vor.u32 %v9821_v3, %v9818_v0  ;;  %v12983_v25 = vld [vmem:[#allocation2 + $0xb0] sm:$0x1]  ;;  %v9840_v17 = vshrl.u32 %v11445_v12, 16 }
 0x3be   : > { %18448 = vst [vmem:[#allocation62_spill] sm:$0xff] %v17660_v35  ;;  %v9176_v43 = vsel %vm13524_vm7, %v9174_v49, %v18450_v53  ;;  %v17667_v40 = vpop.f32.mrf.mxu1  ;;  %12705 = vmatmul.mubr.msk.bf16.gmra.mxu0 %vm872_vm3, %v11470_v23  ;;  %v9832_v47 = vor.u32 %v9831_v38, %v9827_v45  ;;  %v9182_v13 = vrot.slane %v12983_v25, 5  ;;  %v11447_v51 = vld [vmem:[%s13194_s26 + $0x98] sm:$0x1]  ;;  %v9837_v10 = vrot.slane %v9835_v4, 5 }
 0x3bf   : > { %18451 = vst [vmem:[#allocation15_spill] sm:$0xff] %v17667_v40  ;;  %v11399_v5 = vcombine.low %v9173_v28, %v9176_v43  ;;  %v17671_v35 = vpop.f32.mrf.mxu0  ;;  %v9180_v53 = vsel %vm13524_vm7, %v11384_v30, %v9179_v63  ;;  %v9181_v55 = vrot.slane %v9179_v63, 4  ;;  %v9823_v26 = vrot.slane %v9822_v42, 4 }
 0x3c0   : > { %v17675_v49 = vpop.f32.mrf.mxu1  ;;  %v9833_v40 = vrot.slane %v9832_v47, 4  ;;  %v9843_v23 = vshll.u32 %v11445_v12, 16  ;;  %v9849_v28 = vshll.u32 %v11446_v29, 16  ;;  %v9842_v38 = vrot.slane %v9840_v17, 4  ;;  %v9058_v47 = vld [vmem:[#allocation2 + $0xb4] sm:$0xe] }
 0x3c1   : > { %18452 = vst [vmem:[#allocation63_spill] sm:$0xff] %v17675_v49  ;;  %12675 = vmatmul.mubr.bf16.gmra.mxu1 %v11399_v5  ;;  %v17677_v0 = vpop.f32.mrf.mxu0  ;;  %v9183_v3 = vsel %vm13524_vm7, %v9181_v55, %v9182_v13  ;;  %v9853_v43 = vshrl.u32 %v11446_v29, 16  ;;  %v9859_v4 = vshll.u32 %v11447_v51, 16  ;;  %v9828_v30 = vsel %vm13232_vm4, %v9823_v26, %v9827_v45  ;;  %v11448_v29 = vld [vmem:[%s13194_s26 + $0x9c] sm:$0xf] }
 0x3c2   : > { %18453 = vst [vmem:[#allocation64_spill] sm:$0xff] %v17677_v0  ;;  %v9838_v63 = vsel %vm13232_vm4, %v9833_v40, %v9837_v10  ;;  %v11400_v5 = vcombine.low %v9180_v53, %v9183_v3  ;;  %v9845_v42 = vrot.slane %v9843_v23, 5  ;;  %v17687_v25 = vpop.f32.mrf.mxu1  ;;  %v9851_v0 = vrot.slane %v9849_v28, 5  ;;  %v12984_v28 = vld [vmem:[#allocation2 + $0xb8] sm:$0xf] }
 0x3c3   : > { %v17685_v12 = vpop.f32.mrf.mxu0  ;;  %v11471_v49 = vcombine.low %v9828_v30, %v9838_v63  ;;  %v9855_v13 = vrot.slane %v9853_v43, 4  ;;  %v9861_v55 = vrot.slane %v9859_v4, 5  ;;  %v11939_v45 = vadd.f32 %v17393_v41, %v17383_v54  ;;  %v11450_v41 = vld [vmem:[%s13194_s26 + $0xa4] sm:$0x1] }
 0x3c4   : > { %12678 = vmatprep.mubr.bf16.mxu1 %v11400_v5  ;;  %v9846_v51 = vor.u32 %v9845_v42, %v9842_v38  ;;  %v12051_v40 = vadd.f32 %v17409_v36, %v17397_v27  ;;  %v11942_v10 = vadd.f32 %v17411_v33, %v17406_v44  ;;  %v12054_v26 = vadd.f32 %v17423_v60, %v17414_v32  ;;  %v11449_v38 = vld [vmem:[%s13194_s26 + $0xa0] sm:$0xf] }
 0x3c5   : > { %v17696_v53 = vpop.f32.mrf.mxu0  ;;  %12708 = vmatprep.mubr.msk.bf16.mxu0 %vm872_vm3, %v11471_v49  ;;  %v9856_v17 = vor.u32 %v9855_v13, %v9851_v0  ;;  %v11385_v23 = vrot.slane %v9058_v47, 9  ;;  %v9186_v3 = vrot.slane %v12984_v28, 5  ;;  %v9864_v27 = vshrl.u32 %v11448_v29, 16  ;;  %v9059_v47 = vld [vmem:[#allocation2 + $0xc0] sm:$0xe] }
 0x3c6   : > { %v9847_v43 = vrot.slane %v9846_v51, 4  ;;  %v17702_v54 = vadd.f32 %v12051_v40, %v11939_v45  ;;  %v9867_v36 = vshll.u32 %v11448_v29, 16  ;;  %v17709_v49 = vadd.f32 %v12054_v26, %v11942_v10  ;;  %v18457_v45 = vld [vmem:[#allocation22_spill] sm:$0xff] }
 0x3c7   : > { %v17705_v4 = vpop.f32.mrf.mxu1  ;;  %v17707_v44 = vpop.f32.mrf.mxu0  ;;  %v9857_v33 = vrot.slane %v9856_v17, 4  ;;  %v9187_v32 = vsel %vm13524_vm7, %v11385_v23, %v9186_v3  ;;  %v9188_v60 = vrot.slane %v9186_v3, 4  ;;  %v9866_v63 = vrot.slane %v9864_v27, 4  ;;  %v11452_v27 = vld [vmem:[%s13194_s26 + $0xac] sm:$0xf] }
 0x3c8   : > { %18454 = vst [vmem:[#allocation65_spill] sm:$0xff] %v17702_v54  ;;  %18455 = vst [vmem:[#allocation66_spill] sm:$0xff] %v17709_v49  ;;  %v9852_v30 = vsel %vm13232_vm4, %v9847_v43, %v9851_v0  ;;  %v9869_v5 = vrot.slane %v9867_v36, 5  ;;  %v9873_v42 = vshll.u32 %v11449_v38, 16  ;;  %v18458_v40 = vrot.slane %v18457_v45, 5 }
 0x3c9   : > { %v17715_v13 = vpop.f32.mrf.mxu1  ;;  %v17717_v29 = vpop.f32.mrf.mxu0  ;;  %v9862_v51 = vsel %vm13232_vm4, %v9857_v33, %v9861_v55  ;;  %v9877_v17 = vshrl.u32 %v11449_v38, 16  ;;  %v9883_v26 = vshll.u32 %v11450_v41, 16  ;;  %v11451_v0 = vld [vmem:[%s13194_s26 + $0xa8] sm:$0xf]  ;;  %v11386_v33 = vrot.slane %v9059_v47, 9 }
 0x3ca   : > { %18456 = vst [vmem:[#allocation67_spill] sm:$0xff] %v17717_v29  ;;  %v9190_v10 = vsel %vm13524_vm7, %v9188_v60, %v18458_v40  ;;  %v11472_v23 = vcombine.low %v9852_v30, %v9862_v51  ;;  %v9870_v3 = vor.u32 %v9869_v5, %v9866_v63  ;;  %v9875_v43 = vrot.slane %v9873_v42, 5  ;;  %v12985_v45 = vld [vmem:[#allocation2 + $0xc4] sm:$0xf]  ;;  %v12986_v41 = vld [vmem:[#allocation2 + $0xc8] sm:$0x1] }
 0x3cb   : > { %v11401_v28 = vcombine.low %v9187_v32, %v9190_v10  ;;  %v17727_v36 = vpop.f32.mrf.mxu1  ;;  %v17729_v49 = vpop.f32.mrf.mxu0  ;;  %v9879_v54 = vrot.slane %v9877_v17, 4  ;;  %v9885_v55 = vrot.slane %v9883_v26, 5  ;;  %v9193_v29 = vrot.slane %v12985_v45, 5  ;;  %v11453_v32 = vld [vmem:[%s13194_s26 + $0xb0] sm:$0x1] }
 0x3cc   : > { %18459 = vst [vmem:[#allocation22_spill] sm:$0xff] %v17727_v36  ;;  %18460 = vst [vmem:[#allocation68_spill] sm:$0xff] %v17729_v49  ;;  %12709 = vmatmul.mubr.msk.bf16.gmra.mxu0 %vm872_vm3, %v11472_v23  ;;  %v9871_v38 = vrot.slane %v9870_v3, 4  ;;  %v9196_v60 = vrot.slane %v12986_v41, 5  ;;  %v9888_v30 = vshrl.u32 %v11451_v0, 16  ;;  %v9891_v63 = vshll.u32 %v11451_v0, 16 }
 0x3cd   : > { %12679 = vmatmul.mubr.bf16.gmra.mxu1 %v11401_v28  ;;  %v17733_v5 = vpop.f32.mrf.mxu1  ;;  %v17735_v42 = vpop.f32.mrf.mxu0  ;;  %v9880_v51 = vor.u32 %v9879_v54, %v9875_v43  ;;  %v9194_v40 = vsel %vm13524_vm7, %v11386_v33, %v9193_v29  ;;  %v9195_v47 = vrot.slane %v9193_v29, 4  ;;  %v9897_v10 = vshll.u32 %v11452_v27, 16  ;;  %v9060_v29 = vld [vmem:[#allocation2 + $0xcc] sm:$0xe] }
 0x3ce   : > { %18461 = vst [vmem:[#allocation69_spill] sm:$0xff] %v17733_v5  ;;  %18462 = vst [vmem:[#allocation70_spill] sm:$0xff] %v17735_v42  ;;  %v9876_v17 = vsel %vm13232_vm4, %v9871_v38, %v9875_v43  ;;  %v9890_v26 = vrot.slane %v9888_v30, 4  ;;  %v9893_v23 = vrot.slane %v9891_v63, 5  ;;  %v9901_v28 = vshrl.u32 %v11452_v27, 16  ;;  %v18465_v38 = vld [vmem:[#allocation25_spill] sm:$0xff] }
 0x3cf   : > { %v17741_v3 = vpop.f32.mrf.mxu0  ;;  %v9881_v0 = vrot.slane %v9880_v51, 4  ;;  %v9197_v45 = vsel %vm13524_vm7, %v9195_v47, %v9196_v60  ;;  %v9899_v41 = vrot.slane %v9897_v10, 5  ;;  %v9907_v54 = vshll.u32 %v11453_v32, 16  ;;  %v11454_v5 = vld [vmem:[%s13194_s26 + $0xb4] sm:$0xf]  ;;  %v18466_v27 = vld [vmem:[#allocation34_spill] sm:$0xff] }
 0x3d0   : > { %18463 = vst [vmem:[#allocation71_spill] sm:$0xff] %v17741_v3  ;;  %v11402_v42 = vcombine.low %v9194_v40, %v9197_v45  ;;  %v9894_v33 = vor.u32 %v9893_v23, %v9890_v26  ;;  %v9903_v49 = vrot.slane %v9901_v28, 4  ;;  %v17752_v30 = vadd.f32 %v18466_v27, %v18465_v38  ;;  %v11455_v26 = vld [vmem:[%s13194_s26 + $0xb8] sm:$0xf]  ;;  %v12987_v45 = vld [vmem:[#allocation2 + $0xd4] sm:$0x1] }
 0x3d1   : > { %v17746_v36 = vpop.f32.mrf.mxu1  ;;  %v17748_v43 = vpop.f32.mrf.mxu0  ;;  %v9886_v63 = vsel %vm13232_vm4, %v9881_v0, %v9885_v55  ;;  %v9909_v60 = vrot.slane %v9907_v54, 5  ;;  %v11948_v32 = vadd.f32 %v17450_v7, %v17439_v59  ;;  %v12060_v10 = vadd.f32 %v17466_v22, %v17457_v24  ;;  %v12988_v54 = vld [vmem:[#allocation2 + $0xd0] sm:$0xf]  ;;  %v11456_v27 = vld [vmem:[%s13194_s26 + $0xbc] sm:$0x1] }
 0x3d2   : > { %18464 = vst [vmem:[#allocation72_spill] sm:$0xff] %v17748_v43  ;;  %v11473_v51 = vcombine.low %v9876_v17, %v9886_v63  ;;  %12682 = vmatprep.mubr.bf16.mxu1 %v11402_v42  ;;  %v9895_v40 = vrot.slane %v9894_v33, 4  ;;  %v9904_v47 = vor.u32 %v9903_v49, %v9899_v41  ;;  %v9203_v55 = vrot.slane %v12987_v45, 5  ;;  %v11457_v42 = vld [vmem:[%s13194_s26 + $0xc0] sm:$0xf] }
 0x3d3   : > { %v17761_v23 = vpop.f32.mrf.mxu1  ;;  %v17763_v28 = vpop.f32.mrf.mxu0  ;;  %v11387_v0 = vrot.slane %v9060_v29, 9  ;;  %v9200_v38 = vrot.slane %v12988_v54, 5  ;;  %v9912_v59 = vshrl.u32 %v11454_v5, 16  ;;  %v17769_v22 = vadd.f32 %v12060_v10, %v11948_v32 }
 0x3d4   : > { %18467 = vst [vmem:[#allocation25_spill] sm:$0xff] %v17761_v23  ;;  %18468 = vst [vmem:[#allocation34_spill] sm:$0xff] %v17763_v28  ;;  %12712 = vmatprep.mubr.msk.bf16.mxu0 %vm872_vm3, %v11473_v51  ;;  %v9900_v7 = vsel %vm13232_vm4, %v9895_v40, %v9899_v41  ;;  %v9905_v24 = vrot.slane %v9904_v47, 4  ;;  %v9915_v49 = vshll.u32 %v11454_v5, 16  ;;  %v9921_v45 = vshll.u32 %v11455_v26, 16 }
 0x3d5   : > { %18469 = vst [vmem:[#allocation73_spill] sm:$0xff] %v17769_v22  ;;  %v17772_v17 = vpop.f32.mrf.mxu1  ;;  %v9201_v33 = vsel %vm13524_vm7, %v11387_v0, %v9200_v38  ;;  %v9202_v29 = vrot.slane %v9200_v38, 4  ;;  %v9914_v63 = vrot.slane %v9912_v59, 4  ;;  %v17776_v54 = vpop.f32.mrf.mxu0  ;;  %v9925_v40 = vshrl.u32 %v11455_v26, 16  ;;  %v11458_v47 = vld [vmem:[%s13194_s26 + $0xc4] sm:$0xf] }
 0x3d6   : > { %18470 = vst [vmem:[#allocation74_spill] sm:$0xff] %v17772_v17  ;;  %18471 = vst [vmem:[#allocation75_spill] sm:$0xff] %v17776_v54  ;;  %v9910_v51 = vsel %vm13232_vm4, %v9905_v24, %v9909_v60  ;;  %v9917_v41 = vrot.slane %v9915_v49, 5  ;;  %v9931_v32 = vshll.u32 %v11456_v27, 16  ;;  %v9923_v22 = vrot.slane %v9921_v45, 5  ;;  %v18473_v38 = vld [vmem:[#allocation10_spill] sm:$0xff] }
 0x3d7   : > { %v11474_v5 = vcombine.low %v9900_v7, %v9910_v51  ;;  %v9204_v10 = vsel %vm13524_vm7, %v9202_v29, %v9203_v55  ;;  %v11459_v28 = vld [vmem:[%s13194_s26 + $0xc8] sm:$0x1]  ;;  %v9936_v17 = vshrl.u32 %v11457_v42, 16  ;;  %v17784_v0 = vpop.f32.mrf.mxu1  ;;  %v18474_v59 = vld [vmem:[#allocation30_spill] sm:$0xff]  ;;  %v9927_v23 = vrot.slane %v9925_v40, 4  ;;  %v18475_v45 = vld [vmem:[#allocation24_spill] sm:$0xff] }
 0x3d8   : > { %18472 = vst [vmem:[#allocation76_spill] sm:$0xff] %v17784_v0  ;;  %v11864_v43 = vadd.f32 %v18474_v59, %v18473_v38  ;;  %v11403_v54 = vcombine.low %v9201_v33, %v9204_v10  ;;  %v9918_v3 = vor.u32 %v9917_v41, %v9914_v63  ;;  %v9939_v26 = vshll.u32 %v11457_v42, 16  ;;  %v18476_v51 = vld [vmem:[#allocation16_spill] sm:$0xff]  ;;  %v18477_v42 = vld [vmem:[#allocation17_spill] sm:$0xff] }
 0x3d9   : > { %12713 = vmatmul.mubr.msk.bf16.gmra.mxu0 %vm872_vm3, %v11474_v5  ;;  %v9938_v60 = vrot.slane %v9936_v17, 4  ;;  %v9945_v27 = vshll.u32 %v11458_v47, 16  ;;  %v9949_v7 = vshrl.u32 %v11458_v47, 16  ;;  %v17789_v24 = vpop.f32.mrf.mxu0  ;;  %v9928_v55 = vor.u32 %v9927_v23, %v9923_v22 }
 0x3da   : > { %12683 = vmatmul.mubr.bf16.gmra.mxu1 %v11403_v54  ;;  %v9919_v62 = vrot.slane %v9918_v3, 4  ;;  %v9933_v49 = vrot.slane %v9931_v32, 5  ;;  %v9955_v29 = vshll.u32 %v11459_v28, 16  ;;  %v11976_v0 = vadd.f32 %v18476_v51, %v18475_v45  ;;  %v18479_v45 = vld [vmem:[#allocation20_spill] sm:$0xff] }
 0x3db   : > { %v9941_v38 = vrot.slane %v9939_v26, 5  ;;  %v9947_v33 = vrot.slane %v9945_v27, 5  ;;  %v9951_v63 = vrot.slane %v9949_v7, 4  ;;  %v17793_v41 = vpop.f32.mrf.mxu1  ;;  %v17795_v40 = vpop.f32.mrf.mxu0  ;;  %v6946_v17 = vadd.f32 %v17752_v30, %v18477_v42 }
 0x3dc   : > { %v9924_v54 = vsel %vm13232_vm4, %v9919_v62, %v9923_v22  ;;  %v9929_v3 = vrot.slane %v9928_v55, 4  ;;  %v6949_v23 = vadd.f32 %v11976_v0, %v11864_v43  ;;  %v9957_v47 = vrot.slane %v9955_v29, 5 }
 0x3dd   : > { %v9942_v32 = vor.u32 %v9941_v38, %v9938_v60  ;;  %v9952_v28 = vor.u32 %v9951_v63, %v9947_v33  ;;  %v12126_v5 = vpop.f32.mrf.mxu1  ;;  %v17801_v10 = vpop.f32.mrf.mxu0  ;;  %v12085_v26 = vadd.f32 %v17509_v20, %v17496_v15  ;;  %v17809_v30 = vadd.f32 %v17525_v18, %v17513_v39  ;;  %v18483_v63 = vld [vmem:[#allocation58_spill] sm:$0xff] }
 0x3de   : > { %v9934_v59 = vsel %vm13232_vm4, %v9929_v3, %v9933_v49  ;;  %v12088_v22 = vadd.f32 %v17530_v14, %v17519_v1  ;;  %v17819_v49 = vadd.f32 %v17543_v6, %v17536_v16  ;;  %v12091_v15 = vadd.f32 %v17547_v52, %v17539_v8  ;;  %v18478_v16 = vld [vmem:[#allocation27_spill] sm:$0xff] }
 0x3df   : > { %v11475_v43 = vcombine.low %v9924_v54, %v9934_v59  ;;  %v9943_v0 = vrot.slane %v9942_v32, 4  ;;  %v9953_v60 = vrot.slane %v9952_v28, 4  ;;  %v12128_v27 = vpop.f32.mrf.mxu1  ;;  %v12241_v7 = vpop.f32.mrf.mxu0  ;;  %v17813_v62 = vadd.f32 %v12085_v26, %v6946_v17  ;;  %v18485_v17 = vld [vmem:[#allocation26_spill] sm:$0xff]  ;;  %v18487_v54 = vld [vmem:[#allocation12_spill] sm:$0xff]  ;;  %v18491_v59 = vld [vmem:[#allocation15_spill] sm:$0xff] }
 0x3e0   : > { %v17815_v55 = vadd.f32 %v12088_v22, %v6949_v23  ;;  %v12203_v1 = vadd.f32 %v17557_v19, %v17549_v56  ;;  %v12094_v18 = vadd.f32 %v17566_v9, %v17555_v57  ;;  %v8100_v6 = vadd.f32 %v12091_v15, %v18478_v16  ;;  %v18482_v56 = vld [vmem:[#allocation57_spill] sm:$0xff]  ;;  %v18484_v57 = vld [vmem:[#allocation60_spill] sm:$0xff]  ;;  %v18489_v32 = vld [vmem:[#allocation62_spill] sm:$0xff] }
 0x3e1   : > { %12716 = vmatprep.mubr.msk.bf16.mxu0 %vm872_vm3, %v11475_v43  ;;  %v9948_v20 = vsel %vm13232_vm4, %v9943_v0, %v9947_v33  ;;  %v9958_v39 = vsel %vm13232_vm4, %v9953_v60, %v9957_v47  ;;  %v12206_v8 = vadd.f32 %v17583_v48, %v17571_v37  ;;  %v12097_v52 = vadd.f32 %v17589_v31, %v17577_v21  ;;  %v12129_v29 = vpop.f32.mrf.mxu1  ;;  %v18481_v33 = vld [vmem:[#allocation21_spill] sm:$0xff]  ;;  %v18486_v48 = vld [vmem:[#allocation59_spill] sm:$0xff]  ;;  %v18488_v23 = vld [vmem:[#allocation40_spill] sm:$0xff] }
 0x3e2   : > { %v11476_v14 = vcombine.low %v9948_v20, %v9958_v39  ;;  %v8101_v51 = vadd.f32 %v12094_v18, %v18479_v45  ;;  %v12209_v38 = vadd.f32 %v18480_v50, %v17594_v34  ;;  %v12100_v19 = vadd.f32 %v18482_v56, %v18481_v33  ;;  %v18490_v47 = vld [vmem:[#allocation61_spill] sm:$0xff]  ;;  %v18492_v22 = vld [vmem:[#allocation64_spill] sm:$0xff]  ;;  %v18493_v60 = vld [vmem:[#allocation19_spill] sm:$0xff] }
 0x3e3   : > { %v12212_v9 = vadd.f32 %v18484_v57, %v18483_v63  ;;  %v12243_v42 = vpop.f32.mrf.mxu0  ;;  %v8102_v37 = vadd.f32 %v12097_v52, %v18485_v17  ;;  %v12103_v21 = vadd.f32 %v17623_v2, %v18486_v48  ;;  %v12215_v31 = vadd.f32 %v17641_v46, %v17630_v58  ;;  %v18494_v15 = vld [vmem:[#allocation11_spill] sm:$0xff]  ;;  %v18498_v52 = vld [vmem:[#allocation22_spill] sm:$0xff]  ;;  %v18499_v45 = vld [vmem:[#allocation69_spill] sm:$0xff] }
 0x3e4   : > { %12717 = vmatmul.mubr.msk.bf16.gmra.mxu0 %vm872_vm3, %v11476_v14  ;;  %v12106_v34 = vadd.f32 %v17644_v61, %v17635_v11  ;;  %v8103_v3 = vadd.f32 %v12100_v19, %v18487_v54  ;;  %v12218_v28 = vadd.f32 %v18489_v32, %v18488_v23  ;;  %v12109_v26 = vadd.f32 %v18491_v59, %v18490_v47  ;;  %v18495_v58 = vld [vmem:[#allocation63_spill] sm:$0xff]  ;;  %v18500_v56 = vld [vmem:[#allocation13_spill] sm:$0xff]  ;;  %v18501_v63 = vld [vmem:[#allocation68_spill] sm:$0xff] }
 0x3e5   : > { %v12221_v43 = vadd.f32 %v18492_v22, %v17671_v35  ;;  %v12244_v0 = vpop.f32.mrf.mxu0  ;;  %v8104_v2 = vadd.f32 %v12103_v21, %v18493_v60  ;;  %v12112_v46 = vadd.f32 %v17687_v25, %v18495_v58  ;;  %v12224_v11 = vadd.f32 %v17696_v53, %v17685_v12  ;;  %v18496_v39 = vld [vmem:[#allocation31_spill] sm:$0xff]  ;;  %v18502_v25 = vld [vmem:[#allocation70_spill] sm:$0xff]  ;;  %v18503_v12 = vld [vmem:[#allocation25_spill] sm:$0xff] }
 0x3e6   : > { %v8105_v20 = vadd.f32 %v12106_v34, %v18494_v15  ;;  %v12131_v61 = vpop.f32.mrf.mxu1  ;;  %v8106_v18 = vadd.f32 %v12109_v26, %v18496_v39  ;;  %v12115_v14 = vadd.f32 %v17715_v13, %v17705_v4  ;;  %v18497_v16 = vld [vmem:[#allocation67_spill] sm:$0xff]  ;;  %v12118_v50 = vadd.f32 %v18499_v45, %v18498_v52  ;;  %v18505_v48 = vld [vmem:[#allocation72_spill] sm:$0xff]  ;;  %v18508_v23 = vld [vmem:[#allocation74_spill] sm:$0xff] }
 0x3e7   : > { %v12227_v35 = vadd.f32 %v18497_v16, %v17707_v44  ;;  %v12246_v33 = vpop.f32.mrf.mxu0  ;;  %v8107_v19 = vadd.f32 %v12112_v46, %v18500_v56  ;;  %v12230_v57 = vadd.f32 %v18502_v25, %v18501_v63  ;;  %v12121_v53 = vadd.f32 %v18503_v12, %v17746_v36  ;;  %v18504_v17 = vld [vmem:[#allocation71_spill] sm:$0xff]  ;;  %v18507_v54 = vld [vmem:[#allocation36_spill] sm:$0xff]  ;;  %v18510_v59 = vld [vmem:[#allocation34_spill] sm:$0xff] }
 0x3e8   : > { %v12233_v21 = vadd.f32 %v18505_v48, %v18504_v17  ;;  %v12132_v34 = vpop.f32.mrf.mxu1  ;;  %v18506_v4 = vld [vmem:[#allocation35_spill] sm:$0xff]  ;;  %v8109_v44 = vadd.f32 %v12118_v50, %v18507_v54  ;;  %v18509_v32 = vld [vmem:[#allocation76_spill] sm:$0xff]  ;;  %v12127_v46 = vadd.f32 %v12126_v5, %v17793_v41  ;;  %v12239_v36 = vadd.f32 %v17795_v40, %v17789_v24  ;;  %v18513_v52 = vld [vmem:[#allocation33_spill] sm:$0xff] }
 0x3e9   : > { %v8108_v13 = vadd.f32 %v12115_v14, %v18506_v4  ;;  %v12124_v47 = vadd.f32 %v18509_v32, %v18508_v23  ;;  %v18511_v26 = vld [vmem:[#allocation75_spill] sm:$0xff]  ;;  %v12247_v60 = vpop.f32.mrf.mxu0  ;;  %v18512_v15 = vld [vmem:[#allocation32_spill] sm:$0xff]  ;;  %v12130_v39 = vadd.f32 %v12129_v29, %v12128_v27  ;;  %v12242_v45 = vadd.f32 %v12241_v7, %v17801_v10  ;;  %v18515_v12 = vld [vmem:[#allocation37_spill] sm:$0xff] }
 0x3ea   : > { %v12236_v22 = vadd.f32 %v18511_v26, %v18510_v59  ;;  %v8110_v58 = vadd.f32 %v12121_v53, %v18512_v15  ;;  %v12134_v16 = vpop.f32.mrf.mxu1  ;;  %v12133_v50 = vadd.f32 %v12132_v34, %v12131_v61  ;;  %v12245_v56 = vadd.f32 %v12244_v0, %v12243_v42  ;;  %v18514_v63 = vld [vmem:[#allocation23_spill] sm:$0xff]  ;;  %v18516_v41 = vld [vmem:[#allocation29_spill] sm:$0xff] }
 0x3eb   : > { %v8111_v14 = vadd.f32 %v12124_v47, %v18513_v52  ;;  %v8112_v25 = vadd.f32 %v12127_v46, %v18514_v63  ;;  %v8113_v17 = vadd.f32 %v12130_v39, %v18515_v12  ;;  %v12248_v4 = vadd.f32 %v12247_v60, %v12246_v33 }
 0x3ec   : > { %v12135_v48 = vpop.f32.mrf.mxu1  ;;  %v17893_v53 = vadd.f32 %v12203_v1, %v8100_v6  ;;  %v8114_v5 = vadd.f32 %v12133_v50, %v18516_v41  ;;  %v17898_v24 = vadd.f32 %v17809_v30, %v17813_v62  ;;  %v17900_v40 = vadd.f32 %v12206_v8, %v8101_v51  ;;  %v18517_v1 = vld [vmem:[#allocation28_spill] sm:$0xff] }
 0x3ed   : > { %v12136_v54 = vadd.f32 %v12135_v48, %v12134_v16  ;;  %v17904_v10 = vadd.f32 %v17819_v49, %v17815_v55  ;;  %v17906_v27 = vadd.f32 %v12215_v31, %v8104_v2  ;;  %v17908_v7 = vadd.f32 %v12209_v38, %v8102_v37 }
 0x3ee   : > { %v17910_v29 = vadd.f32 %v12218_v28, %v8105_v20  ;;  %v17913_v42 = vadd.f32 %v12212_v9, %v8103_v3  ;;  %v17915_v0 = vadd.f32 %v12227_v35, %v8108_v13  ;;  %v17917_v30 = vadd.f32 %v12221_v43, %v8106_v18  ;;  %v18518_v43 = vld [vmem:[#allocation18_spill] sm:$0xff] }
 0x3ef   : > { %v8115_v6 = vadd.f32 %v12136_v54, %v18517_v1  ;;  %v12249_v62 = vpop.f32.mrf.mxu0  ;;  %v17919_v8 = vadd.f32 %v12230_v57, %v8109_v44  ;;  %v17921_v51 = vadd.f32 %v12224_v11, %v8107_v19  ;;  %v17923_v55 = vadd.f32 %v12239_v36, %v8112_v25  ;;  %v18519_v19 = vld [vmem:[#allocation9_spill] sm:$0xff] }
 0x3f0   : > { %v17925_v2 = vadd.f32 %v12233_v21, %v8110_v58  ;;  %v17927_v61 = vadd.f32 %v12242_v45, %v8113_v17  ;;  %v17931_v13 = vadd.f32 %v12236_v22, %v8111_v14  ;;  %v17935_v15 = vadd.f32 %v12245_v56, %v8114_v5  ;;  %v18520_v36 = vld [vmem:[#allocation53_spill] sm:$0xff]  ;;  %v18521_v14 = vld [vmem:[#allocation54_spill] sm:$0xff] }
 0x3f1   : > { %v12137_v49 = vpop.f32.mrf.mxu1  ;;  %v12250_v38 = vpop.f32.mrf.mxu0  ;;  %v17941_v25 = vadd.f32 %v12248_v4, %v8115_v6 }
 0x3f2   : > { %v12251_v37 = vadd.f32 %v12250_v38, %v12249_v62  ;;  %v18522_v62 = vld [vmem:[#allocation14_spill] sm:$0xff] }
 0x3f3   : > { %v12138_v31 = vpop.f32.mrf.mxu1  ;;  %v12252_v28 = vpop.f32.mrf.mxu0 }
 0x3f4   : > { %v12139_v9 = vadd.f32 %v12138_v31, %v12137_v49 }
 0x3f5   : > { %v12140_v3 = vpop.f32.mrf.mxu1  ;;  %v12253_v20 = vpop.f32.mrf.mxu0 }
 0x3f6   : > { %v8116_v18 = vadd.f32 %v12139_v9, %v18518_v43  ;;  %v12254_v35 = vadd.f32 %v12253_v20, %v12252_v28  ;;  %v18523_v9 = vld [vmem:[#allocation55_spill] sm:$0xff] }
 0x3f7   : > { %v12141_v33 = vpop.f32.mrf.mxu1 }
 0x3f8   : > { %v12142_v11 = vadd.f32 %v12141_v33, %v12140_v3  ;;  %v17933_v21 = vadd.f32 %v12251_v37, %v8116_v18 }
 0x3fa   : > { %v8117_v57 = vadd.f32 %v12142_v11, %v18519_v19  ;;  %v12255_v34 = vpop.f32.mrf.mxu0 }
 0x3fc   : > { %v12256_v44 = vpop.f32.mrf.mxu0  ;;  %v17938_v16 = vadd.f32 %v12254_v35, %v8117_v57 }
 0x3fd   : > { %v12143_v23 = vpop.f32.mrf.mxu1  ;;  %v12257_v32 = vadd.f32 %v12256_v44, %v12255_v34 }
 0x3fe   : > { %v12258_v47 = vpop.f32.mrf.mxu0 }
 0x3ff   : > { %v12144_v59 = vpop.f32.mrf.mxu1 }
 0x400   : > { %v12145_v26 = vadd.f32 %v12144_v59, %v12143_v23  ;;  %v12259_v60 = vpop.f32.mrf.mxu0  ;;  %v18524_v23 = vld [vmem:[#allocation38_spill] sm:$0xff] }
 0x401   : > { %v12146_v58 = vpop.f32.mrf.mxu1  ;;  %v12260_v46 = vadd.f32 %v12259_v60, %v12258_v47  ;;  %v18525_v60 = vld [vmem:[#allocation39_spill] sm:$0xff] }
 0x402   : > { %v8118_v39 = vadd.f32 %v12145_v26, %v18520_v36 }
 0x403   : > { %v12147_v52 = vpop.f32.mrf.mxu1 }
 0x404   : > { %v12148_v22 = vadd.f32 %v12147_v52, %v12146_v58  ;;  %v17944_v38 = vadd.f32 %v12257_v32, %v8118_v39 }
 0x406   : > { %v8119_v45 = vadd.f32 %v12148_v22, %v18521_v14  ;;  %v12261_v50 = vpop.f32.mrf.mxu0 }
 0x408   : > { %v12262_v63 = vpop.f32.mrf.mxu0  ;;  %v17951_v33 = vadd.f32 %v12260_v46, %v8119_v45 }
 0x409   : > { %v12149_v12 = vpop.f32.mrf.mxu1  ;;  %v12263_v17 = vadd.f32 %v12262_v63, %v12261_v50 }
 0x40a   : > { %v12264_v48 = vpop.f32.mrf.mxu0 }
 0x40b   : > { %v12150_v41 = vpop.f32.mrf.mxu1 }
 0x40c   : > { %v12151_v56 = vadd.f32 %v12150_v41, %v12149_v12  ;;  %v12265_v5 = vpop.f32.mrf.mxu0 }
 0x40d   : > { %v12152_v54 = vpop.f32.mrf.mxu1  ;;  %v12266_v1 = vadd.f32 %v12265_v5, %v12264_v48  ;;  %v18526_v48 = vld [vmem:[#allocation65_spill] sm:$0xff] }
 0x40e   : > { %v8120_v49 = vadd.f32 %v12151_v56, %v18522_v62 }
 0x40f   : > { %v12153_v37 = vpop.f32.mrf.mxu1 }
 0x410   : > { %v12154_v31 = vadd.f32 %v12153_v37, %v12152_v54  ;;  %v17946_v28 = vadd.f32 %v12263_v17, %v8120_v49 }
 0x411   : > { %v12267_v4 = vpop.f32.mrf.mxu0 }
 0x412   : > { %v8121_v3 = vadd.f32 %v12154_v31, %v18523_v9  ;;  %v18528_v9 = vld [vmem:[#allocation43_spill] sm:$0xff] }
 0x413   : > { %v12268_v6 = vpop.f32.mrf.mxu0 }
 0x414   : > { %v17949_v20 = vadd.f32 %v12266_v1, %v8121_v3  ;;  %v12269_v18 = vadd.f32 %v12268_v6, %v12267_v4  ;;  %v18527_v1 = vld [vmem:[#allocation66_spill] sm:$0xff]  ;;  %v18529_v3 = vld [vmem:[#allocation44_spill] sm:$0xff] }
 0x415   : > { %v12155_v43 = vpop.f32.mrf.mxu1  ;;  %v12270_v35 = vpop.f32.mrf.mxu0  ;;  %v12057_v4 = vadd.f32 %v18529_v3, %v18528_v9 }
 0x417   : > { %v12156_v11 = vpop.f32.mrf.mxu1  ;;  %v12271_v57 = vpop.f32.mrf.mxu0 }
 0x418   : > { %v12157_v19 = vadd.f32 %v12156_v11, %v12155_v43  ;;  %v12272_v44 = vadd.f32 %v12271_v57, %v12270_v35  ;;  %v18530_v35 = vld [vmem:[#allocation41_spill] sm:$0xff]  ;;  %v18531_v11 = vld [vmem:[#allocation42_spill] sm:$0xff] }
 0x419   : > { %v12158_v34 = vpop.f32.mrf.mxu1 }
 0x41a   : > { %v8122_v32 = vadd.f32 %v12157_v19, %v18524_v23  ;;  %v11945_v19 = vadd.f32 %v18531_v11, %v18530_v35 }
 0x41b   : > { %v12159_v47 = vpop.f32.mrf.mxu1 }
 0x41c   : > { %v12160_v59 = vadd.f32 %v12159_v47, %v12158_v34  ;;  %v17954_v26 = vadd.f32 %v12269_v18, %v8122_v32 }
 0x41e   : > { %v8123_v58 = vadd.f32 %v12160_v59, %v18525_v60  ;;  %v12273_v36 = vpop.f32.mrf.mxu0 }
 0x420   : > { %v12274_v39 = vpop.f32.mrf.mxu0  ;;  %v17957_v45 = vadd.f32 %v12272_v44, %v8123_v58  ;;  %v7058_v44 = vadd.f32 %v12057_v4, %v11945_v19  ;;  %v18539_v4 = vld [vmem:[#allocation45_spill] sm:$0xff] }
 0x421   : > { %v12161_v52 = vpop.f32.mrf.mxu1  ;;  %v12275_v22 = vadd.f32 %v12274_v39, %v12273_v36  ;;  %v18532_v39 = vld [vmem:[#allocation73_spill] sm:$0xff] }
 0x422   : > { %v12276_v14 = vpop.f32.mrf.mxu0 }
 0x423   : > { %v12162_v46 = vpop.f32.mrf.mxu1 }
 0x424   : > { %v12163_v50 = vadd.f32 %v12162_v46, %v12161_v52  ;;  %v12277_v63 = vpop.f32.mrf.mxu0 }
 0x425   : > { %v12164_v12 = vpop.f32.mrf.mxu1  ;;  %v12278_v17 = vadd.f32 %v12277_v63, %v12276_v14  ;;  %v18534_v63 = vld [vmem:[#allocation52_spill] sm:$0xff] }
 0x426   : > { %v8124_v41 = vadd.f32 %v12163_v50, %v18526_v48  ;;  %v18533_v50 = vld [vmem:[#allocation51_spill] sm:$0xff] }
 0x427   : > { %v12165_v56 = vpop.f32.mrf.mxu1 }
 0x428   : > { %v12166_v5 = vadd.f32 %v12165_v56, %v12164_v12  ;;  %v17960_v54 = vadd.f32 %v12275_v22, %v8124_v41  ;;  %v12066_v12 = vadd.f32 %v18534_v63, %v18533_v50  ;;  %v18535_v41 = vld [vmem:[#allocation48_spill] sm:$0xff]  ;;  %v18536_v56 = vld [vmem:[#allocation50_spill] sm:$0xff] }
 0x429   : > { %v12279_v49 = vpop.f32.mrf.mxu0 }
 0x42a   : > { %v8125_v62 = vadd.f32 %v12166_v5, %v18527_v1  ;;  %v11954_v5 = vadd.f32 %v18536_v56, %v18535_v41  ;;  %v18537_v1 = vld [vmem:[#allocation47_spill] sm:$0xff] }
 0x42b   : > { %v12280_v37 = vpop.f32.mrf.mxu0 }
 0x42c   : > { %v17963_v31 = vadd.f32 %v12278_v17, %v8125_v62  ;;  %v12281_v6 = vadd.f32 %v12280_v37, %v12279_v49  ;;  %v18538_v62 = vld [vmem:[#allocation49_spill] sm:$0xff]  ;;  %v7069_v9 = vadd.f32 %v12066_v12, %v11954_v5 }
 0x42d   : > { %v12167_v43 = vpop.f32.mrf.mxu1  ;;  %v12282_v18 = vpop.f32.mrf.mxu0  ;;  %v12063_v49 = vadd.f32 %v18538_v62, %v18537_v1 }
 0x42f   : > { %v12168_v57 = vpop.f32.mrf.mxu1  ;;  %v12283_v34 = vpop.f32.mrf.mxu0 }
 0x430   : > { %v12169_v23 = vadd.f32 %v12168_v57, %v12167_v43  ;;  %v12284_v32 = vadd.f32 %v12283_v34, %v12282_v18 }
 0x431   : > { %v12170_v47 = vpop.f32.mrf.mxu1 }
 0x432   : > { %v8126_v59 = vadd.f32 %v12169_v23, %v7058_v44 }
 0x433   : > { %v12171_v60 = vpop.f32.mrf.mxu1 }
 0x434   : > { %v12172_v58 = vadd.f32 %v12171_v60, %v12170_v47  ;;  %v17969_v36 = vadd.f32 %v12281_v6, %v8126_v59  ;;  %v18540_v6 = vld [vmem:[#allocation46_spill] sm:$0xff] }
 0x435   : > { %v11951_v43 = vadd.f32 %v18540_v6, %v18539_v4 }
 0x436   : > { %v8127_v52 = vadd.f32 %v12172_v58, %v18532_v39  ;;  %v12173_v22 = vpop.f32.mrf.mxu1  ;;  %v17986_v58 = vld [vmem:[%s18131_s4] ss:$0 sm:$0xff] }
 0x437   : > { %v7066_v11 = vadd.f32 %v12063_v49, %v11951_v43 }
 0x438   : > { %v12174_v14 = vpop.f32.mrf.mxu1  ;;  %v17972_v46 = vadd.f32 %v12284_v32, %v8127_v52 }
 0x439   : > { %v12175_v17 = vadd.f32 %v12174_v14, %v12173_v22 }
 0x43a   : > { %v12176_v48 = vpop.f32.mrf.mxu1 }
 0x43b   : > { %v8128_v34 = vadd.f32 %v12175_v17, %v7066_v11 }
 0x43c   : > { %v12177_v37 = vpop.f32.mrf.mxu1 }
 0x43d   : > { %v12178_v3 = vadd.f32 %v12177_v37, %v12176_v48 }
 0x43e   : > { %v12656_v18 = vpop.f32.mrf.mxu1 }
 0x43f   : > { %v8129_v35 = vadd.f32 %v12178_v3, %v7069_v9  ;;  %v9497_v47 = vadd.f32 %v12656_v18, %v17893_v53 }
 0x440   : > { %v9368_v19 = vpop.f32.mrf.mxu1 }
 0x441   : > { %v9495_v39 = vadd.f32 %v9368_v19, %v17898_v24  ;;  %v9968_v63 = vadd.f32 %v17986_v58, %v9497_v47 }
 0x442   : > { %v12657_v44 = vpop.f32.mrf.mxu1 }
 0x443   : > { %v12285_v57 = vpop.f32.mrf.mxu0  ;;  %v9498_v52 = vadd.f32 %v12657_v44, %v17900_v40  ;;  %v9966_v48 = vadd.f32 %v17986_v58, %v9495_v39 }
 0x444   : > { %v9371_v59 = vpop.f32.mrf.mxu1 }
 0x445   : > { %v12286_v23 = vpop.f32.mrf.mxu0  ;;  %v9496_v53 = vadd.f32 %v9371_v59, %v17904_v10  ;;  %v9969_v41 = vadd.f32 %v17986_v58, %v9498_v52 }
 0x446   : > { %v12287_v32 = vadd.f32 %v12286_v23, %v12285_v57 }
 0x447   : > { %v12288_v60 = vpop.f32.mrf.mxu0  ;;  %v9967_v1 = vadd.f32 %v17986_v58, %v9496_v53 }
 0x448   : > { %v17990_v22 = vadd.f32 %v12287_v32, %v8128_v34 }
 0x449   : > { %v12289_v14 = vpop.f32.mrf.mxu0 }
 0x44a   : > { %v12290_v50 = vadd.f32 %v12289_v14, %v12288_v60  ;;  %v12660_v12 = vpop.f32.mrf.mxu1 }
 0x44b   : > { %v12690_v17 = vpop.f32.mrf.mxu0  ;;  %v9501_v3 = vadd.f32 %v12660_v12, %v17906_v27 }
 0x44c   : > { %v9384_v56 = vpop.f32.mrf.mxu1  ;;  %v17996_v5 = vadd.f32 %v12290_v50, %v8129_v35  ;;  %v10261_v40 = vadd.f32 %v12690_v17, %v9968_v63 }
 0x44d   : > { %v10132_v24 = vpop.f32.mrf.mxu0  ;;  %v9499_v35 = vadd.f32 %v9384_v56, %v17908_v7  ;;  %v9972_v44 = vadd.f32 %v17986_v58, %v9501_v3 }
 0x44e   : > { %v12661_v62 = vpop.f32.mrf.mxu1  ;;  %v10259_v37 = vadd.f32 %v10132_v24, %v9966_v48  ;;  %v10293_v4 = vmax.f32 %v10261_v40, 0.0 }
 0x44f   : > { %v12691_v49 = vpop.f32.mrf.mxu0  ;;  %v9502_v11 = vadd.f32 %v12661_v62, %v17910_v29  ;;  %v9970_v47 = vadd.f32 %v17986_v58, %v9499_v35 }
 0x450   : > { %v10262_v10 = vadd.f32 %v12691_v49, %v9969_v41  ;;  %v9387_v18 = vpop.f32.mrf.mxu1  ;;  %v10291_v19 = vmax.f32 %v10259_v37, 0.0 }
 0x451   : > { %v10135_v9 = vpop.f32.mrf.mxu0  ;;  %v9500_v23 = vadd.f32 %v9387_v18, %v17913_v42  ;;  %v9973_v7 = vadd.f32 %v17986_v58, %v9502_v11 }
 0x452   : > { %v10294_v6 = vmax.f32 %v10262_v10, 0.0  ;;  %v10260_v43 = vadd.f32 %v10135_v9, %v9967_v1 }
 0x453   : > { %v9971_v39 = vadd.f32 %v17986_v58, %v9500_v23 }
 0x454   : > { %v11603_v57 = vpack.c.bf16 %v10294_v6, %v10293_v4  ;;  %v10292_v34 = vmax.f32 %v10260_v43, 0.0 }
 0x455   : > { %v12694_v32 = vpop.f32.mrf.mxu0 }
 0x456   : > { %11675 = vst [vmem:[%s18007_s29 + $0x8] sm:$0xff] %v11603_v57   ;;  %v11598_v27 = vpack.c.bf16 %v10292_v34, %v10291_v19  ;;  %v10265_v60 = vadd.f32 %v12694_v32, %v9972_v44 }
 0x457   : > { %v10148_v29 = vpop.f32.mrf.mxu0 }
 0x458   : > { %11599 = vst [vmem:[%s18007_s29] sm:$0xff] %v11598_v27   ;;  %v12664_v59 = vpop.f32.mrf.mxu1  ;;  %v10263_v14 = vadd.f32 %v10148_v29, %v9970_v47  ;;  %v10297_v12 = vmax.f32 %v10265_v60, 0.0 }
 0x459   : > { %v12695_v52 = vpop.f32.mrf.mxu0  ;;  %v9505_v40 = vadd.f32 %v12664_v59, %v17915_v0 }
 0x45a   : > { %v9400_v42 = vpop.f32.mrf.mxu1  ;;  %v10266_v50 = vadd.f32 %v12695_v52, %v9973_v7  ;;  %v10295_v41 = vmax.f32 %v10263_v14, 0.0 }
 0x45b   : > { %v10151_v63 = vpop.f32.mrf.mxu0  ;;  %v9503_v49 = vadd.f32 %v9400_v42, %v17917_v30  ;;  %v9976_v10 = vadd.f32 %v17986_v58, %v9505_v40 }
 0x45c   : > { %v12665_v53 = vpop.f32.mrf.mxu1  ;;  %v10298_v17 = vmax.f32 %v10266_v50, 0.0  ;;  %v10264_v48 = vadd.f32 %v10151_v63, %v9971_v39 }
 0x45d   : > { %v9506_v37 = vadd.f32 %v12665_v53, %v17919_v8  ;;  %v9974_v4 = vadd.f32 %v17986_v58, %v9503_v49 }
 0x45e   : > { %v11613_v56 = vpack.c.bf16 %v10298_v17, %v10297_v12  ;;  %v10296_v24 = vmax.f32 %v10264_v48, 0.0  ;;  %v9403_v1 = vpop.f32.mrf.mxu1 }
 0x45f   : > { %v9504_v9 = vadd.f32 %v9403_v1, %v17921_v51  ;;  %v9977_v6 = vadd.f32 %v17986_v58, %v9506_v37 }
 0x460   : > { %11677 = vst [vmem:[%s18007_s29 + $0x18] sm:$0xff] %v11613_v56   ;;  %v11608_v62 = vpack.c.bf16 %v10296_v24, %v10295_v41 }
 0x461   : > { %v9975_v35 = vadd.f32 %v17986_v58, %v9504_v9 }
 0x462   : > { %11676 = vst [vmem:[%s18007_s29 + $0x10] sm:$0xff] %v11608_v62  }
 0x463   : > { %v12698_v3 = vpop.f32.mrf.mxu0 }
 0x464   : > { %v10269_v0 = vadd.f32 %v12698_v3, %v9976_v10 }
 0x465   : > { %v10164_v18 = vpop.f32.mrf.mxu0 }
 0x466   : > { %v12668_v43 = vpop.f32.mrf.mxu1  ;;  %v10267_v19 = vadd.f32 %v10164_v18, %v9974_v4  ;;  %v10301_v44 = vmax.f32 %v10269_v0, 0.0 }
 0x467   : > { %v12699_v30 = vpop.f32.mrf.mxu0  ;;  %v9509_v27 = vadd.f32 %v12668_v43, %v17923_v55 }
 0x468   : > { %v9416_v11 = vpop.f32.mrf.mxu1  ;;  %v10270_v8 = vadd.f32 %v12699_v30, %v9977_v6  ;;  %v10299_v32 = vmax.f32 %v10267_v19, 0.0 }
 0x469   : > { %v10167_v34 = vpop.f32.mrf.mxu0  ;;  %v9507_v59 = vadd.f32 %v9416_v11, %v17925_v2  ;;  %v9980_v52 = vadd.f32 %v17986_v58, %v9509_v27 }
 0x46a   : > { %v12669_v57 = vpop.f32.mrf.mxu1  ;;  %v10302_v51 = vmax.f32 %v10270_v8, 0.0  ;;  %v10268_v23 = vadd.f32 %v10167_v34, %v9975_v35 }
 0x46b   : > { %v9510_v60 = vadd.f32 %v12669_v57, %v17927_v61  ;;  %v9978_v50 = vadd.f32 %v17986_v58, %v9507_v59 }
 0x46c   : > { %v11623_v47 = vpack.c.bf16 %v10302_v51, %v10301_v44  ;;  %v10300_v7 = vmax.f32 %v10268_v23, 0.0  ;;  %v9419_v29 = vpop.f32.mrf.mxu1 }
 0x46d   : > { %v9508_v42 = vadd.f32 %v9419_v29, %v17931_v13  ;;  %v9981_v55 = vadd.f32 %v17986_v58, %v9510_v60 }
 0x46e   : > { %11679 = vst [vmem:[%s18007_s29 + $0x28] sm:$0xff] %v11623_v47   ;;  %v11618_v39 = vpack.c.bf16 %v10300_v7, %v10299_v32 }
 0x46f   : > { %v9979_v17 = vadd.f32 %v17986_v58, %v9508_v42 }
 0x470   : > { %11678 = vst [vmem:[%s18007_s29 + $0x20] sm:$0xff] %v11618_v39  }
 0x471   : > { %v12702_v14 = vpop.f32.mrf.mxu0 }
 0x472   : > { %v10273_v12 = vadd.f32 %v12702_v14, %v9980_v52 }
 0x473   : > { %v12672_v63 = vpop.f32.mrf.mxu1  ;;  %v10180_v53 = vpop.f32.mrf.mxu0 }
 0x474   : > { %v10271_v48 = vadd.f32 %v10180_v53, %v9978_v50  ;;  %v10305_v13 = vmax.f32 %v10273_v12, 0.0  ;;  %v9513_v62 = vadd.f32 %v12672_v63, %v17933_v21 }
 0x475   : > { %v9432_v2 = vpop.f32.mrf.mxu1  ;;  %v12703_v61 = vpop.f32.mrf.mxu0 }
 0x476   : > { %v10274_v41 = vadd.f32 %v12703_v61, %v9981_v55  ;;  %v10303_v49 = vmax.f32 %v10271_v48, 0.0  ;;  %v9511_v3 = vadd.f32 %v9432_v2, %v17935_v15  ;;  %v9984_v43 = vadd.f32 %v17986_v58, %v9513_v62 }
 0x477   : > { %v12673_v56 = vpop.f32.mrf.mxu1  ;;  %v10183_v24 = vpop.f32.mrf.mxu0 }
 0x478   : > { %v10306_v40 = vmax.f32 %v10274_v41, 0.0  ;;  %v10272_v1 = vadd.f32 %v10183_v24, %v9979_v17  ;;  %v9514_v4 = vadd.f32 %v12673_v56, %v17938_v16  ;;  %v9982_v35 = vadd.f32 %v17986_v58, %v9511_v3 }
 0x479   : > { %v9435_v9 = vpop.f32.mrf.mxu1 }
 0x47a   : > { %v11633_v37 = vpack.c.bf16 %v10306_v40, %v10305_v13  ;;  %v10304_v10 = vmax.f32 %v10272_v1, 0.0  ;;  %v9512_v18 = vadd.f32 %v9435_v9, %v17941_v25  ;;  %v9985_v21 = vadd.f32 %v17986_v58, %v9514_v4 }
 0x47c   : > { %11681 = vst [vmem:[%s18007_s29 + $0x38] sm:$0xff] %v11633_v37   ;;  %v11628_v6 = vpack.c.bf16 %v10304_v10, %v10303_v49  ;;  %v9983_v15 = vadd.f32 %v17986_v58, %v9512_v18 }
 0x47e   : > { %11680 = vst [vmem:[%s18007_s29 + $0x30] sm:$0xff] %v11628_v6   ;;  %v12706_v0 = vpop.f32.mrf.mxu0 }
 0x47f   : > { %v10277_v19 = vadd.f32 %v12706_v0, %v9984_v43 }
 0x480   : > { %v10196_v11 = vpop.f32.mrf.mxu0 }
 0x481   : > { %v12676_v30 = vpop.f32.mrf.mxu1  ;;  %v10275_v57 = vadd.f32 %v10196_v11, %v9982_v35  ;;  %v10309_v25 = vmax.f32 %v10277_v19, 0.0 }
 0x482   : > { %v12707_v8 = vpop.f32.mrf.mxu0  ;;  %v9517_v29 = vadd.f32 %v12676_v30, %v17946_v28 }
 0x483   : > { %v9448_v16 = vpop.f32.mrf.mxu1  ;;  %v10278_v34 = vadd.f32 %v12707_v8, %v9985_v21  ;;  %v10307_v32 = vmax.f32 %v10275_v57, 0.0 }
 0x484   : > { %v10199_v44 = vpop.f32.mrf.mxu0  ;;  %v9515_v39 = vadd.f32 %v9448_v16, %v17944_v38  ;;  %v9988_v42 = vadd.f32 %v17986_v58, %v9517_v29 }
 0x485   : > { %v12677_v51 = vpop.f32.mrf.mxu1  ;;  %v10310_v23 = vmax.f32 %v10278_v34, 0.0  ;;  %v10276_v27 = vadd.f32 %v10199_v44, %v9983_v15 }
 0x486   : > { %v9518_v52 = vadd.f32 %v12677_v51, %v17949_v20  ;;  %v9986_v63 = vadd.f32 %v17986_v58, %v9515_v39 }
 0x487   : > { %v11643_v47 = vpack.c.bf16 %v10310_v23, %v10309_v25  ;;  %v10308_v7 = vmax.f32 %v10276_v27, 0.0  ;;  %v9451_v59 = vpop.f32.mrf.mxu1 }
 0x488   : > { %v9516_v14 = vadd.f32 %v9451_v59, %v17951_v33  ;;  %v9989_v53 = vadd.f32 %v17986_v58, %v9518_v52 }
 0x489   : > { %11683 = vst [vmem:[%s18007_s29 + $0x48] sm:$0xff] %v11643_v47   ;;  %v11638_v60 = vpack.c.bf16 %v10308_v7, %v10307_v32 }
 0x48a   : > { %v9987_v2 = vadd.f32 %v17986_v58, %v9516_v14 }
 0x48b   : > { %11682 = vst [vmem:[%s18007_s29 + $0x40] sm:$0xff] %v11638_v60  }
 0x48c   : > { %v12710_v50 = vpop.f32.mrf.mxu0 }
 0x48d   : > { %v12680_v55 = vpop.f32.mrf.mxu1  ;;  %v10281_v17 = vadd.f32 %v12710_v50, %v9988_v42 }
 0x48e   : > { %v10212_v12 = vpop.f32.mrf.mxu0  ;;  %v9521_v13 = vadd.f32 %v12680_v55, %v17960_v54 }
 0x48f   : > { %v9464_v28 = vpop.f32.mrf.mxu1  ;;  %v10279_v61 = vadd.f32 %v10212_v12, %v9986_v63  ;;  %v10313_v56 = vmax.f32 %v10281_v17, 0.0 }
 0x490   : > { %v12711_v38 = vpop.f32.mrf.mxu0  ;;  %v9519_v37 = vadd.f32 %v9464_v28, %v17954_v26  ;;  %v9992_v3 = vadd.f32 %v17986_v58, %v9521_v13 }
 0x491   : > { %v10282_v20 = vadd.f32 %v12711_v38, %v9989_v53  ;;  %v12681_v48 = vpop.f32.mrf.mxu1  ;;  %v10311_v40 = vmax.f32 %v10279_v61, 0.0 }
 0x492   : > { %v10215_v41 = vpop.f32.mrf.mxu0  ;;  %v9522_v10 = vadd.f32 %v12681_v48, %v17963_v31  ;;  %v9990_v43 = vadd.f32 %v17986_v58, %v9519_v37 }
 0x493   : > { %v10314_v33 = vmax.f32 %v10282_v20, 0.0  ;;  %v10280_v24 = vadd.f32 %v10215_v41, %v9987_v2  ;;  %v9467_v49 = vpop.f32.mrf.mxu1 }
 0x494   : > { %v9520_v4 = vadd.f32 %v9467_v49, %v17957_v45  ;;  %v9993_v54 = vadd.f32 %v17986_v58, %v9522_v10 }
 0x495   : > { %v11653_v1 = vpack.c.bf16 %v10314_v33, %v10313_v56  ;;  %v10312_v62 = vmax.f32 %v10280_v24, 0.0 }
 0x496   : > { %v9991_v21 = vadd.f32 %v17986_v58, %v9520_v4 }
 0x497   : > { %11685 = vst [vmem:[%s18007_s29 + $0x58] sm:$0xff] %v11653_v1   ;;  %v11648_v9 = vpack.c.bf16 %v10312_v62, %v10311_v40 }
 0x499   : > { %11684 = vst [vmem:[%s18007_s29 + $0x50] sm:$0xff] %v11648_v9   ;;  %v12714_v6 = vpop.f32.mrf.mxu0 }
 0x49a   : > { %v12684_v18 = vpop.f32.mrf.mxu1  ;;  %v10285_v35 = vadd.f32 %v12714_v6, %v9992_v3 }
 0x49b   : > { %v10228_v0 = vpop.f32.mrf.mxu0  ;;  %v9525_v45 = vadd.f32 %v12684_v18, %v17990_v22 }
 0x49c   : > { %v9480_v26 = vpop.f32.mrf.mxu1  ;;  %v10283_v31 = vadd.f32 %v10228_v0, %v9990_v43  ;;  %v10317_v8 = vmax.f32 %v10285_v35, 0.0 }
 0x49d   : > { %v12715_v11 = vpop.f32.mrf.mxu0  ;;  %v9523_v44 = vadd.f32 %v9480_v26, %v17969_v36  ;;  %v9996_v32 = vadd.f32 %v17986_v58, %v9525_v45 }
 0x49e   : > { %v10286_v30 = vadd.f32 %v12715_v11, %v9993_v54  ;;  %v12685_v19 = vpop.f32.mrf.mxu1  ;;  %v10315_v25 = vmax.f32 %v10283_v31, 0.0 }
 0x49f   : > { %v10231_v15 = vpop.f32.mrf.mxu0  ;;  %v9526_v51 = vadd.f32 %v12685_v19, %v17996_v5  ;;  %v9994_v29 = vadd.f32 %v17986_v58, %v9523_v44 }
 0x4a0   : > { %v10318_v16 = vmax.f32 %v10286_v30, 0.0  ;;  %v10284_v57 = vadd.f32 %v10231_v15, %v9991_v21  ;;  %v9483_v34 = vpop.f32.mrf.mxu1 }
 0x4a1   : > { %v9524_v47 = vadd.f32 %v9483_v34, %v17972_v46  ;;  %v9997_v59 = vadd.f32 %v17986_v58, %v9526_v51 }
 0x4a2   : > { %v11663_v23 = vpack.c.bf16 %v10318_v16, %v10317_v8  ;;  %v10316_v27 = vmax.f32 %v10284_v57, 0.0 }
 0x4a3   : > { %v9995_v5 = vadd.f32 %v17986_v58, %v9524_v47 }
 0x4a4   : > { %11687 = vst [vmem:[%s18007_s29 + $0x68] sm:$0xff] %v11663_v23   ;;  %v11658_v7 = vpack.c.bf16 %v10316_v27, %v10315_v25  ;;  %v12718_v22 = vpop.f32.mrf.mxu0 }
 0x4a5   : > { %v10289_v60 = vadd.f32 %v12718_v22, %v9996_v32 }
 0x4a6   : > { %11686 = vst [vmem:[%s18007_s29 + $0x60] sm:$0xff] %v11658_v7   ;;  %v10244_v36 = vpop.f32.mrf.mxu0 }
 0x4a7   : > { %v10287_v52 = vadd.f32 %v10244_v36, %v9994_v29  ;;  %v10321_v14 = vmax.f32 %v10289_v60, 0.0 }
 0x4a8   : > { %v12719_v39 = vpop.f32.mrf.mxu0 }
 0x4a9   : > { %v10290_v46 = vadd.f32 %v12719_v39, %v9997_v59  ;;  %v10319_v63 = vmax.f32 %v10287_v52, 0.0 }
 0x4aa   : > { %v10247_v42 = vpop.f32.mrf.mxu0 }
 0x4ab   : > { %v10322_v50 = vmax.f32 %v10290_v46, 0.0  ;;  %v10288_v55 = vadd.f32 %v10247_v42, %v9995_v5 }
 0x4ad   : > { %v11673_v53 = vpack.c.bf16 %v10322_v50, %v10321_v14  ;;  %v10320_v12 = vmax.f32 %v10288_v55, 0.0 }
 0x4af   : > { %11689 = vst [vmem:[%s18007_s29 + $0x78] sm:$0xff] %v11673_v53   ;;  %v11668_v58 = vpack.c.bf16 %v10320_v12, %v10319_v63 }
 0x4b1   : > { %11688 = vst [vmem:[%s18007_s29 + $0x70] sm:$0xff] %v11668_v58  }
 0x4b2   : > { %13028 = shalt.err (!%p13025_p0)
}
 0x4b3   : > { %s13029_s18 = scalar_lea.hbm %s18079_s13, 2048  ;;  %s13033_s20 = scalar_lea.hbm %s18133_s6, 4096 }
 0x4b4   : > { %p13030_p1 = scmp.ne.s32.totalorder %s18079_s13, %s13029_s18  ;;  %p13034_p4 = scmp.lt.s32.totalorder %s18079_s13, %s18133_s6 }
 0x4b5   : > { %p13035_p7 = scmp.lt.s32.totalorder %s13033_s20, %s13029_s18 }
 0x4b6   : > { %p13031_p2 = pnand %p13030_p1, %p13161_p5 }
 0x4b7   : > { %p13036_p8 = por %p13035_p7, %p13034_p4 }
 0x4b8   : > { %p13032_p3 = pneg %p13031_p2 }
 0x4ba   : > { %p13037_p6 = pnand %p13036_p8, %p13032_p3 }
 0x4bc   : > { %13040 = shalt.err (!%p13037_p6)
}
 0x4bd   : > { %s13086_s9 = smov 64   ;;  %s13087_s11 = smov 4  }
 0x4be   : > { %12738 = dma.vmem_to_hbm [thread:$0]  (%p13161_p5), %s18081_s10, 2048, %s18079_s13, %s18087_s14, %s13086_s9, %s13086_s9, %s13087_s11  }
 0x4bf PF: > { %p12750_p9 = scmp.ge.s32.totalorder %s13079_s24, 2  ;;  %s10512_s12 = sand.u32 1, %s13067_s21  }
 0x4c0   : > { %p18541_p10 = scmp.ne.s32.totalorder %s18169_s8, 0  ;;  %s10513_s25 = scalar_lea.sflag [#allocation5], %s10512_s12 }
 0x4c2   : > { %p12745_p11 = pnand %p12750_p9, %p18541_p10 }
 0x4c4   : > { %p12746_p12 = pneg %p12745_p11 }
 0x4c6   : > { %13062 = dma.done.wait (%p12746_p12), %s10513_s25, 2048  }
 0x4c7   : > { %13064 = vsyncadd (%p12746_p12), %s10513_s25, 4294965248  ;;  %p17_p13 = scmp.ge.s32.totalorder %s13148_s27, 4   ;;  %s18542_s21 = smov %s13071_s22 }
 0x4c8   : > { %s18543_s22 = smov %s13075_s23  ;;  %s18544_s23 = smov %s13159_s30 }
 0x4c9   : > { %s18545_s24 = smov %s13148_s27  ;;  %19 = sbr.rel (!%p17_p13) target bundleno = 4 (0x4), region = 101 }
 0x4ce   :  { %10518 = vsyncpa [#allocation4], 1 }
 0x4cf   :  { %10520 = vsyncpa [#allocation4 + $0x1], 1 }
 0x4d0   :  { %10521 = vsyncpa [#allocation5], 1 }
 0x4d1   :  { %10523 = vsyncpa [#allocation5 + $0x1], 1 }

</bundles_post_ra>
